<compile_context>
chip_gen: v7x
topology: tpu7x:2x2x1
jax: 0.10.0
libtpu: 0.0.40
codegen_flags: <defaults>
</compile_context>

<pallas_src>
import jax
import jax.numpy as jnp
from jax.experimental import pallas as pl
from jax.experimental.pallas import tpu as pltpu

# ------------------------------ model sizes --------------------------------

FILTER1, FILTER2 = 5, 4
IN_C, INTER_C, OUT_C = 3, 7, 32
FC1, FC2, FC3 = 80, 84, 10
H_IN = W_IN = 32

# flat-with-halo geometry (input 32x32, pad 1 -> 34x34)
WP1 = 34                    # padded conv1 input width
L1X = 1160                  # 34*34 (=1156) + 4 halo lanes
L1Y = 30 * WP1              # 1020 : conv1 flat output length (rows 30, width 34)
L1P = 984                   # pool1 flat length (covers all needed offsets)
OFF2 = 128                  # lane offset of pooled1 inside the conv2 scratch
L2Y = 911                   # conv2 flat (dilated) output length
L2P = 841                   # pool2 flat length (max needed lane 840)
X2LEN = 1280                # conv2 input scratch lanes (>= 58 + 210 + 911)
NPOOL2 = 56                 # 49 (=7*7) compacted pooled columns, padded to 56


# ------------------------------ fused kernel -------------------------------

def _net_kernel(x_ref, w1_ref, b1_ref, w2_ref, b2_ref, m1_ref, s2_ref,
                wf1_ref, bf1_ref, wf2_ref, bf2_ref, wf3_ref, bf3_ref,
                o_ref, x2_ref):
    f32 = jnp.float32

    # ---- conv1 (5x5, pad 1): 25 shifted (7,3)@(3,1020) matmuls ------------
    x1 = x_ref[0]                                        # (3, 1160) bf16
    acc = jnp.zeros((INTER_C, L1Y), f32)
    for i in range(FILTER1):
        for j in range(FILTER1):
            t = i * FILTER1 + j
            s = WP1 * i + j                              # flat tap offset
            acc = acc + jnp.dot(w1_ref[t], x1[:, s:s + L1Y],
                                preferred_element_type=f32)
    y1 = jnp.maximum(acc + b1_ref[...], 0.0)             # (7, 1020) f32

    # ---- maxpool1 2x2/2 in flat coords (neighbors +1, +34, +35) -----------
    p1 = jnp.maximum(jnp.maximum(y1[:, 0:L1P], y1[:, 1:1 + L1P]),
                     jnp.maximum(y1[:, WP1:WP1 + L1P],
                                 y1[:, WP1 + 1:WP1 + 1 + L1P]))
    # zero the wrap/garbage columns so they serve as conv2's zero padding
    p1 = p1 * m1_ref[...]                                # (7, 984) f32
    # place pooled map (kept on its dilated lattice) into a zero-haloed buffer
    x2_ref[...] = jnp.zeros((INTER_C, X2LEN), jnp.bfloat16)
    x2_ref[:, OFF2:OFF2 + L1P] = p1.astype(jnp.bfloat16)
    x2 = x2_ref[...]                                     # (7, 1280) bf16

    # ---- conv2 (4x4, pad 1) on the dilated lattice: row step 68, col step 2
    acc2 = jnp.zeros((OUT_C, L2Y), f32)
    for i in range(FILTER2):
        for j in range(FILTER2):
            t = i * FILTER2 + j
            s = (OFF2 - 70) + 68 * i + 2 * j             # 58 .. 268
            acc2 = acc2 + jnp.dot(w2_ref[t], x2[:, s:s + L2Y],
                                  preferred_element_type=f32)
    y2 = jnp.maximum(acc2 + b2_ref[...], 0.0)            # (32, 911) f32

    # ---- maxpool2 2x2/2 (dilated neighbor offsets 0, 2, 68, 70) -----------
    p2 = jnp.maximum(jnp.maximum(y2[:, 0:L2P], y2[:, 2:2 + L2P]),
                     jnp.maximum(y2[:, 68:68 + L2P], y2[:, 70:70 + L2P]))

    # ---- compact the scattered 7x7 values per channel (constant 0/1 matmul)
    p2c = jnp.dot(p2, s2_ref[...], preferred_element_type=f32)   # (32, 56)

    # ---- fc1 : flatten permutation pre-folded into wf1 (32, 56, 80) -------
    p2cb = p2c.astype(jnp.bfloat16)
    h = jnp.zeros((1, FC1), f32)
    for co in range(OUT_C):
        h = h + jnp.dot(p2cb[co:co + 1, :], wf1_ref[co],
                        preferred_element_type=f32)
    h = jnp.maximum(h + bf1_ref[...], 0.0)               # (1, 80)

    # ---- fc2 / fc3 (f32) ---------------------------------------------------
    h = jnp.maximum(jnp.dot(h, wf2_ref[...], preferred_element_type=f32)
                    + bf2_ref[...], 0.0)                 # (1, 84)
    out = jnp.dot(h, wf3_ref[...], preferred_element_type=f32) + bf3_ref[...]
    o_ref[0] = out                                       # (1, 10)


# ------------------------- parameter pre-arrangement ------------------------

def prepare_params(p):
    """One-time, offline re-layout / cast of the weights for the fused kernel."""
    # conv taps as (tap, Cout, Cin) so each tap is a ready (Cout,Cin) matrix
    w1t = jnp.transpose(p["w1"], (0, 1, 3, 2)).reshape(FILTER1 * FILTER1,
                                                       INTER_C, IN_C)
    w2t = jnp.transpose(p["w2"], (0, 1, 3, 2)).reshape(FILTER2 * FILTER2,
                                                       OUT_C, INTER_C)
    # pool1 mask: keep flat columns whose (col mod 68) < 30 (the 15 valid
    # pooled columns); everything else must read as conv2 zero-padding.
    lanes = jnp.arange(L1P)
    mask1 = (jnp.remainder(lanes, 2 * WP1) < 2 * 15).astype(jnp.float32)[None, :]
    # pool2 compaction: select lane 136*qr + 4*qc into column 7*qr + qc
    k = jnp.arange(49)
    sel = 136 * (k // 7) + 4 * (k % 7)
    s2 = jnp.zeros((L2P, NPOOL2), jnp.float32).at[sel, k].set(1.0)
    # fc1 weight with PyTorch NCHW-flatten order folded in: (Cout, 7*7, FC1)
    wf1r = jnp.pad(p["wf1"].reshape(OUT_C, 49, FC1),
                   ((0, 0), (0, NPOOL2 - 49), (0, 0)))
    return {
        "w1t": w1t.astype(jnp.bfloat16),
        "b1": p["b1"].reshape(INTER_C, 1).astype(jnp.float32),
        "w2t": w2t.astype(jnp.bfloat16),
        "b2": p["b2"].reshape(OUT_C, 1).astype(jnp.float32),
        "mask1": mask1,
        "s2": s2,
        "wf1r": wf1r.astype(jnp.bfloat16),
        "bf1": p["bf1"].reshape(1, FC1).astype(jnp.float32),
        "wf2": p["wf2"].astype(jnp.float32),
        "bf2": p["bf2"].reshape(1, FC2).astype(jnp.float32),
        "wf3": p["wf3"].astype(jnp.float32),
        "bf3": p["bf3"].reshape(1, FC3).astype(jnp.float32),
    }


def _bcast_spec(shape):
    zeros = (0,) * len(shape)
    return pl.BlockSpec(shape, lambda i, _z=zeros: _z)


# ------------------------------ forward wrapper -----------------------------

def net_forward(x_nchw, prep):
    """Forward pass matching Net.forward; input NCHW (PyTorch convention)."""
    n, c, h, w = x_nchw.shape
    assert (c, h, w) == (IN_C, H_IN, W_IN)
    # tiny host-side prep: pad spatial by 1, flatten H*W, add halo lanes, bf16
    xp = jnp.pad(x_nchw.astype(jnp.float32), ((0, 0), (0, 0), (1, 1), (1, 1)))
    xf = xp.reshape(n, IN_C, WP1 * WP1)
    xf = jnp.pad(xf, ((0, 0), (0, 0), (0, L1X - WP1 * WP1)))
    xf = xf.astype(jnp.bfloat16)

    weights = (prep["w1t"], prep["b1"], prep["w2t"], prep["b2"], prep["mask1"],
               prep["s2"], prep["wf1r"], prep["bf1"], prep["wf2"], prep["bf2"],
               prep["wf3"], prep["bf3"])
    in_specs = [pl.BlockSpec((1, IN_C, L1X), lambda i: (i, 0, 0))]
    in_specs += [_bcast_spec(wgt.shape) for wgt in weights]

    out = pl.pallas_call(
        _net_kernel,
        out_shape=jax.ShapeDtypeStruct((n, 1, FC3), jnp.float32),
        grid=(n,),
        in_specs=in_specs,
        out_specs=pl.BlockSpec((1, 1, FC3), lambda i: (i, 0, 0)),
        scratch_shapes=[pltpu.VMEM((INTER_C, X2LEN), jnp.bfloat16)],
        compiler_params=pltpu.CompilerParams(
            dimension_semantics=("parallel",)),
    )(xf, *weights)
    return out.reshape(n, FC3)


# ------------------------------ init & reference ----------------------------

def init_params(key):
    ks = jax.random.split(key, 10)

    def uni(k, shape, fan_in):
        bound = 1.0 / jnp.sqrt(float(fan_in))
        return jax.random.uniform(k, shape, jnp.float32, -bound, bound)

    p = {}
    p["w1"] = uni(ks[0], (FILTER1, FILTER1, IN_C, INTER_C), IN_C * FILTER1 * FILTER1)
    p["b1"] = uni(ks[1], (INTER_C,), IN_C * FILTER1 * FILTER1)
    p["w2"] = uni(ks[2], (FILTER2, FILTER2, INTER_C, OUT_C), INTER_C * FILTER2 * FILTER2)
    p["b2"] = uni(ks[3], (OUT_C,), INTER_C * FILTER2 * FILTER2)
    p["wf1"] = uni(ks[4], (OUT_C * 7 * 7, FC1), OUT_C * 7 * 7)
    p["bf1"] = uni(ks[5], (FC1,), OUT_C * 7 * 7)
    p["wf2"] = uni(ks[6], (FC1, FC2), FC1)
    p["bf2"] = uni(ks[7], (FC2,), FC1)
    p["wf3"] = uni(ks[8], (FC2, FC3), FC2)
    p["bf3"] = uni(ks[9], (FC3,), FC2)
    return p


def ref_forward(x_nchw, p):
    def conv(x, w, b):
        w_oihw = jnp.transpose(w, (3, 2, 0, 1))
        y = jax.lax.conv_general_dilated(
            x, w_oihw, window_strides=(1, 1), padding=((1, 1), (1, 1)),
            dimension_numbers=("NCHW", "OIHW", "NCHW"))
        return jnp.maximum(y + b[None, :, None, None], 0.0)

    def pool(x):
        return jax.lax.reduce_window(x, -jnp.inf, jax.lax.max,
                                     (1, 1, 2, 2), (1, 1, 2, 2), "VALID")

    x = x_nchw.astype(jnp.float32)
    x = pool(conv(x, p["w1"], p["b1"]))
    x = pool(conv(x, p["w2"], p["b2"]))
    x = x.reshape(x.shape[0], -1)
    x = jnp.maximum(x @ p["wf1"] + p["bf1"], 0.0)
    x = jnp.maximum(x @ p["wf2"] + p["bf2"], 0.0)
    return x @ p["wf3"] + p["bf3"]


# ----------------------------------- main -----------------------------------

if __name__ == "__main__":
    key = jax.random.PRNGKey(0)
    kx, kp = jax.random.split(key)
    # fc1 expects 32*7*7 features => input spatial size must be 32 (CIFAR-like).
    x = jax.random.normal(kx, (2, IN_C, H_IN, W_IN), dtype=jnp.float32)
    params = init_params(kp)
    prep = prepare_params(params)

    fwd = jax.jit(net_forward)
    out = jax.block_until_ready(fwd(x, prep))
    assert out.shape == (2, FC3) and out.dtype == jnp.float32

    ref = jax.block_until_ready(jax.jit(ref_forward)(x, params))
    assert jnp.allclose(out, ref, rtol=1e-2, atol=1e-2), (out, ref)

    print("KERNEL_OK")
</pallas_src>

<mosaic_0001>
module attributes {stable_mosaic.version = 11 : i64} {
  func.func @_net_kernel(%arg0: i32, %arg1: memref<1x3x1160xbf16, #tpu.memory_space<vmem>>, %arg2: memref<25x7x3xbf16, #tpu.memory_space<vmem>>, %arg3: memref<7x1xf32, #tpu.memory_space<vmem>>, %arg4: memref<16x32x7xbf16, #tpu.memory_space<vmem>>, %arg5: memref<32x1xf32, #tpu.memory_space<vmem>>, %arg6: memref<1x984xf32, #tpu.memory_space<vmem>>, %arg7: memref<841x56xf32, #tpu.memory_space<vmem>>, %arg8: memref<32x56x80xbf16, #tpu.memory_space<vmem>>, %arg9: memref<1x80xf32, #tpu.memory_space<vmem>>, %arg10: memref<80x84xf32, #tpu.memory_space<vmem>>, %arg11: memref<1x84xf32, #tpu.memory_space<vmem>>, %arg12: memref<84x10xf32, #tpu.memory_space<vmem>>, %arg13: memref<1x10xf32, #tpu.memory_space<vmem>>, %arg14: memref<1x1x10xf32, #tpu.memory_space<vmem>>, %arg15: memref<7x1280xbf16, #tpu.memory_space<vmem>>) attributes {dimension_semantics = [#tpu.dimension_semantics<parallel>], iteration_bounds = array<i64: 2>, scalar_prefetch = 0 : i64, scratch_operands = 1 : i64, tpu.core_type = #tpu.core_type<tc>, window_params = [{transform_indices = @transform_0, window_bounds = array<i64: 1, 3, 1160>}, {pipeline_mode = #tpu.pipeline_mode<synchronous>, transform_indices = @transform_1, window_bounds = array<i64: 25, 7, 3>}, {pipeline_mode = #tpu.pipeline_mode<synchronous>, transform_indices = @transform_2, window_bounds = array<i64: 7, 1>}, {pipeline_mode = #tpu.pipeline_mode<synchronous>, transform_indices = @transform_3, window_bounds = array<i64: 16, 32, 7>}, {pipeline_mode = #tpu.pipeline_mode<synchronous>, transform_indices = @transform_4, window_bounds = array<i64: 32, 1>}, {pipeline_mode = #tpu.pipeline_mode<synchronous>, transform_indices = @transform_5, window_bounds = array<i64: 1, 984>}, {pipeline_mode = #tpu.pipeline_mode<synchronous>, transform_indices = @transform_6, window_bounds = array<i64: 841, 56>}, {pipeline_mode = #tpu.pipeline_mode<synchronous>, transform_indices = @transform_7, window_bounds = array<i64: 32, 56, 80>}, {pipeline_mode = #tpu.pipeline_mode<synchronous>, transform_indices = @transform_8, window_bounds = array<i64: 1, 80>}, {pipeline_mode = #tpu.pipeline_mode<synchronous>, transform_indices = @transform_9, window_bounds = array<i64: 80, 84>}, {pipeline_mode = #tpu.pipeline_mode<synchronous>, transform_indices = @transform_10, window_bounds = array<i64: 1, 84>}, {pipeline_mode = #tpu.pipeline_mode<synchronous>, transform_indices = @transform_11, window_bounds = array<i64: 84, 10>}, {pipeline_mode = #tpu.pipeline_mode<synchronous>, transform_indices = @transform_12, window_bounds = array<i64: 1, 10>}, {transform_indices = @transform_13, window_bounds = array<i64: 1, 1, 10>}]} {
    %c0 = arith.constant 0 : index
    %c0_0 = arith.constant 0 : index
    %c0_1 = arith.constant 0 : index
    %0 = vector.load %arg1[%c0, %c0_0, %c0_1] : memref<1x3x1160xbf16, #tpu.memory_space<vmem>>, vector<1x3x1160xbf16>
    %1 = vector.shape_cast %0 : vector<1x3x1160xbf16> to vector<3x1160xbf16>
    %cst = arith.constant 0.000000e+00 : f32
    %2 = vector.broadcast %cst : f32 to vector<7x1020xf32>
    %c0_2 = arith.constant 0 : index
    %c0_3 = arith.constant 0 : index
    %c0_4 = arith.constant 0 : index
    %3 = vector.load %arg2[%c0_2, %c0_3, %c0_4] : memref<25x7x3xbf16, #tpu.memory_space<vmem>>, vector<1x7x3xbf16>
    %4 = vector.shape_cast %3 : vector<1x7x3xbf16> to vector<7x3xbf16>
    %5 = vector.extract_strided_slice %1 {offsets = [0, 0], sizes = [3, 1020], strides = [1, 1]} : vector<3x1160xbf16> to vector<3x1020xbf16>
    %cst_5 = arith.constant dense<0.000000e+00> : vector<7x1020xf32>
    %6 = tpu.matmul %4, %5, %cst_5 {dimension_numbers = #tpu.dot_dimension_numbers<[1], [0], [0], [1], [0, 0, 1, 1], [], []>} : vector<7x3xbf16>, vector<3x1020xbf16>, vector<7x1020xf32> -> vector<7x1020xf32>
    %7 = arith.addf %2, %6 : vector<7x1020xf32>
    %c1 = arith.constant 1 : index
    %c0_6 = arith.constant 0 : index
    %c0_7 = arith.constant 0 : index
    %8 = vector.load %arg2[%c1, %c0_6, %c0_7] : memref<25x7x3xbf16, #tpu.memory_space<vmem>>, vector<1x7x3xbf16>
    %9 = vector.shape_cast %8 : vector<1x7x3xbf16> to vector<7x3xbf16>
    %10 = vector.extract_strided_slice %1 {offsets = [0, 1], sizes = [3, 1020], strides = [1, 1]} : vector<3x1160xbf16> to vector<3x1020xbf16>
    %cst_8 = arith.constant dense<0.000000e+00> : vector<7x1020xf32>
    %11 = tpu.matmul %9, %10, %cst_8 {dimension_numbers = #tpu.dot_dimension_numbers<[1], [0], [0], [1], [0, 0, 1, 1], [], []>} : vector<7x3xbf16>, vector<3x1020xbf16>, vector<7x1020xf32> -> vector<7x1020xf32>
    %12 = arith.addf %7, %11 : vector<7x1020xf32>
    %c2 = arith.constant 2 : index
    %c0_9 = arith.constant 0 : index
    %c0_10 = arith.constant 0 : index
    %13 = vector.load %arg2[%c2, %c0_9, %c0_10] : memref<25x7x3xbf16, #tpu.memory_space<vmem>>, vector<1x7x3xbf16>
    %14 = vector.shape_cast %13 : vector<1x7x3xbf16> to vector<7x3xbf16>
    %15 = vector.extract_strided_slice %1 {offsets = [0, 2], sizes = [3, 1020], strides = [1, 1]} : vector<3x1160xbf16> to vector<3x1020xbf16>
    %cst_11 = arith.constant dense<0.000000e+00> : vector<7x1020xf32>
    %16 = tpu.matmul %14, %15, %cst_11 {dimension_numbers = #tpu.dot_dimension_numbers<[1], [0], [0], [1], [0, 0, 1, 1], [], []>} : vector<7x3xbf16>, vector<3x1020xbf16>, vector<7x1020xf32> -> vector<7x1020xf32>
    %17 = arith.addf %12, %16 : vector<7x1020xf32>
    %c3 = arith.constant 3 : index
    %c0_12 = arith.constant 0 : index
    %c0_13 = arith.constant 0 : index
    %18 = vector.load %arg2[%c3, %c0_12, %c0_13] : memref<25x7x3xbf16, #tpu.memory_space<vmem>>, vector<1x7x3xbf16>
    %19 = vector.shape_cast %18 : vector<1x7x3xbf16> to vector<7x3xbf16>
    %20 = vector.extract_strided_slice %1 {offsets = [0, 3], sizes = [3, 1020], strides = [1, 1]} : vector<3x1160xbf16> to vector<3x1020xbf16>
    %cst_14 = arith.constant dense<0.000000e+00> : vector<7x1020xf32>
    %21 = tpu.matmul %19, %20, %cst_14 {dimension_numbers = #tpu.dot_dimension_numbers<[1], [0], [0], [1], [0, 0, 1, 1], [], []>} : vector<7x3xbf16>, vector<3x1020xbf16>, vector<7x1020xf32> -> vector<7x1020xf32>
    %22 = arith.addf %17, %21 : vector<7x1020xf32>
    %c4 = arith.constant 4 : index
    %c0_15 = arith.constant 0 : index
    %c0_16 = arith.constant 0 : index
    %23 = vector.load %arg2[%c4, %c0_15, %c0_16] : memref<25x7x3xbf16, #tpu.memory_space<vmem>>, vector<1x7x3xbf16>
    %24 = vector.shape_cast %23 : vector<1x7x3xbf16> to vector<7x3xbf16>
    %25 = vector.extract_strided_slice %1 {offsets = [0, 4], sizes = [3, 1020], strides = [1, 1]} : vector<3x1160xbf16> to vector<3x1020xbf16>
    %cst_17 = arith.constant dense<0.000000e+00> : vector<7x1020xf32>
    %26 = tpu.matmul %24, %25, %cst_17 {dimension_numbers = #tpu.dot_dimension_numbers<[1], [0], [0], [1], [0, 0, 1, 1], [], []>} : vector<7x3xbf16>, vector<3x1020xbf16>, vector<7x1020xf32> -> vector<7x1020xf32>
    %27 = arith.addf %22, %26 : vector<7x1020xf32>
    %c5 = arith.constant 5 : index
    %c0_18 = arith.constant 0 : index
    %c0_19 = arith.constant 0 : index
    %28 = vector.load %arg2[%c5, %c0_18, %c0_19] : memref<25x7x3xbf16, #tpu.memory_space<vmem>>, vector<1x7x3xbf16>
    %29 = vector.shape_cast %28 : vector<1x7x3xbf16> to vector<7x3xbf16>
    %30 = vector.extract_strided_slice %1 {offsets = [0, 34], sizes = [3, 1020], strides = [1, 1]} : vector<3x1160xbf16> to vector<3x1020xbf16>
    %cst_20 = arith.constant dense<0.000000e+00> : vector<7x1020xf32>
    %31 = tpu.matmul %29, %30, %cst_20 {dimension_numbers = #tpu.dot_dimension_numbers<[1], [0], [0], [1], [0, 0, 1, 1], [], []>} : vector<7x3xbf16>, vector<3x1020xbf16>, vector<7x1020xf32> -> vector<7x1020xf32>
    %32 = arith.addf %27, %31 : vector<7x1020xf32>
    %c6 = arith.constant 6 : index
    %c0_21 = arith.constant 0 : index
    %c0_22 = arith.constant 0 : index
    %33 = vector.load %arg2[%c6, %c0_21, %c0_22] : memref<25x7x3xbf16, #tpu.memory_space<vmem>>, vector<1x7x3xbf16>
    %34 = vector.shape_cast %33 : vector<1x7x3xbf16> to vector<7x3xbf16>
    %35 = vector.extract_strided_slice %1 {offsets = [0, 35], sizes = [3, 1020], strides = [1, 1]} : vector<3x1160xbf16> to vector<3x1020xbf16>
    %cst_23 = arith.constant dense<0.000000e+00> : vector<7x1020xf32>
    %36 = tpu.matmul %34, %35, %cst_23 {dimension_numbers = #tpu.dot_dimension_numbers<[1], [0], [0], [1], [0, 0, 1, 1], [], []>} : vector<7x3xbf16>, vector<3x1020xbf16>, vector<7x1020xf32> -> vector<7x1020xf32>
    %37 = arith.addf %32, %36 : vector<7x1020xf32>
    %c7 = arith.constant 7 : index
    %c0_24 = arith.constant 0 : index
    %c0_25 = arith.constant 0 : index
    %38 = vector.load %arg2[%c7, %c0_24, %c0_25] : memref<25x7x3xbf16, #tpu.memory_space<vmem>>, vector<1x7x3xbf16>
    %39 = vector.shape_cast %38 : vector<1x7x3xbf16> to vector<7x3xbf16>
    %40 = vector.extract_strided_slice %1 {offsets = [0, 36], sizes = [3, 1020], strides = [1, 1]} : vector<3x1160xbf16> to vector<3x1020xbf16>
    %cst_26 = arith.constant dense<0.000000e+00> : vector<7x1020xf32>
    %41 = tpu.matmul %39, %40, %cst_26 {dimension_numbers = #tpu.dot_dimension_numbers<[1], [0], [0], [1], [0, 0, 1, 1], [], []>} : vector<7x3xbf16>, vector<3x1020xbf16>, vector<7x1020xf32> -> vector<7x1020xf32>
    %42 = arith.addf %37, %41 : vector<7x1020xf32>
    %c8 = arith.constant 8 : index
    %c0_27 = arith.constant 0 : index
    %c0_28 = arith.constant 0 : index
    %43 = vector.load %arg2[%c8, %c0_27, %c0_28] : memref<25x7x3xbf16, #tpu.memory_space<vmem>>, vector<1x7x3xbf16>
    %44 = vector.shape_cast %43 : vector<1x7x3xbf16> to vector<7x3xbf16>
    %45 = vector.extract_strided_slice %1 {offsets = [0, 37], sizes = [3, 1020], strides = [1, 1]} : vector<3x1160xbf16> to vector<3x1020xbf16>
    %cst_29 = arith.constant dense<0.000000e+00> : vector<7x1020xf32>
    %46 = tpu.matmul %44, %45, %cst_29 {dimension_numbers = #tpu.dot_dimension_numbers<[1], [0], [0], [1], [0, 0, 1, 1], [], []>} : vector<7x3xbf16>, vector<3x1020xbf16>, vector<7x1020xf32> -> vector<7x1020xf32>
    %47 = arith.addf %42, %46 : vector<7x1020xf32>
    %c9 = arith.constant 9 : index
    %c0_30 = arith.constant 0 : index
    %c0_31 = arith.constant 0 : index
    %48 = vector.load %arg2[%c9, %c0_30, %c0_31] : memref<25x7x3xbf16, #tpu.memory_space<vmem>>, vector<1x7x3xbf16>
    %49 = vector.shape_cast %48 : vector<1x7x3xbf16> to vector<7x3xbf16>
    %50 = vector.extract_strided_slice %1 {offsets = [0, 38], sizes = [3, 1020], strides = [1, 1]} : vector<3x1160xbf16> to vector<3x1020xbf16>
    %cst_32 = arith.constant dense<0.000000e+00> : vector<7x1020xf32>
    %51 = tpu.matmul %49, %50, %cst_32 {dimension_numbers = #tpu.dot_dimension_numbers<[1], [0], [0], [1], [0, 0, 1, 1], [], []>} : vector<7x3xbf16>, vector<3x1020xbf16>, vector<7x1020xf32> -> vector<7x1020xf32>
    %52 = arith.addf %47, %51 : vector<7x1020xf32>
    %c10 = arith.constant 10 : index
    %c0_33 = arith.constant 0 : index
    %c0_34 = arith.constant 0 : index
    %53 = vector.load %arg2[%c10, %c0_33, %c0_34] : memref<25x7x3xbf16, #tpu.memory_space<vmem>>, vector<1x7x3xbf16>
    %54 = vector.shape_cast %53 : vector<1x7x3xbf16> to vector<7x3xbf16>
    %55 = vector.extract_strided_slice %1 {offsets = [0, 68], sizes = [3, 1020], strides = [1, 1]} : vector<3x1160xbf16> to vector<3x1020xbf16>
    %cst_35 = arith.constant dense<0.000000e+00> : vector<7x1020xf32>
    %56 = tpu.matmul %54, %55, %cst_35 {dimension_numbers = #tpu.dot_dimension_numbers<[1], [0], [0], [1], [0, 0, 1, 1], [], []>} : vector<7x3xbf16>, vector<3x1020xbf16>, vector<7x1020xf32> -> vector<7x1020xf32>
    %57 = arith.addf %52, %56 : vector<7x1020xf32>
    %c11 = arith.constant 11 : index
    %c0_36 = arith.constant 0 : index
    %c0_37 = arith.constant 0 : index
    %58 = vector.load %arg2[%c11, %c0_36, %c0_37] : memref<25x7x3xbf16, #tpu.memory_space<vmem>>, vector<1x7x3xbf16>
    %59 = vector.shape_cast %58 : vector<1x7x3xbf16> to vector<7x3xbf16>
    %60 = vector.extract_strided_slice %1 {offsets = [0, 69], sizes = [3, 1020], strides = [1, 1]} : vector<3x1160xbf16> to vector<3x1020xbf16>
    %cst_38 = arith.constant dense<0.000000e+00> : vector<7x1020xf32>
    %61 = tpu.matmul %59, %60, %cst_38 {dimension_numbers = #tpu.dot_dimension_numbers<[1], [0], [0], [1], [0, 0, 1, 1], [], []>} : vector<7x3xbf16>, vector<3x1020xbf16>, vector<7x1020xf32> -> vector<7x1020xf32>
    %62 = arith.addf %57, %61 : vector<7x1020xf32>
    %c12 = arith.constant 12 : index
    %c0_39 = arith.constant 0 : index
    %c0_40 = arith.constant 0 : index
    %63 = vector.load %arg2[%c12, %c0_39, %c0_40] : memref<25x7x3xbf16, #tpu.memory_space<vmem>>, vector<1x7x3xbf16>
    %64 = vector.shape_cast %63 : vector<1x7x3xbf16> to vector<7x3xbf16>
    %65 = vector.extract_strided_slice %1 {offsets = [0, 70], sizes = [3, 1020], strides = [1, 1]} : vector<3x1160xbf16> to vector<3x1020xbf16>
    %cst_41 = arith.constant dense<0.000000e+00> : vector<7x1020xf32>
    %66 = tpu.matmul %64, %65, %cst_41 {dimension_numbers = #tpu.dot_dimension_numbers<[1], [0], [0], [1], [0, 0, 1, 1], [], []>} : vector<7x3xbf16>, vector<3x1020xbf16>, vector<7x1020xf32> -> vector<7x1020xf32>
    %67 = arith.addf %62, %66 : vector<7x1020xf32>
    %c13 = arith.constant 13 : index
    %c0_42 = arith.constant 0 : index
    %c0_43 = arith.constant 0 : index
    %68 = vector.load %arg2[%c13, %c0_42, %c0_43] : memref<25x7x3xbf16, #tpu.memory_space<vmem>>, vector<1x7x3xbf16>
    %69 = vector.shape_cast %68 : vector<1x7x3xbf16> to vector<7x3xbf16>
    %70 = vector.extract_strided_slice %1 {offsets = [0, 71], sizes = [3, 1020], strides = [1, 1]} : vector<3x1160xbf16> to vector<3x1020xbf16>
    %cst_44 = arith.constant dense<0.000000e+00> : vector<7x1020xf32>
    %71 = tpu.matmul %69, %70, %cst_44 {dimension_numbers = #tpu.dot_dimension_numbers<[1], [0], [0], [1], [0, 0, 1, 1], [], []>} : vector<7x3xbf16>, vector<3x1020xbf16>, vector<7x1020xf32> -> vector<7x1020xf32>
    %72 = arith.addf %67, %71 : vector<7x1020xf32>
    %c14 = arith.constant 14 : index
    %c0_45 = arith.constant 0 : index
    %c0_46 = arith.constant 0 : index
    %73 = vector.load %arg2[%c14, %c0_45, %c0_46] : memref<25x7x3xbf16, #tpu.memory_space<vmem>>, vector<1x7x3xbf16>
    %74 = vector.shape_cast %73 : vector<1x7x3xbf16> to vector<7x3xbf16>
    %75 = vector.extract_strided_slice %1 {offsets = [0, 72], sizes = [3, 1020], strides = [1, 1]} : vector<3x1160xbf16> to vector<3x1020xbf16>
    %cst_47 = arith.constant dense<0.000000e+00> : vector<7x1020xf32>
    %76 = tpu.matmul %74, %75, %cst_47 {dimension_numbers = #tpu.dot_dimension_numbers<[1], [0], [0], [1], [0, 0, 1, 1], [], []>} : vector<7x3xbf16>, vector<3x1020xbf16>, vector<7x1020xf32> -> vector<7x1020xf32>
    %77 = arith.addf %72, %76 : vector<7x1020xf32>
    %c15 = arith.constant 15 : index
    %c0_48 = arith.constant 0 : index
    %c0_49 = arith.constant 0 : index
    %78 = vector.load %arg2[%c15, %c0_48, %c0_49] : memref<25x7x3xbf16, #tpu.memory_space<vmem>>, vector<1x7x3xbf16>
    %79 = vector.shape_cast %78 : vector<1x7x3xbf16> to vector<7x3xbf16>
    %80 = vector.extract_strided_slice %1 {offsets = [0, 102], sizes = [3, 1020], strides = [1, 1]} : vector<3x1160xbf16> to vector<3x1020xbf16>
    %cst_50 = arith.constant dense<0.000000e+00> : vector<7x1020xf32>
    %81 = tpu.matmul %79, %80, %cst_50 {dimension_numbers = #tpu.dot_dimension_numbers<[1], [0], [0], [1], [0, 0, 1, 1], [], []>} : vector<7x3xbf16>, vector<3x1020xbf16>, vector<7x1020xf32> -> vector<7x1020xf32>
    %82 = arith.addf %77, %81 : vector<7x1020xf32>
    %c16 = arith.constant 16 : index
    %c0_51 = arith.constant 0 : index
    %c0_52 = arith.constant 0 : index
    %83 = vector.load %arg2[%c16, %c0_51, %c0_52] : memref<25x7x3xbf16, #tpu.memory_space<vmem>>, vector<1x7x3xbf16>
    %84 = vector.shape_cast %83 : vector<1x7x3xbf16> to vector<7x3xbf16>
    %85 = vector.extract_strided_slice %1 {offsets = [0, 103], sizes = [3, 1020], strides = [1, 1]} : vector<3x1160xbf16> to vector<3x1020xbf16>
    %cst_53 = arith.constant dense<0.000000e+00> : vector<7x1020xf32>
    %86 = tpu.matmul %84, %85, %cst_53 {dimension_numbers = #tpu.dot_dimension_numbers<[1], [0], [0], [1], [0, 0, 1, 1], [], []>} : vector<7x3xbf16>, vector<3x1020xbf16>, vector<7x1020xf32> -> vector<7x1020xf32>
    %87 = arith.addf %82, %86 : vector<7x1020xf32>
    %c17 = arith.constant 17 : index
    %c0_54 = arith.constant 0 : index
    %c0_55 = arith.constant 0 : index
    %88 = vector.load %arg2[%c17, %c0_54, %c0_55] : memref<25x7x3xbf16, #tpu.memory_space<vmem>>, vector<1x7x3xbf16>
    %89 = vector.shape_cast %88 : vector<1x7x3xbf16> to vector<7x3xbf16>
    %90 = vector.extract_strided_slice %1 {offsets = [0, 104], sizes = [3, 1020], strides = [1, 1]} : vector<3x1160xbf16> to vector<3x1020xbf16>
    %cst_56 = arith.constant dense<0.000000e+00> : vector<7x1020xf32>
    %91 = tpu.matmul %89, %90, %cst_56 {dimension_numbers = #tpu.dot_dimension_numbers<[1], [0], [0], [1], [0, 0, 1, 1], [], []>} : vector<7x3xbf16>, vector<3x1020xbf16>, vector<7x1020xf32> -> vector<7x1020xf32>
    %92 = arith.addf %87, %91 : vector<7x1020xf32>
    %c18 = arith.constant 18 : index
    %c0_57 = arith.constant 0 : index
    %c0_58 = arith.constant 0 : index
    %93 = vector.load %arg2[%c18, %c0_57, %c0_58] : memref<25x7x3xbf16, #tpu.memory_space<vmem>>, vector<1x7x3xbf16>
    %94 = vector.shape_cast %93 : vector<1x7x3xbf16> to vector<7x3xbf16>
    %95 = vector.extract_strided_slice %1 {offsets = [0, 105], sizes = [3, 1020], strides = [1, 1]} : vector<3x1160xbf16> to vector<3x1020xbf16>
    %cst_59 = arith.constant dense<0.000000e+00> : vector<7x1020xf32>
    %96 = tpu.matmul %94, %95, %cst_59 {dimension_numbers = #tpu.dot_dimension_numbers<[1], [0], [0], [1], [0, 0, 1, 1], [], []>} : vector<7x3xbf16>, vector<3x1020xbf16>, vector<7x1020xf32> -> vector<7x1020xf32>
    %97 = arith.addf %92, %96 : vector<7x1020xf32>
    %c19 = arith.constant 19 : index
    %c0_60 = arith.constant 0 : index
    %c0_61 = arith.constant 0 : index
    %98 = vector.load %arg2[%c19, %c0_60, %c0_61] : memref<25x7x3xbf16, #tpu.memory_space<vmem>>, vector<1x7x3xbf16>
    %99 = vector.shape_cast %98 : vector<1x7x3xbf16> to vector<7x3xbf16>
    %100 = vector.extract_strided_slice %1 {offsets = [0, 106], sizes = [3, 1020], strides = [1, 1]} : vector<3x1160xbf16> to vector<3x1020xbf16>
    %cst_62 = arith.constant dense<0.000000e+00> : vector<7x1020xf32>
    %101 = tpu.matmul %99, %100, %cst_62 {dimension_numbers = #tpu.dot_dimension_numbers<[1], [0], [0], [1], [0, 0, 1, 1], [], []>} : vector<7x3xbf16>, vector<3x1020xbf16>, vector<7x1020xf32> -> vector<7x1020xf32>
    %102 = arith.addf %97, %101 : vector<7x1020xf32>
    %c20 = arith.constant 20 : index
    %c0_63 = arith.constant 0 : index
    %c0_64 = arith.constant 0 : index
    %103 = vector.load %arg2[%c20, %c0_63, %c0_64] : memref<25x7x3xbf16, #tpu.memory_space<vmem>>, vector<1x7x3xbf16>
    %104 = vector.shape_cast %103 : vector<1x7x3xbf16> to vector<7x3xbf16>
    %105 = vector.extract_strided_slice %1 {offsets = [0, 136], sizes = [3, 1020], strides = [1, 1]} : vector<3x1160xbf16> to vector<3x1020xbf16>
    %cst_65 = arith.constant dense<0.000000e+00> : vector<7x1020xf32>
    %106 = tpu.matmul %104, %105, %cst_65 {dimension_numbers = #tpu.dot_dimension_numbers<[1], [0], [0], [1], [0, 0, 1, 1], [], []>} : vector<7x3xbf16>, vector<3x1020xbf16>, vector<7x1020xf32> -> vector<7x1020xf32>
    %107 = arith.addf %102, %106 : vector<7x1020xf32>
    %c21 = arith.constant 21 : index
    %c0_66 = arith.constant 0 : index
    %c0_67 = arith.constant 0 : index
    %108 = vector.load %arg2[%c21, %c0_66, %c0_67] : memref<25x7x3xbf16, #tpu.memory_space<vmem>>, vector<1x7x3xbf16>
    %109 = vector.shape_cast %108 : vector<1x7x3xbf16> to vector<7x3xbf16>
    %110 = vector.extract_strided_slice %1 {offsets = [0, 137], sizes = [3, 1020], strides = [1, 1]} : vector<3x1160xbf16> to vector<3x1020xbf16>
    %cst_68 = arith.constant dense<0.000000e+00> : vector<7x1020xf32>
    %111 = tpu.matmul %109, %110, %cst_68 {dimension_numbers = #tpu.dot_dimension_numbers<[1], [0], [0], [1], [0, 0, 1, 1], [], []>} : vector<7x3xbf16>, vector<3x1020xbf16>, vector<7x1020xf32> -> vector<7x1020xf32>
    %112 = arith.addf %107, %111 : vector<7x1020xf32>
    %c22 = arith.constant 22 : index
    %c0_69 = arith.constant 0 : index
    %c0_70 = arith.constant 0 : index
    %113 = vector.load %arg2[%c22, %c0_69, %c0_70] : memref<25x7x3xbf16, #tpu.memory_space<vmem>>, vector<1x7x3xbf16>
    %114 = vector.shape_cast %113 : vector<1x7x3xbf16> to vector<7x3xbf16>
    %115 = vector.extract_strided_slice %1 {offsets = [0, 138], sizes = [3, 1020], strides = [1, 1]} : vector<3x1160xbf16> to vector<3x1020xbf16>
    %cst_71 = arith.constant dense<0.000000e+00> : vector<7x1020xf32>
    %116 = tpu.matmul %114, %115, %cst_71 {dimension_numbers = #tpu.dot_dimension_numbers<[1], [0], [0], [1], [0, 0, 1, 1], [], []>} : vector<7x3xbf16>, vector<3x1020xbf16>, vector<7x1020xf32> -> vector<7x1020xf32>
    %117 = arith.addf %112, %116 : vector<7x1020xf32>
    %c23 = arith.constant 23 : index
    %c0_72 = arith.constant 0 : index
    %c0_73 = arith.constant 0 : index
    %118 = vector.load %arg2[%c23, %c0_72, %c0_73] : memref<25x7x3xbf16, #tpu.memory_space<vmem>>, vector<1x7x3xbf16>
    %119 = vector.shape_cast %118 : vector<1x7x3xbf16> to vector<7x3xbf16>
    %120 = vector.extract_strided_slice %1 {offsets = [0, 139], sizes = [3, 1020], strides = [1, 1]} : vector<3x1160xbf16> to vector<3x1020xbf16>
    %cst_74 = arith.constant dense<0.000000e+00> : vector<7x1020xf32>
    %121 = tpu.matmul %119, %120, %cst_74 {dimension_numbers = #tpu.dot_dimension_numbers<[1], [0], [0], [1], [0, 0, 1, 1], [], []>} : vector<7x3xbf16>, vector<3x1020xbf16>, vector<7x1020xf32> -> vector<7x1020xf32>
    %122 = arith.addf %117, %121 : vector<7x1020xf32>
    %c24 = arith.constant 24 : index
    %c0_75 = arith.constant 0 : index
    %c0_76 = arith.constant 0 : index
    %123 = vector.load %arg2[%c24, %c0_75, %c0_76] : memref<25x7x3xbf16, #tpu.memory_space<vmem>>, vector<1x7x3xbf16>
    %124 = vector.shape_cast %123 : vector<1x7x3xbf16> to vector<7x3xbf16>
    %125 = vector.extract_strided_slice %1 {offsets = [0, 140], sizes = [3, 1020], strides = [1, 1]} : vector<3x1160xbf16> to vector<3x1020xbf16>
    %cst_77 = arith.constant dense<0.000000e+00> : vector<7x1020xf32>
    %126 = tpu.matmul %124, %125, %cst_77 {dimension_numbers = #tpu.dot_dimension_numbers<[1], [0], [0], [1], [0, 0, 1, 1], [], []>} : vector<7x3xbf16>, vector<3x1020xbf16>, vector<7x1020xf32> -> vector<7x1020xf32>
    %127 = arith.addf %122, %126 : vector<7x1020xf32>
    %c0_78 = arith.constant 0 : index
    %c0_79 = arith.constant 0 : index
    %128 = vector.load %arg3[%c0_78, %c0_79] : memref<7x1xf32, #tpu.memory_space<vmem>>, vector<7x1xf32>
    %129 = vector.broadcast %128 : vector<7x1xf32> to vector<7x1020xf32>
    %130 = arith.addf %127, %129 : vector<7x1020xf32>
    %cst_80 = arith.constant 0.000000e+00 : f32
    %131 = vector.broadcast %cst_80 : f32 to vector<7x1020xf32>
    %132 = arith.maximumf %130, %131 : vector<7x1020xf32>
    %133 = vector.extract_strided_slice %132 {offsets = [0, 0], sizes = [7, 984], strides = [1, 1]} : vector<7x1020xf32> to vector<7x984xf32>
    %134 = vector.extract_strided_slice %132 {offsets = [0, 1], sizes = [7, 984], strides = [1, 1]} : vector<7x1020xf32> to vector<7x984xf32>
    %135 = arith.maximumf %133, %134 : vector<7x984xf32>
    %136 = vector.extract_strided_slice %132 {offsets = [0, 34], sizes = [7, 984], strides = [1, 1]} : vector<7x1020xf32> to vector<7x984xf32>
    %137 = vector.extract_strided_slice %132 {offsets = [0, 35], sizes = [7, 984], strides = [1, 1]} : vector<7x1020xf32> to vector<7x984xf32>
    %138 = arith.maximumf %136, %137 : vector<7x984xf32>
    %139 = arith.maximumf %135, %138 : vector<7x984xf32>
    %c0_81 = arith.constant 0 : index
    %c0_82 = arith.constant 0 : index
    %140 = vector.load %arg6[%c0_81, %c0_82] : memref<1x984xf32, #tpu.memory_space<vmem>>, vector<1x984xf32>
    %141 = vector.broadcast %140 : vector<1x984xf32> to vector<7x984xf32>
    %142 = arith.mulf %139, %141 : vector<7x984xf32>
    %cst_83 = arith.constant 0.000000e+00 : bf16
    %143 = vector.broadcast %cst_83 : bf16 to vector<7x1280xbf16>
    %c0_84 = arith.constant 0 : index
    %c0_85 = arith.constant 0 : index
    %144 = vector.load %arg15[%c0_84, %c0_85] : memref<7x1280xbf16, #tpu.memory_space<vmem>>, vector<7x1280xbf16>
    tpu.vector_store %arg15[%c0_84, %c0_85], %143 {strides = array<i32>} : memref<7x1280xbf16, #tpu.memory_space<vmem>>, vector<7x1280xbf16>,
    %145 = arith.truncf %142 : vector<7x984xf32> to vector<7x984xbf16>
    %c0_86 = arith.constant 0 : index
    %c128 = arith.constant 128 : index
    %146 = vector.load %arg15[%c0_86, %c128] : memref<7x1280xbf16, #tpu.memory_space<vmem>>, vector<7x984xbf16>
    tpu.vector_store %arg15[%c0_86, %c128], %145 {strides = array<i32>} : memref<7x1280xbf16, #tpu.memory_space<vmem>>, vector<7x984xbf16>,
    %c0_87 = arith.constant 0 : index
    %c0_88 = arith.constant 0 : index
    %147 = vector.load %arg15[%c0_87, %c0_88] : memref<7x1280xbf16, #tpu.memory_space<vmem>>, vector<7x1280xbf16>
    %cst_89 = arith.constant 0.000000e+00 : f32
    %148 = vector.broadcast %cst_89 : f32 to vector<32x911xf32>
    %c0_90 = arith.constant 0 : index
    %c0_91 = arith.constant 0 : index
    %c0_92 = arith.constant 0 : index
    %149 = vector.load %arg4[%c0_90, %c0_91, %c0_92] : memref<16x32x7xbf16, #tpu.memory_space<vmem>>, vector<1x32x7xbf16>
    %150 = vector.shape_cast %149 : vector<1x32x7xbf16> to vector<32x7xbf16>
    %151 = vector.extract_strided_slice %147 {offsets = [0, 58], sizes = [7, 911], strides = [1, 1]} : vector<7x1280xbf16> to vector<7x911xbf16>
    %cst_93 = arith.constant dense<0.000000e+00> : vector<32x911xf32>
    %152 = tpu.matmul %150, %151, %cst_93 {dimension_numbers = #tpu.dot_dimension_numbers<[1], [0], [0], [1], [0, 0, 1, 1], [], []>} : vector<32x7xbf16>, vector<7x911xbf16>, vector<32x911xf32> -> vector<32x911xf32>
    %153 = arith.addf %148, %152 : vector<32x911xf32>
    %c1_94 = arith.constant 1 : index
    %c0_95 = arith.constant 0 : index
    %c0_96 = arith.constant 0 : index
    %154 = vector.load %arg4[%c1_94, %c0_95, %c0_96] : memref<16x32x7xbf16, #tpu.memory_space<vmem>>, vector<1x32x7xbf16>
    %155 = vector.shape_cast %154 : vector<1x32x7xbf16> to vector<32x7xbf16>
    %156 = vector.extract_strided_slice %147 {offsets = [0, 60], sizes = [7, 911], strides = [1, 1]} : vector<7x1280xbf16> to vector<7x911xbf16>
    %cst_97 = arith.constant dense<0.000000e+00> : vector<32x911xf32>
    %157 = tpu.matmul %155, %156, %cst_97 {dimension_numbers = #tpu.dot_dimension_numbers<[1], [0], [0], [1], [0, 0, 1, 1], [], []>} : vector<32x7xbf16>, vector<7x911xbf16>, vector<32x911xf32> -> vector<32x911xf32>
    %158 = arith.addf %153, %157 : vector<32x911xf32>
    %c2_98 = arith.constant 2 : index
    %c0_99 = arith.constant 0 : index
    %c0_100 = arith.constant 0 : index
    %159 = vector.load %arg4[%c2_98, %c0_99, %c0_100] : memref<16x32x7xbf16, #tpu.memory_space<vmem>>, vector<1x32x7xbf16>
    %160 = vector.shape_cast %159 : vector<1x32x7xbf16> to vector<32x7xbf16>
    %161 = vector.extract_strided_slice %147 {offsets = [0, 62], sizes = [7, 911], strides = [1, 1]} : vector<7x1280xbf16> to vector<7x911xbf16>
    %cst_101 = arith.constant dense<0.000000e+00> : vector<32x911xf32>
    %162 = tpu.matmul %160, %161, %cst_101 {dimension_numbers = #tpu.dot_dimension_numbers<[1], [0], [0], [1], [0, 0, 1, 1], [], []>} : vector<32x7xbf16>, vector<7x911xbf16>, vector<32x911xf32> -> vector<32x911xf32>
    %163 = arith.addf %158, %162 : vector<32x911xf32>
    %c3_102 = arith.constant 3 : index
    %c0_103 = arith.constant 0 : index
    %c0_104 = arith.constant 0 : index
    %164 = vector.load %arg4[%c3_102, %c0_103, %c0_104] : memref<16x32x7xbf16, #tpu.memory_space<vmem>>, vector<1x32x7xbf16>
    %165 = vector.shape_cast %164 : vector<1x32x7xbf16> to vector<32x7xbf16>
    %166 = vector.extract_strided_slice %147 {offsets = [0, 64], sizes = [7, 911], strides = [1, 1]} : vector<7x1280xbf16> to vector<7x911xbf16>
    %cst_105 = arith.constant dense<0.000000e+00> : vector<32x911xf32>
    %167 = tpu.matmul %165, %166, %cst_105 {dimension_numbers = #tpu.dot_dimension_numbers<[1], [0], [0], [1], [0, 0, 1, 1], [], []>} : vector<32x7xbf16>, vector<7x911xbf16>, vector<32x911xf32> -> vector<32x911xf32>
    %168 = arith.addf %163, %167 : vector<32x911xf32>
    %c4_106 = arith.constant 4 : index
    %c0_107 = arith.constant 0 : index
    %c0_108 = arith.constant 0 : index
    %169 = vector.load %arg4[%c4_106, %c0_107, %c0_108] : memref<16x32x7xbf16, #tpu.memory_space<vmem>>, vector<1x32x7xbf16>
    %170 = vector.shape_cast %169 : vector<1x32x7xbf16> to vector<32x7xbf16>
    %171 = vector.extract_strided_slice %147 {offsets = [0, 126], sizes = [7, 911], strides = [1, 1]} : vector<7x1280xbf16> to vector<7x911xbf16>
    %cst_109 = arith.constant dense<0.000000e+00> : vector<32x911xf32>
    %172 = tpu.matmul %170, %171, %cst_109 {dimension_numbers = #tpu.dot_dimension_numbers<[1], [0], [0], [1], [0, 0, 1, 1], [], []>} : vector<32x7xbf16>, vector<7x911xbf16>, vector<32x911xf32> -> vector<32x911xf32>
    %173 = arith.addf %168, %172 : vector<32x911xf32>
    %c5_110 = arith.constant 5 : index
    %c0_111 = arith.constant 0 : index
    %c0_112 = arith.constant 0 : index
    %174 = vector.load %arg4[%c5_110, %c0_111, %c0_112] : memref<16x32x7xbf16, #tpu.memory_space<vmem>>, vector<1x32x7xbf16>
    %175 = vector.shape_cast %174 : vector<1x32x7xbf16> to vector<32x7xbf16>
    %176 = vector.extract_strided_slice %147 {offsets = [0, 128], sizes = [7, 911], strides = [1, 1]} : vector<7x1280xbf16> to vector<7x911xbf16>
    %cst_113 = arith.constant dense<0.000000e+00> : vector<32x911xf32>
    %177 = tpu.matmul %175, %176, %cst_113 {dimension_numbers = #tpu.dot_dimension_numbers<[1], [0], [0], [1], [0, 0, 1, 1], [], []>} : vector<32x7xbf16>, vector<7x911xbf16>, vector<32x911xf32> -> vector<32x911xf32>
    %178 = arith.addf %173, %177 : vector<32x911xf32>
    %c6_114 = arith.constant 6 : index
    %c0_115 = arith.constant 0 : index
    %c0_116 = arith.constant 0 : index
    %179 = vector.load %arg4[%c6_114, %c0_115, %c0_116] : memref<16x32x7xbf16, #tpu.memory_space<vmem>>, vector<1x32x7xbf16>
    %180 = vector.shape_cast %179 : vector<1x32x7xbf16> to vector<32x7xbf16>
    %181 = vector.extract_strided_slice %147 {offsets = [0, 130], sizes = [7, 911], strides = [1, 1]} : vector<7x1280xbf16> to vector<7x911xbf16>
    %cst_117 = arith.constant dense<0.000000e+00> : vector<32x911xf32>
    %182 = tpu.matmul %180, %181, %cst_117 {dimension_numbers = #tpu.dot_dimension_numbers<[1], [0], [0], [1], [0, 0, 1, 1], [], []>} : vector<32x7xbf16>, vector<7x911xbf16>, vector<32x911xf32> -> vector<32x911xf32>
    %183 = arith.addf %178, %182 : vector<32x911xf32>
    %c7_118 = arith.constant 7 : index
    %c0_119 = arith.constant 0 : index
    %c0_120 = arith.constant 0 : index
    %184 = vector.load %arg4[%c7_118, %c0_119, %c0_120] : memref<16x32x7xbf16, #tpu.memory_space<vmem>>, vector<1x32x7xbf16>
    %185 = vector.shape_cast %184 : vector<1x32x7xbf16> to vector<32x7xbf16>
    %186 = vector.extract_strided_slice %147 {offsets = [0, 132], sizes = [7, 911], strides = [1, 1]} : vector<7x1280xbf16> to vector<7x911xbf16>
    %cst_121 = arith.constant dense<0.000000e+00> : vector<32x911xf32>
    %187 = tpu.matmul %185, %186, %cst_121 {dimension_numbers = #tpu.dot_dimension_numbers<[1], [0], [0], [1], [0, 0, 1, 1], [], []>} : vector<32x7xbf16>, vector<7x911xbf16>, vector<32x911xf32> -> vector<32x911xf32>
    %188 = arith.addf %183, %187 : vector<32x911xf32>
    %c8_122 = arith.constant 8 : index
    %c0_123 = arith.constant 0 : index
    %c0_124 = arith.constant 0 : index
    %189 = vector.load %arg4[%c8_122, %c0_123, %c0_124] : memref<16x32x7xbf16, #tpu.memory_space<vmem>>, vector<1x32x7xbf16>
    %190 = vector.shape_cast %189 : vector<1x32x7xbf16> to vector<32x7xbf16>
    %191 = vector.extract_strided_slice %147 {offsets = [0, 194], sizes = [7, 911], strides = [1, 1]} : vector<7x1280xbf16> to vector<7x911xbf16>
    %cst_125 = arith.constant dense<0.000000e+00> : vector<32x911xf32>
    %192 = tpu.matmul %190, %191, %cst_125 {dimension_numbers = #tpu.dot_dimension_numbers<[1], [0], [0], [1], [0, 0, 1, 1], [], []>} : vector<32x7xbf16>, vector<7x911xbf16>, vector<32x911xf32> -> vector<32x911xf32>
    %193 = arith.addf %188, %192 : vector<32x911xf32>
    %c9_126 = arith.constant 9 : index
    %c0_127 = arith.constant 0 : index
    %c0_128 = arith.constant 0 : index
    %194 = vector.load %arg4[%c9_126, %c0_127, %c0_128] : memref<16x32x7xbf16, #tpu.memory_space<vmem>>, vector<1x32x7xbf16>
    %195 = vector.shape_cast %194 : vector<1x32x7xbf16> to vector<32x7xbf16>
    %196 = vector.extract_strided_slice %147 {offsets = [0, 196], sizes = [7, 911], strides = [1, 1]} : vector<7x1280xbf16> to vector<7x911xbf16>
    %cst_129 = arith.constant dense<0.000000e+00> : vector<32x911xf32>
    %197 = tpu.matmul %195, %196, %cst_129 {dimension_numbers = #tpu.dot_dimension_numbers<[1], [0], [0], [1], [0, 0, 1, 1], [], []>} : vector<32x7xbf16>, vector<7x911xbf16>, vector<32x911xf32> -> vector<32x911xf32>
    %198 = arith.addf %193, %197 : vector<32x911xf32>
    %c10_130 = arith.constant 10 : index
    %c0_131 = arith.constant 0 : index
    %c0_132 = arith.constant 0 : index
    %199 = vector.load %arg4[%c10_130, %c0_131, %c0_132] : memref<16x32x7xbf16, #tpu.memory_space<vmem>>, vector<1x32x7xbf16>
    %200 = vector.shape_cast %199 : vector<1x32x7xbf16> to vector<32x7xbf16>
    %201 = vector.extract_strided_slice %147 {offsets = [0, 198], sizes = [7, 911], strides = [1, 1]} : vector<7x1280xbf16> to vector<7x911xbf16>
    %cst_133 = arith.constant dense<0.000000e+00> : vector<32x911xf32>
    %202 = tpu.matmul %200, %201, %cst_133 {dimension_numbers = #tpu.dot_dimension_numbers<[1], [0], [0], [1], [0, 0, 1, 1], [], []>} : vector<32x7xbf16>, vector<7x911xbf16>, vector<32x911xf32> -> vector<32x911xf32>
    %203 = arith.addf %198, %202 : vector<32x911xf32>
    %c11_134 = arith.constant 11 : index
    %c0_135 = arith.constant 0 : index
    %c0_136 = arith.constant 0 : index
    %204 = vector.load %arg4[%c11_134, %c0_135, %c0_136] : memref<16x32x7xbf16, #tpu.memory_space<vmem>>, vector<1x32x7xbf16>
    %205 = vector.shape_cast %204 : vector<1x32x7xbf16> to vector<32x7xbf16>
    %206 = vector.extract_strided_slice %147 {offsets = [0, 200], sizes = [7, 911], strides = [1, 1]} : vector<7x1280xbf16> to vector<7x911xbf16>
    %cst_137 = arith.constant dense<0.000000e+00> : vector<32x911xf32>
    %207 = tpu.matmul %205, %206, %cst_137 {dimension_numbers = #tpu.dot_dimension_numbers<[1], [0], [0], [1], [0, 0, 1, 1], [], []>} : vector<32x7xbf16>, vector<7x911xbf16>, vector<32x911xf32> -> vector<32x911xf32>
    %208 = arith.addf %203, %207 : vector<32x911xf32>
    %c12_138 = arith.constant 12 : index
    %c0_139 = arith.constant 0 : index
    %c0_140 = arith.constant 0 : index
    %209 = vector.load %arg4[%c12_138, %c0_139, %c0_140] : memref<16x32x7xbf16, #tpu.memory_space<vmem>>, vector<1x32x7xbf16>
    %210 = vector.shape_cast %209 : vector<1x32x7xbf16> to vector<32x7xbf16>
    %211 = vector.extract_strided_slice %147 {offsets = [0, 262], sizes = [7, 911], strides = [1, 1]} : vector<7x1280xbf16> to vector<7x911xbf16>
    %cst_141 = arith.constant dense<0.000000e+00> : vector<32x911xf32>
    %212 = tpu.matmul %210, %211, %cst_141 {dimension_numbers = #tpu.dot_dimension_numbers<[1], [0], [0], [1], [0, 0, 1, 1], [], []>} : vector<32x7xbf16>, vector<7x911xbf16>, vector<32x911xf32> -> vector<32x911xf32>
    %213 = arith.addf %208, %212 : vector<32x911xf32>
    %c13_142 = arith.constant 13 : index
    %c0_143 = arith.constant 0 : index
    %c0_144 = arith.constant 0 : index
    %214 = vector.load %arg4[%c13_142, %c0_143, %c0_144] : memref<16x32x7xbf16, #tpu.memory_space<vmem>>, vector<1x32x7xbf16>
    %215 = vector.shape_cast %214 : vector<1x32x7xbf16> to vector<32x7xbf16>
    %216 = vector.extract_strided_slice %147 {offsets = [0, 264], sizes = [7, 911], strides = [1, 1]} : vector<7x1280xbf16> to vector<7x911xbf16>
    %cst_145 = arith.constant dense<0.000000e+00> : vector<32x911xf32>
    %217 = tpu.matmul %215, %216, %cst_145 {dimension_numbers = #tpu.dot_dimension_numbers<[1], [0], [0], [1], [0, 0, 1, 1], [], []>} : vector<32x7xbf16>, vector<7x911xbf16>, vector<32x911xf32> -> vector<32x911xf32>
    %218 = arith.addf %213, %217 : vector<32x911xf32>
    %c14_146 = arith.constant 14 : index
    %c0_147 = arith.constant 0 : index
    %c0_148 = arith.constant 0 : index
    %219 = vector.load %arg4[%c14_146, %c0_147, %c0_148] : memref<16x32x7xbf16, #tpu.memory_space<vmem>>, vector<1x32x7xbf16>
    %220 = vector.shape_cast %219 : vector<1x32x7xbf16> to vector<32x7xbf16>
    %221 = vector.extract_strided_slice %147 {offsets = [0, 266], sizes = [7, 911], strides = [1, 1]} : vector<7x1280xbf16> to vector<7x911xbf16>
    %cst_149 = arith.constant dense<0.000000e+00> : vector<32x911xf32>
    %222 = tpu.matmul %220, %221, %cst_149 {dimension_numbers = #tpu.dot_dimension_numbers<[1], [0], [0], [1], [0, 0, 1, 1], [], []>} : vector<32x7xbf16>, vector<7x911xbf16>, vector<32x911xf32> -> vector<32x911xf32>
    %223 = arith.addf %218, %222 : vector<32x911xf32>
    %c15_150 = arith.constant 15 : index
    %c0_151 = arith.constant 0 : index
    %c0_152 = arith.constant 0 : index
    %224 = vector.load %arg4[%c15_150, %c0_151, %c0_152] : memref<16x32x7xbf16, #tpu.memory_space<vmem>>, vector<1x32x7xbf16>
    %225 = vector.shape_cast %224 : vector<1x32x7xbf16> to vector<32x7xbf16>
    %226 = vector.extract_strided_slice %147 {offsets = [0, 268], sizes = [7, 911], strides = [1, 1]} : vector<7x1280xbf16> to vector<7x911xbf16>
    %cst_153 = arith.constant dense<0.000000e+00> : vector<32x911xf32>
    %227 = tpu.matmul %225, %226, %cst_153 {dimension_numbers = #tpu.dot_dimension_numbers<[1], [0], [0], [1], [0, 0, 1, 1], [], []>} : vector<32x7xbf16>, vector<7x911xbf16>, vector<32x911xf32> -> vector<32x911xf32>
    %228 = arith.addf %223, %227 : vector<32x911xf32>
    %c0_154 = arith.constant 0 : index
    %c0_155 = arith.constant 0 : index
    %229 = vector.load %arg5[%c0_154, %c0_155] : memref<32x1xf32, #tpu.memory_space<vmem>>, vector<32x1xf32>
    %230 = vector.broadcast %229 : vector<32x1xf32> to vector<32x911xf32>
    %231 = arith.addf %228, %230 : vector<32x911xf32>
    %cst_156 = arith.constant 0.000000e+00 : f32
    %232 = vector.broadcast %cst_156 : f32 to vector<32x911xf32>
    %233 = arith.maximumf %231, %232 : vector<32x911xf32>
    %234 = vector.extract_strided_slice %233 {offsets = [0, 0], sizes = [32, 841], strides = [1, 1]} : vector<32x911xf32> to vector<32x841xf32>
    %235 = vector.extract_strided_slice %233 {offsets = [0, 2], sizes = [32, 841], strides = [1, 1]} : vector<32x911xf32> to vector<32x841xf32>
    %236 = arith.maximumf %234, %235 : vector<32x841xf32>
    %237 = vector.extract_strided_slice %233 {offsets = [0, 68], sizes = [32, 841], strides = [1, 1]} : vector<32x911xf32> to vector<32x841xf32>
    %238 = vector.extract_strided_slice %233 {offsets = [0, 70], sizes = [32, 841], strides = [1, 1]} : vector<32x911xf32> to vector<32x841xf32>
    %239 = arith.maximumf %237, %238 : vector<32x841xf32>
    %240 = arith.maximumf %236, %239 : vector<32x841xf32>
    %c0_157 = arith.constant 0 : index
    %c0_158 = arith.constant 0 : index
    %241 = vector.load %arg7[%c0_157, %c0_158] : memref<841x56xf32, #tpu.memory_space<vmem>>, vector<841x56xf32>
    %cst_159 = arith.constant dense<0.000000e+00> : vector<32x56xf32>
    %242 = tpu.matmul %240, %241, %cst_159 {dimension_numbers = #tpu.dot_dimension_numbers<[1], [0], [0], [1], [0, 0, 1, 1], [], []>} : vector<32x841xf32>, vector<841x56xf32>, vector<32x56xf32> -> vector<32x56xf32>
    %243 = arith.truncf %242 : vector<32x56xf32> to vector<32x56xbf16>
    %cst_160 = arith.constant 0.000000e+00 : f32
    %244 = vector.broadcast %cst_160 : f32 to vector<1x80xf32>
    %245 = vector.extract_strided_slice %243 {offsets = [0, 0], sizes = [1, 56], strides = [1, 1]} : vector<32x56xbf16> to vector<1x56xbf16>
    %c0_161 = arith.constant 0 : index
    %c0_162 = arith.constant 0 : index
    %c0_163 = arith.constant 0 : index
    %246 = vector.load %arg8[%c0_161, %c0_162, %c0_163] : memref<32x56x80xbf16, #tpu.memory_space<vmem>>, vector<1x56x80xbf16>
    %247 = vector.shape_cast %246 : vector<1x56x80xbf16> to vector<56x80xbf16>
    %cst_164 = arith.constant dense<0.000000e+00> : vector<1x80xf32>
    %248 = tpu.matmul %245, %247, %cst_164 {dimension_numbers = #tpu.dot_dimension_numbers<[1], [0], [0], [1], [0, 0, 1, 1], [], []>} : vector<1x56xbf16>, vector<56x80xbf16>, vector<1x80xf32> -> vector<1x80xf32>
    %249 = arith.addf %244, %248 : vector<1x80xf32>
    %250 = vector.extract_strided_slice %243 {offsets = [1, 0], sizes = [1, 56], strides = [1, 1]} : vector<32x56xbf16> to vector<1x56xbf16>
    %c1_165 = arith.constant 1 : index
    %c0_166 = arith.constant 0 : index
    %c0_167 = arith.constant 0 : index
    %251 = vector.load %arg8[%c1_165, %c0_166, %c0_167] : memref<32x56x80xbf16, #tpu.memory_space<vmem>>, vector<1x56x80xbf16>
    %252 = vector.shape_cast %251 : vector<1x56x80xbf16> to vector<56x80xbf16>
    %cst_168 = arith.constant dense<0.000000e+00> : vector<1x80xf32>
    %253 = tpu.matmul %250, %252, %cst_168 {dimension_numbers = #tpu.dot_dimension_numbers<[1], [0], [0], [1], [0, 0, 1, 1], [], []>} : vector<1x56xbf16>, vector<56x80xbf16>, vector<1x80xf32> -> vector<1x80xf32>
    %254 = arith.addf %249, %253 : vector<1x80xf32>
    %255 = vector.extract_strided_slice %243 {offsets = [2, 0], sizes = [1, 56], strides = [1, 1]} : vector<32x56xbf16> to vector<1x56xbf16>
    %c2_169 = arith.constant 2 : index
    %c0_170 = arith.constant 0 : index
    %c0_171 = arith.constant 0 : index
    %256 = vector.load %arg8[%c2_169, %c0_170, %c0_171] : memref<32x56x80xbf16, #tpu.memory_space<vmem>>, vector<1x56x80xbf16>
    %257 = vector.shape_cast %256 : vector<1x56x80xbf16> to vector<56x80xbf16>
    %cst_172 = arith.constant dense<0.000000e+00> : vector<1x80xf32>
    %258 = tpu.matmul %255, %257, %cst_172 {dimension_numbers = #tpu.dot_dimension_numbers<[1], [0], [0], [1], [0, 0, 1, 1], [], []>} : vector<1x56xbf16>, vector<56x80xbf16>, vector<1x80xf32> -> vector<1x80xf32>
    %259 = arith.addf %254, %258 : vector<1x80xf32>
    %260 = vector.extract_strided_slice %243 {offsets = [3, 0], sizes = [1, 56], strides = [1, 1]} : vector<32x56xbf16> to vector<1x56xbf16>
    %c3_173 = arith.constant 3 : index
    %c0_174 = arith.constant 0 : index
    %c0_175 = arith.constant 0 : index
    %261 = vector.load %arg8[%c3_173, %c0_174, %c0_175] : memref<32x56x80xbf16, #tpu.memory_space<vmem>>, vector<1x56x80xbf16>
    %262 = vector.shape_cast %261 : vector<1x56x80xbf16> to vector<56x80xbf16>
    %cst_176 = arith.constant dense<0.000000e+00> : vector<1x80xf32>
    %263 = tpu.matmul %260, %262, %cst_176 {dimension_numbers = #tpu.dot_dimension_numbers<[1], [0], [0], [1], [0, 0, 1, 1], [], []>} : vector<1x56xbf16>, vector<56x80xbf16>, vector<1x80xf32> -> vector<1x80xf32>
    %264 = arith.addf %259, %263 : vector<1x80xf32>
    %265 = vector.extract_strided_slice %243 {offsets = [4, 0], sizes = [1, 56], strides = [1, 1]} : vector<32x56xbf16> to vector<1x56xbf16>
    %c4_177 = arith.constant 4 : index
    %c0_178 = arith.constant 0 : index
    %c0_179 = arith.constant 0 : index
    %266 = vector.load %arg8[%c4_177, %c0_178, %c0_179] : memref<32x56x80xbf16, #tpu.memory_space<vmem>>, vector<1x56x80xbf16>
    %267 = vector.shape_cast %266 : vector<1x56x80xbf16> to vector<56x80xbf16>
    %cst_180 = arith.constant dense<0.000000e+00> : vector<1x80xf32>
    %268 = tpu.matmul %265, %267, %cst_180 {dimension_numbers = #tpu.dot_dimension_numbers<[1], [0], [0], [1], [0, 0, 1, 1], [], []>} : vector<1x56xbf16>, vector<56x80xbf16>, vector<1x80xf32> -> vector<1x80xf32>
    %269 = arith.addf %264, %268 : vector<1x80xf32>
    %270 = vector.extract_strided_slice %243 {offsets = [5, 0], sizes = [1, 56], strides = [1, 1]} : vector<32x56xbf16> to vector<1x56xbf16>
    %c5_181 = arith.constant 5 : index
    %c0_182 = arith.constant 0 : index
    %c0_183 = arith.constant 0 : index
    %271 = vector.load %arg8[%c5_181, %c0_182, %c0_183] : memref<32x56x80xbf16, #tpu.memory_space<vmem>>, vector<1x56x80xbf16>
    %272 = vector.shape_cast %271 : vector<1x56x80xbf16> to vector<56x80xbf16>
    %cst_184 = arith.constant dense<0.000000e+00> : vector<1x80xf32>
    %273 = tpu.matmul %270, %272, %cst_184 {dimension_numbers = #tpu.dot_dimension_numbers<[1], [0], [0], [1], [0, 0, 1, 1], [], []>} : vector<1x56xbf16>, vector<56x80xbf16>, vector<1x80xf32> -> vector<1x80xf32>
    %274 = arith.addf %269, %273 : vector<1x80xf32>
    %275 = vector.extract_strided_slice %243 {offsets = [6, 0], sizes = [1, 56], strides = [1, 1]} : vector<32x56xbf16> to vector<1x56xbf16>
    %c6_185 = arith.constant 6 : index
    %c0_186 = arith.constant 0 : index
    %c0_187 = arith.constant 0 : index
    %276 = vector.load %arg8[%c6_185, %c0_186, %c0_187] : memref<32x56x80xbf16, #tpu.memory_space<vmem>>, vector<1x56x80xbf16>
    %277 = vector.shape_cast %276 : vector<1x56x80xbf16> to vector<56x80xbf16>
    %cst_188 = arith.constant dense<0.000000e+00> : vector<1x80xf32>
    %278 = tpu.matmul %275, %277, %cst_188 {dimension_numbers = #tpu.dot_dimension_numbers<[1], [0], [0], [1], [0, 0, 1, 1], [], []>} : vector<1x56xbf16>, vector<56x80xbf16>, vector<1x80xf32> -> vector<1x80xf32>
    %279 = arith.addf %274, %278 : vector<1x80xf32>
    %280 = vector.extract_strided_slice %243 {offsets = [7, 0], sizes = [1, 56], strides = [1, 1]} : vector<32x56xbf16> to vector<1x56xbf16>
    %c7_189 = arith.constant 7 : index
    %c0_190 = arith.constant 0 : index
    %c0_191 = arith.constant 0 : index
    %281 = vector.load %arg8[%c7_189, %c0_190, %c0_191] : memref<32x56x80xbf16, #tpu.memory_space<vmem>>, vector<1x56x80xbf16>
    %282 = vector.shape_cast %281 : vector<1x56x80xbf16> to vector<56x80xbf16>
    %cst_192 = arith.constant dense<0.000000e+00> : vector<1x80xf32>
    %283 = tpu.matmul %280, %282, %cst_192 {dimension_numbers = #tpu.dot_dimension_numbers<[1], [0], [0], [1], [0, 0, 1, 1], [], []>} : vector<1x56xbf16>, vector<56x80xbf16>, vector<1x80xf32> -> vector<1x80xf32>
    %284 = arith.addf %279, %283 : vector<1x80xf32>
    %285 = vector.extract_strided_slice %243 {offsets = [8, 0], sizes = [1, 56], strides = [1, 1]} : vector<32x56xbf16> to vector<1x56xbf16>
    %c8_193 = arith.constant 8 : index
    %c0_194 = arith.constant 0 : index
    %c0_195 = arith.constant 0 : index
    %286 = vector.load %arg8[%c8_193, %c0_194, %c0_195] : memref<32x56x80xbf16, #tpu.memory_space<vmem>>, vector<1x56x80xbf16>
    %287 = vector.shape_cast %286 : vector<1x56x80xbf16> to vector<56x80xbf16>
    %cst_196 = arith.constant dense<0.000000e+00> : vector<1x80xf32>
    %288 = tpu.matmul %285, %287, %cst_196 {dimension_numbers = #tpu.dot_dimension_numbers<[1], [0], [0], [1], [0, 0, 1, 1], [], []>} : vector<1x56xbf16>, vector<56x80xbf16>, vector<1x80xf32> -> vector<1x80xf32>
    %289 = arith.addf %284, %288 : vector<1x80xf32>
    %290 = vector.extract_strided_slice %243 {offsets = [9, 0], sizes = [1, 56], strides = [1, 1]} : vector<32x56xbf16> to vector<1x56xbf16>
    %c9_197 = arith.constant 9 : index
    %c0_198 = arith.constant 0 : index
    %c0_199 = arith.constant 0 : index
    %291 = vector.load %arg8[%c9_197, %c0_198, %c0_199] : memref<32x56x80xbf16, #tpu.memory_space<vmem>>, vector<1x56x80xbf16>
    %292 = vector.shape_cast %291 : vector<1x56x80xbf16> to vector<56x80xbf16>
    %cst_200 = arith.constant dense<0.000000e+00> : vector<1x80xf32>
    %293 = tpu.matmul %290, %292, %cst_200 {dimension_numbers = #tpu.dot_dimension_numbers<[1], [0], [0], [1], [0, 0, 1, 1], [], []>} : vector<1x56xbf16>, vector<56x80xbf16>, vector<1x80xf32> -> vector<1x80xf32>
    %294 = arith.addf %289, %293 : vector<1x80xf32>
    %295 = vector.extract_strided_slice %243 {offsets = [10, 0], sizes = [1, 56], strides = [1, 1]} : vector<32x56xbf16> to vector<1x56xbf16>
    %c10_201 = arith.constant 10 : index
    %c0_202 = arith.constant 0 : index
    %c0_203 = arith.constant 0 : index
    %296 = vector.load %arg8[%c10_201, %c0_202, %c0_203] : memref<32x56x80xbf16, #tpu.memory_space<vmem>>, vector<1x56x80xbf16>
    %297 = vector.shape_cast %296 : vector<1x56x80xbf16> to vector<56x80xbf16>
    %cst_204 = arith.constant dense<0.000000e+00> : vector<1x80xf32>
    %298 = tpu.matmul %295, %297, %cst_204 {dimension_numbers = #tpu.dot_dimension_numbers<[1], [0], [0], [1], [0, 0, 1, 1], [], []>} : vector<1x56xbf16>, vector<56x80xbf16>, vector<1x80xf32> -> vector<1x80xf32>
    %299 = arith.addf %294, %298 : vector<1x80xf32>
    %300 = vector.extract_strided_slice %243 {offsets = [11, 0], sizes = [1, 56], strides = [1, 1]} : vector<32x56xbf16> to vector<1x56xbf16>
    %c11_205 = arith.constant 11 : index
    %c0_206 = arith.constant 0 : index
    %c0_207 = arith.constant 0 : index
    %301 = vector.load %arg8[%c11_205, %c0_206, %c0_207] : memref<32x56x80xbf16, #tpu.memory_space<vmem>>, vector<1x56x80xbf16>
    %302 = vector.shape_cast %301 : vector<1x56x80xbf16> to vector<56x80xbf16>
    %cst_208 = arith.constant dense<0.000000e+00> : vector<1x80xf32>
    %303 = tpu.matmul %300, %302, %cst_208 {dimension_numbers = #tpu.dot_dimension_numbers<[1], [0], [0], [1], [0, 0, 1, 1], [], []>} : vector<1x56xbf16>, vector<56x80xbf16>, vector<1x80xf32> -> vector<1x80xf32>
    %304 = arith.addf %299, %303 : vector<1x80xf32>
    %305 = vector.extract_strided_slice %243 {offsets = [12, 0], sizes = [1, 56], strides = [1, 1]} : vector<32x56xbf16> to vector<1x56xbf16>
    %c12_209 = arith.constant 12 : index
    %c0_210 = arith.constant 0 : index
    %c0_211 = arith.constant 0 : index
    %306 = vector.load %arg8[%c12_209, %c0_210, %c0_211] : memref<32x56x80xbf16, #tpu.memory_space<vmem>>, vector<1x56x80xbf16>
    %307 = vector.shape_cast %306 : vector<1x56x80xbf16> to vector<56x80xbf16>
    %cst_212 = arith.constant dense<0.000000e+00> : vector<1x80xf32>
    %308 = tpu.matmul %305, %307, %cst_212 {dimension_numbers = #tpu.dot_dimension_numbers<[1], [0], [0], [1], [0, 0, 1, 1], [], []>} : vector<1x56xbf16>, vector<56x80xbf16>, vector<1x80xf32> -> vector<1x80xf32>
    %309 = arith.addf %304, %308 : vector<1x80xf32>
    %310 = vector.extract_strided_slice %243 {offsets = [13, 0], sizes = [1, 56], strides = [1, 1]} : vector<32x56xbf16> to vector<1x56xbf16>
    %c13_213 = arith.constant 13 : index
    %c0_214 = arith.constant 0 : index
    %c0_215 = arith.constant 0 : index
    %311 = vector.load %arg8[%c13_213, %c0_214, %c0_215] : memref<32x56x80xbf16, #tpu.memory_space<vmem>>, vector<1x56x80xbf16>
    %312 = vector.shape_cast %311 : vector<1x56x80xbf16> to vector<56x80xbf16>
    %cst_216 = arith.constant dense<0.000000e+00> : vector<1x80xf32>
    %313 = tpu.matmul %310, %312, %cst_216 {dimension_numbers = #tpu.dot_dimension_numbers<[1], [0], [0], [1], [0, 0, 1, 1], [], []>} : vector<1x56xbf16>, vector<56x80xbf16>, vector<1x80xf32> -> vector<1x80xf32>
    %314 = arith.addf %309, %313 : vector<1x80xf32>
    %315 = vector.extract_strided_slice %243 {offsets = [14, 0], sizes = [1, 56], strides = [1, 1]} : vector<32x56xbf16> to vector<1x56xbf16>
    %c14_217 = arith.constant 14 : index
    %c0_218 = arith.constant 0 : index
    %c0_219 = arith.constant 0 : index
    %316 = vector.load %arg8[%c14_217, %c0_218, %c0_219] : memref<32x56x80xbf16, #tpu.memory_space<vmem>>, vector<1x56x80xbf16>
    %317 = vector.shape_cast %316 : vector<1x56x80xbf16> to vector<56x80xbf16>
    %cst_220 = arith.constant dense<0.000000e+00> : vector<1x80xf32>
    %318 = tpu.matmul %315, %317, %cst_220 {dimension_numbers = #tpu.dot_dimension_numbers<[1], [0], [0], [1], [0, 0, 1, 1], [], []>} : vector<1x56xbf16>, vector<56x80xbf16>, vector<1x80xf32> -> vector<1x80xf32>
    %319 = arith.addf %314, %318 : vector<1x80xf32>
    %320 = vector.extract_strided_slice %243 {offsets = [15, 0], sizes = [1, 56], strides = [1, 1]} : vector<32x56xbf16> to vector<1x56xbf16>
    %c15_221 = arith.constant 15 : index
    %c0_222 = arith.constant 0 : index
    %c0_223 = arith.constant 0 : index
    %321 = vector.load %arg8[%c15_221, %c0_222, %c0_223] : memref<32x56x80xbf16, #tpu.memory_space<vmem>>, vector<1x56x80xbf16>
    %322 = vector.shape_cast %321 : vector<1x56x80xbf16> to vector<56x80xbf16>
    %cst_224 = arith.constant dense<0.000000e+00> : vector<1x80xf32>
    %323 = tpu.matmul %320, %322, %cst_224 {dimension_numbers = #tpu.dot_dimension_numbers<[1], [0], [0], [1], [0, 0, 1, 1], [], []>} : vector<1x56xbf16>, vector<56x80xbf16>, vector<1x80xf32> -> vector<1x80xf32>
    %324 = arith.addf %319, %323 : vector<1x80xf32>
    %325 = vector.extract_strided_slice %243 {offsets = [16, 0], sizes = [1, 56], strides = [1, 1]} : vector<32x56xbf16> to vector<1x56xbf16>
    %c16_225 = arith.constant 16 : index
    %c0_226 = arith.constant 0 : index
    %c0_227 = arith.constant 0 : index
    %326 = vector.load %arg8[%c16_225, %c0_226, %c0_227] : memref<32x56x80xbf16, #tpu.memory_space<vmem>>, vector<1x56x80xbf16>
    %327 = vector.shape_cast %326 : vector<1x56x80xbf16> to vector<56x80xbf16>
    %cst_228 = arith.constant dense<0.000000e+00> : vector<1x80xf32>
    %328 = tpu.matmul %325, %327, %cst_228 {dimension_numbers = #tpu.dot_dimension_numbers<[1], [0], [0], [1], [0, 0, 1, 1], [], []>} : vector<1x56xbf16>, vector<56x80xbf16>, vector<1x80xf32> -> vector<1x80xf32>
    %329 = arith.addf %324, %328 : vector<1x80xf32>
    %330 = vector.extract_strided_slice %243 {offsets = [17, 0], sizes = [1, 56], strides = [1, 1]} : vector<32x56xbf16> to vector<1x56xbf16>
    %c17_229 = arith.constant 17 : index
    %c0_230 = arith.constant 0 : index
    %c0_231 = arith.constant 0 : index
    %331 = vector.load %arg8[%c17_229, %c0_230, %c0_231] : memref<32x56x80xbf16, #tpu.memory_space<vmem>>, vector<1x56x80xbf16>
    %332 = vector.shape_cast %331 : vector<1x56x80xbf16> to vector<56x80xbf16>
    %cst_232 = arith.constant dense<0.000000e+00> : vector<1x80xf32>
    %333 = tpu.matmul %330, %332, %cst_232 {dimension_numbers = #tpu.dot_dimension_numbers<[1], [0], [0], [1], [0, 0, 1, 1], [], []>} : vector<1x56xbf16>, vector<56x80xbf16>, vector<1x80xf32> -> vector<1x80xf32>
    %334 = arith.addf %329, %333 : vector<1x80xf32>
    %335 = vector.extract_strided_slice %243 {offsets = [18, 0], sizes = [1, 56], strides = [1, 1]} : vector<32x56xbf16> to vector<1x56xbf16>
    %c18_233 = arith.constant 18 : index
    %c0_234 = arith.constant 0 : index
    %c0_235 = arith.constant 0 : index
    %336 = vector.load %arg8[%c18_233, %c0_234, %c0_235] : memref<32x56x80xbf16, #tpu.memory_space<vmem>>, vector<1x56x80xbf16>
    %337 = vector.shape_cast %336 : vector<1x56x80xbf16> to vector<56x80xbf16>
    %cst_236 = arith.constant dense<0.000000e+00> : vector<1x80xf32>
    %338 = tpu.matmul %335, %337, %cst_236 {dimension_numbers = #tpu.dot_dimension_numbers<[1], [0], [0], [1], [0, 0, 1, 1], [], []>} : vector<1x56xbf16>, vector<56x80xbf16>, vector<1x80xf32> -> vector<1x80xf32>
    %339 = arith.addf %334, %338 : vector<1x80xf32>
    %340 = vector.extract_strided_slice %243 {offsets = [19, 0], sizes = [1, 56], strides = [1, 1]} : vector<32x56xbf16> to vector<1x56xbf16>
    %c19_237 = arith.constant 19 : index
    %c0_238 = arith.constant 0 : index
    %c0_239 = arith.constant 0 : index
    %341 = vector.load %arg8[%c19_237, %c0_238, %c0_239] : memref<32x56x80xbf16, #tpu.memory_space<vmem>>, vector<1x56x80xbf16>
    %342 = vector.shape_cast %341 : vector<1x56x80xbf16> to vector<56x80xbf16>
    %cst_240 = arith.constant dense<0.000000e+00> : vector<1x80xf32>
    %343 = tpu.matmul %340, %342, %cst_240 {dimension_numbers = #tpu.dot_dimension_numbers<[1], [0], [0], [1], [0, 0, 1, 1], [], []>} : vector<1x56xbf16>, vector<56x80xbf16>, vector<1x80xf32> -> vector<1x80xf32>
    %344 = arith.addf %339, %343 : vector<1x80xf32>
    %345 = vector.extract_strided_slice %243 {offsets = [20, 0], sizes = [1, 56], strides = [1, 1]} : vector<32x56xbf16> to vector<1x56xbf16>
    %c20_241 = arith.constant 20 : index
    %c0_242 = arith.constant 0 : index
    %c0_243 = arith.constant 0 : index
    %346 = vector.load %arg8[%c20_241, %c0_242, %c0_243] : memref<32x56x80xbf16, #tpu.memory_space<vmem>>, vector<1x56x80xbf16>
    %347 = vector.shape_cast %346 : vector<1x56x80xbf16> to vector<56x80xbf16>
    %cst_244 = arith.constant dense<0.000000e+00> : vector<1x80xf32>
    %348 = tpu.matmul %345, %347, %cst_244 {dimension_numbers = #tpu.dot_dimension_numbers<[1], [0], [0], [1], [0, 0, 1, 1], [], []>} : vector<1x56xbf16>, vector<56x80xbf16>, vector<1x80xf32> -> vector<1x80xf32>
    %349 = arith.addf %344, %348 : vector<1x80xf32>
    %350 = vector.extract_strided_slice %243 {offsets = [21, 0], sizes = [1, 56], strides = [1, 1]} : vector<32x56xbf16> to vector<1x56xbf16>
    %c21_245 = arith.constant 21 : index
    %c0_246 = arith.constant 0 : index
    %c0_247 = arith.constant 0 : index
    %351 = vector.load %arg8[%c21_245, %c0_246, %c0_247] : memref<32x56x80xbf16, #tpu.memory_space<vmem>>, vector<1x56x80xbf16>
    %352 = vector.shape_cast %351 : vector<1x56x80xbf16> to vector<56x80xbf16>
    %cst_248 = arith.constant dense<0.000000e+00> : vector<1x80xf32>
    %353 = tpu.matmul %350, %352, %cst_248 {dimension_numbers = #tpu.dot_dimension_numbers<[1], [0], [0], [1], [0, 0, 1, 1], [], []>} : vector<1x56xbf16>, vector<56x80xbf16>, vector<1x80xf32> -> vector<1x80xf32>
    %354 = arith.addf %349, %353 : vector<1x80xf32>
    %355 = vector.extract_strided_slice %243 {offsets = [22, 0], sizes = [1, 56], strides = [1, 1]} : vector<32x56xbf16> to vector<1x56xbf16>
    %c22_249 = arith.constant 22 : index
    %c0_250 = arith.constant 0 : index
    %c0_251 = arith.constant 0 : index
    %356 = vector.load %arg8[%c22_249, %c0_250, %c0_251] : memref<32x56x80xbf16, #tpu.memory_space<vmem>>, vector<1x56x80xbf16>
    %357 = vector.shape_cast %356 : vector<1x56x80xbf16> to vector<56x80xbf16>
    %cst_252 = arith.constant dense<0.000000e+00> : vector<1x80xf32>
    %358 = tpu.matmul %355, %357, %cst_252 {dimension_numbers = #tpu.dot_dimension_numbers<[1], [0], [0], [1], [0, 0, 1, 1], [], []>} : vector<1x56xbf16>, vector<56x80xbf16>, vector<1x80xf32> -> vector<1x80xf32>
    %359 = arith.addf %354, %358 : vector<1x80xf32>
    %360 = vector.extract_strided_slice %243 {offsets = [23, 0], sizes = [1, 56], strides = [1, 1]} : vector<32x56xbf16> to vector<1x56xbf16>
    %c23_253 = arith.constant 23 : index
    %c0_254 = arith.constant 0 : index
    %c0_255 = arith.constant 0 : index
    %361 = vector.load %arg8[%c23_253, %c0_254, %c0_255] : memref<32x56x80xbf16, #tpu.memory_space<vmem>>, vector<1x56x80xbf16>
    %362 = vector.shape_cast %361 : vector<1x56x80xbf16> to vector<56x80xbf16>
    %cst_256 = arith.constant dense<0.000000e+00> : vector<1x80xf32>
    %363 = tpu.matmul %360, %362, %cst_256 {dimension_numbers = #tpu.dot_dimension_numbers<[1], [0], [0], [1], [0, 0, 1, 1], [], []>} : vector<1x56xbf16>, vector<56x80xbf16>, vector<1x80xf32> -> vector<1x80xf32>
    %364 = arith.addf %359, %363 : vector<1x80xf32>
    %365 = vector.extract_strided_slice %243 {offsets = [24, 0], sizes = [1, 56], strides = [1, 1]} : vector<32x56xbf16> to vector<1x56xbf16>
    %c24_257 = arith.constant 24 : index
    %c0_258 = arith.constant 0 : index
    %c0_259 = arith.constant 0 : index
    %366 = vector.load %arg8[%c24_257, %c0_258, %c0_259] : memref<32x56x80xbf16, #tpu.memory_space<vmem>>, vector<1x56x80xbf16>
    %367 = vector.shape_cast %366 : vector<1x56x80xbf16> to vector<56x80xbf16>
    %cst_260 = arith.constant dense<0.000000e+00> : vector<1x80xf32>
    %368 = tpu.matmul %365, %367, %cst_260 {dimension_numbers = #tpu.dot_dimension_numbers<[1], [0], [0], [1], [0, 0, 1, 1], [], []>} : vector<1x56xbf16>, vector<56x80xbf16>, vector<1x80xf32> -> vector<1x80xf32>
    %369 = arith.addf %364, %368 : vector<1x80xf32>
    %370 = vector.extract_strided_slice %243 {offsets = [25, 0], sizes = [1, 56], strides = [1, 1]} : vector<32x56xbf16> to vector<1x56xbf16>
    %c25 = arith.constant 25 : index
    %c0_261 = arith.constant 0 : index
    %c0_262 = arith.constant 0 : index
    %371 = vector.load %arg8[%c25, %c0_261, %c0_262] : memref<32x56x80xbf16, #tpu.memory_space<vmem>>, vector<1x56x80xbf16>
    %372 = vector.shape_cast %371 : vector<1x56x80xbf16> to vector<56x80xbf16>
    %cst_263 = arith.constant dense<0.000000e+00> : vector<1x80xf32>
    %373 = tpu.matmul %370, %372, %cst_263 {dimension_numbers = #tpu.dot_dimension_numbers<[1], [0], [0], [1], [0, 0, 1, 1], [], []>} : vector<1x56xbf16>, vector<56x80xbf16>, vector<1x80xf32> -> vector<1x80xf32>
    %374 = arith.addf %369, %373 : vector<1x80xf32>
    %375 = vector.extract_strided_slice %243 {offsets = [26, 0], sizes = [1, 56], strides = [1, 1]} : vector<32x56xbf16> to vector<1x56xbf16>
    %c26 = arith.constant 26 : index
    %c0_264 = arith.constant 0 : index
    %c0_265 = arith.constant 0 : index
    %376 = vector.load %arg8[%c26, %c0_264, %c0_265] : memref<32x56x80xbf16, #tpu.memory_space<vmem>>, vector<1x56x80xbf16>
    %377 = vector.shape_cast %376 : vector<1x56x80xbf16> to vector<56x80xbf16>
    %cst_266 = arith.constant dense<0.000000e+00> : vector<1x80xf32>
    %378 = tpu.matmul %375, %377, %cst_266 {dimension_numbers = #tpu.dot_dimension_numbers<[1], [0], [0], [1], [0, 0, 1, 1], [], []>} : vector<1x56xbf16>, vector<56x80xbf16>, vector<1x80xf32> -> vector<1x80xf32>
    %379 = arith.addf %374, %378 : vector<1x80xf32>
    %380 = vector.extract_strided_slice %243 {offsets = [27, 0], sizes = [1, 56], strides = [1, 1]} : vector<32x56xbf16> to vector<1x56xbf16>
    %c27 = arith.constant 27 : index
    %c0_267 = arith.constant 0 : index
    %c0_268 = arith.constant 0 : index
    %381 = vector.load %arg8[%c27, %c0_267, %c0_268] : memref<32x56x80xbf16, #tpu.memory_space<vmem>>, vector<1x56x80xbf16>
    %382 = vector.shape_cast %381 : vector<1x56x80xbf16> to vector<56x80xbf16>
    %cst_269 = arith.constant dense<0.000000e+00> : vector<1x80xf32>
    %383 = tpu.matmul %380, %382, %cst_269 {dimension_numbers = #tpu.dot_dimension_numbers<[1], [0], [0], [1], [0, 0, 1, 1], [], []>} : vector<1x56xbf16>, vector<56x80xbf16>, vector<1x80xf32> -> vector<1x80xf32>
    %384 = arith.addf %379, %383 : vector<1x80xf32>
    %385 = vector.extract_strided_slice %243 {offsets = [28, 0], sizes = [1, 56], strides = [1, 1]} : vector<32x56xbf16> to vector<1x56xbf16>
    %c28 = arith.constant 28 : index
    %c0_270 = arith.constant 0 : index
    %c0_271 = arith.constant 0 : index
    %386 = vector.load %arg8[%c28, %c0_270, %c0_271] : memref<32x56x80xbf16, #tpu.memory_space<vmem>>, vector<1x56x80xbf16>
    %387 = vector.shape_cast %386 : vector<1x56x80xbf16> to vector<56x80xbf16>
    %cst_272 = arith.constant dense<0.000000e+00> : vector<1x80xf32>
    %388 = tpu.matmul %385, %387, %cst_272 {dimension_numbers = #tpu.dot_dimension_numbers<[1], [0], [0], [1], [0, 0, 1, 1], [], []>} : vector<1x56xbf16>, vector<56x80xbf16>, vector<1x80xf32> -> vector<1x80xf32>
    %389 = arith.addf %384, %388 : vector<1x80xf32>
    %390 = vector.extract_strided_slice %243 {offsets = [29, 0], sizes = [1, 56], strides = [1, 1]} : vector<32x56xbf16> to vector<1x56xbf16>
    %c29 = arith.constant 29 : index
    %c0_273 = arith.constant 0 : index
    %c0_274 = arith.constant 0 : index
    %391 = vector.load %arg8[%c29, %c0_273, %c0_274] : memref<32x56x80xbf16, #tpu.memory_space<vmem>>, vector<1x56x80xbf16>
    %392 = vector.shape_cast %391 : vector<1x56x80xbf16> to vector<56x80xbf16>
    %cst_275 = arith.constant dense<0.000000e+00> : vector<1x80xf32>
    %393 = tpu.matmul %390, %392, %cst_275 {dimension_numbers = #tpu.dot_dimension_numbers<[1], [0], [0], [1], [0, 0, 1, 1], [], []>} : vector<1x56xbf16>, vector<56x80xbf16>, vector<1x80xf32> -> vector<1x80xf32>
    %394 = arith.addf %389, %393 : vector<1x80xf32>
    %395 = vector.extract_strided_slice %243 {offsets = [30, 0], sizes = [1, 56], strides = [1, 1]} : vector<32x56xbf16> to vector<1x56xbf16>
    %c30 = arith.constant 30 : index
    %c0_276 = arith.constant 0 : index
    %c0_277 = arith.constant 0 : index
    %396 = vector.load %arg8[%c30, %c0_276, %c0_277] : memref<32x56x80xbf16, #tpu.memory_space<vmem>>, vector<1x56x80xbf16>
    %397 = vector.shape_cast %396 : vector<1x56x80xbf16> to vector<56x80xbf16>
    %cst_278 = arith.constant dense<0.000000e+00> : vector<1x80xf32>
    %398 = tpu.matmul %395, %397, %cst_278 {dimension_numbers = #tpu.dot_dimension_numbers<[1], [0], [0], [1], [0, 0, 1, 1], [], []>} : vector<1x56xbf16>, vector<56x80xbf16>, vector<1x80xf32> -> vector<1x80xf32>
    %399 = arith.addf %394, %398 : vector<1x80xf32>
    %400 = vector.extract_strided_slice %243 {offsets = [31, 0], sizes = [1, 56], strides = [1, 1]} : vector<32x56xbf16> to vector<1x56xbf16>
    %c31 = arith.constant 31 : index
    %c0_279 = arith.constant 0 : index
    %c0_280 = arith.constant 0 : index
    %401 = vector.load %arg8[%c31, %c0_279, %c0_280] : memref<32x56x80xbf16, #tpu.memory_space<vmem>>, vector<1x56x80xbf16>
    %402 = vector.shape_cast %401 : vector<1x56x80xbf16> to vector<56x80xbf16>
    %cst_281 = arith.constant dense<0.000000e+00> : vector<1x80xf32>
    %403 = tpu.matmul %400, %402, %cst_281 {dimension_numbers = #tpu.dot_dimension_numbers<[1], [0], [0], [1], [0, 0, 1, 1], [], []>} : vector<1x56xbf16>, vector<56x80xbf16>, vector<1x80xf32> -> vector<1x80xf32>
    %404 = arith.addf %399, %403 : vector<1x80xf32>
    %c0_282 = arith.constant 0 : index
    %c0_283 = arith.constant 0 : index
    %405 = vector.load %arg9[%c0_282, %c0_283] : memref<1x80xf32, #tpu.memory_space<vmem>>, vector<1x80xf32>
    %406 = arith.addf %404, %405 : vector<1x80xf32>
    %cst_284 = arith.constant 0.000000e+00 : f32
    %407 = vector.broadcast %cst_284 : f32 to vector<1x80xf32>
    %408 = arith.maximumf %406, %407 : vector<1x80xf32>
    %c0_285 = arith.constant 0 : index
    %c0_286 = arith.constant 0 : index
    %409 = vector.load %arg10[%c0_285, %c0_286] : memref<80x84xf32, #tpu.memory_space<vmem>>, vector<80x84xf32>
    %cst_287 = arith.constant dense<0.000000e+00> : vector<1x84xf32>
    %410 = tpu.matmul %408, %409, %cst_287 {dimension_numbers = #tpu.dot_dimension_numbers<[1], [0], [0], [1], [0, 0, 1, 1], [], []>} : vector<1x80xf32>, vector<80x84xf32>, vector<1x84xf32> -> vector<1x84xf32>
    %c0_288 = arith.constant 0 : index
    %c0_289 = arith.constant 0 : index
    %411 = vector.load %arg11[%c0_288, %c0_289] : memref<1x84xf32, #tpu.memory_space<vmem>>, vector<1x84xf32>
    %412 = arith.addf %410, %411 : vector<1x84xf32>
    %cst_290 = arith.constant 0.000000e+00 : f32
    %413 = vector.broadcast %cst_290 : f32 to vector<1x84xf32>
    %414 = arith.maximumf %412, %413 : vector<1x84xf32>
    %c0_291 = arith.constant 0 : index
    %c0_292 = arith.constant 0 : index
    %415 = vector.load %arg12[%c0_291, %c0_292] : memref<84x10xf32, #tpu.memory_space<vmem>>, vector<84x10xf32>
    %cst_293 = arith.constant dense<0.000000e+00> : vector<1x10xf32>
    %416 = tpu.matmul %414, %415, %cst_293 {dimension_numbers = #tpu.dot_dimension_numbers<[1], [0], [0], [1], [0, 0, 1, 1], [], []>} : vector<1x84xf32>, vector<84x10xf32>, vector<1x10xf32> -> vector<1x10xf32>
    %c0_294 = arith.constant 0 : index
    %c0_295 = arith.constant 0 : index
    %417 = vector.load %arg13[%c0_294, %c0_295] : memref<1x10xf32, #tpu.memory_space<vmem>>, vector<1x10xf32>
    %418 = arith.addf %416, %417 : vector<1x10xf32>
    %c0_296 = arith.constant 0 : index
    %c0_297 = arith.constant 0 : index
    %c0_298 = arith.constant 0 : index
    %419 = vector.load %arg14[%c0_296, %c0_297, %c0_298] : memref<1x1x10xf32, #tpu.memory_space<vmem>>, vector<1x1x10xf32>
    %420 = vector.shape_cast %419 : vector<1x1x10xf32> to vector<1x10xf32>
    %421 = vector.shape_cast %418 : vector<1x10xf32> to vector<1x1x10xf32>
    tpu.vector_store %arg14[%c0_296, %c0_297, %c0_298], %421 {strides = array<i32>} : memref<1x1x10xf32, #tpu.memory_space<vmem>>, vector<1x1x10xf32>,
    return
  }
  func.func @transform_0(%arg0: i32) -> (i32, i32, i32) {
    %c0_i32 = arith.constant 0 : i32
    %c0_i32_0 = arith.constant 0 : i32
    %c0_i32_1 = arith.constant 0 : i32
    return %arg0, %c0_i32, %c0_i32_0 : i32, i32, i32
  }
  func.func @transform_1(%arg0: i32) -> (i32, i32, i32) {
    %c0_i32 = arith.constant 0 : i32
    %c0_i32_0 = arith.constant 0 : i32
    %c0_i32_1 = arith.constant 0 : i32
    %c0_i32_2 = arith.constant 0 : i32
    return %c0_i32, %c0_i32_0, %c0_i32_1 : i32, i32, i32
  }
  func.func @transform_2(%arg0: i32) -> (i32, i32) {
    %c0_i32 = arith.constant 0 : i32
    %c0_i32_0 = arith.constant 0 : i32
    %c0_i32_1 = arith.constant 0 : i32
    return %c0_i32, %c0_i32_0 : i32, i32
  }
  func.func @transform_3(%arg0: i32) -> (i32, i32, i32) {
    %c0_i32 = arith.constant 0 : i32
    %c0_i32_0 = arith.constant 0 : i32
    %c0_i32_1 = arith.constant 0 : i32
    %c0_i32_2 = arith.constant 0 : i32
    return %c0_i32, %c0_i32_0, %c0_i32_1 : i32, i32, i32
  }
  func.func @transform_4(%arg0: i32) -> (i32, i32) {
    %c0_i32 = arith.constant 0 : i32
    %c0_i32_0 = arith.constant 0 : i32
    %c0_i32_1 = arith.constant 0 : i32
    return %c0_i32, %c0_i32_0 : i32, i32
  }
  func.func @transform_5(%arg0: i32) -> (i32, i32) {
    %c0_i32 = arith.constant 0 : i32
    %c0_i32_0 = arith.constant 0 : i32
    %c0_i32_1 = arith.constant 0 : i32
    return %c0_i32, %c0_i32_0 : i32, i32
  }
  func.func @transform_6(%arg0: i32) -> (i32, i32) {
    %c0_i32 = arith.constant 0 : i32
    %c0_i32_0 = arith.constant 0 : i32
    %c0_i32_1 = arith.constant 0 : i32
    return %c0_i32, %c0_i32_0 : i32, i32
  }
  func.func @transform_7(%arg0: i32) -> (i32, i32, i32) {
    %c0_i32 = arith.constant 0 : i32
    %c0_i32_0 = arith.constant 0 : i32
    %c0_i32_1 = arith.constant 0 : i32
    %c0_i32_2 = arith.constant 0 : i32
    return %c0_i32, %c0_i32_0, %c0_i32_1 : i32, i32, i32
  }
  func.func @transform_8(%arg0: i32) -> (i32, i32) {
    %c0_i32 = arith.constant 0 : i32
    %c0_i32_0 = arith.constant 0 : i32
    %c0_i32_1 = arith.constant 0 : i32
    return %c0_i32, %c0_i32_0 : i32, i32
  }
  func.func @transform_9(%arg0: i32) -> (i32, i32) {
    %c0_i32 = arith.constant 0 : i32
    %c0_i32_0 = arith.constant 0 : i32
    %c0_i32_1 = arith.constant 0 : i32
    return %c0_i32, %c0_i32_0 : i32, i32
  }
  func.func @transform_10(%arg0: i32) -> (i32, i32) {
    %c0_i32 = arith.constant 0 : i32
    %c0_i32_0 = arith.constant 0 : i32
    %c0_i32_1 = arith.constant 0 : i32
    return %c0_i32, %c0_i32_0 : i32, i32
  }
  func.func @transform_11(%arg0: i32) -> (i32, i32) {
    %c0_i32 = arith.constant 0 : i32
    %c0_i32_0 = arith.constant 0 : i32
    %c0_i32_1 = arith.constant 0 : i32
    return %c0_i32, %c0_i32_0 : i32, i32
  }
  func.func @transform_12(%arg0: i32) -> (i32, i32) {
    %c0_i32 = arith.constant 0 : i32
    %c0_i32_0 = arith.constant 0 : i32
    %c0_i32_1 = arith.constant 0 : i32
    return %c0_i32, %c0_i32_0 : i32, i32
  }
  func.func @transform_13(%arg0: i32) -> (i32, i32, i32) {
    %c0_i32 = arith.constant 0 : i32
    %c0_i32_0 = arith.constant 0 : i32
    %c0_i32_1 = arith.constant 0 : i32
    return %arg0, %c0_i32, %c0_i32_0 : i32, i32, i32
  }
}

</mosaic_0001>

<bundles_post_ra>
// kernel: net_forward.1
= control target key start
LH: loop header
LB: loop body
LE: loop exit
PB: predicated region body
PF: predicated region fallthrough
CT: control target
= control target key end

     0   :  { %s21876_s0 = inlined_call_operand.vmem [shape: bf16[2,3,1160], index: 0, kind: input, shape index: {}]   ;;  %s21877_s1 = inlined_call_operand.vmem [shape: bf16[25,7,3], index: 1, kind: input, shape index: {}]   ;;  %s21878_s2 = inlined_call_operand.vmem [shape: f32[7,1], index: 2, kind: input, shape index: {}]   ;;  %s21879_s3 = inlined_call_operand.vmem [shape: bf16[16,32,7], index: 3, kind: input, shape index: {}]   ;;  %s21880_s4 = inlined_call_operand.vmem [shape: f32[32,1], index: 4, kind: input, shape index: {}]   ;;  %s21881_s5 = inlined_call_operand.vmem [shape: f32[1,984], index: 5, kind: input, shape index: {}]   ;;  %s21882_s6 = inlined_call_operand.vmem [shape: f32[841,56], index: 6, kind: input, shape index: {}]   ;;  %s21883_s7 = inlined_call_operand.vmem [shape: bf16[32,56,80], index: 7, kind: input, shape index: {}]   ;;  %s21884_s8 = inlined_call_operand.vmem [shape: f32[1,80], index: 8, kind: input, shape index: {}]   ;;  %s21885_s9 = inlined_call_operand.vmem [shape: f32[80,84], index: 9, kind: input, shape index: {}]   ;;  %s21886_s10 = inlined_call_operand.vmem [shape: f32[1,84], index: 10, kind: input, shape index: {}]   ;;  %s21887_s11 = inlined_call_operand.vmem [shape: f32[84,10], index: 11, kind: input, shape index: {}]   ;;  %s21888_s12 = inlined_call_operand.vmem [shape: f32[1,10], index: 12, kind: input, shape index: {}]   ;;  %s21889_s13 = inlined_call_operand.hbm [shape: f32[2,1,10], index: 13, kind: output, shape index: {}]  }
   0x1   :  { %21920 = sst [smem:[#allocation6_spill]] %s21876_s0 }
   0x2   :  { %21921 = sst [smem:[#allocation7_spill]] %s21877_s1 }
   0x3   :  { %21922 = sst [smem:[#allocation8_spill]] %s21878_s2 }
   0x4   :  { %21923 = sst [smem:[#allocation9_spill]] %s21879_s3 }
   0x5   :  { %18 = vsyncpa [#allocation4], 0 }
   0x6   :  { %20 = vsyncpa [#allocation4 + $0x1], 0  ;;  %s17677_s25 = smov 0   ;;  %s17679_s26 = smov 0  }
   0x7   :  { %s17681_s27 = smov 0   ;;  %s17683_s28 = smov 0  }
   0x8 LB: > { %s17698_s29 = sadd.s32 4294967295, %s17566_s28   ;;  %s14964_s30 = sadd.s32 4294967294, %s17566_s28   ;;  %s17566_s28 = sphi %s17683_s28, %s21970_s28   ;;  %s17562_s27 = sphi %s17681_s27, %s21969_s27   ;;  %s17558_s26 = sphi %s17679_s26, %s21968_s26   ;;  %s17554_s25 = sphi %s17677_s25, %s21967_s25  }
   0x9   : > { %s17702_s14 = sadd.s32 1, %s17566_s28   ;;  %s311_s15 = sadd.s32 1, %s17562_s27 }
   0xa   : > { %s308_s16 = ssub.s32 %s17566_s28, %s17702_s14  ;;  %p321_p0 = scmp.ne.s32.totalorder %s17562_s27, %s17558_s26 }
   0xb   : > { %p309_p1 = scmp.eq.s32.totalorder %s308_s16, 0  ;;  %p322_p2 = scmp.eq.s32.totalorder %s17698_s29, 1 }
   0xc   : > { %p327_p3 = scmp.ne.s32.totalorder %s17558_s26, %s17554_s25  ;;  %p328_p4 = scmp.eq.s32.totalorder %s14964_s30, 1 }
   0xd   : > { %s17713_s17 = scalar_select %p309_p1, %s17562_s27, %s311_s15  }
   0xe   : > { %p17715_p5 = por %p322_p2, %p321_p0  ;;  %p17719_p6 = por %p328_p4, %p327_p3 }
   0xf   : > { %p14967_p7 = scmp.ge.s32.totalorder %s17566_s28, 1  ;;  %p390_p8 = scmp.lt.s32.totalorder %s17566_s28, 3 }
  0x11   : > { %p391_p9 = pnand %p14967_p7, %p390_p8 }
  0x12   : > { %p433_p10 = scmp.lt.s32.totalorder (!%p391_p9), %s17698_s29, 1  ;;  %v451_v0 = vlaneseq (!%p391_p9)  ;;  %v17568_v1 = vmov (!%p391_p9), 1983009808   ;;  %s21926_s0 = sld [smem:[#allocation6_spill]] (!%p391_p9)  ;;  %v17570_v15 = vmov (!%p391_p9), 0   ;;  %vm21902_vm0 = vcmask (!%p391_p9), 1040384  }
  0x13   : > { %394 = sbr.rel (%p391_p9) target bundleno = 3287 (0xcd7), region = 72  ;;  %v449_v2 = vunpack.c.l.s4 (!%p391_p9), %v17568_v1  ;;  %s17569_s30 = smov (!%p391_p9), 127   ;;  %569 = vmatprep.mubr.bf16.mxu1 (!%p391_p9), %v17570_v15  ;;  %651 = vmatprep.mubr.bf16.mxu0 (!%p391_p9), %v17570_v15  ;;  %vm497_vm1 = vcmask (!%p391_p9), 1039360   ;;  %vm510_vm2 = vcmask (!%p391_p9), 1041408   ;;  %v17578_v24 = vmov (!%p391_p9), 65535  }
  0x14   : > { %v17727_v3 = vshrl.u32 (!%p391_p9), %v451_v0, 7  ;;  %17213 = vset.pattern.permute.xlu0 (!%p391_p9), %v17570_v15  ;;  %17214 = vset.pattern.permute.xlu1 (!%p391_p9), %v17570_v15  ;;  %s21906_s15 = smov (!%p391_p9), 126   ;;  %s17572_s16 = smov (!%p391_p9), 125   ;;  %v511_v25 = vsel (!%p391_p9), %vm21902_vm0, 4294967295, %v17578_v24  ;;  %vm505_vm3 = vcmask (!%p391_p9), 23552   ;;  %vm910_vm4 = vcmask (!%p391_p9), 1031168  }
  0x15   : > { %v450_v4 = vunpack.c.0.s8 (!%p391_p9), %v449_v2  ;;  %s17575_s22 = smov (!%p391_p9), 93   ;;  %s17576_s23 = smov (!%p391_p9), 92   ;;  %v17868_v27 = vsel (!%p391_p9), %vm510_vm2, %v511_v25, 0  ;;  %vm1135_vm5 = vcmask (!%p391_p9), 1022976   ;;  %vm1360_vm6 = vcmask (!%p391_p9), 1014784  }
  0x16   : > { %s21927_s1 = sld [smem:[#allocation7_spill]] (!%p391_p9)  ;;  %vm1595_vm7 = vcmask (!%p391_p9), 769024   ;;  %vm1823_vm8 = vcmask (!%p391_p9), 760832   ;;  %vm2051_vm9 = vcmask (!%p391_p9), 752640   ;;  %vm2279_vm10 = vcmask (!%p391_p9), 744448   ;;  %s21928_s2 = sld [smem:[#allocation8_spill]] (!%p391_p9) }
  0x17   : > { %v453_v5 = vsub.s32 (!%p391_p9), %v450_v4, %v17727_v3  ;;  %vm2507_vm11 = vcmask (!%p391_p9), 736256   ;;  %vm2735_vm12 = vcmask (!%p391_p9), 490496   ;;  %vm2963_vm13 = vcmask (!%p391_p9), 482304   ;;  %s21936_s3 = sld [smem:[#allocation9_spill]] (!%p391_p9) }
  0x18   : > { %vm3191_vm14 = vcmask (!%p391_p9), 474112   ;;  %vm3419_vm15 = vcmask (!%p391_p9), 465920   ;;  %vm3647_vm2 = vcmask (!%p391_p9), 457728  }
  0x1a   : > { %s434_s20 = scalar_select %p433_p10, %s17698_s29, 1 }
  0x1c   : > { %s17135_s21 = smul.u32 20, %s434_s20  ;;  %s21890_s20 = smov 124   ;;  %v14969_v39 = vld [vmem:[%s21927_s1 + $0x4] sm:$0xf]  ;;  %v17926_v58 = vld [vmem:[%s21927_s1] sm:$0xf] }
  0x1e   : > { %s17733_s24 = scalar_lea.vmem %s21926_s0, %s17135_s21  ;;  %s17574_s21 = smov 94  }
  0x1f   : > { %v440_v6 = vld [vmem:[%s17733_s24 + $0x8] sm:$0xff]  ;;  %v439_v7 = vld [vmem:[%s17733_s24] sm:$0xff]  ;;  %v17834_v19 = vld.sshfl [vmem:[%s17733_s24 + $0x10] sm:$0x33 pattern:$0x76325410] }
  0x20   : > { %v17737_v8 = vrot.slane %v440_v6, %v453_v5  ;;  %v17739_v9 = vrot.slane %v439_v7, %v453_v5  ;;  %v447_v10 = vcombine.high %v439_v7, %v439_v7  ;;  %v464_v11 = vcombine.high %v440_v6, %v440_v6 }
  0x22   : > { %489 = vrot.lane.b32.xlu0 %v17737_v8, %s17569_s30  ;;  %481 = vrot.lane.b32.xlu1 %v17739_v9, %s17569_s30  ;;  %v17745_v12 = vrot.slane %v447_v10, %v453_v5  ;;  %v17749_v13 = vcombine.high %v17737_v8, %v17737_v8  ;;  %v17753_v14 = vcombine.high %v17739_v9, %v17739_v9 }
  0x23   : > { %v17767_v17 = vrot.slane %v464_v11, %v453_v5  ;;  %v705_v48 = vand.u32 %v17868_v27, %v17739_v9  ;;  %v717_v59 = vand.u32 %v17868_v27, %v17737_v8 }
  0x24   : > { %v17765_v16 = vcombine.high %v17745_v12, %v17745_v12  ;;  %v708_v46 = vand.u32 %v17868_v27, %v17753_v14  ;;  %v720_v49 = vand.u32 %v17868_v27, %v17749_v13  ;;  %v711_v63 = vand.u32 %v17868_v27, %v17745_v12 }
  0x25   : > { %v17775_v18 = vcombine.high %v17767_v17, %v17767_v17 }
  0x26   : > { %491 = vrot.lane.b32.xlu1 %v17749_v13, %s17569_s30  ;;  %483 = vrot.lane.b32.xlu0 %v17753_v14, %s17569_s30  ;;  %v714_v54 = vand.u32 %v17868_v27, %v17765_v16 }
  0x27   : > { %v726_v0 = vand.u32 %v17868_v27, %v17775_v18 }
  0x2a   : > { %485 = vrot.lane.b32.xlu0 %v17745_v12, %s17569_s30  ;;  %487 = vrot.lane.b32.xlu1 %v17765_v16, %s17569_s30 }
  0x2e   : > { %493 = vrot.lane.b32.xlu0 %v17767_v17, %s17569_s30  ;;  %495 = vrot.lane.b32.xlu1 %v17775_v18, %s17569_s30 }
  0x32   : > { %896 = vrot.lane.b32.xlu0 %v17753_v14, %s21906_s15  ;;  %898 = vrot.lane.b32.xlu1 %v17745_v12, %s21906_s15 }
  0x36   : > { %900 = vrot.lane.b32.xlu0 %v17765_v16, %s21906_s15  ;;  %902 = vrot.lane.b32.xlu1 %v17737_v8, %s21906_s15 }
  0x3a   : > { %894 = vrot.lane.b32.xlu0 %v17739_v9, %s21906_s15  ;;  %904 = vrot.lane.b32.xlu1 %v17749_v13, %s21906_s15 }
  0x3e   : > { %906 = vrot.lane.b32.xlu0 %v17767_v17, %s21906_s15  ;;  %908 = vrot.lane.b32.xlu1 %v17775_v18, %s21906_s15 }
  0x42   : > { %1121 = vrot.lane.b32.xlu0 %v17753_v14, %s17572_s16  ;;  %1123 = vrot.lane.b32.xlu1 %v17745_v12, %s17572_s16 }
  0x46   : > { %1125 = vrot.lane.b32.xlu0 %v17765_v16, %s17572_s16  ;;  %1127 = vrot.lane.b32.xlu1 %v17737_v8, %s17572_s16 }
  0x4a   : > { %1119 = vrot.lane.b32.xlu0 %v17739_v9, %s17572_s16  ;;  %1129 = vrot.lane.b32.xlu1 %v17749_v13, %s17572_s16 }
  0x4e   : > { %1131 = vrot.lane.b32.xlu0 %v17767_v17, %s17572_s16  ;;  %1133 = vrot.lane.b32.xlu1 %v17775_v18, %s17572_s16  ;;  %s17577_s16 = smov 91  }
  0x52   : > { %1346 = vrot.lane.b32.xlu0 %v17753_v14, %s21890_s20  ;;  %1348 = vrot.lane.b32.xlu1 %v17745_v12, %s21890_s20 }
  0x56   : > { %1350 = vrot.lane.b32.xlu0 %v17765_v16, %s21890_s20  ;;  %1352 = vrot.lane.b32.xlu1 %v17737_v8, %s21890_s20 }
  0x5a   : > { %1344 = vrot.lane.b32.xlu0 %v17739_v9, %s21890_s20  ;;  %1354 = vrot.lane.b32.xlu1 %v17749_v13, %s21890_s20 }
  0x5e   : > { %1356 = vrot.lane.b32.xlu0 %v17767_v17, %s21890_s20  ;;  %1358 = vrot.lane.b32.xlu1 %v17775_v18, %s21890_s20  ;;  %s17591_s20 = smov 119  }
  0x62   : > { %1579 = vrot.lane.b32.xlu0 %v17753_v14, %s17574_s21  ;;  %1581 = vrot.lane.b32.xlu1 %v17745_v12, %s17574_s21 }
  0x66   : > { %1583 = vrot.lane.b32.xlu0 %v17765_v16, %s17574_s21  ;;  %1585 = vrot.lane.b32.xlu1 %v17737_v8, %s17574_s21 }
  0x6a   : > { %1577 = vrot.lane.b32.xlu0 %v17739_v9, %s17574_s21  ;;  %1587 = vrot.lane.b32.xlu1 %v17749_v13, %s17574_s21 }
  0x6e   : > { %1589 = vrot.lane.b32.xlu0 %v17767_v17, %s17574_s21  ;;  %1591 = vrot.lane.b32.xlu1 %v17775_v18, %s17574_s21 }
  0x72   : > { %1593 = vrot.lane.b32.xlu0 %v17834_v19, %s17574_s21  ;;  %1807 = vrot.lane.b32.xlu1 %v17753_v14, %s17575_s22 }
  0x76   : > { %1809 = vrot.lane.b32.xlu0 %v17745_v12, %s17575_s22  ;;  %1811 = vrot.lane.b32.xlu1 %v17765_v16, %s17575_s22 }
  0x7a   : > { %1813 = vrot.lane.b32.xlu0 %v17737_v8, %s17575_s22  ;;  %1805 = vrot.lane.b32.xlu1 %v17739_v9, %s17575_s22 }
  0x7e   : > { %1815 = vrot.lane.b32.xlu0 %v17749_v13, %s17575_s22  ;;  %1817 = vrot.lane.b32.xlu1 %v17767_v17, %s17575_s22 }
  0x82   : > { %1819 = vrot.lane.b32.xlu0 %v17775_v18, %s17575_s22  ;;  %1821 = vrot.lane.b32.xlu1 %v17834_v19, %s17575_s22  ;;  %s17579_s22 = smov 90  }
  0x86   : > { %2035 = vrot.lane.b32.xlu0 %v17753_v14, %s17576_s23  ;;  %2037 = vrot.lane.b32.xlu1 %v17745_v12, %s17576_s23 }
  0x8a   : > { %2039 = vrot.lane.b32.xlu0 %v17765_v16, %s17576_s23  ;;  %2041 = vrot.lane.b32.xlu1 %v17737_v8, %s17576_s23 }
  0x8e   : > { %2033 = vrot.lane.b32.xlu0 %v17739_v9, %s17576_s23  ;;  %2043 = vrot.lane.b32.xlu1 %v17749_v13, %s17576_s23 }
  0x92   : > { %2045 = vrot.lane.b32.xlu0 %v17767_v17, %s17576_s23  ;;  %2047 = vrot.lane.b32.xlu1 %v17775_v18, %s17576_s23 }
  0x94   : > { %v490_v20 = vpop.permute.xlu0 %489  ;;  %v482_v21 = vpop.permute.xlu1 %481 }
  0x96   : > { %2049 = vrot.lane.b32.xlu0 %v17834_v19, %s17576_s23  ;;  %2263 = vrot.lane.b32.xlu1 %v17753_v14, %s17577_s16  ;;  %s17581_s23 = smov 59  }
  0x98   : > { %v492_v22 = vpop.permute.xlu1 %491  ;;  %v484_v23 = vpop.permute.xlu0 %483 }
  0x99   : > { %v498_v29 = vsel %vm497_vm1, %v482_v21, %v484_v23  ;;  %v502_v37 = vsel %vm497_vm1, %v490_v20, %v492_v22  ;;  %v723_v21 = vand.u32 %v17868_v27, %v17767_v17 }
  0x9a   : > { %2265 = vrot.lane.b32.xlu0 %v17745_v12, %s17577_s16  ;;  %2267 = vrot.lane.b32.xlu1 %v17765_v16, %s17577_s16  ;;  %v514_v33 = vand.u32 %v17868_v27, %v498_v29  ;;  %v526_v43 = vand.u32 %v17868_v27, %v502_v37  ;;  %v17986_v29 = vld [vmem:[%s21927_s1 + $0x8] sm:$0xf] }
  0x9c   : > { %v486_v26 = vpop.permute.xlu0 %485  ;;  %v488_v28 = vpop.permute.xlu1 %487 }
  0x9d   : > { %v499_v30 = vsel %vm497_vm1, %v484_v23, %v486_v26  ;;  %v501_v31 = vsel %vm497_vm1, %v488_v28, %v490_v20  ;;  %v500_v34 = vsel %vm497_vm1, %v486_v26, %v488_v28 }
  0x9e   : > { %2269 = vrot.lane.b32.xlu0 %v17737_v8, %s17577_s16  ;;  %2261 = vrot.lane.b32.xlu1 %v17739_v9, %s17577_s16  ;;  %v517_v32 = vand.u32 %v17868_v27, %v499_v30  ;;  %v523_v38 = vand.u32 %v17868_v27, %v501_v31  ;;  %v520_v42 = vand.u32 %v17868_v27, %v500_v34 }
  0xa0   : > { %537 = vmatprep.subr.bf16.mxu1 %v517_v32  ;;  %v494_v35 = vpop.permute.xlu0 %493  ;;  %v496_v36 = vpop.permute.xlu1 %495 }
  0xa1   : > { %538 = vmatpush1.bf16.msra.mxu1 %v514_v33  ;;  %v503_v40 = vsel %vm497_vm1, %v492_v22, %v494_v35  ;;  %v535_v47 = vand.u32 %v17868_v27, %v496_v36  ;;  %v504_v50 = vsel %vm497_vm1, %v494_v35, %v496_v36 }
  0xa2   : > { %2271 = vrot.lane.b32.xlu0 %v17749_v13, %s17577_s16  ;;  %2273 = vrot.lane.b32.xlu1 %v17767_v17, %s17577_s16  ;;  %v529_v41 = vand.u32 %v17868_v27, %v503_v40  ;;  %v532_v53 = vand.u32 %v17868_v27, %v504_v50 }
  0xa3   : > { %578 = vmatprep.subr.bf16.mxu1 %v523_v38 }
  0xa4   : > { %14970 = vmatmul.mubr.msk.bf16.vlgmr.msra.gmra.mrb[0].mxu1 %vm505_vm3, %v14969_v39  ;;  %619 = vmatprep.subr.bf16.mxu0 %v529_v41  ;;  %v897_v44 = vpop.permute.xlu0 %896  ;;  %v17894_v45 = vpop.permute.xlu1 %898 }
  0xa5   : > { %579 = vmatpush1.bf16.msra.mxu1 %v520_v42  ;;  %620 = vmatpush1.bf16.msra.mxu0 %v526_v43  ;;  %v912_v57 = vsel %vm910_vm4, %v897_v44, %v17894_v45 }
  0xa6   : > { %2275 = vrot.lane.b32.xlu0 %v17775_v18, %s17577_s16  ;;  %2277 = vrot.lane.b32.xlu1 %v17834_v19, %s17577_s16  ;;  %v925_v62 = vand.u32 %v912_v57, %v17868_v27  ;;  %s21892_s16 = smov 60  }
  0xa7   : > { %660 = vmatprep.subr.bf16.mxu1 %v535_v47  ;;  %610 = vmatprep.mubr.bf16.mxu1 %v17570_v15 }
  0xa8   : > { %14972 = vmatmul.mubr.msk.bf16.vlgmr.msra.gmra.mrb[0].mxu0 %vm505_vm3, %v14969_v39  ;;  %v17910_v51 = vpop.permute.xlu0 %900  ;;  %v903_v52 = vpop.permute.xlu1 %902  ;;  %728 = vmatprep.subr.bf16.mxu0 %v708_v46 }
  0xa9   : > { %729 = vmatpush1.bf16.msra.mxu0 %v705_v48  ;;  %760 = vmatprep.mubr.bf16.mxu0 %v17570_v15  ;;  %v914_v20 = vsel %vm910_vm4, %v17910_v51, %v903_v52  ;;  %v913_v31 = vsel %vm910_vm4, %v17894_v45, %v17910_v51 }
  0xaa   : > { %2491 = vrot.lane.b32.xlu0 %v17753_v14, %s17579_s22  ;;  %2493 = vrot.lane.b32.xlu1 %v17745_v12, %s17579_s22  ;;  %v931_v26 = vand.u32 %v914_v20, %v17868_v27  ;;  %v928_v35 = vand.u32 %v913_v31, %v17868_v27 }
  0xab   : > { %810 = vmatprep.subr.bf16.mxu0 %v720_v49 }
  0xac   : > { %v895_v55 = vpop.permute.xlu0 %894  ;;  %14971 = vmatmul.mubr.msk.bf16.vlgmr.msra.gmra.mrb[4].mxu1 %vm505_vm3, %v14969_v39  ;;  %v905_v56 = vpop.permute.xlu1 %904 }
  0xad   : > { %661 = vmatpush1.bf16.msra.mxu1 %v532_v53  ;;  %692 = vmatprep.mubr.bf16.mxu1 %v17570_v15  ;;  %v911_v1 = vsel %vm910_vm4, %v895_v55, %v897_v44  ;;  %v915_v22 = vsel %vm910_vm4, %v903_v52, %v905_v56  ;;  %v18050_v53 = vld [vmem:[%s21927_s1 + $0xc] sm:$0xf] }
  0xae   : > { %2495 = vrot.lane.b32.xlu0 %v17765_v16, %s17579_s22  ;;  %2497 = vrot.lane.b32.xlu1 %v17737_v8, %s17579_s22  ;;  %v922_v6 = vand.u32 %v911_v1, %v17868_v27  ;;  %v934_v30 = vand.u32 %v915_v22, %v17868_v27 }
  0xaf   : > { %769 = vmatprep.subr.bf16.mxu1 %v714_v54 }
  0xb0   : > { %14974 = vmatmul.mubr.msk.bf16.vlgmr.msra.gmra.mrb[4].mxu0 %vm505_vm3, %v17926_v58  ;;  %v17937_v60 = vpop.permute.xlu0 %906  ;;  %v17939_v61 = vpop.permute.xlu1 %908 }
  0xb1   : > { %811 = vmatpush1.bf16.msra.mxu0 %v717_v59  ;;  %842 = vmatprep.mubr.bf16.mxu0 %v17570_v15  ;;  %v916_v5 = vsel %vm910_vm4, %v905_v56, %v17937_v60  ;;  %v943_v36 = vand.u32 %v17939_v61, %v17868_v27  ;;  %v917_v42 = vsel %vm910_vm4, %v17937_v60, %v17939_v61 }
  0xb2   : > { %945 = vmatprep.subr.bf16.mxu0 %v925_v62  ;;  %2489 = vrot.lane.b32.xlu0 %v17739_v9, %s17579_s22  ;;  %v937_v11 = vand.u32 %v916_v5, %v17868_v27  ;;  %v940_v47 = vand.u32 %v917_v42, %v17868_v27 }
  0xb3   : > { %2499 = vrot.lane.b32.xlu1 %v17749_v13, %s17579_s22 }
  0xb4   : > { %v1122_v2 = vpop.permute.xlu0 %1121  ;;  %14973 = vmatmul.mubr.msk.bf16.vlgmr.msra.gmra.mrb[8].mxu1 %vm505_vm3, %v14969_v39  ;;  %v17953_v4 = vpop.permute.xlu1 %1123 }
  0xb5   : > { %770 = vmatpush1.bf16.msra.mxu1 %v711_v63  ;;  %801 = vmatprep.mubr.bf16.mxu1 %v17570_v15  ;;  %v1137_v28 = vsel %vm1135_vm5, %v1122_v2, %v17953_v4 }
  0xb6   : > { %2501 = vrot.lane.b32.xlu0 %v17767_v17, %s17579_s22  ;;  %851 = vmatprep.subr.bf16.mxu1 %v726_v0  ;;  %v1150_v34 = vand.u32 %v1137_v28, %v17868_v27 }
  0xb7   : > { %2503 = vrot.lane.b32.xlu1 %v17775_v18, %s17579_s22 }
  0xb8   : > { %14976 = vmatmul.mubr.msk.bf16.vlgmr.msra.gmra.mrb[8].mxu0 %vm505_vm3, %v17926_v58  ;;  %v17965_v7 = vpop.permute.xlu0 %1125  ;;  %v1128_v10 = vpop.permute.xlu1 %1127 }
  0xb9   : > { %946 = vmatpush1.bf16.msra.mxu0 %v922_v6  ;;  %977 = vmatprep.mubr.bf16.mxu0 %v17570_v15  ;;  %v1139_v46 = vsel %vm1135_vm5, %v17965_v7, %v1128_v10  ;;  %v1138_v55 = vsel %vm1135_vm5, %v17953_v4, %v17965_v7 }
  0xba   : > { %1027 = vmatprep.subr.bf16.mxu0 %v937_v11  ;;  %2505 = vrot.lane.b32.xlu0 %v17834_v19, %s17579_s22  ;;  %v1156_v51 = vand.u32 %v1139_v46, %v17868_v27  ;;  %v1153_v59 = vand.u32 %v1138_v55, %v17868_v27  ;;  %s17583_s22 = smov 57  }
  0xbb   : > { %2719 = vrot.lane.b32.xlu1 %v17753_v14, %s21892_s16 }
  0xbc   : > { %v1120_v23 = vpop.permute.xlu0 %1119  ;;  %v1130_v25 = vpop.permute.xlu1 %1129  ;;  %14975 = vmatmul.mubr.msk.bf16.vlgmr.msra.gmra.mrb[12].mxu1 %vm505_vm3, %v17926_v58 }
  0xbd   : > { %852 = vmatpush1.bf16.msra.mxu1 %v723_v21  ;;  %883 = vmatprep.mubr.bf16.mxu1 %v17570_v15  ;;  %v1136_v37 = vsel %vm1135_vm5, %v1120_v23, %v1122_v2  ;;  %v1140_v48 = vsel %vm1135_vm5, %v1128_v10, %v1130_v25 }
  0xbe   : > { %986 = vmatprep.subr.bf16.mxu1 %v931_v26  ;;  %2721 = vrot.lane.b32.xlu0 %v17745_v12, %s21892_s16  ;;  %v1147_v41 = vand.u32 %v1136_v37, %v17868_v27  ;;  %v1159_v54 = vand.u32 %v1140_v48, %v17868_v27 }
  0xbf   : > { %2723 = vrot.lane.b32.xlu1 %v17765_v16, %s21892_s16 }
  0xc0   : > { %v17997_v32 = vpop.permute.xlu0 %1131  ;;  %14979 = vmatmul.mubr.msk.bf16.vlgmr.msra.gmra.mrb[12].mxu0 %vm505_vm3, %v17986_v29  ;;  %v18001_v33 = vpop.permute.xlu1 %1133 }
  0xc1   : > { %1028 = vmatpush1.bf16.msra.mxu0 %v934_v30  ;;  %1059 = vmatprep.mubr.bf16.mxu0 %v17570_v15  ;;  %v1141_v40 = vsel %vm1135_vm5, %v1130_v25, %v17997_v32  ;;  %v1168_v60 = vand.u32 %v18001_v33, %v17868_v27  ;;  %v1142_v2 = vsel %vm1135_vm5, %v17997_v32, %v18001_v33  ;;  %v18114_v25 = vld [vmem:[%s21927_s1 + $0x10] sm:$0xf]  ;;  %vm3875_vm5 = vcmask 211968  }
  0xc2   : > { %1170 = vmatprep.subr.bf16.mxu0 %v1150_v34  ;;  %2725 = vrot.lane.b32.xlu0 %v17737_v8, %s21892_s16  ;;  %v1162_v45 = vand.u32 %v1141_v40, %v17868_v27  ;;  %v1165_v10 = vand.u32 %v1142_v2, %v17868_v27 }
  0xc3   : > { %2717 = vrot.lane.b32.xlu1 %v17739_v9, %s21892_s16 }
  0xc4   : > { %v1347_v38 = vpop.permute.xlu0 %1346  ;;  %v18013_v39 = vpop.permute.xlu1 %1348  ;;  %14977 = vmatmul.mubr.msk.bf16.vlgmr.msra.gmra.mrb[16].mxu1 %vm505_vm3, %v17926_v58 }
  0xc5   : > { %987 = vmatpush1.bf16.msra.mxu1 %v928_v35  ;;  %1018 = vmatprep.mubr.bf16.mxu1 %v17570_v15  ;;  %v1362_v52 = vsel %vm1360_vm6, %v1347_v38, %v18013_v39 }
  0xc6   : > { %1068 = vmatprep.subr.bf16.mxu1 %v943_v36  ;;  %2727 = vrot.lane.b32.xlu0 %v17749_v13, %s21892_s16  ;;  %v1375_v58 = vand.u32 %v1362_v52, %v17868_v27 }
  0xc7   : > { %2729 = vrot.lane.b32.xlu1 %v17767_v17, %s21892_s16 }
  0xc8   : > { %v18028_v43 = vpop.permute.xlu0 %1350  ;;  %14981 = vmatmul.mubr.msk.bf16.vlgmr.msra.gmra.mrb[16].mxu0 %vm505_vm3, %v17986_v29  ;;  %v1353_v44 = vpop.permute.xlu1 %1352 }
  0xc9   : > { %1171 = vmatpush1.bf16.msra.mxu0 %v1147_v41  ;;  %1202 = vmatprep.mubr.bf16.mxu0 %v17570_v15  ;;  %v1364_v7 = vsel %vm1360_vm6, %v18028_v43, %v1353_v44  ;;  %v1363_v28 = vsel %vm1360_vm6, %v18013_v39, %v18028_v43 }
  0xca   : > { %1252 = vmatprep.subr.bf16.mxu0 %v1162_v45  ;;  %2731 = vrot.lane.b32.xlu0 %v17775_v18, %s21892_s16  ;;  %v1381_v22 = vand.u32 %v1364_v7, %v17868_v27  ;;  %v1378_v32 = vand.u32 %v1363_v28, %v17868_v27 }
  0xcb   : > { %2733 = vrot.lane.b32.xlu1 %v17834_v19, %s21892_s16  ;;  %s21896_s16 = smov 58  }
  0xcc   : > { %v1345_v49 = vpop.permute.xlu0 %1344  ;;  %v1355_v50 = vpop.permute.xlu1 %1354  ;;  %14980 = vmatmul.mubr.msk.bf16.vlgmr.msra.gmra.mrb[20].mxu1 %vm505_vm3, %v17986_v29 }
  0xcd   : > { %1069 = vmatpush1.bf16.msra.mxu1 %v940_v47  ;;  %1100 = vmatprep.mubr.bf16.mxu1 %v17570_v15  ;;  %v1361_v61 = vsel %vm1360_vm6, %v1345_v49, %v1347_v38  ;;  %v1365_v11 = vsel %vm1360_vm6, %v1353_v44, %v1355_v50 }
  0xce   : > { %1211 = vmatprep.subr.bf16.mxu1 %v1156_v51  ;;  %2947 = vrot.lane.b32.xlu0 %v17753_v14, %s17581_s23  ;;  %v1372_v1 = vand.u32 %v1361_v61, %v17868_v27  ;;  %v1384_v26 = vand.u32 %v1365_v11, %v17868_v27 }
  0xcf   : > { %2949 = vrot.lane.b32.xlu1 %v17745_v12, %s17581_s23 }
  0xd0   : > { %v18061_v56 = vpop.permute.xlu0 %1356  ;;  %14984 = vmatmul.mubr.msk.bf16.vlgmr.msra.gmra.mrb[20].mxu0 %vm505_vm3, %v18050_v53  ;;  %v18065_v57 = vpop.permute.xlu1 %1358 }
  0xd1   : > { %1253 = vmatpush1.bf16.msra.mxu0 %v1159_v54  ;;  %1284 = vmatprep.mubr.bf16.mxu0 %v17570_v15  ;;  %v1366_v0 = vsel %vm1360_vm6, %v1355_v50, %v18061_v56  ;;  %v1393_v33 = vand.u32 %v18065_v57, %v17868_v27  ;;  %v1367_v39 = vsel %vm1360_vm6, %v18061_v56, %v18065_v57  ;;  %v18178_v50 = vld [vmem:[%s21927_s1 + $0x14] sm:$0xf] }
  0xd2   : > { %1395 = vmatprep.subr.bf16.mxu0 %v1375_v58  ;;  %2951 = vrot.lane.b32.xlu0 %v17765_v16, %s17581_s23  ;;  %v1387_v6 = vand.u32 %v1366_v0, %v17868_v27  ;;  %v1390_v44 = vand.u32 %v1367_v39, %v17868_v27 }
  0xd3   : > { %2953 = vrot.lane.b32.xlu1 %v17737_v8, %s17581_s23 }
  0xd4   : > { %v1580_v62 = vpop.permute.xlu0 %1579  ;;  %v18077_v63 = vpop.permute.xlu1 %1581  ;;  %14982 = vmatmul.mubr.msk.bf16.vlgmr.msra.gmra.mrb[24].mxu1 %vm505_vm3, %v17986_v29 }
  0xd5   : > { %1212 = vmatpush1.bf16.msra.mxu1 %v1153_v59  ;;  %1243 = vmatprep.mubr.bf16.mxu1 %v17570_v15  ;;  %v1597_v23 = vsel %vm1595_vm7, %v1580_v62, %v18077_v63 }
  0xd6   : > { %1293 = vmatprep.subr.bf16.mxu1 %v1168_v60  ;;  %2945 = vrot.lane.b32.xlu0 %v17739_v9, %s17581_s23  ;;  %v1611_v31 = vand.u32 %v1597_v23, %v17868_v27 }
  0xd7   : > { %2955 = vrot.lane.b32.xlu1 %v17749_v13, %s17581_s23 }
  0xd8   : > { %v18092_v4 = vpop.permute.xlu0 %1583  ;;  %14986 = vmatmul.mubr.msk.bf16.vlgmr.msra.gmra.mrb[24].mxu0 %vm505_vm3, %v18050_v53  ;;  %v1586_v5 = vpop.permute.xlu1 %1585 }
  0xd9   : > { %1396 = vmatpush1.bf16.msra.mxu0 %v1372_v1  ;;  %1427 = vmatprep.mubr.bf16.mxu0 %v17570_v15  ;;  %v1599_v43 = vsel %vm1595_vm7, %v18092_v4, %v1586_v5  ;;  %v1598_v52 = vsel %vm1595_vm7, %v18077_v63, %v18092_v4 }
  0xda   : > { %1477 = vmatprep.subr.bf16.mxu0 %v1387_v6  ;;  %2957 = vrot.lane.b32.xlu0 %v17767_v17, %s17581_s23  ;;  %v1617_v48 = vand.u32 %v1599_v43, %v17868_v27  ;;  %v1614_v57 = vand.u32 %v1598_v52, %v17868_v27 }
  0xdb   : > { %2959 = vrot.lane.b32.xlu1 %v17775_v18, %s17581_s23 }
  0xdc   : > { %v1578_v20 = vpop.permute.xlu0 %1577  ;;  %v1588_v21 = vpop.permute.xlu1 %1587  ;;  %14985 = vmatmul.mubr.msk.bf16.vlgmr.msra.gmra.mrb[28].mxu1 %vm505_vm3, %v18050_v53 }
  0xdd   : > { %1294 = vmatpush1.bf16.msra.mxu1 %v1165_v10  ;;  %1325 = vmatprep.mubr.bf16.mxu1 %v17570_v15  ;;  %v1596_v34 = vsel %vm1595_vm7, %v1578_v20, %v1580_v62  ;;  %v1600_v45 = vsel %vm1595_vm7, %v1586_v5, %v1588_v21 }
  0xde   : > { %1436 = vmatprep.subr.bf16.mxu1 %v1381_v22  ;;  %2961 = vrot.lane.b32.xlu0 %v17834_v19, %s17581_s23  ;;  %v1608_v38 = vand.u32 %v1596_v34, %v17868_v27  ;;  %v1620_v51 = vand.u32 %v1600_v45, %v17868_v27  ;;  %v18243_v22 = vld [vmem:[%s21927_s1 + $0x18] sm:$0xf]  ;;  %s21894_s23 = smov 56  }
  0xdf   : > { %3175 = vrot.lane.b32.xlu1 %v17753_v14, %s21896_s16 }
  0xe0   : > { %v18125_v29 = vpop.permute.xlu0 %1589  ;;  %14989 = vmatmul.mubr.msk.bf16.vlgmr.msra.gmra.mrb[28].mxu0 %vm505_vm3, %v18114_v25  ;;  %v18129_v30 = vpop.permute.xlu1 %1591 }
  0xe1   : > { %1478 = vmatpush1.bf16.msra.mxu0 %v1384_v26  ;;  %1509 = vmatprep.mubr.bf16.mxu0 %v17570_v15  ;;  %v1601_v37 = vsel %vm1595_vm7, %v1588_v21, %v18125_v29  ;;  %v1602_v0 = vsel %vm1595_vm7, %v18125_v29, %v18129_v30 }
  0xe2   : > { %1631 = vmatprep.subr.bf16.mxu0 %v1611_v31  ;;  %3177 = vrot.lane.b32.xlu0 %v17745_v12, %s21896_s16  ;;  %v1623_v42 = vand.u32 %v1601_v37, %v17868_v27  ;;  %v1626_v6 = vand.u32 %v1602_v0, %v17868_v27 }
  0xe3   : > { %3179 = vrot.lane.b32.xlu1 %v17765_v16, %s21896_s16 }
  0xe4   : > { %v1594_v35 = vpop.permute.xlu0 %1593  ;;  %v1808_v36 = vpop.permute.xlu1 %1807  ;;  %14987 = vmatmul.mubr.msk.bf16.vlgmr.msra.gmra.mrb[32].mxu1 %vm505_vm3, %v18050_v53 }
  0xe5   : > { %1437 = vmatpush1.bf16.msra.mxu1 %v1378_v32  ;;  %1468 = vmatprep.mubr.bf16.mxu1 %v17570_v15  ;;  %v1603_v56 = vsel %vm1595_vm7, %v18129_v30, %v1594_v35 }
  0xe6   : > { %1518 = vmatprep.subr.bf16.mxu1 %v1393_v33  ;;  %3181 = vrot.lane.b32.xlu0 %v17737_v8, %s21896_s16  ;;  %v1629_v58 = vand.u32 %v1603_v56, %v17868_v27 }
  0xe7   : > { %3173 = vrot.lane.b32.xlu1 %v17739_v9, %s21896_s16 }
  0xe8   : > { %v18154_v40 = vpop.permute.xlu0 %1809  ;;  %14991 = vmatmul.mubr.msk.bf16.vlgmr.msra.gmra.mrb[32].mxu0 %vm505_vm3, %v18114_v25  ;;  %v18158_v41 = vpop.permute.xlu1 %1811 }
  0xe9   : > { %1632 = vmatpush1.bf16.msra.mxu0 %v1608_v38  ;;  %1663 = vmatprep.mubr.bf16.mxu0 %v17570_v15  ;;  %v1825_v49 = vsel %vm1823_vm8, %v1808_v36, %v18154_v40 }
  0xea   : > { %1713 = vmatprep.subr.bf16.mxu0 %v1623_v42  ;;  %3183 = vrot.lane.b32.xlu0 %v17749_v13, %s21896_s16  ;;  %v1839_v55 = vand.u32 %v1825_v49, %v17868_v27  ;;  %v18306_v49 = vld [vmem:[%s21927_s1 + $0x1c] sm:$0xf] }
  0xeb   : > { %3185 = vrot.lane.b32.xlu1 %v17767_v17, %s21896_s16 }
  0xec   : > { %v1814_v46 = vpop.permute.xlu0 %1813  ;;  %v1806_v47 = vpop.permute.xlu1 %1805  ;;  %14990 = vmatmul.mubr.msk.bf16.vlgmr.msra.gmra.mrb[36].mxu1 %vm505_vm3, %v18114_v25 }
  0xed   : > { %1519 = vmatpush1.bf16.msra.mxu1 %v1390_v44  ;;  %1550 = vmatprep.mubr.bf16.mxu1 %v17570_v15  ;;  %v1824_v59 = vsel %vm1823_vm8, %v1806_v47, %v1808_v36  ;;  %v1827_v5 = vsel %vm1823_vm8, %v18158_v41, %v1814_v46 }
  0xee   : > { %1672 = vmatprep.subr.bf16.mxu1 %v1617_v48  ;;  %3187 = vrot.lane.b32.xlu0 %v17775_v18, %s21896_s16  ;;  %v1836_v63 = vand.u32 %v1824_v59, %v17868_v27  ;;  %v1845_v20 = vand.u32 %v1827_v5, %v17868_v27 }
  0xef   : > { %3189 = vrot.lane.b32.xlu1 %v17834_v19, %s21896_s16  ;;  %s21898_s16 = smov 118  }
  0xf0   : > { %v1816_v53 = vpop.permute.xlu0 %1815  ;;  %14995 = vmatmul.mubr.msk.bf16.vlgmr.msra.gmra.mrb[36].mxu0 %vm505_vm3, %v18178_v50  ;;  %v18191_v54 = vpop.permute.xlu1 %1817 }
  0xf1   : > { %1714 = vmatpush1.bf16.msra.mxu0 %v1620_v51  ;;  %1745 = vmatprep.mubr.bf16.mxu0 %v17570_v15  ;;  %v1829_v62 = vsel %vm1823_vm8, %v1816_v53, %v18191_v54  ;;  %v1828_v7 = vsel %vm1823_vm8, %v1814_v46, %v1816_v53 }
  0xf2   : > { %1859 = vmatprep.subr.bf16.mxu0 %v1839_v55  ;;  %3403 = vrot.lane.b32.xlu0 %v17753_v14, %s17583_s22  ;;  %v1851_v4 = vand.u32 %v1829_v62, %v17868_v27  ;;  %v1848_v23 = vand.u32 %v1828_v7, %v17868_v27 }
  0xf3   : > { %3405 = vrot.lane.b32.xlu1 %v17745_v12, %s17583_s22 }
  0xf4   : > { %v18204_v60 = vpop.permute.xlu0 %1819  ;;  %v1822_v61 = vpop.permute.xlu1 %1821  ;;  %14992 = vmatmul.mubr.msk.bf16.vlgmr.msra.gmra.mrb[40].mxu1 %vm505_vm3, %v18114_v25  ;;  %v1826_v25 = vsel %vm1823_vm8, %v18154_v40, %v18158_v41 }
  0xf5   : > { %1673 = vmatpush1.bf16.msra.mxu1 %v1614_v57  ;;  %1704 = vmatprep.mubr.bf16.mxu1 %v17570_v15  ;;  %v1831_v30 = vsel %vm1823_vm8, %v18204_v60, %v1822_v61  ;;  %v1842_v31 = vand.u32 %v1826_v25, %v17868_v27  ;;  %v1830_v39 = vsel %vm1823_vm8, %v18191_v54, %v18204_v60  ;;  %vm4103_vm8 = vcmask 203776  }
  0xf6   : > { %1754 = vmatprep.subr.bf16.mxu1 %v1629_v58  ;;  %3407 = vrot.lane.b32.xlu0 %v17765_v16, %s17583_s22  ;;  %v1857_v32 = vand.u32 %v1831_v30, %v17868_v27  ;;  %v1854_v43 = vand.u32 %v1830_v39, %v17868_v27 }
  0xf7   : > { %3409 = vrot.lane.b32.xlu1 %v17737_v8, %s17583_s22 }
  0xf8   : > { %v2036_v1 = vpop.permute.xlu0 %2035  ;;  %14997 = vmatmul.mubr.msk.bf16.vlgmr.msra.gmra.mrb[40].mxu0 %vm505_vm3, %v18178_v50  ;;  %v18221_v2 = vpop.permute.xlu1 %2037 }
  0xf9   : > { %1860 = vmatpush1.bf16.msra.mxu0 %v1836_v63  ;;  %1891 = vmatprep.mubr.bf16.mxu0 %v17570_v15  ;;  %v2053_v21 = vsel %vm2051_vm9, %v2036_v1, %v18221_v2 }
  0xfa   : > { %1941 = vmatprep.subr.bf16.mxu0 %v1851_v4  ;;  %3401 = vrot.lane.b32.xlu0 %v17739_v9, %s17583_s22  ;;  %v2067_v29 = vand.u32 %v2053_v21, %v17868_v27 }
  0xfb   : > { %3411 = vrot.lane.b32.xlu1 %v17749_v13, %s17583_s22 }
  0xfc   : > { %v18233_v10 = vpop.permute.xlu0 %2039  ;;  %v2042_v11 = vpop.permute.xlu1 %2041  ;;  %14996 = vmatmul.mubr.msk.bf16.vlgmr.msra.gmra.mrb[44].mxu1 %vm505_vm3, %v18178_v50 }
  0xfd   : > { %1755 = vmatpush1.bf16.msra.mxu1 %v1626_v6  ;;  %1786 = vmatprep.mubr.bf16.mxu1 %v17570_v15  ;;  %v2055_v42 = vsel %vm2051_vm9, %v18233_v10, %v2042_v11  ;;  %v2054_v52 = vsel %vm2051_vm9, %v18221_v2, %v18233_v10 }
  0xfe   : > { %1900 = vmatprep.subr.bf16.mxu1 %v1845_v20  ;;  %3413 = vrot.lane.b32.xlu0 %v17767_v17, %s17583_s22  ;;  %v2073_v47 = vand.u32 %v2055_v42, %v17868_v27  ;;  %v2070_v56 = vand.u32 %v2054_v52, %v17868_v27  ;;  %v18362_v20 = vld [vmem:[%s21927_s1 + $0x20] sm:$0xf] }
  0xff   : > { %3415 = vrot.lane.b32.xlu1 %v17775_v18, %s17583_s22 }
 0x100   : > { %v2034_v26 = vpop.permute.xlu0 %2033  ;;  %15000 = vmatmul.mubr.msk.bf16.vlgmr.msra.gmra.mrb[44].mxu0 %vm505_vm3, %v18243_v22  ;;  %v2044_v28 = vpop.permute.xlu1 %2043 }
 0x101   : > { %1942 = vmatpush1.bf16.msra.mxu0 %v1848_v23  ;;  %1973 = vmatprep.mubr.bf16.mxu0 %v17570_v15  ;;  %v2052_v33 = vsel %vm2051_vm9, %v2034_v26, %v2036_v1  ;;  %v2056_v44 = vsel %vm2051_vm9, %v2042_v11, %v2044_v28 }
 0x102   : > { %2087 = vmatprep.subr.bf16.mxu0 %v2067_v29  ;;  %3417 = vrot.lane.b32.xlu0 %v17834_v19, %s17583_s22  ;;  %v2064_v38 = vand.u32 %v2052_v33, %v17868_v27  ;;  %v2076_v51 = vand.u32 %v2056_v44, %v17868_v27  ;;  %s17585_s22 = smov 26  }
 0x103   : > { %3631 = vrot.lane.b32.xlu1 %v17753_v14, %s21894_s23 }
 0x104   : > { %v18267_v34 = vpop.permute.xlu0 %2045  ;;  %v2048_v35 = vpop.permute.xlu1 %2047  ;;  %14998 = vmatmul.mubr.msk.bf16.vlgmr.msra.gmra.mrb[48].mxu1 %vm505_vm3, %v18178_v50 }
 0x105   : > { %v2057_v36 = vsel %vm2051_vm9, %v2044_v28, %v18267_v34  ;;  %1901 = vmatpush1.bf16.msra.mxu1 %v1842_v31  ;;  %1932 = vmatprep.mubr.bf16.mxu1 %v17570_v15  ;;  %v2058_v63 = vsel %vm2051_vm9, %v18267_v34, %v2048_v35 }
 0x106   : > { %1982 = vmatprep.subr.bf16.mxu1 %v1857_v32  ;;  %3633 = vrot.lane.b32.xlu0 %v17745_v12, %s21894_s23  ;;  %v2079_v37 = vand.u32 %v2057_v36, %v17868_v27  ;;  %v2082_v4 = vand.u32 %v2058_v63, %v17868_v27 }
 0x107   : > { %3635 = vrot.lane.b32.xlu1 %v17765_v16, %s21894_s23 }
 0x108   : > { %v2050_v40 = vpop.permute.xlu0 %2049  ;;  %15002 = vmatmul.mubr.msk.bf16.vlgmr.msra.gmra.mrb[48].mxu0 %vm505_vm3, %v18243_v22  ;;  %v2264_v41 = vpop.permute.xlu1 %2263 }
 0x109   : > { %2088 = vmatpush1.bf16.msra.mxu0 %v2064_v38  ;;  %2119 = vmatprep.mubr.bf16.mxu0 %v17570_v15  ;;  %v2059_v55 = vsel %vm2051_vm9, %v2048_v35, %v2050_v40  ;;  %v18390_v35 = vld.sshfl [vmem:[%s17733_s24 + $0x10] sm:$0x33 pattern:$0x76325410]  ;;  %vm4331_vm9 = vcmask 195584  }
 0x10a   : > { %2169 = vmatprep.subr.bf16.mxu0 %v2079_v37  ;;  %3637 = vrot.lane.b32.xlu0 %v17737_v8, %s21894_s23  ;;  %v2085_v57 = vand.u32 %v2059_v55, %v17868_v27 }
 0x10b   : > { %3629 = vrot.lane.b32.xlu1 %v17739_v9, %s21894_s23 }
 0x10c   : > { %v18294_v45 = vpop.permute.xlu0 %2265  ;;  %v18296_v46 = vpop.permute.xlu1 %2267  ;;  %15001 = vmatmul.mubr.msk.bf16.vlgmr.msra.gmra.mrb[52].mxu1 %vm505_vm3, %v18243_v22 }
 0x10d   : > { %v2281_v48 = vsel %vm2279_vm10, %v2264_v41, %v18294_v45  ;;  %1983 = vmatpush1.bf16.msra.mxu1 %v1854_v43  ;;  %2014 = vmatprep.mubr.bf16.mxu1 %v17570_v15  ;;  %v2282_v23 = vsel %vm2279_vm10, %v18294_v45, %v18296_v46 }
 0x10e   : > { %2128 = vmatprep.subr.bf16.mxu1 %v2073_v47  ;;  %3639 = vrot.lane.b32.xlu0 %v17749_v13, %s21894_s23  ;;  %v2295_v50 = vand.u32 %v2281_v48, %v17868_v27  ;;  %v2298_v29 = vand.u32 %v2282_v23, %v17868_v27  ;;  %v18415_v47 = vld [vmem:[%s21927_s1 + $0x24] sm:$0xf] }
 0x10f   : > { %3641 = vrot.lane.b32.xlu1 %v17767_v17, %s21894_s23 }
 0x110   : > { %v2270_v53 = vpop.permute.xlu0 %2269  ;;  %15005 = vmatmul.mubr.msk.bf16.vlgmr.msra.gmra.mrb[52].mxu0 %vm505_vm3, %v18306_v49  ;;  %v2262_v54 = vpop.permute.xlu1 %2261 }
 0x111   : > { %2170 = vmatpush1.bf16.msra.mxu0 %v2076_v51  ;;  %2201 = vmatprep.mubr.bf16.mxu0 %v17570_v15  ;;  %v2280_v58 = vsel %vm2279_vm10, %v2262_v54, %v2264_v41  ;;  %v2283_v2 = vsel %vm2279_vm10, %v18296_v46, %v2270_v53 }
 0x112   : > { %2315 = vmatprep.subr.bf16.mxu0 %v2295_v50  ;;  %3643 = vrot.lane.b32.xlu0 %v17775_v18, %s21894_s23  ;;  %v2292_v62 = vand.u32 %v2280_v58, %v17868_v27  ;;  %v2301_v10 = vand.u32 %v2283_v2, %v17868_v27 }
 0x113   : > { %3645 = vrot.lane.b32.xlu1 %v17834_v19, %s21894_s23  ;;  %s17586_s23 = smov 25  }
 0x114   : > { %v2272_v59 = vpop.permute.xlu0 %2271  ;;  %v2274_v60 = vpop.permute.xlu1 %2273  ;;  %15003 = vmatmul.mubr.msk.bf16.vlgmr.msra.gmra.mrb[56].mxu1 %vm505_vm3, %v18243_v22 }
 0x115   : > { %v2285_v61 = vsel %vm2279_vm10, %v2272_v59, %v2274_v60  ;;  %2129 = vmatpush1.bf16.msra.mxu1 %v2070_v56  ;;  %2160 = vmatprep.mubr.bf16.mxu1 %v17570_v15  ;;  %v2284_v5 = vsel %vm2279_vm10, %v2270_v53, %v2272_v59 }
 0x116   : > { %2210 = vmatprep.subr.bf16.mxu1 %v2085_v57  ;;  %3859 = vrot.lane.b32.xlu0 %v17753_v14, %s17585_s22  ;;  %v2307_v19 = vand.u32 %v2285_v61, %v17868_v27  ;;  %v2304_v22 = vand.u32 %v2284_v5, %v17868_v27 }
 0x117   : > { %3861 = vrot.lane.b32.xlu1 %v17745_v12, %s17585_s22 }
 0x118   : > { %v2276_v0 = vpop.permute.xlu0 %2275  ;;  %15007 = vmatmul.mubr.msk.bf16.vlgmr.msra.gmra.mrb[56].mxu0 %vm505_vm3, %v18306_v49  ;;  %v2278_v1 = vpop.permute.xlu1 %2277 }
 0x119   : > { %2316 = vmatpush1.bf16.msra.mxu0 %v2292_v62  ;;  %2347 = vmatprep.mubr.bf16.mxu0 %v17570_v15  ;;  %v2287_v28 = vsel %vm2279_vm10, %v2276_v0, %v2278_v1  ;;  %v2286_v36 = vsel %vm2279_vm10, %v2274_v60, %v2276_v0  ;;  %vm4559_vm10 = vcmask 187392  }
 0x11a   : > { %2397 = vmatprep.subr.bf16.mxu0 %v2307_v19  ;;  %3863 = vrot.lane.b32.xlu0 %v17765_v16, %s17585_s22  ;;  %v2313_v30 = vand.u32 %v2287_v28, %v17868_v27  ;;  %v2310_v42 = vand.u32 %v2286_v36, %v17868_v27 }
 0x11b   : > { %3865 = vrot.lane.b32.xlu1 %v17737_v8, %s17585_s22 }
 0x11c   : > { %v2492_v6 = vpop.permute.xlu0 %2491  ;;  %v18352_v7 = vpop.permute.xlu1 %2493  ;;  %15006 = vmatmul.mubr.msk.bf16.vlgmr.msra.gmra.mrb[60].mxu1 %vm505_vm3, %v18306_v49 }
 0x11d   : > { %v2509_v11 = vsel %vm2507_vm11, %v2492_v6, %v18352_v7  ;;  %2211 = vmatpush1.bf16.msra.mxu1 %v2082_v4  ;;  %2242 = vmatprep.mubr.bf16.mxu1 %v17570_v15 }
 0x11e   : > { %2356 = vmatprep.subr.bf16.mxu1 %v2301_v10  ;;  %3857 = vrot.lane.b32.xlu0 %v17739_v9, %s17585_s22  ;;  %v2523_v21 = vand.u32 %v2509_v11, %v17868_v27  ;;  %v18465_v10 = vld [vmem:[%s21927_s1 + $0x28] sm:$0xf] }
 0x11f   : > { %3867 = vrot.lane.b32.xlu1 %v17749_v13, %s17585_s22 }
 0x120   : > { %v2496_v25 = vpop.permute.xlu0 %2495  ;;  %15010 = vmatmul.mubr.msk.bf16.vlgmr.msra.gmra.mrb[60].mxu0 %vm505_vm3, %v18362_v20  ;;  %v2498_v26 = vpop.permute.xlu1 %2497 }
 0x121   : > { %2398 = vmatpush1.bf16.msra.mxu0 %v2304_v22  ;;  %2429 = vmatprep.mubr.bf16.mxu0 %v17570_v15  ;;  %v2511_v38 = vsel %vm2507_vm11, %v2496_v25, %v2498_v26 }
 0x122   : > { %2543 = vmatprep.subr.bf16.mxu0 %v2523_v21  ;;  %3869 = vrot.lane.b32.xlu0 %v17767_v17, %s17585_s22  ;;  %v2529_v45 = vand.u32 %v2511_v38, %v17868_v27 }
 0x123   : > { %3871 = vrot.lane.b32.xlu1 %v17775_v18, %s17585_s22 }
 0x124   : > { %v2490_v31 = vpop.permute.xlu0 %2489  ;;  %15008 = vmatmul.mubr.msk.bf16.vlgmr.msra.gmra.mrb[64].mxu1 %vm505_vm3, %v18306_v49  ;;  %v2510_v49 = vsel %vm2507_vm11, %v18352_v7, %v2496_v25 }
 0x125   : > { %v2508_v32 = vsel %vm2507_vm11, %v2490_v31, %v2492_v6  ;;  %v2500_v33 = vpop.permute.xlu1 %2499  ;;  %2357 = vmatpush1.bf16.msra.mxu1 %v2298_v29  ;;  %2388 = vmatprep.mubr.bf16.mxu1 %v17570_v15  ;;  %v2526_v55 = vand.u32 %v2510_v49, %v17868_v27 }
 0x126   : > { %v2520_v34 = vand.u32 %v2508_v32, %v17868_v27  ;;  %2438 = vmatprep.subr.bf16.mxu1 %v2313_v30  ;;  %3873 = vrot.lane.b32.xlu0 %v18390_v35, %s17585_s22  ;;  %v2512_v43 = vsel %vm2507_vm11, %v2498_v26, %v2500_v33  ;;  %s17587_s22 = smov 24  }
 0x127   : > { %4087 = vrot.lane.b32.xlu1 %v17753_v14, %s17586_s23  ;;  %v2532_v48 = vand.u32 %v2512_v43, %v17868_v27 }
 0x128   : > { %v2502_v37 = vpop.permute.xlu0 %2501  ;;  %15012 = vmatmul.mubr.msk.bf16.vlgmr.msra.gmra.mrb[64].mxu0 %vm505_vm3, %v18362_v20 }
 0x129   : > { %v2513_v39 = vsel %vm2507_vm11, %v2500_v33, %v2502_v37  ;;  %2544 = vmatpush1.bf16.msra.mxu0 %v2520_v34  ;;  %v2504_v40 = vpop.permute.xlu1 %2503  ;;  %2575 = vmatprep.mubr.bf16.mxu0 %v17570_v15 }
 0x12a   : > { %4089 = vrot.lane.b32.xlu0 %v17745_v12, %s17586_s23  ;;  %v2535_v41 = vand.u32 %v2513_v39, %v17868_v27  ;;  %v2514_v61 = vsel %vm2507_vm11, %v2502_v37, %v2504_v40 }
 0x12b   : > { %4091 = vrot.lane.b32.xlu1 %v17765_v16, %s17586_s23  ;;  %v2538_v1 = vand.u32 %v2514_v61, %v17868_v27 }
 0x12c   : > { %v2506_v44 = vpop.permute.xlu0 %2505  ;;  %2625 = vmatprep.subr.bf16.mxu0 %v2535_v41  ;;  %15011 = vmatmul.mubr.msk.bf16.vlgmr.msra.gmra.mrb[68].mxu1 %vm505_vm3, %v18362_v20 }
 0x12d   : > { %v2720_v46 = vpop.permute.xlu1 %2719  ;;  %2439 = vmatpush1.bf16.msra.mxu1 %v2310_v42  ;;  %2470 = vmatprep.mubr.bf16.mxu1 %v17570_v15  ;;  %v2515_v51 = vsel %vm2507_vm11, %v2504_v40, %v2506_v44  ;;  %vm4787_vm11 = vcmask 179200  }
 0x12e   : > { %2584 = vmatprep.subr.bf16.mxu1 %v2529_v45  ;;  %4093 = vrot.lane.b32.xlu0 %v17737_v8, %s17586_s23  ;;  %v2541_v56 = vand.u32 %v2515_v51, %v17868_v27  ;;  %v18513_v45 = vld [vmem:[%s21927_s1 + $0x2c] sm:$0xf] }
 0x12f   : > { %4085 = vrot.lane.b32.xlu1 %v17739_v9, %s17586_s23 }
 0x130   : > { %v2722_v50 = vpop.permute.xlu0 %2721  ;;  %15015 = vmatmul.mubr.msk.bf16.vlgmr.msra.gmra.mrb[68].mxu0 %vm505_vm3, %v18415_v47 }
 0x131   : > { %v2737_v52 = vsel %vm2735_vm12, %v2720_v46, %v2722_v50  ;;  %2626 = vmatpush1.bf16.msra.mxu0 %v2532_v48  ;;  %v2724_v53 = vpop.permute.xlu1 %2723  ;;  %2657 = vmatprep.mubr.bf16.mxu0 %v17570_v15 }
 0x132   : > { %4095 = vrot.lane.b32.xlu0 %v17749_v13, %s17586_s23  ;;  %v2751_v54 = vand.u32 %v2737_v52, %v17868_v27 }
 0x133   : > { %4097 = vrot.lane.b32.xlu1 %v17767_v17, %s17586_s23 }
 0x134   : > { %v2726_v57 = vpop.permute.xlu0 %2725  ;;  %2771 = vmatprep.subr.bf16.mxu0 %v2751_v54  ;;  %15013 = vmatmul.mubr.msk.bf16.vlgmr.msra.gmra.mrb[72].mxu1 %vm505_vm3, %v18362_v20  ;;  %v2738_v20 = vsel %vm2735_vm12, %v2722_v50, %v2724_v53 }
 0x135   : > { %v2718_v58 = vpop.permute.xlu1 %2717  ;;  %2585 = vmatpush1.bf16.msra.mxu1 %v2526_v55  ;;  %2616 = vmatprep.mubr.bf16.mxu1 %v17570_v15  ;;  %v2739_v62 = vsel %vm2735_vm12, %v2724_v53, %v2726_v57  ;;  %v2754_v26 = vand.u32 %v2738_v20, %v17868_v27 }
 0x136   : > { %v2736_v59 = vsel %vm2735_vm12, %v2718_v58, %v2720_v46  ;;  %2666 = vmatprep.subr.bf16.mxu1 %v2541_v56  ;;  %4099 = vrot.lane.b32.xlu0 %v17775_v18, %s17586_s23  ;;  %v2757_v6 = vand.u32 %v2739_v62, %v17868_v27 }
 0x137   : > { %v2748_v60 = vand.u32 %v2736_v59, %v17868_v27  ;;  %4101 = vrot.lane.b32.xlu1 %v18390_v35, %s17586_s23  ;;  %s17588_s23 = smov 23  }
 0x138   : > { %v2728_v19 = vpop.permute.xlu0 %2727  ;;  %15017 = vmatmul.mubr.msk.bf16.vlgmr.msra.gmra.mrb[72].mxu0 %vm505_vm3, %v18415_v47 }
 0x139   : > { %2772 = vmatpush1.bf16.msra.mxu0 %v2748_v60  ;;  %v2730_v63 = vpop.permute.xlu1 %2729  ;;  %2803 = vmatprep.mubr.bf16.mxu0 %v17570_v15  ;;  %v2740_v4 = vsel %vm2735_vm12, %v2726_v57, %v2728_v19 }
 0x13a   : > { %v2741_v0 = vsel %vm2735_vm12, %v2728_v19, %v2730_v63  ;;  %4315 = vrot.lane.b32.xlu0 %v17753_v14, %s17587_s22  ;;  %v2760_v11 = vand.u32 %v2740_v4, %v17868_v27 }
 0x13b   : > { %4317 = vrot.lane.b32.xlu1 %v17745_v12, %s17587_s22  ;;  %v2763_v2 = vand.u32 %v2741_v0, %v17868_v27 }
 0x13c   : > { %v2732_v5 = vpop.permute.xlu0 %2731  ;;  %15016 = vmatmul.mubr.msk.bf16.vlgmr.msra.gmra.mrb[76].mxu1 %vm505_vm3, %v18415_v47 }
 0x13d   : > { %2853 = vmatprep.subr.bf16.mxu0 %v2763_v2  ;;  %v2734_v7 = vpop.permute.xlu1 %2733  ;;  %2667 = vmatpush1.bf16.msra.mxu1 %v2538_v1  ;;  %v2742_v32 = vsel %vm2735_vm12, %v2730_v63, %v2732_v5 }
 0x13e   : > { %2812 = vmatprep.subr.bf16.mxu1 %v2757_v6  ;;  %4319 = vrot.lane.b32.xlu0 %v17765_v16, %s17587_s22  ;;  %v2743_v22 = vsel %vm2735_vm12, %v2732_v5, %v2734_v7  ;;  %v2766_v39 = vand.u32 %v2742_v32, %v17868_v27  ;;  %v18561_v5 = vld [vmem:[%s21927_s1 + $0x30] sm:$0xf] }
 0x13f   : > { %4321 = vrot.lane.b32.xlu1 %v17737_v8, %s17587_s22  ;;  %2698 = vmatprep.mubr.bf16.mxu1 %v17570_v15  ;;  %v2769_v29 = vand.u32 %v2743_v22, %v17868_v27 }
 0x140   : > { %v2948_v21 = vpop.permute.xlu0 %2947  ;;  %15020 = vmatmul.mubr.msk.bf16.vlgmr.msra.gmra.mrb[76].mxu0 %vm505_vm3, %v18465_v10 }
 0x141   : > { %2854 = vmatpush1.bf16.msra.mxu0 %v2760_v11  ;;  %v2950_v23 = vpop.permute.xlu1 %2949  ;;  %2885 = vmatprep.mubr.bf16.mxu0 %v17570_v15 }
 0x142   : > { %v2965_v25 = vsel %vm2963_vm13, %v2948_v21, %v2950_v23  ;;  %4313 = vrot.lane.b32.xlu0 %v17739_v9, %s17587_s22 }
 0x143   : > { %4323 = vrot.lane.b32.xlu1 %v17749_v13, %s17587_s22  ;;  %v2979_v28 = vand.u32 %v2965_v25, %v17868_v27 }
 0x144   : > { %v2952_v30 = vpop.permute.xlu0 %2951  ;;  %15018 = vmatmul.mubr.msk.bf16.vlgmr.msra.gmra.mrb[80].mxu1 %vm505_vm3, %v18415_v47 }
 0x145   : > { %2999 = vmatprep.subr.bf16.mxu0 %v2979_v28  ;;  %v2954_v31 = vpop.permute.xlu1 %2953  ;;  %2813 = vmatpush1.bf16.msra.mxu1 %v2754_v26  ;;  %v2966_v48 = vsel %vm2963_vm13, %v2950_v23, %v2952_v30 }
 0x146   : > { %2894 = vmatprep.subr.bf16.mxu1 %v2769_v29  ;;  %4325 = vrot.lane.b32.xlu0 %v17767_v17, %s17587_s22  ;;  %v2967_v34 = vsel %vm2963_vm13, %v2952_v30, %v2954_v31  ;;  %v2982_v53 = vand.u32 %v2966_v48, %v17868_v27 }
 0x147   : > { %4327 = vrot.lane.b32.xlu1 %v17775_v18, %s17587_s22  ;;  %2844 = vmatprep.mubr.bf16.mxu1 %v17570_v15  ;;  %v2985_v42 = vand.u32 %v2967_v34, %v17868_v27 }
 0x148   : > { %v2946_v33 = vpop.permute.xlu0 %2945  ;;  %15022 = vmatmul.mubr.msk.bf16.vlgmr.msra.gmra.mrb[80].mxu0 %vm505_vm3, %v18465_v10 }
 0x149   : > { %v2964_v36 = vsel %vm2963_vm13, %v2946_v33, %v2948_v21  ;;  %v2956_v37 = vpop.permute.xlu1 %2955  ;;  %3031 = vmatprep.mubr.bf16.mxu0 %v17570_v15 }
 0x14a   : > { %v2976_v38 = vand.u32 %v2964_v36, %v17868_v27  ;;  %4329 = vrot.lane.b32.xlu0 %v18390_v35, %s17587_s22  ;;  %v2968_v40 = vsel %vm2963_vm13, %v2954_v31, %v2956_v37  ;;  %s21900_s22 = smov 120  }
 0x14b   : > { %4543 = vrot.lane.b32.xlu1 %v17753_v14, %s17588_s23  ;;  %v2988_v47 = vand.u32 %v2968_v40, %v17868_v27 }
 0x14c   : > { %v2958_v41 = vpop.permute.xlu0 %2957  ;;  %3000 = vmatpush1.bf16.msra.mxu0 %v2976_v38  ;;  %15021 = vmatmul.mubr.msk.bf16.vlgmr.msra.gmra.mrb[84].mxu1 %vm505_vm3, %v18465_v10 }
 0x14d   : > { %v2969_v43 = vsel %vm2963_vm13, %v2956_v37, %v2958_v41  ;;  %v2960_v44 = vpop.permute.xlu1 %2959  ;;  %2895 = vmatpush1.bf16.msra.mxu1 %v2766_v39  ;;  %2926 = vmatprep.mubr.bf16.mxu1 %v17570_v15 }
 0x14e   : > { %3040 = vmatprep.subr.bf16.mxu1 %v2985_v42  ;;  %4545 = vrot.lane.b32.xlu0 %v17745_v12, %s17588_s23  ;;  %v2991_v46 = vand.u32 %v2969_v43, %v17868_v27  ;;  %v2970_v58 = vsel %vm2963_vm13, %v2958_v41, %v2960_v44 }
 0x14f   : > { %4547 = vrot.lane.b32.xlu1 %v17765_v16, %s17588_s23  ;;  %v2994_v63 = vand.u32 %v2970_v58, %v17868_v27 }
 0x150   : > { %v2962_v49 = vpop.permute.xlu0 %2961  ;;  %15025 = vmatmul.mubr.msk.bf16.vlgmr.msra.gmra.mrb[84].mxu0 %vm505_vm3, %v18513_v45  ;;  %3081 = vmatprep.subr.bf16.mxu0 %v2991_v46 }
 0x151   : > { %v2971_v50 = vsel %vm2963_vm13, %v2960_v44, %v2962_v49  ;;  %v3176_v51 = vpop.permute.xlu1 %3175  ;;  %3082 = vmatpush1.bf16.msra.mxu0 %v2988_v47  ;;  %3113 = vmatprep.mubr.bf16.mxu0 %v17570_v15  ;;  %v18616_v44 = vld [vmem:[%s21927_s1 + $0x34] sm:$0xf]  ;;  %vm5016_vm13 = vcmask 982016  }
 0x152   : > { %v2997_v52 = vand.u32 %v2971_v50, %v17868_v27  ;;  %4549 = vrot.lane.b32.xlu0 %v17737_v8, %s17588_s23 }
 0x153   : > { %4541 = vrot.lane.b32.xlu1 %v17739_v9, %s17588_s23 }
 0x154   : > { %v3178_v54 = vpop.permute.xlu0 %3177  ;;  %15023 = vmatmul.mubr.msk.bf16.vlgmr.msra.gmra.mrb[88].mxu1 %vm505_vm3, %v18465_v10 }
 0x155   : > { %v3193_v55 = vsel %vm3191_vm14, %v3176_v51, %v3178_v54  ;;  %v3180_v56 = vpop.permute.xlu1 %3179  ;;  %3041 = vmatpush1.bf16.msra.mxu1 %v2982_v53  ;;  %3072 = vmatprep.mubr.bf16.mxu1 %v17570_v15 }
 0x156   : > { %3122 = vmatprep.subr.bf16.mxu1 %v2997_v52  ;;  %4551 = vrot.lane.b32.xlu0 %v17749_v13, %s17588_s23  ;;  %v3207_v57 = vand.u32 %v3193_v55, %v17868_v27  ;;  %v3194_v11 = vsel %vm3191_vm14, %v3178_v54, %v3180_v56 }
 0x157   : > { %4553 = vrot.lane.b32.xlu1 %v17767_v17, %s17588_s23  ;;  %v3210_v23 = vand.u32 %v3194_v11, %v17868_v27 }
 0x158   : > { %v3182_v59 = vpop.permute.xlu0 %3181  ;;  %15027 = vmatmul.mubr.msk.bf16.vlgmr.msra.gmra.mrb[88].mxu0 %vm505_vm3, %v18513_v45  ;;  %3227 = vmatprep.subr.bf16.mxu0 %v3207_v57 }
 0x159   : > { %v3195_v60 = vsel %vm3191_vm14, %v3180_v56, %v3182_v59  ;;  %v3174_v61 = vpop.permute.xlu1 %3173  ;;  %3259 = vmatprep.mubr.bf16.mxu0 %v17570_v15 }
 0x15a   : > { %v3192_v19 = vsel %vm3191_vm14, %v3174_v61, %v3176_v51  ;;  %4555 = vrot.lane.b32.xlu0 %v17775_v18, %s17588_s23  ;;  %v3213_v62 = vand.u32 %v3195_v60, %v17868_v27 }
 0x15b   : > { %v3204_v0 = vand.u32 %v3192_v19, %v17868_v27  ;;  %4557 = vrot.lane.b32.xlu1 %v18390_v35, %s17588_s23  ;;  %s17589_s23 = smov 22  }
 0x15c   : > { %v3184_v1 = vpop.permute.xlu0 %3183  ;;  %15026 = vmatmul.mubr.msk.bf16.vlgmr.msra.gmra.mrb[92].mxu1 %vm505_vm3, %v18513_v45 }
 0x15d   : > { %v3196_v2 = vsel %vm3191_vm14, %v3182_v59, %v3184_v1  ;;  %3228 = vmatpush1.bf16.msra.mxu0 %v3204_v0  ;;  %v3186_v4 = vpop.permute.xlu1 %3185  ;;  %3123 = vmatpush1.bf16.msra.mxu1 %v2994_v63  ;;  %v18650_v63 = vcombine.high %v18390_v35, %v18390_v35 }
 0x15e   : > { %v3216_v6 = vand.u32 %v3196_v2, %v17868_v27  ;;  %v3197_v7 = vsel %vm3191_vm14, %v3184_v1, %v3186_v4  ;;  %3268 = vmatprep.subr.bf16.mxu1 %v3213_v62  ;;  %4771 = vrot.lane.b32.xlu0 %v17753_v14, %s17589_s23 }
 0x15f   : > { %4773 = vrot.lane.b32.xlu1 %v17745_v12, %s17589_s23  ;;  %v3219_v10 = vand.u32 %v3197_v7, %v17868_v27  ;;  %3154 = vmatprep.mubr.bf16.mxu1 %v17570_v15 }
 0x160   : > { %v3188_v20 = vpop.permute.xlu0 %3187  ;;  %15030 = vmatmul.mubr.msk.bf16.vlgmr.msra.gmra.mrb[92].mxu0 %vm505_vm3, %v18561_v5 }
 0x161   : > { %3309 = vmatprep.subr.bf16.mxu0 %v3219_v10  ;;  %v3190_v21 = vpop.permute.xlu1 %3189  ;;  %3341 = vmatprep.mubr.bf16.mxu0 %v17570_v15  ;;  %v3198_v31 = vsel %vm3191_vm14, %v3186_v4, %v3188_v20 }
 0x162   : > { %v3199_v22 = vsel %vm3191_vm14, %v3188_v20, %v3190_v21  ;;  %3310 = vmatpush1.bf16.msra.mxu0 %v3216_v6  ;;  %4775 = vrot.lane.b32.xlu0 %v17765_v16, %s17589_s23 }
 0x163   : > { %v3225_v25 = vand.u32 %v3199_v22, %v17868_v27  ;;  %4777 = vrot.lane.b32.xlu1 %v17737_v8, %s17589_s23 }
 0x164   : > { %v3404_v26 = vpop.permute.xlu0 %3403  ;;  %15028 = vmatmul.mubr.msk.bf16.vlgmr.msra.gmra.mrb[96].mxu1 %vm505_vm3, %v18513_v45 }
 0x165   : > { %v3406_v28 = vpop.permute.xlu1 %3405  ;;  %3269 = vmatpush1.bf16.msra.mxu1 %v3210_v23  ;;  %3300 = vmatprep.mubr.bf16.mxu1 %v17570_v15 }
 0x166   : > { %v3421_v29 = vsel %vm3419_vm15, %v3404_v26, %v3406_v28  ;;  %3350 = vmatprep.subr.bf16.mxu1 %v3225_v25  ;;  %4769 = vrot.lane.b32.xlu0 %v17739_v9, %s17589_s23  ;;  %v3222_v9 = vand.u32 %v3198_v31, %v17868_v27 }
 0x167   : > { %4779 = vrot.lane.b32.xlu1 %v17749_v13, %s17589_s23  ;;  %v3435_v30 = vand.u32 %v3421_v29, %v17868_v27  ;;  %v18677_v29 = vld [vmem:[%s21927_s1 + $0x38] sm:$0xf] }
 0x168   : > { %v3408_v32 = vpop.permute.xlu0 %3407  ;;  %15032 = vmatmul.mubr.msk.bf16.vlgmr.msra.gmra.mrb[96].mxu0 %vm505_vm3, %v18561_v5 }
 0x169   : > { %3455 = vmatprep.subr.bf16.mxu0 %v3435_v30  ;;  %v3410_v33 = vpop.permute.xlu1 %3409  ;;  %3487 = vmatprep.mubr.bf16.mxu0 %v17570_v15  ;;  %v3422_v41 = vsel %vm3419_vm15, %v3406_v28, %v3408_v32 }
 0x16a   : > { %v3423_v34 = vsel %vm3419_vm15, %v3408_v32, %v3410_v33  ;;  %4781 = vrot.lane.b32.xlu0 %v17767_v17, %s17589_s23  ;;  %v3438_v48 = vand.u32 %v3422_v41, %v17868_v27 }
 0x16b   : > { %4783 = vrot.lane.b32.xlu1 %v17775_v18, %s17589_s23  ;;  %v3441_v36 = vand.u32 %v3423_v34, %v17868_v27 }
 0x16c   : > { %v3402_v37 = vpop.permute.xlu0 %3401  ;;  %15031 = vmatmul.mubr.msk.bf16.vlgmr.msra.gmra.mrb[100].mxu1 %vm505_vm3, %v18561_v5 }
 0x16d   : > { %v3420_v38 = vsel %vm3419_vm15, %v3402_v37, %v3404_v26  ;;  %v3412_v39 = vpop.permute.xlu1 %3411  ;;  %3351 = vmatpush1.bf16.msra.mxu1 %v3222_v9  ;;  %3382 = vmatprep.mubr.bf16.mxu1 %v17570_v15 }
 0x16e   : > { %v3432_v40 = vand.u32 %v3420_v38, %v17868_v27  ;;  %3496 = vmatprep.subr.bf16.mxu1 %v3441_v36  ;;  %4785 = vrot.lane.b32.xlu0 %v18390_v35, %s17589_s23  ;;  %v3424_v42 = vsel %vm3419_vm15, %v3410_v33, %v3412_v39  ;;  %s17594_s23 = smov 116  }
 0x16f   : > { %5000 = vrot.lane.b32.xlu1 %v17745_v12, %s21900_s22  ;;  %v3444_v49 = vand.u32 %v3424_v42, %v17868_v27 }
 0x170   : > { %v3414_v43 = vpop.permute.xlu0 %3413  ;;  %3456 = vmatpush1.bf16.msra.mxu0 %v3432_v40 }
 0x171   : > { %v3425_v45 = vsel %vm3419_vm15, %v3412_v39, %v3414_v43  ;;  %v3416_v46 = vpop.permute.xlu1 %3415 }
 0x172   : > { %5002 = vrot.lane.b32.xlu0 %v17765_v16, %s21900_s22  ;;  %v3447_v47 = vand.u32 %v3425_v45, %v17868_v27  ;;  %v3426_v55 = vsel %vm3419_vm15, %v3414_v43, %v3416_v46 }
 0x173   : > { %5004 = vrot.lane.b32.xlu1 %v17737_v8, %s21900_s22  ;;  %15035 = vmatmul.mubr.msk.bf16.vlgmr.msra.gmra.mrb[100].mxu0 %vm505_vm3, %v18616_v44  ;;  %v3450_v62 = vand.u32 %v3426_v55, %v17868_v27 }
 0x174   : > { %v3418_v50 = vpop.permute.xlu0 %3417  ;;  %3537 = vmatprep.subr.bf16.mxu0 %v3447_v47  ;;  %15033 = vmatmul.mubr.msk.bf16.vlgmr.msra.gmra.mrb[104].mxu1 %vm505_vm3, %v18561_v5 }
 0x175   : > { %v3427_v51 = vsel %vm3419_vm15, %v3416_v46, %v3418_v50  ;;  %v3632_v52 = vpop.permute.xlu1 %3631  ;;  %3497 = vmatpush1.bf16.msra.mxu1 %v3438_v48  ;;  %3538 = vmatpush1.bf16.msra.mxu0 %v3444_v49  ;;  %vm5244_vm15 = vcmask 973824  }
 0x176   : > { %v3453_v53 = vand.u32 %v3427_v51, %v17868_v27  ;;  %5006 = vrot.lane.b32.xlu0 %v17749_v13, %s21900_s22  ;;  %3569 = vmatprep.mubr.bf16.mxu0 %v17570_v15 }
 0x177   : > { %4998 = vrot.lane.b32.xlu1 %v17753_v14, %s21900_s22  ;;  %3528 = vmatprep.mubr.bf16.mxu1 %v17570_v15  ;;  %v571_v54 = vpop.f32.mrb[0].mxu1 }
 0x178   : > { %v3634_v56 = vpop.permute.xlu0 %3633  ;;  %3578 = vmatprep.subr.bf16.mxu1 %v3453_v53  ;;  %v573_v57 = vpop.f32.mrb[1].mxu1 }
 0x179   : > { %v3649_v58 = vsel %vm3647_vm2, %v3632_v52, %v3634_v56  ;;  %v3636_v59 = vpop.permute.xlu1 %3635  ;;  %v575_v60 = vpop.f32.mrb[2].mxu1 }
 0x17a   : > { %5008 = vrot.lane.b32.xlu0 %v17767_v17, %s21900_s22  ;;  %v3663_v61 = vand.u32 %v3649_v58, %v17868_v27  ;;  %v576_v19 = vpop.f32.mrb[3].mxu1  ;;  %v3650_v22 = vsel %vm3647_vm2, %v3634_v56, %v3636_v59 }
 0x17b   : > { %5010 = vrot.lane.b32.xlu1 %v17775_v18, %s21900_s22  ;;  %15037 = vmatmul.mubr.msk.bf16.vlgmr.msra.gmra.mrb[104].mxu0 %vm505_vm3, %v18616_v44  ;;  %v18652_v0 = vpop.f32.mrb[0].mxu0  ;;  %v3666_v34 = vand.u32 %v3650_v22, %v17868_v27 }
 0x17c   : > { %v3638_v1 = vpop.permute.xlu0 %3637  ;;  %3683 = vmatprep.subr.bf16.mxu0 %v3663_v61  ;;  %15036 = vmatmul.mubr.msk.bf16.vlgmr.msra.gmra.mrb[108].mxu1 %vm505_vm3, %v18616_v44  ;;  %v18656_v2 = vpop.f32.mrb[1].mxu0 }
 0x17d   : > { %v3651_v4 = vsel %vm3647_vm2, %v3636_v59, %v3638_v1  ;;  %v3630_v5 = vpop.permute.xlu1 %3629  ;;  %3579 = vmatpush1.bf16.msra.mxu1 %v3450_v62  ;;  %3715 = vmatprep.mubr.bf16.mxu0 %v17570_v15  ;;  %v657_v6 = vpop.f32.mrb[2].mxu0 }
 0x17e   : > { %v3648_v7 = vsel %vm3647_vm2, %v3630_v5, %v3632_v52  ;;  %5012 = vrot.lane.b32.xlu0 %v18390_v35, %s21900_s22  ;;  %v3669_v10 = vand.u32 %v3651_v4, %v17868_v27  ;;  %3610 = vmatprep.mubr.bf16.mxu1 %v17570_v15  ;;  %v658_v11 = vpop.f32.mrb[3].mxu0 }
 0x17f   : > { %v3660_v20 = vand.u32 %v3648_v7, %v17868_v27  ;;  %5014 = vrot.lane.b32.xlu1 %v18650_v63, %s21900_s22  ;;  %v18668_v21 = vpop.f32.mrb[4].mxu1  ;;  %s17596_s22 = smov 70  }
 0x180   : > { %v3640_v23 = vpop.permute.xlu0 %3639  ;;  %3724 = vmatprep.subr.bf16.mxu1 %v3669_v10  ;;  %v18671_v25 = vpop.f32.mrb[5].mxu1 }
 0x181   : > { %v3652_v26 = vsel %vm3647_vm2, %v3638_v1, %v3640_v23  ;;  %3684 = vmatpush1.bf16.msra.mxu0 %v3660_v20  ;;  %v3642_v28 = vpop.permute.xlu1 %3641  ;;  %v616_v30 = vpop.f32.mrb[6].mxu1 }
 0x182   : > { %v3672_v31 = vand.u32 %v3652_v26, %v17868_v27  ;;  %v3653_v32 = vsel %vm3647_vm2, %v3640_v23, %v3642_v28  ;;  %5228 = vrot.lane.b32.xlu0 %v17745_v12, %s17591_s20  ;;  %v617_v33 = vpop.f32.mrb[7].mxu1 }
 0x183   : > { %5230 = vrot.lane.b32.xlu1 %v17765_v16, %s17591_s20  ;;  %v3675_v9 = vand.u32 %v3653_v32, %v17868_v27  ;;  %v762_v36 = vpop.f32.mrb[4].mxu0  ;;  %v18756_v33 = vld [vmem:[%s21927_s1 + $0x3c] sm:$0xf] }
 0x184   : > { %15040 = vmatmul.mubr.msk.bf16.vlgmr.msra.gmra.mrb[108].mxu0 %vm505_vm3, %v18677_v29  ;;  %v3644_v37 = vpop.permute.xlu0 %3643  ;;  %15038 = vmatmul.mubr.msk.bf16.vlgmr.msra.gmra.mrb[112].mxu1 %vm505_vm3, %v18616_v44  ;;  %v18691_v38 = vadd.f32 %v762_v36, %v571_v54  ;;  %v764_v39 = vpop.f32.mrb[5].mxu0 }
 0x185   : > { %3765 = vmatprep.subr.bf16.mxu0 %v3675_v9  ;;  %v3646_v40 = vpop.permute.xlu1 %3645  ;;  %3725 = vmatpush1.bf16.msra.mxu1 %v3666_v34  ;;  %v18693_v41 = vadd.f32 %v764_v39, %v573_v57  ;;  %v766_v42 = vpop.f32.mrb[6].mxu0  ;;  %v3654_v47 = vsel %vm3647_vm2, %v3642_v28, %v3644_v37 }
 0x186   : > { %v3655_v43 = vsel %vm3647_vm2, %v3644_v37, %v3646_v40  ;;  %3766 = vmatpush1.bf16.msra.mxu0 %v3672_v31  ;;  %5232 = vrot.lane.b32.xlu0 %v17737_v8, %s17591_s20  ;;  %v767_v45 = vpop.f32.mrb[7].mxu0  ;;  %v3678_v54 = vand.u32 %v3654_v47, %v17868_v27 }
 0x187   : > { %v3681_v46 = vand.u32 %v3655_v43, %v17868_v27  ;;  %5234 = vrot.lane.b32.xlu1 %v17749_v13, %s17591_s20  ;;  %3797 = vmatprep.mubr.bf16.mxu0 %v17570_v15  ;;  %v18702_v44 = vpop.f32.mrb[8].mxu1 }
 0x188   : > { %v3860_v48 = vpop.permute.xlu0 %3859  ;;  %3756 = vmatprep.mubr.bf16.mxu1 %v17570_v15  ;;  %v18706_v49 = vpop.f32.mrb[9].mxu1 }
 0x189   : > { %v3862_v50 = vpop.permute.xlu1 %3861  ;;  %3806 = vmatprep.subr.bf16.mxu1 %v3681_v46  ;;  %v698_v51 = vpop.f32.mrb[10].mxu1 }
 0x18a   : > { %v3877_v52 = vsel %vm3875_vm5, %v3860_v48, %v3862_v50  ;;  %5226 = vrot.lane.b32.xlu0 %v17753_v14, %s17591_s20  ;;  %v699_v53 = vpop.f32.mrb[11].mxu1 }
 0x18b   : > { %5236 = vrot.lane.b32.xlu1 %v17767_v17, %s17591_s20  ;;  %v3891_v55 = vand.u32 %v3877_v52, %v17868_v27  ;;  %v844_v56 = vpop.f32.mrb[8].mxu0 }
 0x18c   : > { %15042 = vmatmul.mubr.msk.bf16.vlgmr.msra.gmra.mrb[112].mxu0 %vm505_vm3, %v18677_v29  ;;  %v3864_v57 = vpop.permute.xlu0 %3863  ;;  %15041 = vmatmul.mubr.msk.bf16.vlgmr.msra.gmra.mrb[116].mxu1 %vm505_vm3, %v18677_v29  ;;  %v18720_v58 = vadd.f32 %v844_v56, %v18652_v0  ;;  %v846_v59 = vpop.f32.mrb[9].mxu0 }
 0x18d   : > { %3911 = vmatprep.subr.bf16.mxu0 %v3891_v55  ;;  %v3866_v60 = vpop.permute.xlu1 %3865  ;;  %3807 = vmatpush1.bf16.msra.mxu1 %v3678_v54  ;;  %v18723_v61 = vadd.f32 %v846_v59, %v18656_v2  ;;  %v848_v19 = vpop.f32.mrb[10].mxu0  ;;  %v3878_v2 = vsel %vm3875_vm5, %v3862_v50, %v3864_v57 }
 0x18e   : > { %v3879_v62 = vsel %vm3875_vm5, %v3864_v57, %v3866_v60  ;;  %5238 = vrot.lane.b32.xlu0 %v17775_v18, %s17591_s20  ;;  %v849_v1 = vpop.f32.mrb[11].mxu0  ;;  %3838 = vmatprep.mubr.bf16.mxu1 %v17570_v15  ;;  %v3894_v28 = vand.u32 %v3878_v2, %v17868_v27 }
 0x18f   : > { %5240 = vrot.lane.b32.xlu1 %v18390_v35, %s17591_s20  ;;  %v3897_v0 = vand.u32 %v3879_v62, %v17868_v27  ;;  %v803_v4 = vpop.f32.mrb[12].mxu1  ;;  %3943 = vmatprep.mubr.bf16.mxu0 %v17570_v15 }
 0x190   : > { %v3858_v5 = vpop.permute.xlu0 %3857  ;;  %v18735_v6 = vadd.f32 %v803_v4, %v18668_v21  ;;  %v805_v7 = vpop.f32.mrb[13].mxu1 }
 0x191   : > { %v3876_v10 = vsel %vm3875_vm5, %v3858_v5, %v3860_v48  ;;  %v3868_v11 = vpop.permute.xlu1 %3867  ;;  %3952 = vmatprep.subr.bf16.mxu1 %v3897_v0  ;;  %v18739_v20 = vadd.f32 %v805_v7, %v18671_v25  ;;  %v807_v22 = vpop.f32.mrb[14].mxu1 }
 0x192   : > { %v3888_v23 = vand.u32 %v3876_v10, %v17868_v27  ;;  %5242 = vrot.lane.b32.xlu0 %v18650_v63, %s17591_s20  ;;  %v808_v26 = vpop.f32.mrb[15].mxu1  ;;  %v3880_v30 = vsel %vm3875_vm5, %v3866_v60, %v3868_v11  ;;  %s17598_s20 = smov 64  }
 0x193   : > { %5456 = vrot.lane.b32.xlu1 %v17745_v12, %s21898_s16  ;;  %v979_v21 = vpop.f32.mrb[12].mxu0  ;;  %v3900_v39 = vand.u32 %v3880_v30, %v17868_v27 }
 0x194   : > { %v18749_v31 = vadd.f32 %v979_v21, %v18691_v38  ;;  %v3870_v25 = vpop.permute.xlu0 %3869  ;;  %v981_v32 = vpop.f32.mrb[13].mxu0  ;;  %3912 = vmatpush1.bf16.msra.mxu0 %v3888_v23  ;;  %15043 = vmatmul.mubr.msk.bf16.vlgmr.msra.gmra.mrb[120].mxu1 %vm505_vm3, %v18677_v29 }
 0x195   : > { %v3881_v34 = vsel %vm3875_vm5, %v3868_v11, %v3870_v25  ;;  %v18760_v9 = vadd.f32 %v981_v32, %v18693_v41  ;;  %v3872_v36 = vpop.permute.xlu1 %3871  ;;  %3953 = vmatpush1.bf16.msra.mxu1 %v3894_v28  ;;  %v983_v37 = vpop.f32.mrb[14].mxu0  ;;  %3984 = vmatprep.mubr.bf16.mxu1 %v17570_v15 }
 0x196   : > { %5458 = vrot.lane.b32.xlu0 %v17765_v16, %s21898_s16  ;;  %v3903_v29 = vand.u32 %v3881_v34, %v17868_v27  ;;  %v984_v38 = vpop.f32.mrb[15].mxu0  ;;  %v3882_v41 = vsel %vm3875_vm5, %v3870_v25, %v3872_v36 }
 0x197   : > { %5460 = vrot.lane.b32.xlu1 %v17737_v8, %s21898_s16  ;;  %15045 = vmatmul.mubr.msk.bf16.vlgmr.msra.gmra.mrb[116].mxu0 %vm505_vm3, %v18756_v33  ;;  %v885_v40 = vpop.f32.mrb[16].mxu1 }
 0x198   : > { %v3874_v42 = vpop.permute.xlu0 %3873  ;;  %3993 = vmatprep.subr.bf16.mxu0 %v3903_v29  ;;  %v18773_v43 = vadd.f32 %v885_v40, %v18702_v44  ;;  %v887_v45 = vpop.f32.mrb[17].mxu1  ;;  %4025 = vmatprep.mubr.bf16.mxu0 %v17570_v15  ;;  %v3906_v44 = vand.u32 %v3882_v41, %v17868_v27 }
 0x199   : > { %v3883_v46 = vsel %vm3875_vm5, %v3872_v36, %v3874_v42  ;;  %v4088_v47 = vpop.permute.xlu1 %4087  ;;  %3994 = vmatpush1.bf16.msra.mxu0 %v3900_v39  ;;  %v18778_v48 = vadd.f32 %v887_v45, %v18706_v49  ;;  %v889_v50 = vpop.f32.mrb[18].mxu1  ;;  %v18832_v36 = vld [vmem:[%s21927_s1 + $0x40] sm:$0xf]  ;;  %vm5472_vm5 = vcmask 965632  }
 0x19a   : > { %v3909_v51 = vand.u32 %v3883_v46, %v17868_v27  ;;  %5462 = vrot.lane.b32.xlu0 %v17749_v13, %s21898_s16  ;;  %v890_v52 = vpop.f32.mrb[19].mxu1 }
 0x19b   : > { %5454 = vrot.lane.b32.xlu1 %v17753_v14, %s21898_s16  ;;  %v1061_v53 = vpop.f32.mrb[16].mxu0 }
 0x19c   : > { %v18787_v54 = vadd.f32 %v1061_v53, %v18720_v58  ;;  %v4090_v55 = vpop.permute.xlu0 %4089  ;;  %v1063_v49 = vpop.f32.mrb[17].mxu0  ;;  %15046 = vmatmul.mubr.msk.bf16.vlgmr.msra.gmra.mrb[124].mxu1 %vm505_vm3, %v18756_v33  ;;  %4034 = vmatprep.subr.bf16.mxu1 %v3909_v51 }
 0x19d   : > { %v4105_v56 = vsel %vm4103_vm8, %v4088_v47, %v4090_v55  ;;  %v18793_v57 = vadd.f32 %v1063_v49, %v18723_v61  ;;  %v4092_v59 = vpop.permute.xlu1 %4091  ;;  %4035 = vmatpush1.bf16.msra.mxu1 %v3906_v44  ;;  %v1065_v60 = vpop.f32.mrb[18].mxu0  ;;  %4066 = vmatprep.mubr.bf16.mxu1 %v17570_v15 }
 0x19e   : > { %5464 = vrot.lane.b32.xlu0 %v17767_v17, %s21898_s16  ;;  %v4119_v58 = vand.u32 %v4105_v56, %v17868_v27  ;;  %v1066_v19 = vpop.f32.mrb[19].mxu0  ;;  %v4106_v61 = vsel %vm4103_vm8, %v4090_v55, %v4092_v59 }
 0x19f   : > { %5466 = vrot.lane.b32.xlu1 %v17775_v18, %s21898_s16  ;;  %v1020_v62 = vpop.f32.mrb[20].mxu1  ;;  %15047 = vmatmul.mubr.msk.bf16.vlgmr.msra.gmra.mrb[120].mxu0 %vm505_vm3, %v18756_v33  ;;  %v4122_v23 = vand.u32 %v4106_v61, %v17868_v27 }
 0x1a0   : > { %v18805_v1 = vadd.f32 %v1020_v62, %v18735_v6  ;;  %v4094_v0 = vpop.permute.xlu0 %4093  ;;  %4139 = vmatprep.subr.bf16.mxu0 %v4119_v58  ;;  %v1022_v4 = vpop.f32.mrb[21].mxu1  ;;  %4171 = vmatprep.mubr.bf16.mxu0 %v17570_v15 }
 0x1a1   : > { %v4107_v2 = vsel %vm4103_vm8, %v4092_v59, %v4094_v0  ;;  %v4086_v5 = vpop.permute.xlu1 %4085  ;;  %v18810_v7 = vadd.f32 %v1022_v4, %v18739_v20  ;;  %v1024_v10 = vpop.f32.mrb[22].mxu1 }
 0x1a2   : > { %v4104_v11 = vsel %vm4103_vm8, %v4086_v5, %v4088_v47  ;;  %5468 = vrot.lane.b32.xlu0 %v18390_v35, %s21898_s16  ;;  %v4125_v6 = vand.u32 %v4107_v2, %v17868_v27  ;;  %v1025_v22 = vpop.f32.mrb[23].mxu1 }
 0x1a3   : > { %v4116_v26 = vand.u32 %v4104_v11, %v17868_v27  ;;  %5470 = vrot.lane.b32.xlu1 %v18650_v63, %s21898_s16  ;;  %v1204_v28 = vpop.f32.mrb[20].mxu0  ;;  %s17593_s16 = smov 117  }
 0x1a4   : > { %v18821_v20 = vadd.f32 %v1204_v28, %v18749_v31  ;;  %v4096_v21 = vpop.permute.xlu0 %4095  ;;  %v1206_v30 = vpop.f32.mrb[21].mxu0  ;;  %15048 = vmatmul.mubr.msk.bf16.vlgmr.msra.gmra.mrb[128].mxu1 %vm505_vm3, %v18756_v33  ;;  %4180 = vmatprep.subr.bf16.mxu1 %v4125_v6 }
 0x1a5   : > { %v4108_v25 = vsel %vm4103_vm8, %v4094_v0, %v4096_v21  ;;  %v18827_v32 = vadd.f32 %v1206_v30, %v18760_v9  ;;  %4140 = vmatpush1.bf16.msra.mxu0 %v4116_v26  ;;  %v4098_v34 = vpop.permute.xlu1 %4097  ;;  %4181 = vmatpush1.bf16.msra.mxu1 %v4122_v23  ;;  %v1208_v31 = vpop.f32.mrb[22].mxu0 }
 0x1a6   : > { %v4128_v37 = vand.u32 %v4108_v25, %v17868_v27  ;;  %v4109_v29 = vsel %vm4103_vm8, %v4096_v21, %v4098_v34  ;;  %5684 = vrot.lane.b32.xlu0 %v17745_v12, %s17593_s16  ;;  %v1209_v33 = vpop.f32.mrb[23].mxu0  ;;  %4212 = vmatprep.mubr.bf16.mxu1 %v17570_v15 }
 0x1a7   : > { %5686 = vrot.lane.b32.xlu1 %v17765_v16, %s17593_s16  ;;  %v1102_v9 = vpop.f32.mrb[24].mxu1  ;;  %v4131_v38 = vand.u32 %v4109_v29, %v17868_v27  ;;  %v15054_v29 = vld [vmem:[%s21927_s1 + $0x44] sm:$0xf] }
 0x1a8   : > { %v18843_v39 = vadd.f32 %v1102_v9, %v18773_v43  ;;  %15050 = vmatmul.mubr.msk.bf16.vlgmr.msra.gmra.mrb[124].mxu0 %vm505_vm3, %v18832_v36  ;;  %v4100_v40 = vpop.permute.xlu0 %4099  ;;  %v1104_v41 = vpop.f32.mrb[25].mxu1 }
 0x1a9   : > { %v4110_v42 = vsel %vm4103_vm8, %v4098_v34, %v4100_v40  ;;  %4221 = vmatprep.subr.bf16.mxu0 %v4131_v38  ;;  %v4102_v45 = vpop.permute.xlu1 %4101  ;;  %v18849_v46 = vadd.f32 %v1104_v41, %v18778_v48  ;;  %v1106_v47 = vpop.f32.mrb[26].mxu1  ;;  %4253 = vmatprep.mubr.bf16.mxu0 %v17570_v15 }
 0x1aa   : > { %v4134_v50 = vand.u32 %v4110_v42, %v17868_v27  ;;  %v4111_v43 = vsel %vm4103_vm8, %v4100_v40, %v4102_v45  ;;  %4222 = vmatpush1.bf16.msra.mxu0 %v4128_v37  ;;  %5688 = vrot.lane.b32.xlu0 %v17737_v8, %s17593_s16  ;;  %v1107_v51 = vpop.f32.mrb[27].mxu1  ;;  %vm5700_vm8 = vcmask 957440  }
 0x1ab   : > { %v4137_v52 = vand.u32 %v4111_v43, %v17868_v27  ;;  %5690 = vrot.lane.b32.xlu1 %v17749_v13, %s17593_s16  ;;  %v1286_v44 = vpop.f32.mrb[24].mxu0 }
 0x1ac   : > { %v18860_v48 = vadd.f32 %v1286_v44, %v18787_v54  ;;  %v4316_v53 = vpop.permute.xlu0 %4315  ;;  %v1288_v55 = vpop.f32.mrb[25].mxu0  ;;  %15051 = vmatmul.mubr.msk.bf16.vlgmr.msra.gmra.mrb[132].mxu1 %vm505_vm3, %v18832_v36 }
 0x1ad   : > { %v18865_v49 = vadd.f32 %v1288_v55, %v18793_v57  ;;  %v4318_v56 = vpop.permute.xlu1 %4317  ;;  %4262 = vmatprep.subr.bf16.mxu1 %v4137_v52  ;;  %v1290_v59 = vpop.f32.mrb[26].mxu0  ;;  %4294 = vmatprep.mubr.bf16.mxu1 %v17570_v15 }
 0x1ae   : > { %v4333_v60 = vsel %vm4331_vm9, %v4316_v53, %v4318_v56  ;;  %4263 = vmatpush1.bf16.msra.mxu1 %v4134_v50  ;;  %5682 = vrot.lane.b32.xlu0 %v17753_v14, %s17593_s16  ;;  %v1291_v54 = vpop.f32.mrb[27].mxu0 }
 0x1af   : > { %5692 = vrot.lane.b32.xlu1 %v17767_v17, %s17593_s16  ;;  %v1245_v58 = vpop.f32.mrb[28].mxu1  ;;  %v4347_v19 = vand.u32 %v4333_v60, %v17868_v27 }
 0x1b0   : > { %v18875_v57 = vadd.f32 %v1245_v58, %v18805_v1  ;;  %15052 = vmatmul.mubr.msk.bf16.vlgmr.msra.gmra.mrb[128].mxu0 %vm505_vm3, %v18832_v36  ;;  %v4320_v62 = vpop.permute.xlu0 %4319  ;;  %v1247_v61 = vpop.f32.mrb[29].mxu1 }
 0x1b1   : > { %v4334_v0 = vsel %vm4331_vm9, %v4318_v56, %v4320_v62  ;;  %4367 = vmatprep.subr.bf16.mxu0 %v4347_v19  ;;  %v4322_v4 = vpop.permute.xlu1 %4321  ;;  %v18881_v2 = vadd.f32 %v1247_v61, %v18810_v7  ;;  %v1249_v5 = vpop.f32.mrb[30].mxu1  ;;  %4399 = vmatprep.mubr.bf16.mxu0 %v17570_v15 }
 0x1b2   : > { %v4350_v10 = vand.u32 %v4334_v0, %v17868_v27  ;;  %v4335_v1 = vsel %vm4331_vm9, %v4320_v62, %v4322_v4  ;;  %5694 = vrot.lane.b32.xlu0 %v17775_v18, %s17593_s16  ;;  %v1250_v11 = vpop.f32.mrb[31].mxu1 }
 0x1b3   : > { %5696 = vrot.lane.b32.xlu1 %v18390_v35, %s17593_s16  ;;  %v1429_v6 = vpop.f32.mrb[28].mxu0  ;;  %v4353_v22 = vand.u32 %v4335_v1, %v17868_v27 }
 0x1b4   : > { %v18892_v7 = vadd.f32 %v1429_v6, %v18821_v20  ;;  %v4314_v23 = vpop.permute.xlu0 %4313  ;;  %v1431_v26 = vpop.f32.mrb[29].mxu0  ;;  %15053 = vmatmul.mubr.msk.bf16.vlgmr.msra.gmra.mrb[136].mxu1 %vm505_vm3, %v18832_v36 }
 0x1b5   : > { %v4332_v28 = vsel %vm4331_vm9, %v4314_v23, %v4316_v53  ;;  %v18898_v21 = vadd.f32 %v1431_v26, %v18827_v32  ;;  %v4324_v30 = vpop.permute.xlu1 %4323  ;;  %4408 = vmatprep.subr.bf16.mxu1 %v4353_v22  ;;  %v1433_v25 = vpop.f32.mrb[30].mxu0  ;;  %4440 = vmatprep.mubr.bf16.mxu1 %v17570_v15 }
 0x1b6   : > { %v4344_v35 = vand.u32 %v4332_v28, %v17868_v27  ;;  %4409 = vmatpush1.bf16.msra.mxu1 %v4350_v10  ;;  %5698 = vrot.lane.b32.xlu0 %v18650_v63, %s17593_s16  ;;  %v1434_v20 = vpop.f32.mrb[31].mxu0  ;;  %v4336_v32 = vsel %vm4331_vm9, %v4322_v4, %v4324_v30  ;;  %v17503_v10 = vld.sshfl [vmem:[%s17733_s24 + $0x10] sm:$0x33 pattern:$0x76325410]  ;;  %s17597_s16 = smov 66  }
 0x1b7   : > { %5912 = vrot.lane.b32.xlu1 %v17745_v12, %s17594_s23  ;;  %v1327_v34 = vpop.f32.mrb[32].mxu1  ;;  %v4356_v41 = vand.u32 %v4336_v32, %v17868_v27  ;;  %v15059_v25 = vld [vmem:[%s21927_s1 + $0x48] sm:$0xf]  ;;  %s21935_s24 = smov 124  }
 0x1b8   : > { %v18908_v36 = vadd.f32 %v1327_v34, %v18843_v39  ;;  %v4326_v31 = vpop.permute.xlu0 %4325  ;;  %4368 = vmatpush1.bf16.msra.mxu0 %v4344_v35  ;;  %v1329_v37 = vpop.f32.mrb[33].mxu1 }
 0x1b9   : > { %v4337_v33 = vsel %vm4331_vm9, %v4324_v30, %v4326_v31  ;;  %v4328_v9 = vpop.permute.xlu1 %4327  ;;  %v18915_v38 = vadd.f32 %v1329_v37, %v18849_v46  ;;  %v1331_v12 = vpop.f32.mrb[34].mxu1 }
 0x1ba   : > { %5914 = vrot.lane.b32.xlu0 %v17765_v16, %s17594_s23  ;;  %v4359_v39 = vand.u32 %v4337_v33, %v17868_v27  ;;  %v1332_v40 = vpop.f32.mrb[35].mxu1  ;;  %v4338_v45 = vsel %vm4331_vm9, %v4326_v31, %v4328_v9 }
 0x1bb   : > { %5916 = vrot.lane.b32.xlu1 %v17737_v8, %s17594_s23  ;;  %v1511_v42 = vpop.f32.mrb[32].mxu0  ;;  %15055 = vmatmul.mubr.msk.bf16.vlgmr.msra.gmra.mrb[132].mxu0 %vm505_vm3, %v15054_v29 }
 0x1bc   : > { %v4330_v47 = vpop.permute.xlu0 %4329  ;;  %v1513_v46 = vpop.f32.mrb[33].mxu0  ;;  %4449 = vmatprep.subr.bf16.mxu0 %v4359_v39  ;;  %15056 = vmatmul.mubr.msk.bf16.vlgmr.msra.gmra.mrb[140].mxu1 %vm505_vm3, %v15054_v29  ;;  %v18927_v16 = vadd.f32 %v1511_v42, %v18860_v48  ;;  %v4362_v48 = vand.u32 %v4338_v45, %v17868_v27 }
 0x1bd   : > { %v4339_v50 = vsel %vm4331_vm9, %v4328_v9, %v4330_v47  ;;  %v4544_v43 = vpop.permute.xlu1 %4543  ;;  %4450 = vmatpush1.bf16.msra.mxu0 %v4356_v41  ;;  %v1515_v51 = vpop.f32.mrb[34].mxu0  ;;  %4481 = vmatprep.mubr.bf16.mxu0 %v17570_v15  ;;  %v18932_v8 = vadd.f32 %v1513_v46, %v18865_v49  ;;  %vm21903_vm9 = vcmask 949248  }
 0x1be   : > { %v4365_v52 = vand.u32 %v4339_v50, %v17868_v27  ;;  %5918 = vrot.lane.b32.xlu0 %v17749_v13, %s17594_s23  ;;  %v1516_v44 = vpop.f32.mrb[35].mxu0  ;;  %4522 = vmatprep.mubr.bf16.mxu1 %v17570_v15 }
 0x1bf   : > { %5910 = vrot.lane.b32.xlu1 %v17753_v14, %s17594_s23  ;;  %v1470_v53 = vpop.f32.mrb[36].mxu1 }
 0x1c0   : > { %v4546_v55 = vpop.permute.xlu0 %4545  ;;  %v1472_v56 = vpop.f32.mrb[37].mxu1  ;;  %4490 = vmatprep.subr.bf16.mxu1 %v4365_v52  ;;  %v18942_v49 = vadd.f32 %v1470_v53, %v18875_v57 }
 0x1c1   : > { %v4561_v59 = vsel %vm4559_vm10, %v4544_v43, %v4546_v55  ;;  %v4548_v60 = vpop.permute.xlu1 %4547  ;;  %4491 = vmatpush1.bf16.msra.mxu1 %v4362_v48  ;;  %v1474_v13 = vpop.f32.mrb[38].mxu1  ;;  %v18946_v54 = vadd.f32 %v1472_v56, %v18881_v2 }
 0x1c2   : > { %5920 = vrot.lane.b32.xlu0 %v17767_v17, %s17594_s23  ;;  %v4575_v14 = vand.u32 %v4561_v59, %v17868_v27  ;;  %v1475_v58 = vpop.f32.mrb[39].mxu1  ;;  %v4562_v57 = vsel %vm4559_vm10, %v4546_v55, %v4548_v60 }
 0x1c3   : > { %5922 = vrot.lane.b32.xlu1 %v17775_v18, %s17594_s23  ;;  %v1665_v19 = vpop.f32.mrb[36].mxu0  ;;  %15057 = vmatmul.mubr.msk.bf16.vlgmr.msra.gmra.mrb[136].mxu0 %vm505_vm3, %v15054_v29  ;;  %v4578_v6 = vand.u32 %v4562_v57, %v17868_v27 }
 0x1c4   : > { %v4550_v62 = vpop.permute.xlu0 %4549  ;;  %v1667_v61 = vpop.f32.mrb[37].mxu0  ;;  %4595 = vmatprep.subr.bf16.mxu0 %v4575_v14  ;;  %15058 = vmatmul.mubr.msk.bf16.vlgmr.msra.gmra.mrb[144].mxu1 %vm505_vm3, %v15054_v29  ;;  %v18957_v0 = vadd.f32 %v1665_v19, %v18892_v7 }
 0x1c5   : > { %v4563_v17 = vsel %vm4559_vm10, %v4548_v60, %v4550_v62  ;;  %v4542_v4 = vpop.permute.xlu1 %4541  ;;  %v1669_v2 = vpop.f32.mrb[38].mxu0  ;;  %4627 = vmatprep.mubr.bf16.mxu0 %v17570_v15  ;;  %4668 = vmatprep.mubr.bf16.mxu1 %v17570_v15  ;;  %v18963_v18 = vadd.f32 %v1667_v61, %v18898_v21 }
 0x1c6   : > { %v4560_v5 = vsel %vm4559_vm10, %v4542_v4, %v4544_v43  ;;  %5924 = vrot.lane.b32.xlu0 %v17503_v10, %s17594_s23  ;;  %v4581_v1 = vand.u32 %v4563_v17, %v17868_v27  ;;  %v1670_v11 = vpop.f32.mrb[39].mxu0 }
 0x1c7   : > { %v4572_v22 = vand.u32 %v4560_v5, %v17868_v27  ;;  %5926 = vrot.lane.b32.xlu1 %v18650_v63, %s17594_s23  ;;  %v1552_v7 = vpop.f32.mrb[40].mxu1 }
 0x1c8   : > { %v4552_v23 = vpop.permute.xlu0 %4551  ;;  %v1554_v26 = vpop.f32.mrb[41].mxu1  ;;  %4636 = vmatprep.subr.bf16.mxu1 %v4581_v1  ;;  %v1565_v28 = vadd.f32 %v1552_v7, %v18908_v36  ;;  %v15064_v1 = vld [vmem:[%s21927_s1 + $0x4c] sm:$0xf] }
 0x1c9   : > { %v4564_v21 = vsel %vm4559_vm10, %v4550_v62, %v4552_v23  ;;  %4596 = vmatpush1.bf16.msra.mxu0 %v4572_v22  ;;  %v4554_v30 = vpop.permute.xlu1 %4553  ;;  %4637 = vmatpush1.bf16.msra.mxu1 %v4578_v6  ;;  %v1556_v35 = vpop.f32.mrb[42].mxu1  ;;  %v1566_v20 = vadd.f32 %v1554_v26, %v18915_v38 }
 0x1ca   : > { %v4584_v63 = vand.u32 %v4564_v21, %v17868_v27  ;;  %v4565_v34 = vsel %vm4559_vm10, %v4552_v23, %v4554_v30  ;;  %v1557_v32 = vpop.f32.mrb[43].mxu1 }
 0x1cb   : > { %v1747_v31 = vpop.f32.mrb[40].mxu0  ;;  %v4587_v36 = vand.u32 %v4565_v34, %v17868_v27 }
 0x1cc   : > { %v18983_v37 = vadd.f32 %v1747_v31, %v18927_v16  ;;  %15060 = vmatmul.mubr.msk.bf16.vlgmr.msra.gmra.mrb[140].mxu0 %vm505_vm3, %v15059_v25  ;;  %v4556_v29 = vpop.permute.xlu0 %4555  ;;  %v1749_v33 = vpop.f32.mrb[41].mxu0  ;;  %15061 = vmatmul.mubr.msk.bf16.vlgmr.msra.gmra.mrb[148].mxu1 %vm505_vm3, %v15059_v25 }
 0x1cd   : > { %v4566_v9 = vsel %vm4559_vm10, %v4554_v30, %v4556_v29  ;;  %v1800_v38 = vadd.f32 %v1749_v33, %v18932_v8  ;;  %4677 = vmatprep.subr.bf16.mxu0 %v4587_v36  ;;  %v4558_v12 = vpop.permute.xlu1 %4557  ;;  %v1751_v39 = vpop.f32.mrb[42].mxu0  ;;  %4709 = vmatprep.mubr.bf16.mxu0 %v17570_v15 }
 0x1ce   : > { %v4590_v40 = vand.u32 %v4566_v9, %v17868_v27  ;;  %v4567_v41 = vsel %vm4559_vm10, %v4556_v29, %v4558_v12  ;;  %4678 = vmatpush1.bf16.msra.mxu0 %v4584_v63  ;;  %v1752_v42 = vpop.f32.mrb[43].mxu0  ;;  %4750 = vmatprep.mubr.bf16.mxu1 %v17570_v15  ;;  %vm6305_vm10 = vsmask.f32 3328 }
 0x1cf   : > { %v4593_v45 = vand.u32 %v4567_v41, %v17868_v27  ;;  %v1706_v47 = vpop.f32.mrb[44].mxu1 }
 0x1d0   : > { %v1797_v46 = vadd.f32 %v1706_v47, %v18942_v49  ;;  %v4772_v16 = vpop.permute.xlu0 %4771  ;;  %v1708_v50 = vpop.f32.mrb[45].mxu1 }
 0x1d1   : > { %v4774_v43 = vpop.permute.xlu1 %4773  ;;  %v1798_v51 = vadd.f32 %v1708_v50, %v18946_v54  ;;  %4718 = vmatprep.subr.bf16.mxu1 %v4593_v45  ;;  %v1710_v8 = vpop.f32.mrb[46].mxu1 }
 0x1d2   : > { %v4789_v52 = vsel %vm4787_vm11, %v4772_v16, %v4774_v43  ;;  %4719 = vmatpush1.bf16.msra.mxu1 %v4590_v40  ;;  %v1711_v44 = vpop.f32.mrb[47].mxu1 }
 0x1d3   : > { %v1893_v48 = vpop.f32.mrb[44].mxu0  ;;  %v4803_v53 = vand.u32 %v4789_v52, %v17868_v27 }
 0x1d4   : > { %v2023_v55 = vadd.f32 %v1893_v48, %v18957_v0  ;;  %15062 = vmatmul.mubr.msk.bf16.vlgmr.msra.gmra.mrb[144].mxu0 %vm505_vm3, %v15059_v25  ;;  %v4776_v56 = vpop.permute.xlu0 %4775  ;;  %v1895_v49 = vpop.f32.mrb[45].mxu0 }
 0x1d5   : > { %v4790_v59 = vsel %vm4787_vm11, %v4774_v43, %v4776_v56  ;;  %v19002_v60 = vadd.f32 %v1895_v49, %v18963_v18  ;;  %4823 = vmatprep.subr.bf16.mxu0 %v4803_v53  ;;  %v4778_v13 = vpop.permute.xlu1 %4777  ;;  %15063 = vmatmul.mubr.msk.bf16.vlgmr.msra.gmra.mrb[152].mxu1 %vm505_vm3, %v15059_v25  ;;  %v1897_v54 = vpop.f32.mrb[46].mxu0 }
 0x1d6   : > { %v4806_v14 = vand.u32 %v4790_v59, %v17868_v27  ;;  %v4791_v58 = vsel %vm4787_vm11, %v4776_v56, %v4778_v13  ;;  %v1898_v19 = vpop.f32.mrb[47].mxu0  ;;  %4896 = vmatprep.mubr.bf16.mxu1 %v17570_v15  ;;  %4855 = vmatprep.mubr.bf16.mxu0 %v17570_v15 }
 0x1d7   : > { %v1788_v57 = vpop.f32.mrb[48].mxu1  ;;  %v4809_v62 = vand.u32 %v4791_v58, %v17868_v27 }
 0x1d8   : > { %v1801_v61 = vadd.f32 %v1788_v57, %v1565_v28  ;;  %v4770_v0 = vpop.permute.xlu0 %4769  ;;  %v1790_v17 = vpop.f32.mrb[49].mxu1 }
 0x1d9   : > { %v4788_v4 = vsel %vm4787_vm11, %v4770_v0, %v4772_v16  ;;  %v4780_v2 = vpop.permute.xlu1 %4779  ;;  %v1802_v18 = vadd.f32 %v1790_v17, %v1566_v20  ;;  %4864 = vmatprep.subr.bf16.mxu1 %v4809_v62  ;;  %v1792_v5 = vpop.f32.mrb[50].mxu1 }
 0x1da   : > { %v4800_v10 = vand.u32 %v4788_v4, %v17868_v27  ;;  %4865 = vmatpush1.bf16.msra.mxu1 %v4806_v14  ;;  %v1793_v11 = vpop.f32.mrb[51].mxu1  ;;  %v4792_v22 = vsel %vm4787_vm11, %v4778_v13, %v4780_v2 }
 0x1db   : > { %v1975_v6 = vpop.f32.mrb[48].mxu0  ;;  %v4812_v63 = vand.u32 %v4792_v22, %v17868_v27 }
 0x1dc   : > { %v2027_v7 = vadd.f32 %v1975_v6, %v18983_v37  ;;  %v4782_v23 = vpop.permute.xlu0 %4781  ;;  %v1977_v26 = vpop.f32.mrb[49].mxu0  ;;  %4824 = vmatpush1.bf16.msra.mxu0 %v4800_v10 }
 0x1dd   : > { %v4793_v28 = vsel %vm4787_vm11, %v4780_v2, %v4782_v23  ;;  %v19018_v21 = vadd.f32 %v1977_v26, %v1800_v38  ;;  %v4784_v30 = vpop.permute.xlu1 %4783  ;;  %15066 = vmatmul.mubr.msk.bf16.vlgmr.msra.gmra.mrb[156].mxu1 %vm505_vm3, %v15064_v1  ;;  %v1979_v25 = vpop.f32.mrb[50].mxu0 }
 0x1de   : > { %v4815_v35 = vand.u32 %v4793_v28, %v17868_v27  ;;  %v1980_v20 = vpop.f32.mrb[51].mxu0  ;;  %4978 = vmatprep.mubr.bf16.mxu1 %v17570_v15  ;;  %v4794_v32 = vsel %vm4787_vm11, %v4782_v23, %v4784_v30 }
 0x1df   : > { %v1934_v34 = vpop.f32.mrb[52].mxu1  ;;  %15065 = vmatmul.mubr.msk.bf16.vlgmr.msra.gmra.mrb[148].mxu0 %vm505_vm3, %v15064_v1  ;;  %v4818_v40 = vand.u32 %v4794_v32, %v17868_v27 }
 0x1e0   : > { %v2025_v31 = vadd.f32 %v1934_v34, %v1797_v46  ;;  %v4786_v36 = vpop.permute.xlu0 %4785  ;;  %4905 = vmatprep.subr.bf16.mxu0 %v4815_v35  ;;  %v1936_v37 = vpop.f32.mrb[53].mxu1  ;;  %4937 = vmatprep.mubr.bf16.mxu0 %v17570_v15 }
 0x1e1   : > { %v4795_v29 = vsel %vm4787_vm11, %v4784_v30, %v4786_v36  ;;  %v5001_v33 = vpop.permute.xlu1 %5000  ;;  %v19028_v9 = vadd.f32 %v1936_v37, %v1798_v51  ;;  %4906 = vmatpush1.bf16.msra.mxu0 %v4812_v63  ;;  %v1938_v38 = vpop.f32.mrb[54].mxu1  ;;  %vm6307_vm11 = vcmask 1047556  }
 0x1e2   : > { %v4821_v12 = vand.u32 %v4795_v29, %v17868_v27  ;;  %v1939_v39 = vpop.f32.mrb[55].mxu1 }
 0x1e3   : > { %v2121_v41 = vpop.f32.mrb[52].mxu0 }
 0x1e4   : > { %v19032_v42 = vadd.f32 %v2121_v41, %v2023_v55  ;;  %v5003_v45 = vpop.permute.xlu0 %5002  ;;  %v2123_v47 = vpop.f32.mrb[53].mxu0  ;;  %4946 = vmatprep.subr.bf16.mxu1 %v4821_v12 }
 0x1e5   : > { %v5018_v46 = vsel %vm5016_vm13, %v5001_v33, %v5003_v45  ;;  %v19036_v16 = vadd.f32 %v2123_v47, %v19002_v60  ;;  %v5005_v50 = vpop.permute.xlu1 %5004  ;;  %4947 = vmatpush1.bf16.msra.mxu1 %v4818_v40  ;;  %v2125_v43 = vpop.f32.mrb[54].mxu0 }
 0x1e6   : > { %v5032_v51 = vand.u32 %v5018_v46, %v17868_v27  ;;  %v2126_v8 = vpop.f32.mrb[55].mxu0  ;;  %v5019_v44 = vsel %vm5016_vm13, %v5003_v45, %v5005_v50 }
 0x1e7   : > { %v2016_v52 = vpop.f32.mrb[56].mxu1  ;;  %15067 = vmatmul.mubr.msk.bf16.vlgmr.msra.gmra.mrb[152].mxu0 %vm505_vm3, %v15064_v1  ;;  %v5035_v58 = vand.u32 %v5019_v44, %v17868_v27 }
 0x1e8   : > { %v19041_v48 = vadd.f32 %v2016_v52, %v1801_v61  ;;  %v5007_v53 = vpop.permute.xlu0 %5006  ;;  %5052 = vmatprep.subr.bf16.mxu0 %v5032_v51  ;;  %v2018_v55 = vpop.f32.mrb[57].mxu1  ;;  %15068 = vmatmul.mubr.msk.bf16.vlgmr.msra.gmra.mrb[160].mxu1 %vm505_vm3, %v15064_v1 }
 0x1e9   : > { %v5020_v56 = vsel %vm5016_vm13, %v5005_v50, %v5007_v53  ;;  %v4999_v49 = vpop.permute.xlu1 %4998  ;;  %v19045_v59 = vadd.f32 %v2018_v55, %v1802_v18  ;;  %v2020_v60 = vpop.f32.mrb[58].mxu1  ;;  %5084 = vmatprep.mubr.bf16.mxu0 %v17570_v15  ;;  %5125 = vmatprep.mubr.bf16.mxu1 %v17570_v15  ;;  %v15069_v18 = vld [vmem:[%s21927_s1 + $0x50] sm:$0xf] }
 0x1ea   : > { %v5017_v13 = vsel %vm5016_vm13, %v4999_v49, %v5001_v33  ;;  %v5038_v54 = vand.u32 %v5020_v56, %v17868_v27  ;;  %v2021_v14 = vpop.f32.mrb[59].mxu1 }
 0x1eb   : > { %v5029_v19 = vand.u32 %v5017_v13, %v17868_v27  ;;  %v2203_v57 = vpop.f32.mrb[56].mxu0 }
 0x1ec   : > { %v19053_v62 = vadd.f32 %v2203_v57, %v2027_v7  ;;  %v5009_v61 = vpop.permute.xlu0 %5008  ;;  %v2205_v0 = vpop.f32.mrb[57].mxu0  ;;  %5093 = vmatprep.subr.bf16.mxu1 %v5038_v54  ;;  %v15074_v54 = vld [vmem:[%s21927_s1 + $0x54] sm:$0xf] }
 0x1ed   : > { %v5021_v17 = vsel %vm5016_vm13, %v5007_v53, %v5009_v61  ;;  %v19057_v4 = vadd.f32 %v2205_v0, %v19018_v21  ;;  %5053 = vmatpush1.bf16.msra.mxu0 %v5029_v19  ;;  %v5011_v2 = vpop.permute.xlu1 %5010  ;;  %5094 = vmatpush1.bf16.msra.mxu1 %v5035_v58  ;;  %v2207_v5 = vpop.f32.mrb[58].mxu0 }
 0x1ee   : > { %v5041_v10 = vand.u32 %v5021_v17, %v17868_v27  ;;  %v5022_v1 = vsel %vm5016_vm13, %v5009_v61, %v5011_v2  ;;  %v2208_v11 = vpop.f32.mrb[59].mxu0 }
 0x1ef   : > { %v2162_v6 = vpop.f32.mrb[60].mxu1  ;;  %v5044_v22 = vand.u32 %v5022_v1, %v17868_v27 }
 0x1f0   : > { %v19065_v7 = vadd.f32 %v2162_v6, %v2025_v31  ;;  %15070 = vmatmul.mubr.msk.bf16.vlgmr.msra.gmra.mrb[156].mxu0 %vm505_vm3, %v15069_v18  ;;  %v5013_v23 = vpop.permute.xlu0 %5012  ;;  %v2164_v26 = vpop.f32.mrb[61].mxu1  ;;  %15071 = vmatmul.mubr.msk.bf16.vlgmr.msra.gmra.mrb[164].mxu1 %vm505_vm3, %v15069_v18 }
 0x1f1   : > { %v5023_v28 = vsel %vm5016_vm13, %v5011_v2, %v5013_v23  ;;  %5134 = vmatprep.subr.bf16.mxu0 %v5044_v22  ;;  %v5015_v21 = vpop.permute.xlu1 %5014  ;;  %v2254_v30 = vadd.f32 %v2164_v26, %v19028_v9  ;;  %v2166_v25 = vpop.f32.mrb[62].mxu1  ;;  %5166 = vmatprep.mubr.bf16.mxu0 %v17570_v15 }
 0x1f2   : > { %v5047_v35 = vand.u32 %v5023_v28, %v17868_v27  ;;  %v5024_v20 = vsel %vm5016_vm13, %v5013_v23, %v5015_v21  ;;  %5135 = vmatpush1.bf16.msra.mxu0 %v5041_v10  ;;  %v2167_v63 = vpop.f32.mrb[63].mxu1  ;;  %5207 = vmatprep.mubr.bf16.mxu1 %v17570_v15 }
 0x1f3   : > { %v5050_v34 = vand.u32 %v5024_v20, %v17868_v27  ;;  %v2349_v32 = vpop.f32.mrb[60].mxu0 }
 0x1f4   : > { %v2479_v31 = vadd.f32 %v2349_v32, %v19032_v42  ;;  %v5229_v36 = vpop.permute.xlu0 %5228  ;;  %v2351_v37 = vpop.f32.mrb[61].mxu0 }
 0x1f5   : > { %v19078_v29 = vadd.f32 %v2351_v37, %v19036_v16  ;;  %v5231_v33 = vpop.permute.xlu1 %5230  ;;  %5175 = vmatprep.subr.bf16.mxu1 %v5050_v34  ;;  %v2353_v9 = vpop.f32.mrb[62].mxu0 }
 0x1f6   : > { %v5246_v38 = vsel %vm5244_vm15, %v5229_v36, %v5231_v33  ;;  %5176 = vmatpush1.bf16.msra.mxu1 %v5047_v35  ;;  %v2354_v12 = vpop.f32.mrb[63].mxu0 }
 0x1f7   : > { %v2244_v39 = vpop.f32.mrb[64].mxu1  ;;  %v5260_v40 = vand.u32 %v5246_v38, %v17868_v27 }
 0x1f8   : > { %v2257_v41 = vadd.f32 %v2244_v39, %v19041_v48  ;;  %15072 = vmatmul.mubr.msk.bf16.vlgmr.msra.gmra.mrb[160].mxu0 %vm505_vm3, %v15069_v18  ;;  %v5233_v42 = vpop.permute.xlu0 %5232  ;;  %v2246_v45 = vpop.f32.mrb[65].mxu1 }
 0x1f9   : > { %v5247_v47 = vsel %vm5244_vm15, %v5231_v33, %v5233_v42  ;;  %5280 = vmatprep.subr.bf16.mxu0 %v5260_v40  ;;  %v5235_v46 = vpop.permute.xlu1 %5234  ;;  %v2258_v16 = vadd.f32 %v2246_v45, %v19045_v59  ;;  %15073 = vmatmul.mubr.msk.bf16.vlgmr.msra.gmra.mrb[168].mxu1 %vm505_vm3, %v15069_v18  ;;  %v2248_v50 = vpop.f32.mrb[66].mxu1  ;;  %v6136_v33 = vld [vmem:[%s21928_s2] sm:$0x7f] }
 0x1fa   : > { %v5263_v43 = vand.u32 %v5247_v47, %v17868_v27  ;;  %v5248_v51 = vsel %vm5244_vm15, %v5233_v42, %v5235_v46  ;;  %v2249_v8 = vpop.f32.mrb[67].mxu1  ;;  %5353 = vmatprep.mubr.bf16.mxu1 %v17570_v15  ;;  %5312 = vmatprep.mubr.bf16.mxu0 %v17570_v15 }
 0x1fb   : > { %v2431_v52 = vpop.f32.mrb[64].mxu0  ;;  %v5266_v44 = vand.u32 %v5248_v51, %v17868_v27  ;;  %6139 = vperm.xlu0 %17213, %v6136_v33  }
 0x1fc   : > { %v2483_v48 = vadd.f32 %v2431_v52, %v19053_v62  ;;  %v5227_v53 = vpop.permute.xlu0 %5226  ;;  %v2433_v55 = vpop.f32.mrb[65].mxu0 }
 0x1fd   : > { %v5245_v56 = vsel %vm5244_vm15, %v5227_v53, %v5229_v36  ;;  %v19095_v49 = vadd.f32 %v2433_v55, %v19057_v4  ;;  %v5237_v59 = vpop.permute.xlu1 %5236  ;;  %5321 = vmatprep.subr.bf16.mxu1 %v5266_v44  ;;  %v2435_v60 = vpop.f32.mrb[66].mxu0 }
 0x1fe   : > { %v5257_v13 = vand.u32 %v5245_v56, %v17868_v27  ;;  %5322 = vmatpush1.bf16.msra.mxu1 %v5263_v43  ;;  %v2436_v14 = vpop.f32.mrb[67].mxu0  ;;  %v5249_v19 = vsel %vm5244_vm15, %v5235_v46, %v5237_v59  ;;  %v15079_v60 = vld [vmem:[%s21927_s1 + $0x58] sm:$0xf] }
 0x1ff   : > { %v2390_v58 = vpop.f32.mrb[68].mxu1  ;;  %v5269_v10 = vand.u32 %v5249_v19, %v17868_v27 }
 0x200   : > { %v19103_v57 = vadd.f32 %v2390_v58, %v19065_v7  ;;  %v5239_v62 = vpop.permute.xlu0 %5238  ;;  %5281 = vmatpush1.bf16.msra.mxu0 %v5257_v13  ;;  %v2392_v61 = vpop.f32.mrb[69].mxu1 }
 0x201   : > { %v5250_v0 = vsel %vm5244_vm15, %v5237_v59, %v5239_v62  ;;  %v5241_v17 = vpop.permute.xlu1 %5240  ;;  %v19106_v4 = vadd.f32 %v2392_v61, %v2254_v30  ;;  %15076 = vmatmul.mubr.msk.bf16.vlgmr.msra.gmra.mrb[172].mxu1 %vm505_vm3, %v15074_v54  ;;  %v2394_v2 = vpop.f32.mrb[70].mxu1 }
 0x202   : > { %v5272_v18 = vand.u32 %v5250_v0, %v17868_v27  ;;  %v2395_v5 = vpop.f32.mrb[71].mxu1  ;;  %5435 = vmatprep.mubr.bf16.mxu1 %v17570_v15  ;;  %v5251_v11 = vsel %vm5244_vm15, %v5239_v62, %v5241_v17 }
 0x203   : > { %v2577_v1 = vpop.f32.mrb[68].mxu0  ;;  %15075 = vmatmul.mubr.msk.bf16.vlgmr.msra.gmra.mrb[164].mxu0 %vm505_vm3, %v15074_v54  ;;  %v5275_v35 = vand.u32 %v5251_v11, %v17868_v27 }
 0x204   : > { %v19114_v6 = vadd.f32 %v2577_v1, %v2479_v31  ;;  %v5243_v22 = vpop.permute.xlu0 %5242  ;;  %v2579_v7 = vpop.f32.mrb[69].mxu0  ;;  %5362 = vmatprep.subr.bf16.mxu0 %v5272_v18  ;;  %5394 = vmatprep.mubr.bf16.mxu0 %v17570_v15 }
 0x205   : > { %v5252_v23 = vsel %vm5244_vm15, %v5241_v17, %v5243_v22  ;;  %v19119_v26 = vadd.f32 %v2579_v7, %v19078_v29  ;;  %v5457_v28 = vpop.permute.xlu1 %5456  ;;  %5363 = vmatpush1.bf16.msra.mxu0 %v5269_v10  ;;  %v2581_v21 = vpop.f32.mrb[70].mxu0 }
 0x206   : > { %v5278_v30 = vand.u32 %v5252_v23, %v17868_v27  ;;  %v2582_v25 = vpop.f32.mrb[71].mxu0 }
 0x207   : > { %v2472_v20 = vpop.f32.mrb[72].mxu1 }
 0x208   : > { %v19123_v63 = vadd.f32 %v2472_v20, %v2257_v41  ;;  %v5459_v34 = vpop.permute.xlu0 %5458  ;;  %v2474_v32 = vpop.f32.mrb[73].mxu1  ;;  %5403 = vmatprep.subr.bf16.mxu1 %v5278_v30 }
 0x209   : > { %v5474_v31 = vsel %vm5472_vm5, %v5457_v28, %v5459_v34  ;;  %v5461_v36 = vpop.permute.xlu1 %5460  ;;  %v19126_v37 = vadd.f32 %v2474_v32, %v2258_v16  ;;  %5404 = vmatpush1.bf16.msra.mxu1 %v5275_v35  ;;  %v2476_v29 = vpop.f32.mrb[74].mxu1 }
 0x20a   : > { %v5488_v9 = vand.u32 %v5474_v31, %v17868_v27  ;;  %v2477_v38 = vpop.f32.mrb[75].mxu1  ;;  %v5475_v39 = vsel %vm5472_vm5, %v5459_v34, %v5461_v36 }
 0x20b   : > { %v2659_v12 = vpop.f32.mrb[72].mxu0  ;;  %15077 = vmatmul.mubr.msk.bf16.vlgmr.msra.gmra.mrb[168].mxu0 %vm505_vm3, %v15074_v54  ;;  %v5491_v8 = vand.u32 %v5475_v39, %v17868_v27 }
 0x20c   : > { %v19134_v40 = vadd.f32 %v2659_v12, %v2483_v48  ;;  %v5463_v41 = vpop.permute.xlu0 %5462  ;;  %v2661_v42 = vpop.f32.mrb[73].mxu0  ;;  %5508 = vmatprep.subr.bf16.mxu0 %v5488_v9  ;;  %15078 = vmatmul.mubr.msk.bf16.vlgmr.msra.gmra.mrb[176].mxu1 %vm505_vm3, %v15074_v54 }
 0x20d   : > { %v5476_v45 = vsel %vm5472_vm5, %v5461_v36, %v5463_v41  ;;  %v19139_v47 = vadd.f32 %v2661_v42, %v19095_v49  ;;  %v5455_v46 = vpop.permute.xlu1 %5454  ;;  %v2663_v16 = vpop.f32.mrb[74].mxu0  ;;  %5540 = vmatprep.mubr.bf16.mxu0 %v17570_v15  ;;  %5581 = vmatprep.mubr.bf16.mxu1 %v17570_v15 }
 0x20e   : > { %v5473_v50 = vsel %vm5472_vm5, %v5455_v46, %v5457_v28  ;;  %v5494_v43 = vand.u32 %v5476_v45, %v17868_v27  ;;  %v2664_v51 = vpop.f32.mrb[75].mxu0 }
 0x20f   : > { %v5485_v52 = vand.u32 %v5473_v50, %v17868_v27  ;;  %v2618_v44 = vpop.f32.mrb[76].mxu1 }
 0x210   : > { %v19148_v48 = vadd.f32 %v2618_v44, %v19103_v57  ;;  %v5465_v53 = vpop.permute.xlu0 %5464  ;;  %v2620_v55 = vpop.f32.mrb[77].mxu1  ;;  %5549 = vmatprep.subr.bf16.mxu1 %v5494_v43  ;;  %v15084_v43 = vld [vmem:[%s21927_s1 + $0x5c] sm:$0xf] }
 0x211   : > { %v5477_v56 = vsel %vm5472_vm5, %v5463_v41, %v5465_v53  ;;  %5509 = vmatpush1.bf16.msra.mxu0 %v5485_v52  ;;  %v5467_v49 = vpop.permute.xlu1 %5466  ;;  %v2710_v59 = vadd.f32 %v2620_v55, %v19106_v4  ;;  %5550 = vmatpush1.bf16.msra.mxu1 %v5491_v8  ;;  %v2622_v13 = vpop.f32.mrb[78].mxu1 }
 0x212   : > { %v5497_v54 = vand.u32 %v5477_v56, %v17868_v27  ;;  %v5478_v14 = vsel %vm5472_vm5, %v5465_v53, %v5467_v49  ;;  %v2623_v58 = vpop.f32.mrb[79].mxu1 }
 0x213   : > { %v2805_v19 = vpop.f32.mrb[76].mxu0  ;;  %v5500_v57 = vand.u32 %v5478_v14, %v17868_v27 }
 0x214   : > { %v19159_v62 = vadd.f32 %v2805_v19, %v19114_v6  ;;  %15080 = vmatmul.mubr.msk.bf16.vlgmr.msra.gmra.mrb[172].mxu0 %vm505_vm3, %v15079_v60  ;;  %v5469_v61 = vpop.permute.xlu0 %5468  ;;  %v2807_v0 = vpop.f32.mrb[77].mxu0  ;;  %15081 = vmatmul.mubr.msk.bf16.vlgmr.msra.gmra.mrb[180].mxu1 %vm505_vm3, %v15079_v60 }
 0x215   : > { %v5479_v17 = vsel %vm5472_vm5, %v5467_v49, %v5469_v61  ;;  %v2936_v4 = vadd.f32 %v2807_v0, %v19119_v26  ;;  %5590 = vmatprep.subr.bf16.mxu0 %v5500_v57  ;;  %v5471_v2 = vpop.permute.xlu1 %5470  ;;  %v2809_v18 = vpop.f32.mrb[78].mxu0  ;;  %5622 = vmatprep.mubr.bf16.mxu0 %v17570_v15 }
 0x216   : > { %v5503_v5 = vand.u32 %v5479_v17, %v17868_v27  ;;  %v5480_v10 = vsel %vm5472_vm5, %v5469_v61, %v5471_v2  ;;  %5591 = vmatpush1.bf16.msra.mxu0 %v5497_v54  ;;  %v2810_v1 = vpop.f32.mrb[79].mxu0  ;;  %5663 = vmatprep.mubr.bf16.mxu1 %v17570_v15 }
 0x217   : > { %v5506_v11 = vand.u32 %v5480_v10, %v17868_v27  ;;  %v2700_v6 = vpop.f32.mrb[80].mxu1 }
 0x218   : > { %v2713_v22 = vadd.f32 %v2700_v6, %v19123_v63  ;;  %v5685_v7 = vpop.permute.xlu0 %5684  ;;  %v2702_v23 = vpop.f32.mrb[81].mxu1 }
 0x219   : > { %v5687_v26 = vpop.permute.xlu1 %5686  ;;  %v2714_v28 = vadd.f32 %v2702_v23, %v19126_v37  ;;  %5631 = vmatprep.subr.bf16.mxu1 %v5506_v11  ;;  %v2704_v21 = vpop.f32.mrb[82].mxu1 }
 0x21a   : > { %v5702_v30 = vsel %vm5700_vm8, %v5685_v7, %v5687_v26  ;;  %5632 = vmatpush1.bf16.msra.mxu1 %v5503_v5  ;;  %v2705_v25 = vpop.f32.mrb[83].mxu1 }
 0x21b   : > { %v2887_v35 = vpop.f32.mrb[80].mxu0  ;;  %v5716_v20 = vand.u32 %v5702_v30, %v17868_v27 }
 0x21c   : > { %v2939_v34 = vadd.f32 %v2887_v35, %v19134_v40  ;;  %15082 = vmatmul.mubr.msk.bf16.vlgmr.msra.gmra.mrb[176].mxu0 %vm505_vm3, %v15079_v60  ;;  %v5689_v32 = vpop.permute.xlu0 %5688  ;;  %v2889_v63 = vpop.f32.mrb[81].mxu0 }
 0x21d   : > { %v5703_v31 = vsel %vm5700_vm8, %v5687_v26, %v5689_v32  ;;  %v19178_v36 = vadd.f32 %v2889_v63, %v19139_v47  ;;  %5736 = vmatprep.subr.bf16.mxu0 %v5716_v20  ;;  %v5691_v37 = vpop.permute.xlu1 %5690  ;;  %15083 = vmatmul.mubr.msk.bf16.vlgmr.msra.gmra.mrb[184].mxu1 %vm505_vm3, %v15079_v60  ;;  %v2891_v29 = vpop.f32.mrb[82].mxu0 }
 0x21e   : > { %v5719_v33 = vand.u32 %v5703_v31, %v17868_v27  ;;  %v5704_v9 = vsel %vm5700_vm8, %v5689_v32, %v5691_v37  ;;  %v2892_v38 = vpop.f32.mrb[83].mxu0  ;;  %5809 = vmatprep.mubr.bf16.mxu1 %v17570_v15  ;;  %5768 = vmatprep.mubr.bf16.mxu0 %v17570_v15 }
 0x21f   : > { %v2846_v12 = vpop.f32.mrb[84].mxu1  ;;  %v5722_v39 = vand.u32 %v5704_v9, %v17868_v27 }
 0x220   : > { %v2937_v40 = vadd.f32 %v2846_v12, %v19148_v48  ;;  %v5683_v41 = vpop.permute.xlu0 %5682  ;;  %v2848_v42 = vpop.f32.mrb[85].mxu1 }
 0x221   : > { %v5701_v45 = vsel %vm5700_vm8, %v5683_v41, %v5685_v7  ;;  %v5693_v47 = vpop.permute.xlu1 %5692  ;;  %v2938_v46 = vadd.f32 %v2848_v42, %v2710_v59  ;;  %5777 = vmatprep.subr.bf16.mxu1 %v5722_v39  ;;  %v2850_v16 = vpop.f32.mrb[86].mxu1 }
 0x222   : > { %v5713_v50 = vand.u32 %v5701_v45, %v17868_v27  ;;  %5778 = vmatpush1.bf16.msra.mxu1 %v5719_v33  ;;  %v2851_v51 = vpop.f32.mrb[87].mxu1  ;;  %v5705_v52 = vsel %vm5700_vm8, %v5691_v37, %v5693_v47 }
 0x223   : > { %v3033_v8 = vpop.f32.mrb[84].mxu0  ;;  %v5725_v54 = vand.u32 %v5705_v52, %v17868_v27 }
 0x224   : > { %v3163_v44 = vadd.f32 %v3033_v8, %v19159_v62  ;;  %v5695_v48 = vpop.permute.xlu0 %5694  ;;  %v3035_v53 = vpop.f32.mrb[85].mxu0  ;;  %5737 = vmatpush1.bf16.msra.mxu0 %v5713_v50 }
 0x225   : > { %v5706_v55 = vsel %vm5700_vm8, %v5693_v47, %v5695_v48  ;;  %v19195_v56 = vadd.f32 %v3035_v53, %v2936_v4  ;;  %v5697_v49 = vpop.permute.xlu1 %5696  ;;  %15086 = vmatmul.mubr.msk.bf16.vlgmr.msra.gmra.mrb[188].mxu1 %vm505_vm3, %v15084_v43  ;;  %v3037_v59 = vpop.f32.mrb[86].mxu0 }
 0x226   : > { %v5728_v60 = vand.u32 %v5706_v55, %v17868_v27  ;;  %v3038_v13 = vpop.f32.mrb[87].mxu0  ;;  %5891 = vmatprep.mubr.bf16.mxu1 %v17570_v15  ;;  %v5707_v58 = vsel %vm5700_vm8, %v5695_v48, %v5697_v49 }
 0x227   : > { %v2928_v14 = vpop.f32.mrb[88].mxu1  ;;  %15085 = vmatmul.mubr.msk.bf16.vlgmr.msra.gmra.mrb[180].mxu0 %vm505_vm3, %v15084_v43  ;;  %v5731_v5 = vand.u32 %v5707_v58, %v17868_v27 }
 0x228   : > { %v2941_v19 = vadd.f32 %v2928_v14, %v2713_v22  ;;  %v5699_v57 = vpop.permute.xlu0 %5698  ;;  %5818 = vmatprep.subr.bf16.mxu0 %v5728_v60  ;;  %v2930_v62 = vpop.f32.mrb[89].mxu1  ;;  %5850 = vmatprep.mubr.bf16.mxu0 %v17570_v15 }
 0x229   : > { %v5708_v61 = vsel %vm5700_vm8, %v5697_v49, %v5699_v57  ;;  %v5913_v0 = vpop.permute.xlu1 %5912  ;;  %v19205_v17 = vadd.f32 %v2930_v62, %v2714_v28  ;;  %5819 = vmatpush1.bf16.msra.mxu0 %v5725_v54  ;;  %v2932_v4 = vpop.f32.mrb[90].mxu1  ;;  %vm6308_vm8 = vsmask.f32 7424 }
 0x22a   : > { %v5734_v2 = vand.u32 %v5708_v61, %v17868_v27  ;;  %v2933_v18 = vpop.f32.mrb[91].mxu1  ;;  %vm6309_vm0 = vmand %vm6307_vm11, %vm6308_vm8 }
 0x22b   : > { %v3115_v10 = vpop.f32.mrb[88].mxu0 }
 0x22c   : > { %v19209_v1 = vadd.f32 %v3115_v10, %v2939_v34  ;;  %v5915_v11 = vpop.permute.xlu0 %5914  ;;  %v3117_v6 = vpop.f32.mrb[89].mxu0  ;;  %5859 = vmatprep.subr.bf16.mxu1 %v5734_v2 }
 0x22d   : > { %v5930_v22 = vsel %vm21903_vm9, %v5913_v0, %v5915_v11  ;;  %v3168_v7 = vadd.f32 %v3117_v6, %v19178_v36  ;;  %v5917_v23 = vpop.permute.xlu1 %5916  ;;  %5860 = vmatpush1.bf16.msra.mxu1 %v5731_v5  ;;  %v3119_v26 = vpop.f32.mrb[90].mxu0 }
 0x22e   : > { %v5944_v28 = vand.u32 %v5930_v22, %v17868_v27  ;;  %v3120_v21 = vpop.f32.mrb[91].mxu0  ;;  %v5931_v25 = vsel %vm21903_vm9, %v5915_v11, %v5917_v23 }
 0x22f   : > { %v3074_v30 = vpop.f32.mrb[92].mxu1  ;;  %15087 = vmatmul.mubr.msk.bf16.vlgmr.msra.gmra.mrb[184].mxu0 %vm505_vm3, %v15084_v43  ;;  %v5947_v9 = vand.u32 %v5931_v25, %v17868_v27 }
 0x230   : > { %v3165_v35 = vadd.f32 %v3074_v30, %v2937_v40  ;;  %v5919_v20 = vpop.permute.xlu0 %5918  ;;  %5964 = vmatprep.subr.bf16.mxu0 %v5944_v28  ;;  %v3076_v34 = vpop.f32.mrb[93].mxu1  ;;  %15088 = vmatmul.mubr.msk.bf16.vlgmr.msra.gmra.mrb[192].mxu1 %vm505_vm3, %v15084_v43 }
 0x231   : > { %v5932_v32 = vsel %vm21903_vm9, %v5917_v23, %v5919_v20  ;;  %v5911_v63 = vpop.permute.xlu1 %5910  ;;  %v3166_v31 = vadd.f32 %v3076_v34, %v2938_v46  ;;  %v3078_v36 = vpop.f32.mrb[94].mxu1  ;;  %5996 = vmatprep.mubr.bf16.mxu0 %v17570_v15  ;;  %6037 = vmatprep.mubr.bf16.mxu1 %v17570_v15  ;;  %v15089_v46 = vld [vmem:[%s21927_s1 + $0x60] sm:$0xf]  ;;  %s431_s1 = sand.u32 1, %s17558_s26  }
 0x232   : > { %v5929_v37 = vsel %vm21903_vm9, %v5911_v63, %v5913_v0  ;;  %v5950_v29 = vand.u32 %v5932_v32, %v17868_v27  ;;  %v3079_v33 = vpop.f32.mrb[95].mxu1 }
 0x233   : > { %v5941_v38 = vand.u32 %v5929_v37, %v17868_v27  ;;  %v3261_v12 = vpop.f32.mrb[92].mxu0 }
 0x234   : > { %v3391_v39 = vadd.f32 %v3261_v12, %v3163_v44  ;;  %v5921_v40 = vpop.permute.xlu0 %5920  ;;  %v3263_v41 = vpop.f32.mrb[93].mxu0  ;;  %6005 = vmatprep.subr.bf16.mxu1 %v5950_v29 }
 0x235   : > { %v5933_v42 = vsel %vm21903_vm9, %v5919_v20, %v5921_v40  ;;  %v3392_v45 = vadd.f32 %v3263_v41, %v19195_v56  ;;  %5965 = vmatpush1.bf16.msra.mxu0 %v5941_v38  ;;  %v5923_v47 = vpop.permute.xlu1 %5922  ;;  %6006 = vmatpush1.bf16.msra.mxu1 %v5947_v9  ;;  %v3265_v16 = vpop.f32.mrb[94].mxu0 }
 0x236   : > { %v5953_v50 = vand.u32 %v5933_v42, %v17868_v27  ;;  %v5934_v43 = vsel %vm21903_vm9, %v5921_v40, %v5923_v47  ;;  %v3266_v51 = vpop.f32.mrb[95].mxu0 }
 0x237   : > { %v3156_v8 = vpop.f32.mrb[96].mxu1  ;;  %v5956_v52 = vand.u32 %v5934_v43, %v17868_v27 }
 0x238   : > { %v3169_v44 = vadd.f32 %v3156_v8, %v2941_v19  ;;  %15090 = vmatmul.mubr.msk.bf16.vlgmr.msra.gmra.mrb[188].mxu0 %vm505_vm3, %v15089_v46  ;;  %v5925_v48 = vpop.permute.xlu0 %5924  ;;  %v3158_v53 = vpop.f32.mrb[97].mxu1  ;;  %15091 = vmatmul.mubr.msk.bf16.vlgmr.msra.gmra.mrb[196].mxu1 %vm505_vm3, %v15089_v46 }
 0x239   : > { %v5935_v55 = vsel %vm21903_vm9, %v5923_v47, %v5925_v48  ;;  %6046 = vmatprep.subr.bf16.mxu0 %v5956_v52  ;;  %v5927_v56 = vpop.permute.xlu1 %5926  ;;  %v3170_v49 = vadd.f32 %v3158_v53, %v19205_v17  ;;  %v3160_v59 = vpop.f32.mrb[98].mxu1  ;;  %6078 = vmatprep.mubr.bf16.mxu0 %v17570_v15 }
 0x23a   : > { %v5959_v60 = vand.u32 %v5935_v55, %v17868_v27  ;;  %v5936_v13 = vsel %vm21903_vm9, %v5925_v48, %v5927_v56  ;;  %6047 = vmatpush1.bf16.msra.mxu0 %v5953_v50  ;;  %v3161_v54 = vpop.f32.mrb[99].mxu1  ;;  %6119 = vmatprep.mubr.bf16.mxu1 %v17570_v15 }
 0x23b   : > { %v5962_v14 = vand.u32 %v5936_v13, %v17868_v27  ;;  %v3343_v58 = vpop.f32.mrb[96].mxu0 }
 0x23c   : > { %v3395_v19 = vadd.f32 %v3343_v58, %v19209_v1  ;;  %v3345_v57 = vpop.f32.mrb[97].mxu0 }
 0x23d   : > { %v3396_v62 = vadd.f32 %v3345_v57, %v3168_v7  ;;  %6087 = vmatprep.subr.bf16.mxu1 %v5962_v14  ;;  %v3347_v61 = vpop.f32.mrb[98].mxu0 }
 0x23e   : > { %6088 = vmatpush1.bf16.msra.mxu1 %v5959_v60  ;;  %v3348_v0 = vpop.f32.mrb[99].mxu0 }
 0x23f   : > { %v3302_v17 = vpop.f32.mrb[100].mxu1 }
 0x240   : > { %v3393_v4 = vadd.f32 %v3302_v17, %v3165_v35  ;;  %15092 = vmatmul.mubr.msk.bf16.vlgmr.msra.gmra.mrb[192].mxu0 %vm505_vm3, %v15089_v46  ;;  %v3304_v2 = vpop.f32.mrb[101].mxu1 }
 0x241   : > { %v3394_v18 = vadd.f32 %v3304_v2, %v3166_v31  ;;  %15093 = vmatmul.mubr.msk.bf16.vlgmr.msra.gmra.mrb[200].mxu1 %vm505_vm3, %v15089_v46  ;;  %v3306_v5 = vpop.f32.mrb[102].mxu1  ;;  %6508 = vmatprep.mubr.bf16.mxu0 %v17570_v15  ;;  %vm6304_vm3 = vcmask 1043456  }
 0x242   : > { %v3307_v27 = vpop.f32.mrb[103].mxu1  ;;  %6561 = vmatprep.mubr.bf16.mxu1 %v17570_v15  ;;  %vm19263_vm15 = vmand %vm6304_vm3, %vm6305_vm10 }
 0x243   : > { %vm19270_vm9 = vmor %vm6309_vm0, %vm19263_vm15  ;;  %vm6367_vm0 = vcmask 719876  }
 0x244   : > { %vm19302_vm10 = vmand %vm6367_vm0, %vm6308_vm8  ;;  %vm6995_vm8 = vcmask 539648   ;;  %vm7308_vm0 = vcmask 523264  }
 0x245   : > { %vm6369_vm11 = vmor %vm19302_vm10, %vm19263_vm15  ;;  %vm6714_vm15 = vcmask 572416   ;;  %vm7626_vm10 = vcmask 15360  }
 0x246   : > { %v3489_v10 = vpop.f32.mrb[100].mxu0 }
 0x247   : > { %v3619_v1 = vadd.f32 %v3489_v10, %v3391_v39  ;;  %v3384_v11 = vpop.f32.mrb[104].mxu1  ;;  %v3491_v6 = vpop.f32.mrb[101].mxu0 }
 0x248   : > { %v3397_v22 = vadd.f32 %v3384_v11, %v3169_v44  ;;  %v3620_v7 = vadd.f32 %v3491_v6, %v3392_v45  ;;  %v3386_v23 = vpop.f32.mrb[105].mxu1  ;;  %v3493_v26 = vpop.f32.mrb[102].mxu0 }
 0x249   : > { %v3398_v28 = vadd.f32 %v3386_v23, %v3170_v49  ;;  %v3388_v21 = vpop.f32.mrb[106].mxu1  ;;  %v3494_v30 = vpop.f32.mrb[103].mxu0 }
 0x24a   : > { %v3389_v25 = vpop.f32.mrb[107].mxu1 }
 0x24e   : > { %v3571_v35 = vpop.f32.mrb[104].mxu0 }
 0x24f   : > { %v3623_v20 = vadd.f32 %v3571_v35, %v3395_v19  ;;  %v3530_v34 = vpop.f32.mrb[108].mxu1  ;;  %v3573_v32 = vpop.f32.mrb[105].mxu0 }
 0x250   : > { %v3621_v63 = vadd.f32 %v3530_v34, %v3393_v4  ;;  %v3624_v31 = vadd.f32 %v3573_v32, %v3396_v62  ;;  %v3532_v36 = vpop.f32.mrb[109].mxu1  ;;  %v3575_v37 = vpop.f32.mrb[106].mxu0 }
 0x251   : > { %v3622_v29 = vadd.f32 %v3532_v36, %v3394_v18  ;;  %v3534_v33 = vpop.f32.mrb[110].mxu1  ;;  %v3576_v9 = vpop.f32.mrb[107].mxu0 }
 0x252   : > { %v3535_v38 = vpop.f32.mrb[111].mxu1 }
 0x257   : > { %v3717_v12 = vpop.f32.mrb[108].mxu0  ;;  %v3612_v39 = vpop.f32.mrb[112].mxu1 }
 0x258   : > { %v3847_v40 = vadd.f32 %v3717_v12, %v3619_v1  ;;  %v3625_v41 = vadd.f32 %v3612_v39, %v3397_v22  ;;  %v3719_v42 = vpop.f32.mrb[109].mxu0  ;;  %v3614_v45 = vpop.f32.mrb[113].mxu1 }
 0x259   : > { %v3848_v47 = vadd.f32 %v3719_v42, %v3620_v7  ;;  %v3626_v46 = vadd.f32 %v3614_v45, %v3398_v28  ;;  %v3721_v16 = vpop.f32.mrb[110].mxu0  ;;  %v3616_v50 = vpop.f32.mrb[114].mxu1 }
 0x25a   : > { %v3722_v43 = vpop.f32.mrb[111].mxu0  ;;  %v3617_v51 = vpop.f32.mrb[115].mxu1 }
 0x25f   : > { %v3799_v8 = vpop.f32.mrb[112].mxu0  ;;  %v3758_v52 = vpop.f32.mrb[116].mxu1 }
 0x260   : > { %v3851_v44 = vadd.f32 %v3799_v8, %v3623_v20  ;;  %v3849_v48 = vadd.f32 %v3758_v52, %v3621_v63  ;;  %v3801_v53 = vpop.f32.mrb[113].mxu0  ;;  %v3760_v55 = vpop.f32.mrb[117].mxu1 }
 0x261   : > { %v3852_v56 = vadd.f32 %v3801_v53, %v3624_v31  ;;  %v3850_v49 = vadd.f32 %v3760_v55, %v3622_v29  ;;  %v3762_v59 = vpop.f32.mrb[118].mxu1  ;;  %v3803_v60 = vpop.f32.mrb[114].mxu0 }
 0x262   : > { %v3763_v13 = vpop.f32.mrb[119].mxu1  ;;  %v3804_v54 = vpop.f32.mrb[115].mxu0 }
 0x267   : > { %v3840_v14 = vpop.f32.mrb[120].mxu1 }
 0x268   : > { %v3853_v58 = vadd.f32 %v3840_v14, %v3625_v41  ;;  %v3842_v19 = vpop.f32.mrb[121].mxu1 }
 0x269   : > { %v3854_v57 = vadd.f32 %v3842_v19, %v3626_v46  ;;  %v3844_v62 = vpop.f32.mrb[122].mxu1 }
 0x26a   : > { %v3945_v61 = vpop.f32.mrb[116].mxu0  ;;  %v3845_v0 = vpop.f32.mrb[123].mxu1 }
 0x26b   : > { %v4075_v17 = vadd.f32 %v3945_v61, %v3847_v40  ;;  %v3947_v4 = vpop.f32.mrb[117].mxu0 }
 0x26c   : > { %v4076_v2 = vadd.f32 %v3947_v4, %v3848_v47  ;;  %v3949_v18 = vpop.f32.mrb[118].mxu0 }
 0x26d   : > { %v3950_v5 = vpop.f32.mrb[119].mxu0 }
 0x26f   : > { %v3986_v27 = vpop.f32.mrb[124].mxu1 }
 0x270   : > { %v4077_v10 = vadd.f32 %v3986_v27, %v3849_v48  ;;  %v3988_v1 = vpop.f32.mrb[125].mxu1 }
 0x271   : > { %v4078_v11 = vadd.f32 %v3988_v1, %v3850_v49  ;;  %v3990_v6 = vpop.f32.mrb[126].mxu1 }
 0x272   : > { %v4027_v22 = vpop.f32.mrb[120].mxu0  ;;  %v3991_v7 = vpop.f32.mrb[127].mxu1 }
 0x273   : > { %v4079_v23 = vadd.f32 %v4027_v22, %v3851_v44  ;;  %v4029_v26 = vpop.f32.mrb[121].mxu0 }
 0x274   : > { %v4080_v28 = vadd.f32 %v4029_v26, %v3852_v56  ;;  %v4031_v21 = vpop.f32.mrb[122].mxu0 }
 0x275   : > { %v4032_v30 = vpop.f32.mrb[123].mxu0 }
 0x277   : > { %v4068_v25 = vpop.f32.mrb[128].mxu1 }
 0x278   : > { %v4081_v35 = vadd.f32 %v4068_v25, %v3853_v58  ;;  %v4070_v20 = vpop.f32.mrb[129].mxu1 }
 0x279   : > { %v4082_v34 = vadd.f32 %v4070_v20, %v3854_v57  ;;  %v4072_v32 = vpop.f32.mrb[130].mxu1 }
 0x27a   : > { %v4073_v63 = vpop.f32.mrb[131].mxu1 }
 0x27b   : > { %v4173_v31 = vpop.f32.mrb[124].mxu0 }
 0x27c   : > { %v4303_v36 = vadd.f32 %v4173_v31, %v4075_v17  ;;  %v4175_v37 = vpop.f32.mrb[125].mxu0 }
 0x27d   : > { %v4304_v29 = vadd.f32 %v4175_v37, %v4076_v2  ;;  %v4177_v33 = vpop.f32.mrb[126].mxu0 }
 0x27e   : > { %v4178_v9 = vpop.f32.mrb[127].mxu0 }
 0x27f   : > { %v4214_v38 = vpop.f32.mrb[132].mxu1 }
 0x280   : > { %v4305_v12 = vadd.f32 %v4214_v38, %v4077_v10  ;;  %v4216_v39 = vpop.f32.mrb[133].mxu1 }
 0x281   : > { %v4306_v40 = vadd.f32 %v4216_v39, %v4078_v11  ;;  %v4218_v41 = vpop.f32.mrb[134].mxu1 }
 0x282   : > { %v4219_v42 = vpop.f32.mrb[135].mxu1 }
 0x283   : > { %v4255_v45 = vpop.f32.mrb[128].mxu0 }
 0x284   : > { %v4307_v47 = vadd.f32 %v4255_v45, %v4079_v23  ;;  %v4257_v46 = vpop.f32.mrb[129].mxu0 }
 0x285   : > { %v4308_v16 = vadd.f32 %v4257_v46, %v4080_v28  ;;  %v4259_v50 = vpop.f32.mrb[130].mxu0 }
 0x286   : > { %v4260_v43 = vpop.f32.mrb[131].mxu0 }
 0x287   : > { %v4296_v51 = vpop.f32.mrb[136].mxu1 }
 0x288   : > { %v4309_v8 = vadd.f32 %v4296_v51, %v4081_v35  ;;  %v4298_v52 = vpop.f32.mrb[137].mxu1 }
 0x289   : > { %v4310_v44 = vadd.f32 %v4298_v52, %v4082_v34  ;;  %v4300_v48 = vpop.f32.mrb[138].mxu1 }
 0x28a   : > { %v4301_v53 = vpop.f32.mrb[139].mxu1 }
 0x28e   : > { %v4401_v55 = vpop.f32.mrb[132].mxu0 }
 0x28f   : > { %v4531_v56 = vadd.f32 %v4401_v55, %v4303_v36  ;;  %v4403_v49 = vpop.f32.mrb[133].mxu0  ;;  %v4442_v59 = vpop.f32.mrb[140].mxu1 }
 0x290   : > { %v4532_v60 = vadd.f32 %v4403_v49, %v4304_v29  ;;  %v4533_v13 = vadd.f32 %v4442_v59, %v4305_v12  ;;  %v4444_v54 = vpop.f32.mrb[141].mxu1  ;;  %v4405_v14 = vpop.f32.mrb[134].mxu0 }
 0x291   : > { %v4534_v58 = vadd.f32 %v4444_v54, %v4306_v40  ;;  %v4406_v19 = vpop.f32.mrb[135].mxu0  ;;  %v4446_v57 = vpop.f32.mrb[142].mxu1 }
 0x292   : > { %v4447_v62 = vpop.f32.mrb[143].mxu1 }
 0x296   : > { %v4483_v61 = vpop.f32.mrb[136].mxu0 }
 0x297   : > { %v4535_v0 = vadd.f32 %v4483_v61, %v4307_v47  ;;  %v4485_v17 = vpop.f32.mrb[137].mxu0  ;;  %v4524_v4 = vpop.f32.mrb[144].mxu1 }
 0x298   : > { %v4536_v2 = vadd.f32 %v4485_v17, %v4308_v16  ;;  %v4537_v18 = vadd.f32 %v4524_v4, %v4309_v8  ;;  %v4526_v5 = vpop.f32.mrb[145].mxu1  ;;  %v4487_v27 = vpop.f32.mrb[138].mxu0 }
 0x299   : > { %v4538_v10 = vadd.f32 %v4526_v5, %v4310_v44  ;;  %v4488_v1 = vpop.f32.mrb[139].mxu0  ;;  %v4528_v11 = vpop.f32.mrb[146].mxu1 }
 0x29a   : > { %v4529_v6 = vpop.f32.mrb[147].mxu1 }
 0x29f   : > { %v4629_v22 = vpop.f32.mrb[140].mxu0  ;;  %v4670_v7 = vpop.f32.mrb[148].mxu1 }
 0x2a0   : > { %v4759_v23 = vadd.f32 %v4629_v22, %v4531_v56  ;;  %v4631_v26 = vpop.f32.mrb[141].mxu0  ;;  %v4761_v28 = vadd.f32 %v4670_v7, %v4533_v13  ;;  %v4672_v21 = vpop.f32.mrb[149].mxu1 }
 0x2a1   : > { %v4760_v30 = vadd.f32 %v4631_v26, %v4532_v60  ;;  %v4762_v25 = vadd.f32 %v4672_v21, %v4534_v58  ;;  %v4633_v35 = vpop.f32.mrb[142].mxu0  ;;  %v4674_v20 = vpop.f32.mrb[150].mxu1 }
 0x2a2   : > { %v4634_v34 = vpop.f32.mrb[143].mxu0  ;;  %v4675_v32 = vpop.f32.mrb[151].mxu1 }
 0x2a7   : > { %v4711_v63 = vpop.f32.mrb[144].mxu0 }
 0x2a8   : > { %v4763_v31 = vadd.f32 %v4711_v63, %v4535_v0  ;;  %v4713_v36 = vpop.f32.mrb[145].mxu0  ;;  %v4752_v37 = vpop.f32.mrb[152].mxu1 }
 0x2a9   : > { %v4764_v29 = vadd.f32 %v4713_v36, %v4536_v2  ;;  %v4765_v33 = vadd.f32 %v4752_v37, %v4537_v18  ;;  %v4754_v9 = vpop.f32.mrb[153].mxu1  ;;  %v4715_v38 = vpop.f32.mrb[146].mxu0 }
 0x2aa   : > { %v4766_v12 = vadd.f32 %v4754_v9, %v4538_v10  ;;  %v4756_v39 = vpop.f32.mrb[154].mxu1  ;;  %v4716_v40 = vpop.f32.mrb[147].mxu0 }
 0x2ab   : > { %v4757_v41 = vpop.f32.mrb[155].mxu1 }
 0x2b0   : > { %v4898_v42 = vpop.f32.mrb[156].mxu1 }
 0x2b1   : > { %v4989_v45 = vadd.f32 %v4898_v42, %v4761_v28  ;;  %v4900_v47 = vpop.f32.mrb[157].mxu1 }
 0x2b2   : > { %v4990_v46 = vadd.f32 %v4900_v47, %v4762_v25  ;;  %v4857_v16 = vpop.f32.mrb[148].mxu0  ;;  %v4902_v50 = vpop.f32.mrb[158].mxu1 }
 0x2b3   : > { %v4987_v43 = vadd.f32 %v4857_v16, %v4759_v23  ;;  %v4859_v51 = vpop.f32.mrb[149].mxu0  ;;  %v4903_v8 = vpop.f32.mrb[159].mxu1 }
 0x2b4   : > { %v4988_v52 = vadd.f32 %v4859_v51, %v4760_v30  ;;  %v4861_v44 = vpop.f32.mrb[150].mxu0 }
 0x2b5   : > { %v4862_v48 = vpop.f32.mrb[151].mxu0 }
 0x2ba   : > { %v4939_v53 = vpop.f32.mrb[152].mxu0 }
 0x2bb   : > { %v4991_v55 = vadd.f32 %v4939_v53, %v4763_v31  ;;  %v4941_v56 = vpop.f32.mrb[153].mxu0  ;;  %v4980_v49 = vpop.f32.mrb[160].mxu1 }
 0x2bc   : > { %v4992_v59 = vadd.f32 %v4941_v56, %v4764_v29  ;;  %v4993_v60 = vadd.f32 %v4980_v49, %v4765_v33  ;;  %v4982_v13 = vpop.f32.mrb[161].mxu1  ;;  %v4943_v54 = vpop.f32.mrb[154].mxu0 }
 0x2bd   : > { %v4994_v14 = vadd.f32 %v4982_v13, %v4766_v12  ;;  %v4944_v58 = vpop.f32.mrb[155].mxu0  ;;  %v4984_v19 = vpop.f32.mrb[162].mxu1 }
 0x2be   : > { %v4985_v57 = vpop.f32.mrb[163].mxu1 }
 0x2c3   : > { %v5086_v62 = vpop.f32.mrb[156].mxu0  ;;  %v5127_v61 = vpop.f32.mrb[164].mxu1 }
 0x2c4   : > { %v5216_v0 = vadd.f32 %v5086_v62, %v4987_v43  ;;  %v5088_v17 = vpop.f32.mrb[157].mxu0  ;;  %v5218_v4 = vadd.f32 %v5127_v61, %v4989_v45  ;;  %v5129_v2 = vpop.f32.mrb[165].mxu1 }
 0x2c5   : > { %v5217_v18 = vadd.f32 %v5088_v17, %v4988_v52  ;;  %v5219_v5 = vadd.f32 %v5129_v2, %v4990_v46  ;;  %v5090_v27 = vpop.f32.mrb[158].mxu0  ;;  %v5131_v10 = vpop.f32.mrb[166].mxu1 }
 0x2c6   : > { %v5091_v1 = vpop.f32.mrb[159].mxu0  ;;  %v5132_v11 = vpop.f32.mrb[167].mxu1 }
 0x2cb   : > { %v5168_v6 = vpop.f32.mrb[160].mxu0 }
 0x2cc   : > { %v5220_v22 = vadd.f32 %v5168_v6, %v4991_v55  ;;  %v5170_v7 = vpop.f32.mrb[161].mxu0  ;;  %v5209_v23 = vpop.f32.mrb[168].mxu1 }
 0x2cd   : > { %v5221_v26 = vadd.f32 %v5170_v7, %v4992_v59  ;;  %v5222_v28 = vadd.f32 %v5209_v23, %v4993_v60  ;;  %v5211_v21 = vpop.f32.mrb[169].mxu1  ;;  %v5172_v30 = vpop.f32.mrb[162].mxu0 }
 0x2ce   : > { %v5223_v25 = vadd.f32 %v5211_v21, %v4994_v14  ;;  %v5213_v35 = vpop.f32.mrb[170].mxu1  ;;  %v5173_v20 = vpop.f32.mrb[163].mxu0 }
 0x2cf   : > { %v5214_v34 = vpop.f32.mrb[171].mxu1 }
 0x2d4   : > { %v5355_v32 = vpop.f32.mrb[172].mxu1 }
 0x2d5   : > { %v5446_v63 = vadd.f32 %v5355_v32, %v5218_v4  ;;  %v5357_v31 = vpop.f32.mrb[173].mxu1 }
 0x2d6   : > { %v5447_v36 = vadd.f32 %v5357_v31, %v5219_v5  ;;  %v5314_v37 = vpop.f32.mrb[164].mxu0  ;;  %v5359_v29 = vpop.f32.mrb[174].mxu1 }
 0x2d7   : > { %v5444_v33 = vadd.f32 %v5314_v37, %v5216_v0  ;;  %v5316_v9 = vpop.f32.mrb[165].mxu0  ;;  %v5360_v38 = vpop.f32.mrb[175].mxu1 }
 0x2d8   : > { %v5445_v12 = vadd.f32 %v5316_v9, %v5217_v18  ;;  %v5318_v39 = vpop.f32.mrb[166].mxu0 }
 0x2d9   : > { %v5319_v40 = vpop.f32.mrb[167].mxu0 }
 0x2da   : > { %v6140_v40 = vpop.permute.xlu0 %6139 }
 0x2de   : > { %v5396_v41 = vpop.f32.mrb[168].mxu0 }
 0x2df   : > { %v5448_v42 = vadd.f32 %v5396_v41, %v5220_v22  ;;  %v5398_v45 = vpop.f32.mrb[169].mxu0  ;;  %v5437_v47 = vpop.f32.mrb[176].mxu1 }
 0x2e0   : > { %v5449_v46 = vadd.f32 %v5398_v45, %v5221_v26  ;;  %v5450_v16 = vadd.f32 %v5437_v47, %v5222_v28  ;;  %v5439_v50 = vpop.f32.mrb[177].mxu1  ;;  %v5400_v43 = vpop.f32.mrb[170].mxu0 }
 0x2e1   : > { %v5451_v51 = vadd.f32 %v5439_v50, %v5223_v25  ;;  %v5401_v8 = vpop.f32.mrb[171].mxu0  ;;  %v5441_v52 = vpop.f32.mrb[178].mxu1 }
 0x2e2   : > { %v5442_v44 = vpop.f32.mrb[179].mxu1 }
 0x2e7   : > { %v5542_v48 = vpop.f32.mrb[172].mxu0  ;;  %v5583_v53 = vpop.f32.mrb[180].mxu1 }
 0x2e8   : > { %v5672_v55 = vadd.f32 %v5542_v48, %v5444_v33  ;;  %v5544_v56 = vpop.f32.mrb[173].mxu0  ;;  %v5674_v49 = vadd.f32 %v5583_v53, %v5446_v63  ;;  %v5585_v59 = vpop.f32.mrb[181].mxu1 }
 0x2e9   : > { %v5673_v60 = vadd.f32 %v5544_v56, %v5445_v12  ;;  %v5675_v13 = vadd.f32 %v5585_v59, %v5447_v36  ;;  %v5546_v54 = vpop.f32.mrb[174].mxu0  ;;  %v5587_v14 = vpop.f32.mrb[182].mxu1 }
 0x2ea   : > { %v5547_v58 = vpop.f32.mrb[175].mxu0  ;;  %v5588_v19 = vpop.f32.mrb[183].mxu1 }
 0x2ef   : > { %v5624_v57 = vpop.f32.mrb[176].mxu0 }
 0x2f0   : > { %v5676_v62 = vadd.f32 %v5624_v57, %v5448_v42  ;;  %v5626_v61 = vpop.f32.mrb[177].mxu0  ;;  %v5665_v0 = vpop.f32.mrb[184].mxu1 }
 0x2f1   : > { %v5677_v17 = vadd.f32 %v5626_v61, %v5449_v46  ;;  %v5678_v4 = vadd.f32 %v5665_v0, %v5450_v16  ;;  %v5667_v2 = vpop.f32.mrb[185].mxu1  ;;  %v5628_v18 = vpop.f32.mrb[178].mxu0 }
 0x2f2   : > { %v5679_v5 = vadd.f32 %v5667_v2, %v5451_v51  ;;  %v5629_v27 = vpop.f32.mrb[179].mxu0  ;;  %v5669_v10 = vpop.f32.mrb[186].mxu1 }
 0x2f3   : > { %v5670_v1 = vpop.f32.mrb[187].mxu1 }
 0x2f8   : > { %v5811_v11 = vpop.f32.mrb[188].mxu1 }
 0x2f9   : > { %v5902_v6 = vadd.f32 %v5811_v11, %v5674_v49  ;;  %v5813_v22 = vpop.f32.mrb[189].mxu1 }
 0x2fa   : > { %v5903_v7 = vadd.f32 %v5813_v22, %v5675_v13  ;;  %v5770_v23 = vpop.f32.mrb[180].mxu0  ;;  %v5815_v26 = vpop.f32.mrb[190].mxu1 }
 0x2fb   : > { %v5900_v28 = vadd.f32 %v5770_v23, %v5672_v55  ;;  %v5772_v21 = vpop.f32.mrb[181].mxu0  ;;  %v5816_v30 = vpop.f32.mrb[191].mxu1 }
 0x2fc   : > { %v5901_v25 = vadd.f32 %v5772_v21, %v5673_v60  ;;  %v5774_v35 = vpop.f32.mrb[182].mxu0  ;;  %v6314_v21 = vld [vmem:[#allocation2 + $0x8] sm:$0xff] }
 0x2fd   : > { %v5775_v20 = vpop.f32.mrb[183].mxu0  ;;  %v6315_v35 = vsel %vm19270_vm9, 0, %v6314_v21 }
 0x2fe   : > { %6316 = vst [vmem:[#allocation2 + $0x8] sm:$0xff] %v6315_v35  ;;  %v6286_v35 = vsub.s32 7, %v17727_v3 }
 0x302   : > { %v5852_v34 = vpop.f32.mrb[184].mxu0 }
 0x303   : > { %v5904_v32 = vadd.f32 %v5852_v34, %v5676_v62  ;;  %v5854_v63 = vpop.f32.mrb[185].mxu0  ;;  %v5893_v31 = vpop.f32.mrb[192].mxu1  ;;  %v6317_v34 = vld [vmem:[#allocation2 + $0x10] sm:$0xff] }
 0x304   : > { %v5905_v36 = vadd.f32 %v5854_v63, %v5677_v17  ;;  %v5906_v37 = vadd.f32 %v5893_v31, %v5678_v4  ;;  %v5856_v29 = vpop.f32.mrb[186].mxu0  ;;  %v5895_v33 = vpop.f32.mrb[193].mxu1  ;;  %v6318_v63 = vsel %vm19270_vm9, 0, %v6317_v34 }
 0x305   : > { %v5907_v9 = vadd.f32 %v5895_v33, %v5679_v5  ;;  %v5857_v38 = vpop.f32.mrb[187].mxu0  ;;  %v5897_v12 = vpop.f32.mrb[194].mxu1  ;;  %6319 = vst [vmem:[#allocation2 + $0x10] sm:$0xff] %v6318_v63 }
 0x306   : > { %v5898_v39 = vpop.f32.mrb[195].mxu1 }
 0x307   : > { %v6323_v39 = vld [vmem:[#allocation2 + $0x20] sm:$0xff] }
 0x30b   : > { %v5998_v41 = vpop.f32.mrb[188].mxu0  ;;  %v6039_v42 = vpop.f32.mrb[196].mxu1 }
 0x30c   : > { %v6128_v45 = vadd.f32 %v5998_v41, %v5900_v28  ;;  %v6000_v47 = vpop.f32.mrb[189].mxu0  ;;  %v6130_v46 = vadd.f32 %v6039_v42, %v5902_v6  ;;  %v6041_v16 = vpop.f32.mrb[197].mxu1  ;;  %v6311_v28 = vld [vmem:[#allocation2] sm:$0xff]  ;;  %v6324_v42 = vsel %vm19270_vm9, 0, %v6323_v39 }
 0x30d   : > { %v6129_v50 = vadd.f32 %v6000_v47, %v5901_v25  ;;  %v6002_v43 = vpop.f32.mrb[190].mxu0  ;;  %v6131_v51 = vadd.f32 %v6041_v16, %v5903_v7  ;;  %v6043_v8 = vpop.f32.mrb[198].mxu1  ;;  %v6312_v25 = vsel %vm19270_vm9, 0, %v6311_v28  ;;  %6325 = vst [vmem:[#allocation2 + $0x20] sm:$0xff] %v6324_v42 }
 0x30e   : > { %v6003_v52 = vpop.f32.mrb[191].mxu0  ;;  %v6142_v44 = vadd.f32 %v6140_v40, %v6128_v45  ;;  %v6044_v48 = vpop.f32.mrb[199].mxu1  ;;  %v6144_v18 = vadd.f32 %v6140_v40, %v6130_v46  ;;  %6313 = vst [vmem:[#allocation2] sm:$0xff] %v6312_v25 }
 0x30f   : > { %v19246_v55 = vadd.f32 %v6140_v40, %v6129_v50  ;;  %v6145_v5 = vadd.f32 %v6140_v40, %v6131_v51 }
 0x310   : > { %v6150_v53 = vmax.f32 %v6142_v44, 0.0  ;;  %v6152_v1 = vmax.f32 %v6144_v18, 0.0 }
 0x311   : > { %v6151_v13 = vmax.f32 %v19246_v55, 0.0  ;;  %v6153_v11 = vmax.f32 %v6145_v5, 0.0 }
 0x312   : > { %6166 = vrot.lane.b32.xlu1 %v6150_v53, %s17569_s30 }
 0x313   : > { %v6080_v56 = vpop.f32.mrb[192].mxu0 }
 0x314   : > { %v6132_v49 = vadd.f32 %v6080_v56, %v5904_v32  ;;  %v6082_v59 = vpop.f32.mrb[193].mxu0  ;;  %v6121_v60 = vpop.f32.mrb[200].mxu1 }
 0x315   : > { %v6133_v54 = vadd.f32 %v6082_v59, %v5905_v36  ;;  %v6134_v14 = vadd.f32 %v6121_v60, %v5906_v37  ;;  %v6084_v58 = vpop.f32.mrb[194].mxu0  ;;  %v6123_v19 = vpop.f32.mrb[201].mxu1  ;;  %v6320_v37 = vld [vmem:[#allocation2 + $0x18] sm:$0xff]  ;;  %v6254_v60 = vld [vmem:[%s21881_s5] sm:$0xff] }
 0x316   : > { %v6146_v57 = vadd.f32 %v6140_v40, %v6132_v49  ;;  %v6135_v62 = vadd.f32 %v6123_v19, %v5907_v9  ;;  %6168 = vrot.lane.b32.xlu1 %v6151_v13, %s17569_s30  ;;  %v6085_v61 = vpop.f32.mrb[195].mxu0  ;;  %v6125_v0 = vpop.f32.mrb[202].mxu1  ;;  %v6321_v33 = vsel %vm19270_vm9, 0, %v6320_v37  ;;  %v6258_v49 = vsub.s32 0, %v17727_v3 }
 0x317   : > { %v19251_v17 = vadd.f32 %v6140_v40, %v6133_v54  ;;  %v6126_v4 = vpop.f32.mrb[203].mxu1  ;;  %v6148_v10 = vadd.f32 %v6140_v40, %v6134_v14  ;;  %6322 = vst [vmem:[#allocation2 + $0x18] sm:$0xff] %v6321_v33  ;;  %v6266_v58 = vsub.s32 2, %v17727_v3  ;;  %v6270_v19 = vsub.s32 3, %v17727_v3 }
 0x318   : > { %v6154_v2 = vmax.f32 %v6146_v57, 0.0  ;;  %v6149_v6 = vadd.f32 %v6140_v40, %v6135_v62  ;;  %v6259_v54 = vrot.slane %v6254_v60, %v6258_v49 }
 0x319   : > { %v6155_v27 = vmax.f32 %v19251_v17, 0.0  ;;  %v6156_v22 = vmax.f32 %v6148_v10, 0.0  ;;  %v6267_v5 = vrot.slane %v6254_v60, %v6266_v58 }
 0x31a   : > { %6174 = vrot.lane.b32.xlu0 %v6154_v2, %s17569_s30  ;;  %v6157_v7 = vmax.f32 %v6149_v6, 0.0 }
 0x31b   : > { %6176 = vrot.lane.b32.xlu1 %v6155_v27, %s17569_s30 }
 0x31e   : > { %6170 = vrot.lane.b32.xlu0 %v6152_v1, %s17569_s30  ;;  %v6370_v49 = vld [vmem:[#allocation2 + $0x1c] sm:$0xff] }
 0x31f   : > { %6172 = vrot.lane.b32.xlu1 %v6153_v11, %s17569_s30 }
 0x322   : > { %6178 = vrot.lane.b32.xlu0 %v6156_v22, %s17569_s30 }
 0x323   : > { %6180 = vrot.lane.b32.xlu1 %v6157_v7, %s17569_s30  ;;  %s17599_s30 = smov 2  }
 0x384   : > { %v6167_v23 = vpop.permute.xlu1 %6166 }
 0x388   : > { %v6169_v20 = vpop.permute.xlu1 %6168 }
 0x389   : > { %v6183_v32 = vsel %vm497_vm1, %v6167_v23, %v6169_v20 }
 0x38a   : > { %v6198_v31 = vmax.f32 %v6150_v53, %v6183_v32 }
 0x38c   : > { %v6175_v36 = vpop.permute.xlu0 %6174  ;;  %6214 = vrot.lane.b32.xlu0 %v6198_v31, %s17574_s21 }
 0x38d   : > { %v6177_v29 = vpop.permute.xlu1 %6176 }
 0x38e   : > { %v6187_v9 = vsel %vm497_vm1, %v6175_v36, %v6177_v29 }
 0x38f   : > { %v19285_v38 = vmax.f32 %v6154_v2, %v6187_v9  ;;  %v6274_v2 = vsub.s32 4, %v17727_v3 }
 0x390   : > { %v6171_v12 = vpop.permute.xlu0 %6170 }
 0x391   : > { %v6184_v40 = vsel %vm497_vm1, %v6169_v20, %v6171_v12  ;;  %v6173_v41 = vpop.permute.xlu1 %6172  ;;  %6222 = vrot.lane.b32.xlu0 %v19285_v38, %s17574_s21  ;;  %v6275_v25 = vrot.slane %v6254_v60, %v6274_v2 }
 0x392   : > { %v6199_v45 = vmax.f32 %v6151_v13, %v6184_v40  ;;  %v6185_v47 = vsel %vm497_vm1, %v6171_v12, %v6173_v41  ;;  %v6186_v46 = vsel %vm497_vm1, %v6173_v41, %v6175_v36  ;;  %v6262_v13 = vsub.s32 1, %v17727_v3 }
 0x393   : > { %v6200_v16 = vmax.f32 %v6152_v1, %v6185_v47  ;;  %v6201_v51 = vmax.f32 %v6153_v11, %v6186_v46  ;;  %v6278_v1 = vsub.s32 5, %v17727_v3  ;;  %v6282_v36 = vsub.s32 6, %v17727_v3 }
 0x394   : > { %6216 = vrot.lane.b32.xlu1 %v6199_v45, %s17574_s21  ;;  %v6179_v50 = vpop.permute.xlu0 %6178  ;;  %v6263_v62 = vrot.slane %v6254_v60, %v6262_v13  ;;  %v6287_v41 = vrot.slane %v6254_v60, %v6286_v35 }
 0x395   : > { %v6181_v43 = vpop.permute.xlu1 %6180  ;;  %6218 = vrot.lane.b32.xlu0 %v6200_v16, %s17574_s21  ;;  %v6188_v52 = vsel %vm497_vm1, %v6177_v29, %v6179_v50  ;;  %v6279_v63 = vrot.slane %v6254_v60, %v6278_v1  ;;  %v6361_v29 = vld [vmem:[#allocation2 + $0xc] sm:$0xff]  ;;  %v6283_v3 = vrot.slane %v6254_v60, %v6282_v36 }
 0x396   : > { %v6189_v8 = vsel %vm497_vm1, %v6179_v50, %v6181_v43  ;;  %v6203_v53 = vmax.f32 %v6155_v27, %v6188_v52  ;;  %v6205_v55 = vmax.f32 %v6157_v7, %v6181_v43  ;;  %v6271_v27 = vrot.slane %v6254_v60, %v6270_v19  ;;  %v6358_v7 = vld [vmem:[#allocation2 + $0x4] sm:$0xff] }
 0x397   : > { %v19298_v44 = vmax.f32 %v6156_v22, %v6189_v8  ;;  %vm6448_vm1 = vcmask 1042432  }
 0x398   : > { %6220 = vrot.lane.b32.xlu1 %v6201_v51, %s17574_s21 }
 0x399   : > { %6226 = vrot.lane.b32.xlu0 %v19298_v44, %s17574_s21 }
 0x39c   : > { %6224 = vrot.lane.b32.xlu1 %v6203_v53, %s17574_s21 }
 0x3a0   : > { %6228 = vrot.lane.b32.xlu1 %v6205_v55, %s17574_s21  ;;  %s17595_s21 = smov 68  }
 0x3fe   : > { %v6215_v56 = vpop.permute.xlu0 %6214 }
 0x403   : > { %v6223_v59 = vpop.permute.xlu0 %6222 }
 0x406   : > { %v6217_v14 = vpop.permute.xlu1 %6216 }
 0x407   : > { %v6231_v57 = vsel %vm1595_vm7, %v6215_v56, %v6217_v14  ;;  %v6219_v61 = vpop.permute.xlu0 %6218 }
 0x408   : > { %v6246_v0 = vmax.f32 %v6198_v31, %v6231_v57  ;;  %v6232_v17 = vsel %vm1595_vm7, %v6217_v14, %v6219_v61 }
 0x409   : > { %v6247_v4 = vmax.f32 %v6199_v45, %v6232_v17  ;;  %v6450_v17 = vsel %vm6448_vm1, 4294967295, %v17578_v24 }
 0x40a   : > { %v6296_v18 = vmul.f32 %v6259_v54, %v6246_v0  ;;  %v6221_v10 = vpop.permute.xlu1 %6220 }
 0x40b   : > { %v6297_v11 = vmul.f32 %v6263_v62, %v6247_v4  ;;  %v6233_v6 = vsel %vm1595_vm7, %v6219_v61, %v6221_v10  ;;  %v6234_v22 = vsel %vm1595_vm7, %v6221_v10, %v6223_v59  ;;  %v6227_v32 = vpop.permute.xlu0 %6226 }
 0x40c   : > { %v6248_v23 = vmax.f32 %v6200_v16, %v6233_v6  ;;  %v6249_v28 = vmax.f32 %v6201_v51, %v6234_v22  ;;  %v6364_v16 = vld [vmem:[#allocation2 + $0x14] sm:$0xff] }
 0x40d   : > { %v15716_v21 = vpack.c.bf16 %v6297_v11, %v6296_v18  ;;  %v19442_v18 = vsel %vm6304_vm3, %v6450_v17, 0 }
 0x40e   : > { %v6298_v20 = vmul.f32 %v6267_v5, %v6248_v23  ;;  %v6299_v34 = vmul.f32 %v6271_v27, %v6249_v28  ;;  %v6225_v31 = vpop.permute.xlu1 %6224 }
 0x40f   : > { %v6359_v37 = vsel %vm19270_vm9, %v15716_v21, %v6358_v7  ;;  %v6235_v33 = vsel %vm1595_vm7, %v6223_v59, %v6225_v31  ;;  %v6236_v9 = vsel %vm1595_vm7, %v6225_v31, %v6227_v32  ;;  %v17341_v21 = vld [vmem:[%s21936_s3 + $0x10] sm:$0xff]  }
 0x410   : > { %6360 = vst [vmem:[#allocation2 + $0x4] sm:$0xff] %v6359_v37  ;;  %v15717_v12 = vpack.c.bf16 %v6299_v34, %v6298_v20  ;;  %v6250_v39 = vmax.f32 %v19285_v38, %v6235_v33  ;;  %v6251_v40 = vmax.f32 %v6203_v53, %v6236_v9  ;;  %v17342_v9 = vld [vmem:[%s21936_s3 + $0x18] sm:$0xff]  }
 0x412   : > { %v6362_v42 = vsel %vm19270_vm9, %v15717_v12, %v6361_v29  ;;  %v6300_v45 = vmul.f32 %v6275_v25, %v6250_v39  ;;  %v6301_v47 = vmul.f32 %v6279_v63, %v6251_v40  ;;  %v6229_v46 = vpop.permute.xlu1 %6228 }
 0x413   : > { %6363 = vst [vmem:[#allocation2 + $0xc] sm:$0xff] %v6362_v42  ;;  %v6237_v50 = vsel %vm1595_vm7, %v6227_v32, %v6229_v46  ;;  %v6253_v43 = vmax.f32 %v6205_v55, %v6229_v46  ;;  %vm6433_vm7 = vcmask 556032  }
 0x414   : > { %v15718_v51 = vpack.c.bf16 %v6301_v47, %v6300_v45  ;;  %v6252_v8 = vmax.f32 %v19298_v44, %v6237_v50 }
 0x415   : > { %v6303_v52 = vmul.f32 %v6287_v41, %v6253_v43 }
 0x416   : > { %v6365_v38 = vsel %vm19270_vm9, %v15718_v51, %v6364_v16  ;;  %v6302_v53 = vmul.f32 %v6283_v3, %v6252_v8  ;;  %vm6441_vm9 = vcmask 56320  }
 0x417   : > { %v6373_v56 = vld [vmem:[#allocation2] sm:$0xff]  ;;  %6366 = vst [vmem:[#allocation2 + $0x14] sm:$0xff] %v6365_v38 }
 0x418   : > { %v19342_v59 = vcombine.high %v6373_v56, %v6373_v56  ;;  %v15719_v60 = vpack.c.bf16 %v6303_v52, %v6302_v53  ;;  %v15104_v48 = vcombine.low %v6373_v56, %v6373_v56 }
 0x41a   : > { %v6374_v13 = vld [vmem:[#allocation2 + $0x8] sm:$0xff]  ;;  %v6371_v55 = vsel %vm6369_vm11, %v15719_v60, %v6370_v49  ;;  %6419 = vrot.lane.b32.xlu0 %v19342_v59, %s17595_s21  ;;  %vm8853_vm11 = vcmask 506880  }
 0x41b   : > { %v19350_v44 = vcombine.low %v6374_v13, %v6374_v13  ;;  %v19352_v30 = vcombine.high %v6374_v13, %v6374_v13  ;;  %6372 = vst [vmem:[#allocation2 + $0x1c] sm:$0xff] %v6371_v55 }
 0x41d   : > { %6421 = vrot.lane.b32.xlu1 %v19350_v44, %s17595_s21 }
 0x41e   : > { %v6375_v54 = vld [vmem:[#allocation2 + $0x10] sm:$0xff]  ;;  %6423 = vrot.lane.b32.xlu0 %v19352_v30, %s17595_s21 }
 0x41f   : > { %v19356_v14 = vcombine.low %v6375_v54, %v6375_v54  ;;  %v19359_v58 = vcombine.high %v6375_v54, %v6375_v54 }
 0x421   : > { %6425 = vrot.lane.b32.xlu1 %v19356_v14, %s17595_s21 }
 0x422   : > { %v6376_v26 = vld [vmem:[#allocation2 + $0x18] sm:$0xff]  ;;  %6417 = vrot.lane.b32.xlu0 %v15104_v48, %s17595_s21  ;;  %v19393_v62 = vld [vmem:[#allocation2 + $0x20] sm:$0xff] }
 0x423   : > { %v19361_v19 = vcombine.low %v6376_v26, %v6376_v26  ;;  %v19365_v57 = vcombine.high %v6376_v26, %v6376_v26  ;;  %v19399_v61 = vcombine.low %v19393_v62, %v19393_v62 }
 0x425   : > { %6427 = vrot.lane.b32.xlu1 %v19359_v58, %s17595_s21 }
 0x426   : > { %6429 = vrot.lane.b32.xlu0 %v19361_v19, %s17595_s21 }
 0x429   : > { %6431 = vrot.lane.b32.xlu1 %v19365_v57, %s17595_s21  ;;  %s17600_s21 = smov 62  }
 0x42a   : > { %6700 = vrot.lane.b32.xlu0 %v19342_v59, %s17596_s22 }
 0x42d   : > { %6702 = vrot.lane.b32.xlu1 %v19350_v44, %s17596_s22 }
 0x42e   : > { %6704 = vrot.lane.b32.xlu0 %v19352_v30, %s17596_s22 }
 0x431   : > { %6706 = vrot.lane.b32.xlu1 %v19356_v14, %s17596_s22 }
 0x432   : > { %6698 = vrot.lane.b32.xlu0 %v15104_v48, %s17596_s22 }
 0x435   : > { %6708 = vrot.lane.b32.xlu1 %v19359_v58, %s17596_s22 }
 0x436   : > { %6710 = vrot.lane.b32.xlu0 %v19361_v19, %s17596_s22 }
 0x439   : > { %6712 = vrot.lane.b32.xlu1 %v19365_v57, %s17596_s22  ;;  %s17601_s22 = smov 122  }
 0x43a   : > { %6981 = vrot.lane.b32.xlu0 %v19342_v59, %s17597_s16 }
 0x43d   : > { %6983 = vrot.lane.b32.xlu1 %v19350_v44, %s17597_s16 }
 0x43e   : > { %6985 = vrot.lane.b32.xlu0 %v19352_v30, %s17597_s16 }
 0x441   : > { %6987 = vrot.lane.b32.xlu1 %v19356_v14, %s17597_s16 }
 0x442   : > { %6979 = vrot.lane.b32.xlu0 %v15104_v48, %s17597_s16 }
 0x445   : > { %6989 = vrot.lane.b32.xlu1 %v19359_v58, %s17597_s16 }
 0x446   : > { %6991 = vrot.lane.b32.xlu0 %v19361_v19, %s17597_s16 }
 0x449   : > { %6993 = vrot.lane.b32.xlu1 %v19365_v57, %s17597_s16  ;;  %s21941_s16 = smov 118  }
 0x44a   : > { %7294 = vrot.lane.b32.xlu0 %v19342_v59, %s17598_s20 }
 0x44d   : > { %7296 = vrot.lane.b32.xlu1 %v19350_v44, %s17598_s20 }
 0x44e   : > { %7298 = vrot.lane.b32.xlu0 %v19352_v30, %s17598_s20 }
 0x451   : > { %7300 = vrot.lane.b32.xlu1 %v19356_v14, %s17598_s20 }
 0x452   : > { %7292 = vrot.lane.b32.xlu0 %v15104_v48, %s17598_s20 }
 0x455   : > { %7302 = vrot.lane.b32.xlu1 %v19359_v58, %s17598_s20 }
 0x456   : > { %7304 = vrot.lane.b32.xlu0 %v19361_v19, %s17598_s20 }
 0x459   : > { %7306 = vrot.lane.b32.xlu1 %v19365_v57, %s17598_s20  ;;  %s21937_s20 = smov 60  }
 0x45a   : > { %7610 = vrot.lane.b32.xlu0 %v19342_v59, %s17599_s30 }
 0x45d   : > { %7612 = vrot.lane.b32.xlu1 %v19350_v44, %s17599_s30 }
 0x45e   : > { %7614 = vrot.lane.b32.xlu0 %v19352_v30, %s17599_s30 }
 0x461   : > { %7616 = vrot.lane.b32.xlu1 %v19356_v14, %s17599_s30 }
 0x462   : > { %7608 = vrot.lane.b32.xlu0 %v15104_v48, %s17599_s30  ;;  %v17343_v48 = vld [vmem:[%s21936_s3] sm:$0xff]  }
 0x465   : > { %7618 = vrot.lane.b32.xlu1 %v19359_v58, %s17599_s30 }
 0x466   : > { %7620 = vrot.lane.b32.xlu0 %v19361_v19, %s17599_s30 }
 0x469   : > { %7622 = vrot.lane.b32.xlu1 %v19365_v57, %s17599_s30 }
 0x46a   : > { %7624 = vrot.lane.b32.xlu0 %v19399_v61, %s17599_s30  ;;  %s21939_s30 = smov 56  }
 0x46d   : > { %8215 = vrot.lane.b32.xlu1 %v19350_v44, %s21906_s15 }
 0x46e   : > { %8217 = vrot.lane.b32.xlu0 %v19352_v30, %s21906_s15 }
 0x471   : > { %8219 = vrot.lane.b32.xlu1 %v19356_v14, %s21906_s15 }
 0x472   : > { %8221 = vrot.lane.b32.xlu0 %v19359_v58, %s21906_s15 }
 0x475   : > { %8213 = vrot.lane.b32.xlu1 %v19342_v59, %s21906_s15 }
 0x476   : > { %8223 = vrot.lane.b32.xlu0 %v19361_v19, %s21906_s15 }
 0x479   : > { %8225 = vrot.lane.b32.xlu1 %v19365_v57, %s21906_s15 }
 0x47a   : > { %8227 = vrot.lane.b32.xlu0 %v19399_v61, %s21906_s15 }
 0x47d   : > { %8527 = vrot.lane.b32.xlu1 %v19350_v44, %s21935_s24 }
 0x47e   : > { %8529 = vrot.lane.b32.xlu0 %v19352_v30, %s21935_s24 }
 0x481   : > { %8531 = vrot.lane.b32.xlu1 %v19356_v14, %s21935_s24 }
 0x482   : > { %8533 = vrot.lane.b32.xlu0 %v19359_v58, %s21935_s24 }
 0x485   : > { %8525 = vrot.lane.b32.xlu1 %v19342_v59, %s21935_s24 }
 0x486   : > { %8535 = vrot.lane.b32.xlu0 %v19361_v19, %s21935_s24 }
 0x489   : > { %8537 = vrot.lane.b32.xlu1 %v19365_v57, %s21935_s24 }
 0x48a   : > { %8539 = vrot.lane.b32.xlu0 %v19399_v61, %s21935_s24  ;;  %s21940_s24 = smov 120  }
 0x48c   : > { %v6420_v0 = vpop.permute.xlu0 %6419 }
 0x48d   : > { %8839 = vrot.lane.b32.xlu1 %v19350_v44, %s17600_s21 }
 0x48e   : > { %8841 = vrot.lane.b32.xlu0 %v19352_v30, %s17600_s21 }
 0x48f   : > { %v6422_v4 = vpop.permute.xlu1 %6421 }
 0x490   : > { %v6435_v2 = vsel %vm6433_vm7, %v6420_v0, %v6422_v4  ;;  %v6424_v5 = vpop.permute.xlu0 %6423 }
 0x491   : > { %8843 = vrot.lane.b32.xlu1 %v19356_v14, %s17600_s21  ;;  %v6456_v27 = vand.u32 %v19442_v18, %v6435_v2  ;;  %v6436_v24 = vsel %vm6433_vm7, %v6422_v4, %v6424_v5 }
 0x492   : > { %8845 = vrot.lane.b32.xlu0 %v19359_v58, %s17600_s21  ;;  %v6459_v7 = vand.u32 %v19442_v18, %v6436_v24  ;;  %v17344_v24 = vld [vmem:[%s21936_s3 + $0x8] sm:$0xff]  }
 0x493   : > { %v6426_v10 = vpop.permute.xlu1 %6425  ;;  %6476 = vmatprep.subr.bf16.mxu0 %v6456_v27 }
 0x494   : > { %v6437_v1 = vsel %vm6433_vm7, %v6424_v5, %v6426_v10  ;;  %v6418_v11 = vpop.permute.xlu0 %6417 }
 0x495   : > { %v6434_v6 = vsel %vm6433_vm7, %v6418_v11, %v6420_v0  ;;  %8837 = vrot.lane.b32.xlu1 %v19342_v59, %s17600_s21  ;;  %v6462_v22 = vand.u32 %v19442_v18, %v6437_v1 }
 0x496   : > { %v6453_v23 = vand.u32 %v19442_v18, %v6434_v6  ;;  %8847 = vrot.lane.b32.xlu0 %v19361_v19, %s17600_s21 }
 0x497   : > { %v6428_v28 = vpop.permute.xlu1 %6427  ;;  %6529 = vmatprep.subr.bf16.mxu1 %v6462_v22 }
 0x498   : > { %v6438_v25 = vsel %vm6433_vm7, %v6426_v10, %v6428_v28  ;;  %6477 = vmatpush1.bf16.msra.mxu0 %v6453_v23  ;;  %6530 = vmatpush1.bf16.msra.mxu1 %v6459_v7  ;;  %v6430_v35 = vpop.permute.xlu0 %6429 }
 0x499   : > { %v6439_v20 = vsel %vm6433_vm7, %v6428_v28, %v6430_v35  ;;  %8849 = vrot.lane.b32.xlu1 %v19365_v57, %s17600_s21  ;;  %v6465_v32 = vand.u32 %v19442_v18, %v6438_v25 }
 0x49a   : > { %8851 = vrot.lane.b32.xlu0 %v19399_v61, %s17600_s21  ;;  %v6468_v34 = vand.u32 %v19442_v18, %v6439_v20  ;;  %s21938_s21 = smov 58  }
 0x49b   : > { %v6432_v63 = vpop.permute.xlu1 %6431  ;;  %15112 = vmatmul.mubr.msk.bf16.vlgmr.msra.gmra.mrb[196].mxu0 %vm6441_vm9, %v17341_v21  ;;  %15114 = vmatmul.mubr.msk.bf16.vlgmr.msra.gmra.mrb[204].mxu1 %vm6441_vm9, %v17341_v21 }
 0x49c   : > { %v6440_v31 = vsel %vm6433_vm7, %v6430_v35, %v6432_v63  ;;  %v6474_v36 = vand.u32 %v19442_v18, %v6432_v63  ;;  %6582 = vmatprep.subr.bf16.mxu0 %v6468_v34  ;;  %v6701_v37 = vpop.permute.xlu0 %6700  ;;  %6518 = vmatprep.mubr.bf16.mxu0 %v17570_v15 }
 0x49d   : > { %v6471_v29 = vand.u32 %v19442_v18, %v6440_v31  ;;  %9152 = vrot.lane.b32.xlu1 %v19350_v44, %s21937_s20  ;;  %6583 = vmatpush1.bf16.msra.mxu0 %v6465_v32 }
 0x49e   : > { %9154 = vrot.lane.b32.xlu0 %v19352_v30, %s21937_s20  ;;  %6635 = vmatprep.subr.bf16.mxu1 %v6474_v36  ;;  %v17346_v36 = vld [vmem:[%s21936_s3 + $0x20] sm:$0xff]  }
 0x49f   : > { %v6703_v33 = vpop.permute.xlu1 %6702  ;;  %6636 = vmatpush1.bf16.msra.mxu1 %v6471_v29  ;;  %6571 = vmatprep.mubr.bf16.mxu1 %v17570_v15 }
 0x4a0   : > { %v6716_v12 = vsel %vm6714_vm15, %v6701_v37, %v6703_v33  ;;  %v6705_v39 = vpop.permute.xlu0 %6704 }
 0x4a1   : > { %9156 = vrot.lane.b32.xlu1 %v19356_v14, %s21937_s20  ;;  %v6732_v40 = vand.u32 %v6716_v12, %v19442_v18  ;;  %v6717_v3 = vsel %vm6714_vm15, %v6703_v33, %v6705_v39  ;;  %v19610_v33 = vcombine.high %v19393_v62, %v19393_v62 }
 0x4a2   : > { %9158 = vrot.lane.b32.xlu0 %v19359_v58, %s21937_s20  ;;  %v6735_v51 = vand.u32 %v6717_v3, %v19442_v18 }
 0x4a3   : > { %v6707_v41 = vpop.permute.xlu1 %6706  ;;  %15113 = vmatmul.mubr.msk.bf16.gmra.mrb[200].mxu0 %vm6441_vm9, %v17342_v9  ;;  %15115 = vmatmul.mubr.msk.bf16.gmra.mrb[208].mxu1 %vm6441_vm9, %v17342_v9 }
 0x4a4   : > { %v6718_v42 = vsel %vm6714_vm15, %v6705_v39, %v6707_v41  ;;  %6752 = vmatprep.subr.bf16.mxu0 %v6732_v40  ;;  %v6699_v45 = vpop.permute.xlu0 %6698  ;;  %6614 = vmatprep.mubr.bf16.mxu0 %v17570_v15 }
 0x4a5   : > { %9150 = vrot.lane.b32.xlu1 %v19342_v59, %s21937_s20  ;;  %v6738_v47 = vand.u32 %v6718_v42, %v19442_v18  ;;  %6667 = vmatprep.mubr.bf16.mxu1 %v17570_v15  ;;  %v6715_v46 = vsel %vm6714_vm15, %v6699_v45, %v6701_v37 }
 0x4a6   : > { %9160 = vrot.lane.b32.xlu0 %v19361_v19, %s21937_s20  ;;  %v6729_v8 = vand.u32 %v6715_v46, %v19442_v18 }
 0x4a7   : > { %v6709_v16 = vpop.permute.xlu1 %6708  ;;  %6805 = vmatprep.subr.bf16.mxu1 %v6738_v47 }
 0x4a8   : > { %v6711_v50 = vpop.permute.xlu0 %6710  ;;  %v6719_v13 = vsel %vm6714_vm15, %v6707_v41, %v6709_v16  ;;  %v17347_v41 = vld [vmem:[%s21936_s3 + $0x28] sm:$0xff]  }
 0x4a9   : > { %v6720_v43 = vsel %vm6714_vm15, %v6709_v16, %v6711_v50  ;;  %9162 = vrot.lane.b32.xlu1 %v19365_v57, %s21937_s20  ;;  %v6741_v17 = vand.u32 %v6719_v13, %v19442_v18  ;;  %v17348_v13 = vld [vmem:[%s21936_s3 + $0x30] sm:$0xff]  }
 0x4aa   : > { %9164 = vrot.lane.b32.xlu0 %v19399_v61, %s21937_s20  ;;  %v6744_v52 = vand.u32 %v6720_v43, %v19442_v18 }
 0x4ab   : > { %v6713_v38 = vpop.permute.xlu1 %6712  ;;  %15116 = vmatmul.mubr.msk.bf16.vlgmr.msra.gmra.mrb[204].mxu0 %vm6441_vm9, %v17341_v21  ;;  %15118 = vmatmul.mubr.msk.bf16.vlgmr.msra.gmra.mrb[212].mxu1 %vm6441_vm9, %v17341_v21 }
 0x4ac   : > { %v6750_v53 = vand.u32 %v6713_v38, %v19442_v18  ;;  %6753 = vmatpush1.bf16.msra.mxu0 %v6729_v8  ;;  %6806 = vmatpush1.bf16.msra.mxu1 %v6735_v51  ;;  %v6982_v49 = vpop.permute.xlu0 %6981  ;;  %v6721_v55 = vsel %vm6714_vm15, %v6711_v50, %v6713_v38 }
 0x4ad   : > { %6858 = vmatprep.subr.bf16.mxu0 %v6744_v52  ;;  %9464 = vrot.lane.b32.xlu1 %v19350_v44, %s21938_s21  ;;  %v6747_v4 = vand.u32 %v6721_v55, %v19442_v18 }
 0x4ae   : > { %9466 = vrot.lane.b32.xlu0 %v19352_v30, %s21938_s21  ;;  %6911 = vmatprep.subr.bf16.mxu1 %v6750_v53 }
 0x4af   : > { %v6984_v56 = vpop.permute.xlu1 %6983  ;;  %6624 = vmatprep.mubr.bf16.mxu0 %v17570_v15  ;;  %6677 = vmatprep.mubr.bf16.mxu1 %v17570_v15 }
 0x4b0   : > { %v6986_v54 = vpop.permute.xlu0 %6985  ;;  %v6997_v26 = vsel %vm6995_vm8, %v6982_v49, %v6984_v56 }
 0x4b1   : > { %9468 = vrot.lane.b32.xlu1 %v19356_v14, %s21938_s21  ;;  %v7013_v2 = vand.u32 %v6997_v26, %v19442_v18  ;;  %v6998_v11 = vsel %vm6995_vm8, %v6984_v56, %v6986_v54 }
 0x4b2   : > { %9470 = vrot.lane.b32.xlu0 %v19359_v58, %s21938_s21  ;;  %v7016_v23 = vand.u32 %v6998_v11, %v19442_v18 }
 0x4b3   : > { %15117 = vmatmul.mubr.msk.bf16.gmra.mrb[208].mxu0 %vm6441_vm9, %v17342_v9  ;;  %15119 = vmatmul.mubr.msk.bf16.gmra.mrb[216].mxu1 %vm6441_vm9, %v17342_v9  ;;  %v19527_v60 = vpop.permute.xlu1 %6987 }
 0x4b4   : > { %6784 = vmatprep.mubr.bf16.mxu0 %v17570_v15  ;;  %6837 = vmatprep.mubr.bf16.mxu1 %v17570_v15  ;;  %v6999_v0 = vsel %vm6995_vm8, %v6986_v54, %v19527_v60  ;;  %v6980_v27 = vpop.permute.xlu0 %6979 }
 0x4b5   : > { %9462 = vrot.lane.b32.xlu1 %v19342_v59, %s21938_s21  ;;  %v7019_v5 = vand.u32 %v6999_v0, %v19442_v18  ;;  %v6996_v6 = vsel %vm6995_vm8, %v6980_v27, %v6982_v49  ;;  %v17349_v27 = vld [vmem:[%s21936_s3 + $0x38] sm:$0xff]  }
 0x4b6   : > { %9472 = vrot.lane.b32.xlu0 %v19361_v19, %s21938_s21  ;;  %v7010_v28 = vand.u32 %v6996_v6, %v19442_v18 }
 0x4b7   : > { %v6990_v10 = vpop.permute.xlu1 %6989 }
 0x4b8   : > { %v6992_v1 = vpop.permute.xlu0 %6991  ;;  %v7000_v32 = vsel %vm6995_vm8, %v19527_v60, %v6990_v10 }
 0x4b9   : > { %9474 = vrot.lane.b32.xlu1 %v19365_v57, %s21938_s21  ;;  %v7001_v22 = vsel %vm6995_vm8, %v6990_v10, %v6992_v1  ;;  %v7022_v9 = vand.u32 %v7000_v32, %v19442_v18  ;;  %v17350_v32 = vld [vmem:[%s21936_s3 + $0x40] sm:$0xff]  }
 0x4ba   : > { %9476 = vrot.lane.b32.xlu0 %v19399_v61, %s21938_s21  ;;  %v7025_v25 = vand.u32 %v7001_v22, %v19442_v18 }
 0x4bb   : > { %15122 = vmatmul.mubr.msk.bf16.vlgmr.msra.gmra.mrb[196].mxu0 %vm6441_vm9, %v17343_v48  ;;  %15124 = vmatmul.mubr.msk.bf16.vlgmr.msra.gmra.mrb[204].mxu1 %vm6441_vm9, %v17343_v48  ;;  %v6994_v7 = vpop.permute.xlu1 %6993 }
 0x4bc   : > { %6859 = vmatpush1.bf16.msra.mxu0 %v6741_v17  ;;  %6912 = vmatpush1.bf16.msra.mxu1 %v6747_v4  ;;  %v7031_v21 = vand.u32 %v6994_v7, %v19442_v18  ;;  %v7295_v20 = vpop.permute.xlu0 %7294  ;;  %v7002_v63 = vsel %vm6995_vm8, %v6992_v1, %v6994_v7 }
 0x4bd   : > { %7033 = vmatprep.subr.bf16.mxu0 %v7013_v2  ;;  %7086 = vmatprep.subr.bf16.mxu1 %v7019_v5  ;;  %v7028_v12 = vand.u32 %v7002_v63, %v19442_v18 }
 0x4be   : > { %9776 = vrot.lane.b32.xlu1 %v19350_v44, %s21939_s30  ;;  %9778 = vrot.lane.b32.xlu0 %v19352_v30, %s21939_s30 }
 0x4bf   : > { %6794 = vmatprep.mubr.bf16.mxu0 %v17570_v15  ;;  %6847 = vmatprep.mubr.bf16.mxu1 %v17570_v15  ;;  %v7297_v35 = vpop.permute.xlu1 %7296 }
 0x4c0   : > { %v7299_v31 = vpop.permute.xlu0 %7298  ;;  %v7310_v37 = vsel %vm7308_vm0, %v7295_v20, %v7297_v35 }
 0x4c1   : > { %v7326_v39 = vand.u32 %v7310_v37, %v19442_v18  ;;  %v7311_v47 = vsel %vm7308_vm0, %v7297_v35, %v7299_v31  ;;  %v11325_v35 = vld [vmem:[%s21880_s4 + $0x18] sm:$0xff]  ;;  %v7940_v37 = vand.u32 %v19356_v14, %v19442_v18 }
 0x4c2   : > { %9780 = vrot.lane.b32.xlu1 %v19356_v14, %s21939_s30  ;;  %9782 = vrot.lane.b32.xlu0 %v19359_v58, %s21939_s30  ;;  %v7329_v50 = vand.u32 %v7311_v47, %v19442_v18 }
 0x4c3   : > { %15123 = vmatmul.mubr.msk.bf16.gmra.mrb[200].mxu0 %vm6441_vm9, %v17344_v24  ;;  %15125 = vmatmul.mubr.msk.bf16.gmra.mrb[208].mxu1 %vm6441_vm9, %v17344_v24  ;;  %v19595_v34 = vpop.permute.xlu1 %7300 }
 0x4c4   : > { %6890 = vmatprep.mubr.bf16.mxu0 %v17570_v15  ;;  %6943 = vmatprep.mubr.bf16.mxu1 %v17570_v15  ;;  %v7312_v29 = vsel %vm7308_vm0, %v7299_v31, %v19595_v34  ;;  %v7293_v62 = vpop.permute.xlu0 %7292 }
 0x4c5   : > { %v7332_v40 = vand.u32 %v7312_v29, %v19442_v18  ;;  %v7309_v3 = vsel %vm7308_vm0, %v7293_v62, %v7295_v20  ;;  %v17351_v29 = vld [vmem:[%s21936_s3 + $0x48] sm:$0xff]   ;;  %v7943_v62 = vand.u32 %v19359_v58, %v19442_v18 }
 0x4c6   : > { %9774 = vrot.lane.b32.xlu1 %v19342_v59, %s21939_s30  ;;  %9784 = vrot.lane.b32.xlu0 %v19361_v19, %s21939_s30  ;;  %v7323_v43 = vand.u32 %v7309_v3, %v19442_v18 }
 0x4c7   : > { %v7303_v42 = vpop.permute.xlu1 %7302 }
 0x4c8   : > { %v7305_v45 = vpop.permute.xlu0 %7304  ;;  %v7313_v49 = vsel %vm7308_vm0, %v19595_v34, %v7303_v42 }
 0x4c9   : > { %v7314_v46 = vsel %vm7308_vm0, %v7303_v42, %v7305_v45  ;;  %v7335_v26 = vand.u32 %v7313_v49, %v19442_v18 }
 0x4ca   : > { %9786 = vrot.lane.b32.xlu1 %v19365_v57, %s21939_s30  ;;  %9788 = vrot.lane.b32.xlu0 %v19399_v61, %s21939_s30  ;;  %v7338_v8 = vand.u32 %v7314_v46, %v19442_v18 }
 0x4cb   : > { %15126 = vmatmul.mubr.msk.bf16.vlgmr.msra.gmra.mrb[204].mxu0 %vm6441_vm9, %v17343_v48  ;;  %15128 = vmatmul.mubr.msk.bf16.vlgmr.msra.gmra.mrb[212].mxu1 %vm6441_vm9, %v17343_v48  ;;  %v7307_v16 = vpop.permute.xlu1 %7306 }
 0x4cc   : > { %7034 = vmatpush1.bf16.msra.mxu0 %v7010_v28  ;;  %7087 = vmatpush1.bf16.msra.mxu1 %v7016_v23  ;;  %v7344_v51 = vand.u32 %v7307_v16, %v19442_v18  ;;  %v7611_v52 = vpop.permute.xlu0 %7610  ;;  %v7315_v60 = vsel %vm7308_vm0, %v7305_v45, %v7307_v16  ;;  %vm21962_vm0 = vcmask 1040384  }
 0x4cd   : > { %7139 = vmatprep.subr.bf16.mxu0 %v7025_v25  ;;  %7192 = vmatprep.subr.bf16.mxu1 %v7031_v21  ;;  %v7341_v0 = vand.u32 %v7315_v60, %v19442_v18  ;;  %v11323_v25 = vld [vmem:[%s21880_s4 + $0x8] sm:$0xff] }
 0x4ce   : > { %10090 = vrot.lane.b32.xlu1 %v19352_v30, %s17601_s22  ;;  %10092 = vrot.lane.b32.xlu0 %v19356_v14, %s17601_s22 }
 0x4cf   : > { %6900 = vmatprep.mubr.bf16.mxu0 %v17570_v15  ;;  %6953 = vmatprep.mubr.bf16.mxu1 %v17570_v15  ;;  %v7613_v38 = vpop.permute.xlu1 %7612 }
 0x4d0   : > { %v7615_v53 = vpop.permute.xlu0 %7614  ;;  %v7628_v55 = vsel %vm7626_vm10, %v7611_v52, %v7613_v38 }
 0x4d1   : > { %v7645_v17 = vand.u32 %v7628_v55, %v19442_v18  ;;  %v7629_v1 = vsel %vm7626_vm10, %v7613_v38, %v7615_v53 }
 0x4d2   : > { %10094 = vrot.lane.b32.xlu1 %v19359_v58, %s17601_s22  ;;  %10096 = vrot.lane.b32.xlu0 %v19361_v19, %s17601_s22  ;;  %v7648_v7 = vand.u32 %v7629_v1, %v19442_v18 }
 0x4d3   : > { %15127 = vmatmul.mubr.msk.bf16.gmra.mrb[208].mxu0 %vm6441_vm9, %v17344_v24  ;;  %15129 = vmatmul.mubr.msk.bf16.gmra.mrb[216].mxu1 %vm6441_vm9, %v17344_v24  ;;  %v19668_v56 = vpop.permute.xlu1 %7616 }
 0x4d4   : > { %7065 = vmatprep.mubr.bf16.mxu0 %v17570_v15  ;;  %7118 = vmatprep.mubr.bf16.mxu1 %v17570_v15  ;;  %v7630_v54 = vsel %vm7626_vm10, %v7615_v53, %v19668_v56  ;;  %v7609_v48 = vpop.permute.xlu0 %7608 }
 0x4d5   : > { %v7651_v4 = vand.u32 %v7630_v54, %v19442_v18  ;;  %v7627_v11 = vsel %vm7626_vm10, %v7609_v48, %v7611_v52  ;;  %v17354_v54 = vld [vmem:[%s21936_s3 + $0x60] sm:$0xff]  }
 0x4d6   : > { %10088 = vrot.lane.b32.xlu1 %v19350_v44, %s17601_s22  ;;  %10098 = vrot.lane.b32.xlu0 %v19365_v57, %s17601_s22  ;;  %v7642_v23 = vand.u32 %v7627_v11, %v19442_v18 }
 0x4d7   : > { %v7619_v2 = vpop.permute.xlu1 %7618 }
 0x4d8   : > { %v7621_v5 = vpop.permute.xlu0 %7620  ;;  %v7631_v20 = vsel %vm7626_vm10, %v19668_v56, %v7619_v2 }
 0x4d9   : > { %v7632_v6 = vsel %vm7626_vm10, %v7619_v2, %v7621_v5  ;;  %v7654_v63 = vand.u32 %v7631_v20, %v19442_v18 }
 0x4da   : > { %10100 = vrot.lane.b32.xlu1 %v19399_v61, %s17601_s22  ;;  %10102 = vrot.lane.b32.xlu0 %v19610_v33, %s17601_s22  ;;  %v7657_v21 = vand.u32 %v7632_v6, %v19442_v18  ;;  %s14897_s22 = scalar_lea.sflag [#allocation4], %s431_s1 }
 0x4db   : > { %15136 = vmatmul.mubr.msk.bf16.vlgmr.msra.gmra.mrb[196].mxu0 %vm6441_vm9, %v17346_v36  ;;  %15138 = vmatmul.mubr.msk.bf16.vlgmr.msra.gmra.mrb[204].mxu1 %vm6441_vm9, %v17346_v36  ;;  %v7623_v24 = vpop.permute.xlu1 %7622 }
 0x4dc   : > { %7140 = vmatpush1.bf16.msra.mxu0 %v7022_v9  ;;  %7193 = vmatpush1.bf16.msra.mxu1 %v7028_v12  ;;  %v7625_v10 = vpop.permute.xlu0 %7624  ;;  %v7633_v34 = vsel %vm7626_vm10, %v7621_v5, %v7623_v24  ;;  %v7952_v9 = vand.u32 %v19399_v61, %v19442_v18  ;;  %v17352_v12 = vld [vmem:[%s21936_s3 + $0x50] sm:$0xff]  }
 0x4dd   : > { %7346 = vmatprep.subr.bf16.mxu0 %v7326_v39  ;;  %7399 = vmatprep.subr.bf16.mxu1 %v7332_v40  ;;  %v7634_v22 = vsel %vm7626_vm10, %v7623_v24, %v7625_v10  ;;  %v7660_v31 = vand.u32 %v7633_v34, %v19442_v18 }
 0x4de   : > { %10403 = vrot.lane.b32.xlu1 %v19352_v30, %s21940_s24  ;;  %10405 = vrot.lane.b32.xlu0 %v19356_v14, %s21940_s24  ;;  %v7663_v28 = vand.u32 %v7634_v22, %v19442_v18 }
 0x4df   : > { %7075 = vmatprep.mubr.bf16.mxu0 %v17570_v15  ;;  %7128 = vmatprep.mubr.bf16.mxu1 %v17570_v15 }
 0x4e2   : > { %10407 = vrot.lane.b32.xlu1 %v19359_v58, %s21940_s24  ;;  %10409 = vrot.lane.b32.xlu0 %v19361_v19, %s21940_s24 }
 0x4e3   : > { %15137 = vmatmul.mubr.msk.bf16.gmra.mrb[200].mxu0 %vm6441_vm9, %v17347_v41  ;;  %15139 = vmatmul.mubr.msk.bf16.gmra.mrb[208].mxu1 %vm6441_vm9, %v17347_v41 }
 0x4e4   : > { %7171 = vmatprep.mubr.bf16.mxu0 %v17570_v15  ;;  %7224 = vmatprep.mubr.bf16.mxu1 %v17570_v15 }
 0x4e6   : > { %10401 = vrot.lane.b32.xlu1 %v19350_v44, %s21940_s24  ;;  %10411 = vrot.lane.b32.xlu0 %v19365_v57, %s21940_s24 }
 0x4ea   : > { %10413 = vrot.lane.b32.xlu1 %v19399_v61, %s21940_s24  ;;  %10415 = vrot.lane.b32.xlu0 %v19610_v33, %s21940_s24 }
 0x4eb   : > { %15140 = vmatmul.mubr.msk.bf16.vlgmr.msra.gmra.mrb[204].mxu0 %vm6441_vm9, %v17346_v36  ;;  %15142 = vmatmul.mubr.msk.bf16.vlgmr.msra.gmra.mrb[212].mxu1 %vm6441_vm9, %v17346_v36  ;;  %v7934_v36 = vand.u32 %v19350_v44, %v19442_v18 }
 0x4ec   : > { %7347 = vmatpush1.bf16.msra.mxu0 %v7323_v43  ;;  %7400 = vmatpush1.bf16.msra.mxu1 %v7329_v50 }
 0x4ed   : > { %7452 = vmatprep.subr.bf16.mxu0 %v7338_v8  ;;  %7505 = vmatprep.subr.bf16.mxu1 %v7344_v51 }
 0x4ee   : > { %10715 = vrot.lane.b32.xlu1 %v19352_v30, %s21941_s16  ;;  %10717 = vrot.lane.b32.xlu0 %v19356_v14, %s21941_s16 }
 0x4ef   : > { %7181 = vmatprep.mubr.bf16.mxu0 %v17570_v15  ;;  %7234 = vmatprep.mubr.bf16.mxu1 %v17570_v15 }
 0x4f2   : > { %10719 = vrot.lane.b32.xlu1 %v19359_v58, %s21941_s16  ;;  %10721 = vrot.lane.b32.xlu0 %v19361_v19, %s21941_s16 }
 0x4f3   : > { %15141 = vmatmul.mubr.msk.bf16.gmra.mrb[208].mxu0 %vm6441_vm9, %v17347_v41  ;;  %15143 = vmatmul.mubr.msk.bf16.gmra.mrb[216].mxu1 %vm6441_vm9, %v17347_v41  ;;  %v7949_v41 = vand.u32 %v19365_v57, %v19442_v18 }
 0x4f4   : > { %7378 = vmatprep.mubr.bf16.mxu0 %v17570_v15  ;;  %7431 = vmatprep.mubr.bf16.mxu1 %v17570_v15 }
 0x4f6   : > { %10713 = vrot.lane.b32.xlu1 %v19350_v44, %s21941_s16  ;;  %10723 = vrot.lane.b32.xlu0 %v19365_v57, %s21941_s16 }
 0x4fa   : > { %10725 = vrot.lane.b32.xlu1 %v19399_v61, %s21941_s16  ;;  %10727 = vrot.lane.b32.xlu0 %v19610_v33, %s21941_s16  ;;  %s21961_s16 = smov 126  }
 0x4fb   : > { %15150 = vmatmul.mubr.msk.bf16.vlgmr.msra.gmra.mrb[196].mxu0 %vm6441_vm9, %v17348_v13  ;;  %15152 = vmatmul.mubr.msk.bf16.vlgmr.msra.gmra.mrb[204].mxu1 %vm6441_vm9, %v17348_v13 }
 0x4fc   : > { %7453 = vmatpush1.bf16.msra.mxu0 %v7335_v26  ;;  %7506 = vmatpush1.bf16.msra.mxu1 %v7341_v0 }
 0x4fd   : > { %7665 = vmatprep.subr.bf16.mxu0 %v7645_v17  ;;  %7718 = vmatprep.subr.bf16.mxu1 %v7651_v4 }
 0x4fe   : > { %11027 = vrot.lane.b32.xlu1 %v19352_v30, %s17594_s23  ;;  %11029 = vrot.lane.b32.xlu0 %v19356_v14, %s17594_s23  ;;  %v7937_v14 = vand.u32 %v19352_v30, %v19442_v18  ;;  %v8218_v30 = vpop.permute.xlu0 %8217 }
 0x4ff   : > { %7388 = vmatprep.mubr.bf16.mxu0 %v17570_v15  ;;  %7441 = vmatprep.mubr.bf16.mxu1 %v17570_v15 }
 0x502   : > { %11031 = vrot.lane.b32.xlu1 %v19359_v58, %s17594_s23  ;;  %11033 = vrot.lane.b32.xlu0 %v19361_v19, %s17594_s23 }
 0x503   : > { %15151 = vmatmul.mubr.msk.bf16.gmra.mrb[200].mxu0 %vm6441_vm9, %v17349_v27  ;;  %15153 = vmatmul.mubr.msk.bf16.gmra.mrb[208].mxu1 %vm6441_vm9, %v17349_v27 }
 0x504   : > { %7484 = vmatprep.mubr.bf16.mxu0 %v17570_v15  ;;  %7537 = vmatprep.mubr.bf16.mxu1 %v17570_v15 }
 0x506   : > { %11025 = vrot.lane.b32.xlu1 %v19350_v44, %s17594_s23  ;;  %11035 = vrot.lane.b32.xlu0 %v19365_v57, %s17594_s23  ;;  %v7931_v44 = vand.u32 %v19342_v59, %v19442_v18  ;;  %v8216_v59 = vpop.permute.xlu1 %8215  ;;  %v17353_v57 = vld [vmem:[%s21936_s3 + $0x58] sm:$0xff]  }
 0x507   : > { %v8230_v39 = vsel %vm910_vm4, %v8216_v59, %v8218_v30 }
 0x508   : > { %v8246_v42 = vand.u32 %v8230_v39, %v19442_v18 }
 0x50a   : > { %11037 = vrot.lane.b32.xlu1 %v19399_v61, %s17594_s23  ;;  %11039 = vrot.lane.b32.xlu0 %v19610_v33, %s17594_s23  ;;  %v7946_v33 = vand.u32 %v19361_v19, %v19442_v18  ;;  %v8220_v19 = vpop.permute.xlu1 %8219  ;;  %v8222_v61 = vpop.permute.xlu0 %8221 }
 0x50b   : > { %15154 = vmatmul.mubr.msk.bf16.vlgmr.msra.gmra.mrb[204].mxu0 %vm6441_vm9, %v17348_v13  ;;  %15156 = vmatmul.mubr.msk.bf16.vlgmr.msra.gmra.mrb[212].mxu1 %vm6441_vm9, %v17348_v13  ;;  %v8232_v40 = vsel %vm910_vm4, %v8220_v19, %v8222_v61  ;;  %v8231_v46 = vsel %vm910_vm4, %v8218_v30, %v8220_v19 }
 0x50c   : > { %7666 = vmatpush1.bf16.msra.mxu0 %v7642_v23  ;;  %7719 = vmatpush1.bf16.msra.mxu1 %v7648_v7  ;;  %v8252_v45 = vand.u32 %v8232_v40, %v19442_v18  ;;  %v8249_v51 = vand.u32 %v8231_v46, %v19442_v18 }
 0x50d   : > { %7771 = vmatprep.subr.bf16.mxu0 %v7657_v21  ;;  %7824 = vmatprep.subr.bf16.mxu1 %v7663_v28 }
 0x50e   : > { %11333 = vperm.xlu0 %17213, %v11323_v25   ;;  %7494 = vmatprep.mubr.bf16.mxu0 %v17570_v15  ;;  %v8214_v58 = vpop.permute.xlu1 %8213  ;;  %v8224_v47 = vpop.permute.xlu0 %8223 }
 0x50f   : > { %7547 = vmatprep.mubr.bf16.mxu1 %v17570_v15  ;;  %v8229_v16 = vsel %vm910_vm4, %v8214_v58, %v8216_v59  ;;  %v8233_v13 = vsel %vm910_vm4, %v8222_v61, %v8224_v47  ;;  %v17357_v59 = vld [vmem:[%s21936_s3 + $0x78] sm:$0xff]  }
 0x510   : > { %v8243_v8 = vand.u32 %v8229_v16, %v19442_v18  ;;  %v8255_v0 = vand.u32 %v8233_v13, %v19442_v18 }
 0x512   : > { %11343 = vperm.xlu0 %17213, %v11325_v35   ;;  %v8226_v3 = vpop.permute.xlu1 %8225  ;;  %v8228_v43 = vpop.permute.xlu0 %8227 }
 0x513   : > { %15155 = vmatmul.mubr.msk.bf16.gmra.mrb[208].mxu0 %vm6441_vm9, %v17349_v27  ;;  %15157 = vmatmul.mubr.msk.bf16.gmra.mrb[216].mxu1 %vm6441_vm9, %v17349_v27  ;;  %v8234_v50 = vsel %vm910_vm4, %v8224_v47, %v8226_v3  ;;  %v8264_v52 = vand.u32 %v8228_v43, %v19442_v18  ;;  %v8235_v55 = vsel %vm910_vm4, %v8226_v3, %v8228_v43  ;;  %v17355_v27 = vld [vmem:[%s21936_s3 + $0x68] sm:$0xff]  }
 0x514   : > { %7697 = vmatprep.mubr.bf16.mxu0 %v17570_v15  ;;  %7750 = vmatprep.mubr.bf16.mxu1 %v17570_v15  ;;  %v8258_v38 = vand.u32 %v8234_v50, %v19442_v18  ;;  %v8261_v17 = vand.u32 %v8235_v55, %v19442_v18  ;;  %v17358_v50 = vld [vmem:[%s21936_s3 + $0x80] sm:$0xff]  }
 0x516   : > { %v8528_v53 = vpop.permute.xlu1 %8527  ;;  %v8530_v56 = vpop.permute.xlu0 %8529 }
 0x517   : > { %v8542_v48 = vsel %vm1360_vm6, %v8528_v53, %v8530_v56 }
 0x518   : > { %v8558_v4 = vand.u32 %v8542_v48, %v19442_v18 }
 0x51a   : > { %v8532_v49 = vpop.permute.xlu1 %8531  ;;  %v8534_v60 = vpop.permute.xlu0 %8533 }
 0x51b   : > { %15165 = vmatmul.mubr.msk.bf16.vlgmr.msra.gmra.mrb[196].mxu0 %vm6441_vm9, %v17350_v32  ;;  %15167 = vmatmul.mubr.msk.bf16.vlgmr.msra.gmra.mrb[204].mxu1 %vm6441_vm9, %v17350_v32  ;;  %v8544_v26 = vsel %vm1360_vm6, %v8532_v49, %v8534_v60  ;;  %v8543_v1 = vsel %vm1360_vm6, %v8530_v56, %v8532_v49  ;;  %v17359_v49 = vld [vmem:[%s21936_s3 + $0x88] sm:$0xff]  }
 0x51c   : > { %7772 = vmatpush1.bf16.msra.mxu0 %v7654_v63  ;;  %7825 = vmatpush1.bf16.msra.mxu1 %v7660_v31  ;;  %v8564_v2 = vand.u32 %v8544_v26, %v19442_v18  ;;  %v8561_v7 = vand.u32 %v8543_v1, %v19442_v18  ;;  %v17356_v31 = vld [vmem:[%s21936_s3 + $0x70] sm:$0xff]  }
 0x51d   : > { %7954 = vmatprep.subr.bf16.mxu0 %v7934_v36  ;;  %8007 = vmatprep.subr.bf16.mxu1 %v7940_v37 }
 0x51e   : > { %7707 = vmatprep.mubr.bf16.mxu0 %v17570_v15  ;;  %7760 = vmatprep.mubr.bf16.mxu1 %v17570_v15  ;;  %v8526_v5 = vpop.permute.xlu1 %8525  ;;  %v8536_v24 = vpop.permute.xlu0 %8535 }
 0x51f   : > { %v8541_v11 = vsel %vm1360_vm6, %v8526_v5, %v8528_v53 }
 0x520   : > { %v8555_v23 = vand.u32 %v8541_v11, %v19442_v18 }
 0x522   : > { %v8538_v10 = vpop.permute.xlu1 %8537  ;;  %v8540_v22 = vpop.permute.xlu0 %8539 }
 0x523   : > { %15166 = vmatmul.mubr.msk.bf16.gmra.mrb[200].mxu0 %vm6441_vm9, %v17351_v29  ;;  %15168 = vmatmul.mubr.msk.bf16.gmra.mrb[208].mxu1 %vm6441_vm9, %v17351_v29  ;;  %v8546_v6 = vsel %vm1360_vm6, %v8536_v24, %v8538_v10  ;;  %v8576_v28 = vand.u32 %v8540_v22, %v19442_v18  ;;  %v8547_v63 = vsel %vm1360_vm6, %v8538_v10, %v8540_v22 }
 0x524   : > { %7803 = vmatprep.mubr.bf16.mxu0 %v17570_v15  ;;  %7856 = vmatprep.mubr.bf16.mxu1 %v17570_v15  ;;  %v8570_v21 = vand.u32 %v8546_v6, %v19442_v18  ;;  %v17360_v6 = vld [vmem:[%s21936_s3 + $0x90] sm:$0xff]  }
 0x526   : > { %v8840_v25 = vpop.permute.xlu1 %8839  ;;  %v8842_v35 = vpop.permute.xlu0 %8841 }
 0x527   : > { %v8855_v36 = vsel %vm8853_vm11, %v8840_v25, %v8842_v35 }
 0x52a   : > { %v8844_v20 = vpop.permute.xlu1 %8843  ;;  %v8846_v34 = vpop.permute.xlu0 %8845 }
 0x52b   : > { %15169 = vmatmul.mubr.msk.bf16.vlgmr.msra.gmra.mrb[204].mxu0 %vm6441_vm9, %v17350_v32  ;;  %15171 = vmatmul.mubr.msk.bf16.vlgmr.msra.gmra.mrb[212].mxu1 %vm6441_vm9, %v17350_v32  ;;  %v8545_v32 = vsel %vm1360_vm6, %v8534_v60, %v8536_v24  ;;  %v8857_v37 = vsel %vm8853_vm11, %v8844_v20, %v8846_v34  ;;  %v8856_v61 = vsel %vm8853_vm11, %v8842_v35, %v8844_v20  ;;  %v17361_v20 = vld [vmem:[%s21936_s3 + $0x98] sm:$0xff]   ;;  %vm10104_vm6 = vcmask 998400  }
 0x52c   : > { %7955 = vmatpush1.bf16.msra.mxu0 %v7931_v44  ;;  %8008 = vmatpush1.bf16.msra.mxu1 %v7937_v14  ;;  %v8573_v44 = vand.u32 %v8547_v63, %v19442_v18  ;;  %v8871_v14 = vand.u32 %v8855_v36, %v19442_v18 }
 0x52d   : > { %8060 = vmatprep.subr.bf16.mxu0 %v7946_v33  ;;  %8113 = vmatprep.subr.bf16.mxu1 %v7952_v9  ;;  %v8877_v33 = vand.u32 %v8857_v37, %v19442_v18 }
 0x52e   : > { %7813 = vmatprep.mubr.bf16.mxu0 %v17570_v15  ;;  %7866 = vmatprep.mubr.bf16.mxu1 %v17570_v15  ;;  %v8838_v9 = vpop.permute.xlu1 %8837  ;;  %v8848_v30 = vpop.permute.xlu0 %8847 }
 0x52f   : > { %v8858_v46 = vsel %vm8853_vm11, %v8846_v34, %v8848_v30 }
 0x532   : > { %v8850_v19 = vpop.permute.xlu1 %8849  ;;  %v8852_v40 = vpop.permute.xlu0 %8851 }
 0x533   : > { %15170 = vmatmul.mubr.msk.bf16.gmra.mrb[208].mxu0 %vm6441_vm9, %v17351_v29  ;;  %15172 = vmatmul.mubr.msk.bf16.gmra.mrb[216].mxu1 %vm6441_vm9, %v17351_v29  ;;  %v8567_v29 = vand.u32 %v8545_v32, %v19442_v18  ;;  %v8859_v39 = vsel %vm8853_vm11, %v8848_v30, %v8850_v19  ;;  %v8860_v16 = vsel %vm8853_vm11, %v8850_v19, %v8852_v40 }
 0x534   : > { %7986 = vmatprep.mubr.bf16.mxu0 %v17570_v15  ;;  %8039 = vmatprep.mubr.bf16.mxu1 %v17570_v15 }
 0x536   : > { %v9153_v58 = vpop.permute.xlu1 %9152 }
 0x53a   : > { %v9157_v47 = vpop.permute.xlu1 %9156 }
 0x53b   : > { %15179 = vmatmul.mubr.msk.bf16.vlgmr.msra.gmra.mrb[196].mxu0 %vm6441_vm9, %v17352_v12  ;;  %15181 = vmatmul.mubr.msk.bf16.vlgmr.msra.gmra.mrb[204].mxu1 %vm6441_vm9, %v17352_v12 }
 0x53c   : > { %8061 = vmatpush1.bf16.msra.mxu0 %v7943_v62  ;;  %8114 = vmatpush1.bf16.msra.mxu1 %v7949_v41  ;;  %v8874_v62 = vand.u32 %v8856_v61, %v19442_v18 }
 0x53d   : > { %8266 = vmatprep.subr.bf16.mxu0 %v8246_v42  ;;  %8319 = vmatprep.subr.bf16.mxu1 %v8252_v45  ;;  %v8889_v42 = vand.u32 %v8852_v40, %v19442_v18  ;;  %v8883_v45 = vand.u32 %v8859_v39, %v19442_v18  ;;  %v17362_v39 = vld [vmem:[%s21936_s3 + $0xa0] sm:$0xff]  }
 0x53e   : > { %7996 = vmatprep.mubr.bf16.mxu0 %v17570_v15  ;;  %8049 = vmatprep.mubr.bf16.mxu1 %v17570_v15  ;;  %v9151_v56 = vpop.permute.xlu1 %9150 }
 0x542   : > { %v9163_v13 = vpop.permute.xlu1 %9162 }
 0x543   : > { %15180 = vmatmul.mubr.msk.bf16.gmra.mrb[200].mxu0 %vm6441_vm9, %v17353_v57  ;;  %15182 = vmatmul.mubr.msk.bf16.gmra.mrb[208].mxu1 %vm6441_vm9, %v17353_v57 }
 0x544   : > { %8092 = vmatprep.mubr.bf16.mxu0 %v17570_v15  ;;  %8145 = vmatprep.mubr.bf16.mxu1 %v17570_v15 }
 0x546   : > { %v9465_v5 = vpop.permute.xlu1 %9464 }
 0x54a   : > { %v9469_v24 = vpop.permute.xlu1 %9468 }
 0x54b   : > { %15183 = vmatmul.mubr.msk.bf16.vlgmr.msra.gmra.mrb[204].mxu0 %vm6441_vm9, %v17352_v12  ;;  %15185 = vmatmul.mubr.msk.bf16.vlgmr.msra.gmra.mrb[212].mxu1 %vm6441_vm9, %v17352_v12  ;;  %v8854_v12 = vsel %vm8853_vm11, %v8838_v9, %v8840_v25  ;;  %vm11894_vm11 = vcmask 596992  }
 0x54c   : > { %8267 = vmatpush1.bf16.msra.mxu0 %v8243_v8  ;;  %8320 = vmatpush1.bf16.msra.mxu1 %v8249_v51  ;;  %v8868_v41 = vand.u32 %v8854_v12, %v19442_v18  ;;  %v8880_v8 = vand.u32 %v8858_v46, %v19442_v18 }
 0x54d   : > { %8372 = vmatprep.subr.bf16.mxu0 %v8258_v38  ;;  %8425 = vmatprep.subr.bf16.mxu1 %v8264_v52  ;;  %v8886_v52 = vand.u32 %v8860_v16, %v19442_v18 }
 0x54e   : > { %8102 = vmatprep.mubr.bf16.mxu0 %v17570_v15  ;;  %8155 = vmatprep.mubr.bf16.mxu1 %v17570_v15  ;;  %v9463_v35 = vpop.permute.xlu1 %9462 }
 0x552   : > { %v9475_v32 = vpop.permute.xlu1 %9474 }
 0x553   : > { %15184 = vmatmul.mubr.msk.bf16.gmra.mrb[208].mxu0 %vm6441_vm9, %v17353_v57  ;;  %15186 = vmatmul.mubr.msk.bf16.gmra.mrb[216].mxu1 %vm6441_vm9, %v17353_v57  ;;  %v9155_v57 = vpop.permute.xlu0 %9154 }
 0x554   : > { %8298 = vmatprep.mubr.bf16.mxu0 %v17570_v15  ;;  %8351 = vmatprep.mubr.bf16.mxu1 %v17570_v15  ;;  %v9167_v43 = vsel %vm2735_vm12, %v9153_v58, %v9155_v57  ;;  %v9168_v55 = vsel %vm2735_vm12, %v9155_v57, %v9157_v47 }
 0x555   : > { %v9183_v53 = vand.u32 %v9167_v43, %v19442_v18 }
 0x556   : > { %v9777_v9 = vpop.permute.xlu1 %9776 }
 0x557   : > { %v9159_v3 = vpop.permute.xlu0 %9158 }
 0x558   : > { %v9169_v51 = vsel %vm2735_vm12, %v9157_v47, %v9159_v3  ;;  %v17363_v47 = vld [vmem:[%s21936_s3 + $0xa8] sm:$0xff]  }
 0x559   : > { %v9189_v38 = vand.u32 %v9169_v51, %v19442_v18 }
 0x55a   : > { %v9781_v30 = vpop.permute.xlu1 %9780 }
 0x55b   : > { %15193 = vmatmul.mubr.msk.bf16.vlgmr.msra.gmra.mrb[196].mxu0 %vm6441_vm9, %v17354_v54  ;;  %15195 = vmatmul.mubr.msk.bf16.vlgmr.msra.gmra.mrb[204].mxu1 %vm6441_vm9, %v17354_v54  ;;  %v9161_v60 = vpop.permute.xlu0 %9160 }
 0x55c   : > { %8373 = vmatpush1.bf16.msra.mxu0 %v8255_v0  ;;  %8426 = vmatpush1.bf16.msra.mxu1 %v8261_v17  ;;  %v9171_v48 = vsel %vm2735_vm12, %v9161_v60, %v9163_v13  ;;  %v9186_v0 = vand.u32 %v9168_v55, %v19442_v18  ;;  %v9170_v1 = vsel %vm2735_vm12, %v9159_v3, %v9161_v60 }
 0x55d   : > { %8578 = vmatprep.subr.bf16.mxu0 %v8558_v4  ;;  %8631 = vmatprep.subr.bf16.mxu1 %v8564_v2  ;;  %v9195_v4 = vand.u32 %v9171_v48, %v19442_v18  ;;  %v17364_v48 = vld [vmem:[%s21936_s3 + $0xb0] sm:$0xff]  }
 0x55e   : > { %8308 = vmatprep.mubr.bf16.mxu0 %v17570_v15  ;;  %8361 = vmatprep.mubr.bf16.mxu1 %v17570_v15  ;;  %v9775_v57 = vpop.permute.xlu1 %9774 }
 0x55f   : > { %v9165_v26 = vpop.permute.xlu0 %9164 }
 0x560   : > { %v9201_v2 = vand.u32 %v9165_v26, %v19442_v18  ;;  %v9172_v11 = vsel %vm2735_vm12, %v9163_v13, %v9165_v26 }
 0x562   : > { %v9787_v46 = vpop.permute.xlu1 %9786 }
 0x563   : > { %15194 = vmatmul.mubr.msk.bf16.gmra.mrb[200].mxu0 %vm6441_vm9, %v17355_v27  ;;  %15196 = vmatmul.mubr.msk.bf16.gmra.mrb[208].mxu1 %vm6441_vm9, %v17355_v27 }
 0x564   : > { %8404 = vmatprep.mubr.bf16.mxu0 %v17570_v15  ;;  %8457 = vmatprep.mubr.bf16.mxu1 %v17570_v15 }
 0x56b   : > { %15197 = vmatmul.mubr.msk.bf16.vlgmr.msra.gmra.mrb[204].mxu0 %vm6441_vm9, %v17354_v54  ;;  %15199 = vmatmul.mubr.msk.bf16.vlgmr.msra.gmra.mrb[212].mxu1 %vm6441_vm9, %v17354_v54  ;;  %v9166_v54 = vsel %vm2735_vm12, %v9151_v56, %v9153_v58  ;;  %v10091_v56 = vpop.permute.xlu1 %10090 }
 0x56c   : > { %8579 = vmatpush1.bf16.msra.mxu0 %v8555_v23  ;;  %8632 = vmatpush1.bf16.msra.mxu1 %v8561_v7  ;;  %v9180_v17 = vand.u32 %v9166_v54, %v19442_v18  ;;  %v9192_v23 = vand.u32 %v9170_v1, %v19442_v18 }
 0x56d   : > { %8684 = vmatprep.subr.bf16.mxu0 %v8570_v21  ;;  %8737 = vmatprep.subr.bf16.mxu1 %v8576_v28  ;;  %v9198_v28 = vand.u32 %v9172_v11, %v19442_v18 }
 0x56e   : > { %8414 = vmatprep.mubr.bf16.mxu0 %v17570_v15  ;;  %8467 = vmatprep.mubr.bf16.mxu1 %v17570_v15 }
 0x56f   : > { %v10095_v60 = vpop.permute.xlu1 %10094 }
 0x573   : > { %15198 = vmatmul.mubr.msk.bf16.gmra.mrb[208].mxu0 %vm6441_vm9, %v17355_v27  ;;  %15200 = vmatmul.mubr.msk.bf16.gmra.mrb[216].mxu1 %vm6441_vm9, %v17355_v27  ;;  %v9467_v27 = vpop.permute.xlu0 %9466 }
 0x574   : > { %8610 = vmatprep.mubr.bf16.mxu0 %v17570_v15  ;;  %8663 = vmatprep.mubr.bf16.mxu1 %v17570_v15  ;;  %v9479_v22 = vsel %vm3191_vm14, %v9465_v5, %v9467_v27  ;;  %v9480_v63 = vsel %vm3191_vm14, %v9467_v27, %v9469_v24  ;;  %v10089_v27 = vpop.permute.xlu1 %10088 }
 0x575   : > { %v9495_v21 = vand.u32 %v9479_v22, %v19442_v18 }
 0x577   : > { %v9471_v10 = vpop.permute.xlu0 %9470 }
 0x578   : > { %v9481_v7 = vsel %vm3191_vm14, %v9469_v24, %v9471_v10  ;;  %v17365_v24 = vld [vmem:[%s21936_s3 + $0xb8] sm:$0xff]   ;;  %v10101_v1 = vpop.permute.xlu1 %10100 }
 0x579   : > { %v9501_v25 = vand.u32 %v9481_v7, %v19442_v18 }
 0x57b   : > { %15207 = vmatmul.mubr.msk.bf16.vlgmr.msra.gmra.mrb[196].mxu0 %vm6441_vm9, %v17356_v31  ;;  %15209 = vmatmul.mubr.msk.bf16.vlgmr.msra.gmra.mrb[204].mxu1 %vm6441_vm9, %v17356_v31  ;;  %v9473_v34 = vpop.permute.xlu0 %9472 }
 0x57c   : > { %8685 = vmatpush1.bf16.msra.mxu0 %v8567_v29  ;;  %8738 = vmatpush1.bf16.msra.mxu1 %v8573_v44  ;;  %v9483_v36 = vsel %vm3191_vm14, %v9473_v34, %v9475_v32  ;;  %v9498_v29 = vand.u32 %v9480_v63, %v19442_v18  ;;  %v9482_v61 = vsel %vm3191_vm14, %v9471_v10, %v9473_v34  ;;  %v11322_v34 = vld [vmem:[%s21880_s4] sm:$0xff] }
 0x57d   : > { %8891 = vmatprep.subr.bf16.mxu0 %v8871_v14  ;;  %8944 = vmatprep.subr.bf16.mxu1 %v8877_v33  ;;  %v9507_v14 = vand.u32 %v9483_v36, %v19442_v18 }
 0x57e   : > { %8620 = vmatprep.mubr.bf16.mxu0 %v17570_v15  ;;  %8673 = vmatprep.mubr.bf16.mxu1 %v17570_v15 }
 0x57f   : > { %v9477_v37 = vpop.permute.xlu0 %9476  ;;  %11328 = vperm.xlu1 %17214, %v11322_v34  }
 0x580   : > { %v9513_v33 = vand.u32 %v9477_v37, %v19442_v18  ;;  %v9484_v12 = vsel %vm3191_vm14, %v9475_v32, %v9477_v37 }
 0x583   : > { %15208 = vmatmul.mubr.msk.bf16.gmra.mrb[200].mxu0 %vm6441_vm9, %v17357_v59  ;;  %15210 = vmatmul.mubr.msk.bf16.gmra.mrb[208].mxu1 %vm6441_vm9, %v17357_v59 }
 0x584   : > { %8716 = vmatprep.mubr.bf16.mxu0 %v17570_v15  ;;  %8769 = vmatprep.mubr.bf16.mxu1 %v17570_v15 }
 0x58b   : > { %15211 = vmatmul.mubr.msk.bf16.vlgmr.msra.gmra.mrb[204].mxu0 %vm6441_vm9, %v17356_v31  ;;  %15213 = vmatmul.mubr.msk.bf16.vlgmr.msra.gmra.mrb[212].mxu1 %vm6441_vm9, %v17356_v31  ;;  %v9478_v31 = vsel %vm3191_vm14, %v9463_v35, %v9465_v5  ;;  %v10404_v35 = vpop.permute.xlu1 %10403  ;;  %vm21942_vm14 = vcmask 949248  }
 0x58c   : > { %8892 = vmatpush1.bf16.msra.mxu0 %v8868_v41  ;;  %8945 = vmatpush1.bf16.msra.mxu1 %v8874_v62  ;;  %v9492_v44 = vand.u32 %v9478_v31, %v19442_v18  ;;  %v9504_v41 = vand.u32 %v9482_v61, %v19442_v18  ;;  %v11324_v31 = vld [vmem:[%s21880_s4 + $0x10] sm:$0xff]  ;;  %v17367_v61 = vld [vmem:[%s21936_s3 + $0xc8] sm:$0xff]  }
 0x58d   : > { %8997 = vmatprep.subr.bf16.mxu0 %v8883_v45  ;;  %9050 = vmatprep.subr.bf16.mxu1 %v8889_v42  ;;  %v9510_v42 = vand.u32 %v9484_v12, %v19442_v18 }
 0x58e   : > { %8726 = vmatprep.mubr.bf16.mxu0 %v17570_v15  ;;  %8779 = vmatprep.mubr.bf16.mxu1 %v17570_v15 }
 0x58f   : > { %v10408_v32 = vpop.permute.xlu1 %10407  ;;  %11338 = vperm.xlu1 %17214, %v11324_v31  }
 0x593   : > { %15212 = vmatmul.mubr.msk.bf16.gmra.mrb[208].mxu0 %vm6441_vm9, %v17357_v59  ;;  %15214 = vmatmul.mubr.msk.bf16.gmra.mrb[216].mxu1 %vm6441_vm9, %v17357_v59  ;;  %v9779_v59 = vpop.permute.xlu0 %9778 }
 0x594   : > { %8923 = vmatprep.mubr.bf16.mxu0 %v17570_v15  ;;  %8976 = vmatprep.mubr.bf16.mxu1 %v17570_v15  ;;  %v9791_v40 = vsel %vm3647_vm2, %v9777_v9, %v9779_v59  ;;  %v9792_v16 = vsel %vm3647_vm2, %v9779_v59, %v9781_v30 }
 0x595   : > { %v9807_v45 = vand.u32 %v9791_v40, %v19442_v18 }
 0x597   : > { %v9783_v19 = vpop.permute.xlu0 %9782 }
 0x598   : > { %v9793_v62 = vsel %vm3647_vm2, %v9781_v30, %v9783_v19 }
 0x599   : > { %v9813_v58 = vand.u32 %v9793_v62, %v19442_v18 }
 0x59b   : > { %15221 = vmatmul.mubr.msk.bf16.vlgmr.msra.gmra.mrb[196].mxu0 %vm6441_vm9, %v17358_v50  ;;  %15223 = vmatmul.mubr.msk.bf16.vlgmr.msra.gmra.mrb[204].mxu1 %vm6441_vm9, %v17358_v50  ;;  %v9785_v3 = vpop.permute.xlu0 %9784 }
 0x59c   : > { %8998 = vmatpush1.bf16.msra.mxu0 %v8880_v8  ;;  %9051 = vmatpush1.bf16.msra.mxu1 %v8886_v52  ;;  %v9795_v43 = vsel %vm3647_vm2, %v9785_v3, %v9787_v46  ;;  %v9810_v8 = vand.u32 %v9792_v16, %v19442_v18  ;;  %v9794_v55 = vsel %vm3647_vm2, %v9783_v19, %v9785_v3  ;;  %v10402_v19 = vpop.permute.xlu1 %10401 }
 0x59d   : > { %9203 = vmatprep.subr.bf16.mxu0 %v9183_v53  ;;  %9256 = vmatprep.subr.bf16.mxu1 %v9189_v38  ;;  %v9819_v38 = vand.u32 %v9795_v43, %v19442_v18  ;;  %v10417_v62 = vsel %vm5016_vm13, %v10402_v19, %v10404_v35 }
 0x59e   : > { %8933 = vmatprep.mubr.bf16.mxu0 %v17570_v15  ;;  %8986 = vmatprep.mubr.bf16.mxu1 %v17570_v15 }
 0x59f   : > { %v9789_v51 = vpop.permute.xlu0 %9788 }
 0x5a0   : > { %v9825_v53 = vand.u32 %v9789_v51, %v19442_v18  ;;  %v9796_v54 = vsel %vm3647_vm2, %v9787_v46, %v9789_v51 }
 0x5a3   : > { %15222 = vmatmul.mubr.msk.bf16.gmra.mrb[200].mxu0 %vm6441_vm9, %v17359_v49  ;;  %15224 = vmatmul.mubr.msk.bf16.gmra.mrb[208].mxu1 %vm6441_vm9, %v17359_v49 }
 0x5a4   : > { %9029 = vmatprep.mubr.bf16.mxu0 %v17570_v15  ;;  %9082 = vmatprep.mubr.bf16.mxu1 %v17570_v15 }
 0x5ab   : > { %15225 = vmatmul.mubr.msk.bf16.vlgmr.msra.gmra.mrb[204].mxu0 %vm6441_vm9, %v17358_v50  ;;  %15227 = vmatmul.mubr.msk.bf16.vlgmr.msra.gmra.mrb[212].mxu1 %vm6441_vm9, %v17358_v50  ;;  %v9790_v50 = vsel %vm3647_vm2, %v9775_v57, %v9777_v9 }
 0x5ac   : > { %9204 = vmatpush1.bf16.msra.mxu0 %v9180_v17  ;;  %9257 = vmatpush1.bf16.msra.mxu1 %v9186_v0  ;;  %v9804_v52 = vand.u32 %v9790_v50, %v19442_v18  ;;  %v9816_v17 = vand.u32 %v9794_v55, %v19442_v18  ;;  %v17369_v55 = vld [vmem:[%s21936_s3 + $0xd8] sm:$0xff]  }
 0x5ad   : > { %9309 = vmatprep.subr.bf16.mxu0 %v9195_v4  ;;  %9362 = vmatprep.subr.bf16.mxu1 %v9201_v2  ;;  %v9822_v4 = vand.u32 %v9796_v54, %v19442_v18 }
 0x5ae   : > { %9039 = vmatprep.mubr.bf16.mxu0 %v17570_v15  ;;  %9092 = vmatprep.mubr.bf16.mxu1 %v17570_v15 }
 0x5b3   : > { %15226 = vmatmul.mubr.msk.bf16.gmra.mrb[208].mxu0 %vm6441_vm9, %v17359_v49  ;;  %15228 = vmatmul.mubr.msk.bf16.gmra.mrb[216].mxu1 %vm6441_vm9, %v17359_v49  ;;  %v10093_v49 = vpop.permute.xlu0 %10092 }
 0x5b4   : > { %9235 = vmatprep.mubr.bf16.mxu0 %v17570_v15  ;;  %9288 = vmatprep.mubr.bf16.mxu1 %v17570_v15  ;;  %v10106_v26 = vsel %vm10104_vm6, %v10091_v56, %v10093_v49  ;;  %v10107_v11 = vsel %vm10104_vm6, %v10093_v49, %v10095_v60 }
 0x5b5   : > { %v10122_v2 = vand.u32 %v10106_v26, %v19442_v18 }
 0x5b7   : > { %v10097_v13 = vpop.permute.xlu0 %10096 }
 0x5b8   : > { %v10108_v0 = vsel %vm10104_vm6, %v10095_v60, %v10097_v13 }
 0x5b9   : > { %v10128_v5 = vand.u32 %v10108_v0, %v19442_v18 }
 0x5bb   : > { %15235 = vmatmul.mubr.msk.bf16.vlgmr.msra.gmra.mrb[196].mxu0 %vm6441_vm9, %v17360_v6  ;;  %15237 = vmatmul.mubr.msk.bf16.vlgmr.msra.gmra.mrb[204].mxu1 %vm6441_vm9, %v17360_v6  ;;  %v10099_v10 = vpop.permute.xlu0 %10098 }
 0x5bc   : > { %9310 = vmatpush1.bf16.msra.mxu0 %v9192_v23  ;;  %9363 = vmatpush1.bf16.msra.mxu1 %v9198_v28  ;;  %v10110_v22 = vsel %vm10104_vm6, %v10099_v10, %v10101_v1  ;;  %v10125_v23 = vand.u32 %v10107_v11, %v19442_v18  ;;  %v10109_v36 = vsel %vm10104_vm6, %v10097_v13, %v10099_v10 }
 0x5bd   : > { %9515 = vmatprep.subr.bf16.mxu0 %v9495_v21  ;;  %9568 = vmatprep.subr.bf16.mxu1 %v9501_v25  ;;  %v10134_v21 = vand.u32 %v10110_v22, %v19442_v18 }
 0x5be   : > { %9245 = vmatprep.mubr.bf16.mxu0 %v17570_v15  ;;  %9298 = vmatprep.mubr.bf16.mxu1 %v17570_v15 }
 0x5bf   : > { %v10103_v7 = vpop.permute.xlu0 %10102 }
 0x5c0   : > { %v10140_v25 = vand.u32 %v10103_v7, %v19442_v18  ;;  %v10111_v37 = vsel %vm10104_vm6, %v10101_v1, %v10103_v7 }
 0x5c1   : > { %v10137_v9 = vand.u32 %v10111_v37, %v19442_v18 }
 0x5c3   : > { %15236 = vmatmul.mubr.msk.bf16.gmra.mrb[200].mxu0 %vm6441_vm9, %v17361_v20  ;;  %15238 = vmatmul.mubr.msk.bf16.gmra.mrb[208].mxu1 %vm6441_vm9, %v17361_v20 }
 0x5c4   : > { %9341 = vmatprep.mubr.bf16.mxu0 %v17570_v15  ;;  %9394 = vmatprep.mubr.bf16.mxu1 %v17570_v15 }
 0x5cb   : > { %15239 = vmatmul.mubr.msk.bf16.vlgmr.msra.gmra.mrb[204].mxu0 %vm6441_vm9, %v17360_v6  ;;  %15241 = vmatmul.mubr.msk.bf16.vlgmr.msra.gmra.mrb[212].mxu1 %vm6441_vm9, %v17360_v6  ;;  %v10105_v6 = vsel %vm10104_vm6, %v10089_v27, %v10091_v56 }
 0x5cc   : > { %9516 = vmatpush1.bf16.msra.mxu0 %v9492_v44  ;;  %9569 = vmatpush1.bf16.msra.mxu1 %v9498_v29  ;;  %v10119_v28 = vand.u32 %v10105_v6, %v19442_v18  ;;  %v17366_v29 = vld [vmem:[%s21936_s3 + $0xc0] sm:$0xff]  }
 0x5cd   : > { %9621 = vmatprep.subr.bf16.mxu0 %v9507_v14  ;;  %9674 = vmatprep.subr.bf16.mxu1 %v9513_v33  ;;  %v10131_v33 = vand.u32 %v10109_v36, %v19442_v18 }
 0x5ce   : > { %9351 = vmatprep.mubr.bf16.mxu0 %v17570_v15  ;;  %9404 = vmatprep.mubr.bf16.mxu1 %v17570_v15 }
 0x5d3   : > { %15240 = vmatmul.mubr.msk.bf16.gmra.mrb[208].mxu0 %vm6441_vm9, %v17361_v20  ;;  %15242 = vmatmul.mubr.msk.bf16.gmra.mrb[216].mxu1 %vm6441_vm9, %v17361_v20  ;;  %v10406_v20 = vpop.permute.xlu0 %10405 }
 0x5d4   : > { %9547 = vmatprep.mubr.bf16.mxu0 %v17570_v15  ;;  %9600 = vmatprep.mubr.bf16.mxu1 %v17570_v15  ;;  %v10418_v44 = vsel %vm5016_vm13, %v10404_v35, %v10406_v20  ;;  %v10419_v40 = vsel %vm5016_vm13, %v10406_v20, %v10408_v32 }
 0x5d5   : > { %v10434_v59 = vand.u32 %v10418_v44, %v19442_v18 }
 0x5d7   : > { %v10410_v63 = vpop.permute.xlu0 %10409 }
 0x5d8   : > { %v10420_v14 = vsel %vm5016_vm13, %v10408_v32, %v10410_v63 }
 0x5d9   : > { %v10440_v30 = vand.u32 %v10420_v14, %v19442_v18 }
 0x5db   : > { %15249 = vmatmul.mubr.msk.bf16.vlgmr.msra.gmra.mrb[196].mxu0 %vm6441_vm9, %v17362_v39  ;;  %15251 = vmatmul.mubr.msk.bf16.vlgmr.msra.gmra.mrb[204].mxu1 %vm6441_vm9, %v17362_v39  ;;  %v10412_v12 = vpop.permute.xlu0 %10411 }
 0x5dc   : > { %9622 = vmatpush1.bf16.msra.mxu0 %v9504_v41  ;;  %9675 = vmatpush1.bf16.msra.mxu1 %v9510_v42  ;;  %v10421_v43 = vsel %vm5016_vm13, %v10410_v63, %v10412_v12  ;;  %v17371_v63 = vld [vmem:[%s21936_s3 + $0xe8] sm:$0xff]  }
 0x5dd   : > { %9827 = vmatprep.subr.bf16.mxu0 %v9807_v45  ;;  %9880 = vmatprep.subr.bf16.mxu1 %v9813_v58  ;;  %v10437_v45 = vand.u32 %v10419_v40, %v19442_v18  ;;  %v10431_v58 = vand.u32 %v10417_v62, %v19442_v18  ;;  %v17373_v62 = vld [vmem:[%s21936_s3 + $0xf8] sm:$0xff]  }
 0x5de   : > { %9557 = vmatprep.mubr.bf16.mxu0 %v17570_v15  ;;  %9610 = vmatprep.mubr.bf16.mxu1 %v17570_v15 }
 0x5df   : > { %v10416_v42 = vpop.permute.xlu0 %10415 }
 0x5e3   : > { %15250 = vmatmul.mubr.msk.bf16.gmra.mrb[200].mxu0 %vm6441_vm9, %v17363_v47  ;;  %15252 = vmatmul.mubr.msk.bf16.gmra.mrb[208].mxu1 %vm6441_vm9, %v17363_v47  ;;  %v10718_v46 = vpop.permute.xlu0 %10717 }
 0x5e4   : > { %9653 = vmatprep.mubr.bf16.mxu0 %v17570_v15  ;;  %9706 = vmatprep.mubr.bf16.mxu1 %v17570_v15 }
 0x5e7   : > { %v10722_v50 = vpop.permute.xlu0 %10721 }
 0x5eb   : > { %15253 = vmatmul.mubr.msk.bf16.vlgmr.msra.gmra.mrb[204].mxu0 %vm6441_vm9, %v17362_v39  ;;  %15255 = vmatmul.mubr.msk.bf16.vlgmr.msra.gmra.mrb[212].mxu1 %vm6441_vm9, %v17362_v39  ;;  %v10414_v39 = vpop.permute.xlu1 %10413  ;;  %v10724_v54 = vpop.permute.xlu0 %10723 }
 0x5ec   : > { %9828 = vmatpush1.bf16.msra.mxu0 %v9804_v52  ;;  %9881 = vmatpush1.bf16.msra.mxu1 %v9810_v8  ;;  %v10422_v41 = vsel %vm5016_vm13, %v10412_v12, %v10414_v39  ;;  %v10423_v51 = vsel %vm5016_vm13, %v10414_v39, %v10416_v42  ;;  %v17368_v8 = vld [vmem:[%s21936_s3 + $0xd0] sm:$0xff]   ;;  %v10733_v22 = vsel %vm5472_vm5, %v10722_v50, %v10724_v54  ;;  %vm21943_vm13 = vmmov %vm21942_vm14 }
 0x5ed   : > { %9933 = vmatprep.subr.bf16.mxu0 %v9819_v38  ;;  %9986 = vmatprep.subr.bf16.mxu1 %v9825_v53  ;;  %v10446_v57 = vand.u32 %v10422_v41, %v19442_v18  ;;  %v10443_v53 = vand.u32 %v10421_v43, %v19442_v18  ;;  %v10449_v56 = vand.u32 %v10423_v51, %v19442_v18  ;;  %v17372_v12 = vld [vmem:[%s21936_s3 + $0xf0] sm:$0xff]  }
 0x5ee   : > { %9663 = vmatprep.mubr.bf16.mxu0 %v17570_v15  ;;  %9716 = vmatprep.mubr.bf16.mxu1 %v17570_v15 }
 0x5ef   : > { %v10716_v3 = vpop.permute.xlu1 %10715 }
 0x5f0   : > { %v10730_v52 = vsel %vm5472_vm5, %v10716_v3, %v10718_v46 }
 0x5f1   : > { %v10746_v49 = vand.u32 %v10730_v52, %v19442_v18 }
 0x5f3   : > { %15254 = vmatmul.mubr.msk.bf16.gmra.mrb[208].mxu0 %vm6441_vm9, %v17363_v47  ;;  %15256 = vmatmul.mubr.msk.bf16.gmra.mrb[216].mxu1 %vm6441_vm9, %v17363_v47  ;;  %v10452_v47 = vand.u32 %v10416_v42, %v19442_v18  ;;  %v10720_v16 = vpop.permute.xlu1 %10719 }
 0x5f4   : > { %9859 = vmatprep.mubr.bf16.mxu0 %v17570_v15  ;;  %9912 = vmatprep.mubr.bf16.mxu1 %v17570_v15  ;;  %v10732_v38 = vsel %vm5472_vm5, %v10720_v16, %v10722_v50  ;;  %v10731_v26 = vsel %vm5472_vm5, %v10718_v46, %v10720_v16 }
 0x5f5   : > { %v10752_v60 = vand.u32 %v10732_v38, %v19442_v18 }
 0x5f7   : > { %v10714_v13 = vpop.permute.xlu1 %10713 }
 0x5f8   : > { %v10729_v0 = vsel %vm5472_vm5, %v10714_v13, %v10716_v3 }
 0x5fb   : > { %15263 = vmatmul.mubr.msk.bf16.vlgmr.msra.gmra.mrb[196].mxu0 %vm6441_vm9, %v17364_v48  ;;  %15265 = vmatmul.mubr.msk.bf16.vlgmr.msra.gmra.mrb[204].mxu1 %vm6441_vm9, %v17364_v48 }
 0x5fc   : > { %9934 = vmatpush1.bf16.msra.mxu0 %v9816_v17  ;;  %9987 = vmatpush1.bf16.msra.mxu1 %v9822_v4  ;;  %v10728_v4 = vpop.permute.xlu0 %10727 }
 0x5fd   : > { %10142 = vmatprep.subr.bf16.mxu0 %v10122_v2  ;;  %10195 = vmatprep.subr.bf16.mxu1 %v10128_v5  ;;  %v10749_v2 = vand.u32 %v10731_v26, %v19442_v18  ;;  %v10743_v5 = vand.u32 %v10729_v0, %v19442_v18 }
 0x5fe   : > { %9869 = vmatprep.mubr.bf16.mxu0 %v17570_v15  ;;  %9922 = vmatprep.mubr.bf16.mxu1 %v17570_v15 }
 0x600   : > { %v11030_v1 = vpop.permute.xlu0 %11029 }
 0x603   : > { %15264 = vmatmul.mubr.msk.bf16.gmra.mrb[200].mxu0 %vm6441_vm9, %v17365_v24  ;;  %15266 = vmatmul.mubr.msk.bf16.gmra.mrb[208].mxu1 %vm6441_vm9, %v17365_v24 }
 0x604   : > { %9965 = vmatprep.mubr.bf16.mxu0 %v17570_v15  ;;  %10018 = vmatprep.mubr.bf16.mxu1 %v17570_v15  ;;  %v11034_v6 = vpop.permute.xlu0 %11033 }
 0x608   : > { %v11036_v31 = vpop.permute.xlu0 %11035 }
 0x60b   : > { %15267 = vmatmul.mubr.msk.bf16.vlgmr.msra.gmra.mrb[204].mxu0 %vm6441_vm9, %v17364_v48  ;;  %15269 = vmatmul.mubr.msk.bf16.vlgmr.msra.gmra.mrb[212].mxu1 %vm6441_vm9, %v17364_v48  ;;  %v10726_v48 = vpop.permute.xlu1 %10725 }
 0x60c   : > { %10143 = vmatpush1.bf16.msra.mxu0 %v10119_v28  ;;  %10196 = vmatpush1.bf16.msra.mxu1 %v10125_v23  ;;  %v10734_v17 = vsel %vm5472_vm5, %v10724_v54, %v10726_v48  ;;  %v10735_v7 = vsel %vm5472_vm5, %v10726_v48, %v10728_v4  ;;  %v17370_v23 = vld [vmem:[%s21936_s3 + $0xe0] sm:$0xff]   ;;  %vm21944_vm5 = vmmov %vm21943_vm13  ;;  %v11040_v14 = vpop.permute.xlu0 %11039 }
 0x60d   : > { %10248 = vmatprep.subr.bf16.mxu0 %v10134_v21  ;;  %10301 = vmatprep.subr.bf16.mxu1 %v10140_v25  ;;  %v10758_v27 = vand.u32 %v10734_v17, %v19442_v18  ;;  %v10755_v25 = vand.u32 %v10733_v22, %v19442_v18  ;;  %v10761_v35 = vand.u32 %v10735_v7, %v19442_v18  ;;  %vm21945_vm1 = vmmov %vm21944_vm5 }
 0x60e   : > { %9975 = vmatprep.mubr.bf16.mxu0 %v17570_v15  ;;  %10028 = vmatprep.mubr.bf16.mxu1 %v17570_v15  ;;  %vm21946_vm7 = vmmov %vm21945_vm1 }
 0x60f   : > { %v11028_v10 = vpop.permute.xlu1 %11027  ;;  %vm21947_vm15 = vmmov %vm21945_vm1 }
 0x610   : > { %v11042_v28 = vsel %vm21942_vm14, %v11028_v10, %v11030_v1  ;;  %v11045_v19 = vsel %vm21947_vm15, %v11034_v6, %v11036_v31  ;;  %vm21948_vm8 = vmmov %vm21945_vm1 }
 0x611   : > { %v11058_v20 = vand.u32 %v11042_v28, %v19442_v18  ;;  %v11067_v39 = vand.u32 %v11045_v19, %v19442_v18 }
 0x613   : > { %15268 = vmatmul.mubr.msk.bf16.gmra.mrb[208].mxu0 %vm6441_vm9, %v17365_v24  ;;  %15270 = vmatmul.mubr.msk.bf16.gmra.mrb[216].mxu1 %vm6441_vm9, %v17365_v24  ;;  %v10764_v24 = vand.u32 %v10728_v4, %v19442_v18  ;;  %v11032_v11 = vpop.permute.xlu1 %11031 }
 0x614   : > { %10174 = vmatprep.mubr.bf16.mxu0 %v17570_v15  ;;  %10227 = vmatprep.mubr.bf16.mxu1 %v17570_v15  ;;  %v11044_v21 = vsel %vm21943_vm13, %v11032_v11, %v11034_v6  ;;  %v11043_v37 = vsel %vm21944_vm5, %v11030_v1, %v11032_v11 }
 0x615   : > { %v11064_v34 = vand.u32 %v11044_v21, %v19442_v18 }
 0x617   : > { %v11026_v32 = vpop.permute.xlu1 %11025 }
 0x61b   : > { %15278 = vmatmul.mubr.msk.bf16.vlgmr.msra.gmra.mrb[196].mxu0 %vm6441_vm9, %v17366_v29  ;;  %15280 = vmatmul.mubr.msk.bf16.vlgmr.msra.gmra.mrb[204].mxu1 %vm6441_vm9, %v17366_v29  ;;  %v11038_v36 = vpop.permute.xlu1 %11037 }
 0x61c   : > { %10249 = vmatpush1.bf16.msra.mxu0 %v10131_v33  ;;  %10302 = vmatpush1.bf16.msra.mxu1 %v10137_v9  ;;  %v11046_v44 = vsel %vm21946_vm7, %v11036_v31, %v11038_v36  ;;  %v11061_v33 = vand.u32 %v11043_v37, %v19442_v18 }
 0x61d   : > { %10454 = vmatprep.subr.bf16.mxu0 %v10434_v59  ;;  %10507 = vmatprep.subr.bf16.mxu1 %v10440_v30  ;;  %v11070_v59 = vand.u32 %v11046_v44, %v19442_v18  ;;  %v11076_v30 = vand.u32 %v11040_v14, %v19442_v18 }
 0x61e   : > { %10184 = vmatprep.mubr.bf16.mxu0 %v17570_v15  ;;  %10237 = vmatprep.mubr.bf16.mxu1 %v17570_v15 }
 0x61f   : > { %v20181_v41 = vpop.permute.xlu1 %11328 }
 0x623   : > { %15279 = vmatmul.mubr.msk.bf16.gmra.mrb[200].mxu0 %vm6441_vm9, %v17367_v61  ;;  %15281 = vmatmul.mubr.msk.bf16.gmra.mrb[208].mxu1 %vm6441_vm9, %v17367_v61  ;;  %v20225_v1 = vpop.permute.xlu1 %11338 }
 0x624   : > { %10280 = vmatprep.mubr.bf16.mxu0 %v17570_v15  ;;  %10333 = vmatprep.mubr.bf16.mxu1 %v17570_v15 }
 0x62b   : > { %15282 = vmatmul.mubr.msk.bf16.vlgmr.msra.gmra.mrb[204].mxu0 %vm6441_vm9, %v17366_v29  ;;  %15284 = vmatmul.mubr.msk.bf16.vlgmr.msra.gmra.mrb[212].mxu1 %vm6441_vm9, %v17366_v29  ;;  %v11041_v29 = vsel %vm21945_vm1, %v11026_v32, %v11028_v10 }
 0x62c   : > { %10455 = vmatpush1.bf16.msra.mxu0 %v10431_v58  ;;  %10508 = vmatpush1.bf16.msra.mxu1 %v10437_v45  ;;  %v11055_v9 = vand.u32 %v11041_v29, %v19442_v18 }
 0x62d   : > { %10560 = vmatprep.subr.bf16.mxu0 %v10446_v57  ;;  %10613 = vmatprep.subr.bf16.mxu1 %v10452_v47 }
 0x62e   : > { %10290 = vmatprep.mubr.bf16.mxu0 %v17570_v15  ;;  %10343 = vmatprep.mubr.bf16.mxu1 %v17570_v15 }
 0x633   : > { %15283 = vmatmul.mubr.msk.bf16.gmra.mrb[208].mxu0 %vm6441_vm9, %v17367_v61  ;;  %15285 = vmatmul.mubr.msk.bf16.gmra.mrb[216].mxu1 %vm6441_vm9, %v17367_v61  ;;  %v11047_v61 = vsel %vm21948_vm8, %v11038_v36, %v11040_v14 }
 0x634   : > { %10486 = vmatprep.mubr.bf16.mxu0 %v17570_v15  ;;  %10539 = vmatprep.mubr.bf16.mxu1 %v17570_v15  ;;  %v11073_v40 = vand.u32 %v11047_v61, %v19442_v18  ;;  %v20179_v18 = vpop.permute.xlu0 %11333 }
 0x63b   : > { %15292 = vmatmul.mubr.msk.bf16.vlgmr.msra.gmra.mrb[196].mxu0 %vm6441_vm9, %v17368_v8  ;;  %15294 = vmatmul.mubr.msk.bf16.vlgmr.msra.gmra.mrb[204].mxu1 %vm6441_vm9, %v17368_v8 }
 0x63c   : > { %10561 = vmatpush1.bf16.msra.mxu0 %v10443_v53  ;;  %10614 = vmatpush1.bf16.msra.mxu1 %v10449_v56 }
 0x63d   : > { %10766 = vmatprep.subr.bf16.mxu0 %v10746_v49  ;;  %10819 = vmatprep.subr.bf16.mxu1 %v10752_v60 }
 0x63e   : > { %10496 = vmatprep.mubr.bf16.mxu0 %v17570_v15  ;;  %10549 = vmatprep.mubr.bf16.mxu1 %v17570_v15 }
 0x643   : > { %15293 = vmatmul.mubr.msk.bf16.gmra.mrb[200].mxu0 %vm6441_vm9, %v17369_v55  ;;  %15295 = vmatmul.mubr.msk.bf16.gmra.mrb[208].mxu1 %vm6441_vm9, %v17369_v55 }
 0x644   : > { %10592 = vmatprep.mubr.bf16.mxu0 %v17570_v15  ;;  %10645 = vmatprep.mubr.bf16.mxu1 %v17570_v15 }
 0x64b   : > { %15296 = vmatmul.mubr.msk.bf16.vlgmr.msra.gmra.mrb[204].mxu0 %vm6441_vm9, %v17368_v8  ;;  %15298 = vmatmul.mubr.msk.bf16.vlgmr.msra.gmra.mrb[212].mxu1 %vm6441_vm9, %v17368_v8 }
 0x64c   : > { %10767 = vmatpush1.bf16.msra.mxu0 %v10743_v5  ;;  %10820 = vmatpush1.bf16.msra.mxu1 %v10749_v2 }
 0x64d   : > { %10872 = vmatprep.subr.bf16.mxu0 %v10758_v27  ;;  %10925 = vmatprep.subr.bf16.mxu1 %v10764_v24 }
 0x64e   : > { %10602 = vmatprep.mubr.bf16.mxu0 %v17570_v15  ;;  %10655 = vmatprep.mubr.bf16.mxu1 %v17570_v15 }
 0x653   : > { %15297 = vmatmul.mubr.msk.bf16.gmra.mrb[208].mxu0 %vm6441_vm9, %v17369_v55  ;;  %15299 = vmatmul.mubr.msk.bf16.gmra.mrb[216].mxu1 %vm6441_vm9, %v17369_v55 }
 0x654   : > { %10798 = vmatprep.mubr.bf16.mxu0 %v17570_v15  ;;  %10851 = vmatprep.mubr.bf16.mxu1 %v17570_v15 }
 0x65b   : > { %15306 = vmatmul.mubr.msk.bf16.vlgmr.msra.gmra.mrb[196].mxu0 %vm6441_vm9, %v17370_v23  ;;  %15308 = vmatmul.mubr.msk.bf16.vlgmr.msra.gmra.mrb[204].mxu1 %vm6441_vm9, %v17370_v23 }
 0x65c   : > { %10873 = vmatpush1.bf16.msra.mxu0 %v10755_v25  ;;  %10926 = vmatpush1.bf16.msra.mxu1 %v10761_v35 }
 0x65d   : > { %11078 = vmatprep.subr.bf16.mxu0 %v11058_v20  ;;  %11131 = vmatprep.subr.bf16.mxu1 %v11064_v34 }
 0x65e   : > { %10808 = vmatprep.mubr.bf16.mxu0 %v17570_v15  ;;  %10861 = vmatprep.mubr.bf16.mxu1 %v17570_v15 }
 0x663   : > { %15307 = vmatmul.mubr.msk.bf16.gmra.mrb[200].mxu0 %vm6441_vm9, %v17371_v63  ;;  %15309 = vmatmul.mubr.msk.bf16.gmra.mrb[208].mxu1 %vm6441_vm9, %v17371_v63 }
 0x664   : > { %10904 = vmatprep.mubr.bf16.mxu0 %v17570_v15  ;;  %10957 = vmatprep.mubr.bf16.mxu1 %v17570_v15 }
 0x66b   : > { %15310 = vmatmul.mubr.msk.bf16.vlgmr.msra.gmra.mrb[204].mxu0 %vm6441_vm9, %v17370_v23  ;;  %15312 = vmatmul.mubr.msk.bf16.vlgmr.msra.gmra.mrb[212].mxu1 %vm6441_vm9, %v17370_v23 }
 0x66c   : > { %11079 = vmatpush1.bf16.msra.mxu0 %v11055_v9  ;;  %11132 = vmatpush1.bf16.msra.mxu1 %v11061_v33 }
 0x66d   : > { %11184 = vmatprep.subr.bf16.mxu0 %v11070_v59  ;;  %11237 = vmatprep.subr.bf16.mxu1 %v11076_v30  ;;  %v20254_v59 = vpop.permute.xlu0 %11343 }
 0x66e   : > { %10914 = vmatprep.mubr.bf16.mxu0 %v17570_v15  ;;  %10967 = vmatprep.mubr.bf16.mxu1 %v17570_v15 }
 0x673   : > { %15311 = vmatmul.mubr.msk.bf16.gmra.mrb[208].mxu0 %vm6441_vm9, %v17371_v63  ;;  %15313 = vmatmul.mubr.msk.bf16.gmra.mrb[216].mxu1 %vm6441_vm9, %v17371_v63 }
 0x674   : > { %11110 = vmatprep.mubr.bf16.mxu0 %v17570_v15  ;;  %11163 = vmatprep.mubr.bf16.mxu1 %v17570_v15 }
 0x67b   : > { %15320 = vmatmul.mubr.msk.bf16.vlgmr.msra.gmra.mrb[196].mxu0 %vm6441_vm9, %v17372_v12  ;;  %15322 = vmatmul.mubr.msk.bf16.vlgmr.msra.gmra.mrb[204].mxu1 %vm6441_vm9, %v17372_v12 }
 0x67c   : > { %11185 = vmatpush1.bf16.msra.mxu0 %v11067_v39  ;;  %11238 = vmatpush1.bf16.msra.mxu1 %v11073_v40 }
 0x67d   : > { %11120 = vmatprep.mubr.bf16.mxu0 %v17570_v15  ;;  %11173 = vmatprep.mubr.bf16.mxu1 %v17570_v15 }
 0x683   : > { %15321 = vmatmul.mubr.msk.bf16.gmra.mrb[200].mxu0 %vm6441_vm9, %v17373_v62  ;;  %15323 = vmatmul.mubr.msk.bf16.gmra.mrb[208].mxu1 %vm6441_vm9, %v17373_v62 }
 0x684   : > { %11216 = vmatprep.mubr.bf16.mxu0 %v17570_v15  ;;  %11269 = vmatprep.mubr.bf16.mxu1 %v17570_v15 }
 0x68b   : > { %15324 = vmatmul.mubr.msk.bf16.vlgmr.msra.gmra.mrb[204].mxu0 %vm6441_vm9, %v17372_v12  ;;  %15326 = vmatmul.mubr.msk.bf16.vlgmr.msra.gmra.mrb[212].mxu1 %vm6441_vm9, %v17372_v12 }
 0x68c   : > { %11226 = vmatprep.mubr.bf16.mxu0 %v17570_v15  ;;  %11279 = vmatprep.mubr.bf16.mxu1 %v17570_v15 }
 0x693   : > { %15325 = vmatmul.mubr.msk.bf16.gmra.mrb[208].mxu0 %vm6441_vm9, %v17373_v62  ;;  %15327 = vmatmul.mubr.msk.bf16.gmra.mrb[216].mxu1 %vm6441_vm9, %v17373_v62  ;;  %vm17602_vm9 = vmmov 1  }
 0x694   : > { %vm20958_vm10 = vmpackc.low %vm21962_vm0, %vm17602_vm9 }
 0x74e   : > { %v11112_v42 = vpop.f32.mrb[196].mxu0  ;;  %v11165_v45 = vpop.f32.mrb[204].mxu1 }
 0x74f   : > { %v20184_v58 = vadd.f32 %v20181_v41, %v11112_v42  ;;  %v20187_v57 = vadd.f32 %v20181_v41, %v11165_v45  ;;  %v11114_v47 = vpop.f32.mrb[197].mxu0  ;;  %v11167_v3 = vpop.f32.mrb[205].mxu1 }
 0x750   : > { %v20190_v15 = vadd.f32 %v20181_v41, %v11114_v47  ;;  %v20193_v46 = vadd.f32 %v20181_v41, %v11167_v3  ;;  %v11116_v16 = vpop.f32.mrb[198].mxu0  ;;  %v11169_v50 = vpop.f32.mrb[206].mxu1 }
 0x751   : > { %v11378_v43 = vmax.f32 %v20184_v58, 0.0  ;;  %v11380_v51 = vmax.f32 %v20187_v57, 0.0  ;;  %v20198_v8 = vadd.f32 %v20179_v18, %v11169_v50  ;;  %v11118_v52 = vpop.f32.mrb[199].mxu0  ;;  %v11171_v38 = vpop.f32.mrb[207].mxu1  ;;  %v20228_v11 = vadd.f32 %v20179_v18, %v11116_v16 }
 0x752   : > { %v11379_v53 = vmax.f32 %v20190_v15, 0.0  ;;  %v11381_v56 = vmax.f32 %v20193_v46, 0.0  ;;  %v20203_v49 = vadd.f32 %v20179_v18, %v11118_v52  ;;  %v20223_v10 = vadd.f32 %v20179_v18, %v11171_v38 }
 0x753   : > { %v11388_v55 = vmax.f32 %v20198_v8, 0.0  ;;  %v11386_v44 = vmax.f32 %v20228_v11, 0.0  ;;  %v11884_v11 = vld [vmem:[%s21882_s6 + $0x300] sm:$0xff] }
 0x754   : > { %v17215_v60 = vpack.i.bf16 %v11380_v51, %v11379_v53  ;;  %v17220_v13 = vpack.i.bf16 %v11378_v43, %v11381_v56  ;;  %v11387_v54 = vmax.f32 %v20203_v49, 0.0  ;;  %v11389_v31 = vmax.f32 %v20223_v10, 0.0  ;;  %v11851_v49 = vld [vmem:[%s21882_s6 + $0x1f8] sm:$0xff] }
 0x756   : > { %v11122_v48 = vpop.f32.mrb[200].mxu0  ;;  %17216 = vrot.lane.b32.xlu1 %v17215_v60, %s21906_s15  ;;  %17221 = vrot.lane.b32.xlu0 %v17220_v13, %s21906_s15  ;;  %v11175_v26 = vpop.f32.mrb[208].mxu1  ;;  %v17225_v4 = vpack.i.bf16 %v11388_v55, %v11387_v54 }
 0x757   : > { %v11124_v0 = vpop.f32.mrb[201].mxu0  ;;  %v11177_v17 = vpop.f32.mrb[209].mxu1  ;;  %v20231_v6 = vadd.f32 %v20225_v1, %v11122_v48  ;;  %v20234_v22 = vadd.f32 %v20225_v1, %v11175_v26 }
 0x758   : > { %v11126_v2 = vpop.f32.mrb[202].mxu0  ;;  %v11179_v5 = vpop.f32.mrb[210].mxu1  ;;  %v20237_v28 = vadd.f32 %v20225_v1, %v11124_v0  ;;  %v20243_v20 = vadd.f32 %v20225_v1, %v11177_v17 }
 0x759   : > { %v11128_v27 = vpop.f32.mrb[203].mxu0  ;;  %v11181_v24 = vpop.f32.mrb[211].mxu1  ;;  %v11394_v14 = vmax.f32 %v20231_v6, 0.0  ;;  %v11396_v33 = vmax.f32 %v20234_v22, 0.0  ;;  %v20269_v40 = vadd.f32 %v20254_v59, %v11179_v5  ;;  %v20280_v45 = vadd.f32 %v20254_v59, %v11126_v2 }
 0x75a   : > { %17226 = vrot.lane.b32.xlu1 %v17225_v4, %s21906_s15  ;;  %v11395_v30 = vmax.f32 %v20237_v28, 0.0  ;;  %v21914_v39 = vmax.f32 %v20243_v20, 0.0  ;;  %v20272_v62 = vadd.f32 %v20254_v59, %v11128_v27  ;;  %v20290_v50 = vadd.f32 %v20254_v59, %v11181_v24 }
 0x75b   : > { %v21916_v26 = vmax.f32 %v20269_v40, 0.0  ;;  %v21917_v27 = vmax.f32 %v20280_v45, 0.0 }
 0x75c   : > { %v17235_v16 = vpack.i.bf16 %v11396_v33, %v11395_v30  ;;  %v17245_v48 = vpack.i.bf16 %v11394_v14, %v21914_v39  ;;  %v21918_v0 = vmax.f32 %v20272_v62, 0.0  ;;  %v21911_v24 = vmax.f32 %v20290_v50, 0.0 }
 0x75e   : > { %v11218_v7 = vpop.f32.mrb[204].mxu0  ;;  %v11271_v23 = vpop.f32.mrb[212].mxu1 }
 0x75f   : > { %v20240_v21 = vadd.f32 %v20181_v41, %v11218_v7  ;;  %v11220_v25 = vpop.f32.mrb[205].mxu0  ;;  %v11273_v35 = vpop.f32.mrb[213].mxu1 }
 0x760   : > { %v20246_v34 = vadd.f32 %v20181_v41, %v11220_v25  ;;  %v11222_v32 = vpop.f32.mrb[206].mxu0  ;;  %v11275_v63 = vpop.f32.mrb[214].mxu1 }
 0x761   : > { %v11382_v36 = vmax.f32 %v20240_v21, 0.0  ;;  %v11224_v37 = vpop.f32.mrb[207].mxu0  ;;  %v11277_v29 = vpop.f32.mrb[215].mxu1  ;;  %v20262_v61 = vadd.f32 %v20179_v18, %v11222_v32 }
 0x762   : > { %v21915_v9 = vmax.f32 %v20246_v34, 0.0  ;;  %v20265_v12 = vadd.f32 %v20179_v18, %v11224_v37  ;;  %v17250_v37 = vpack.i.bf16 %v21916_v26, %v21918_v0 }
 0x763   : > { %v17230_v19 = vpack.i.bf16 %v11382_v36, %v11389_v31  ;;  %v21919_v52 = vmax.f32 %v20262_v61, 0.0 }
 0x764   : > { %v17240_v42 = vpack.i.bf16 %v11386_v44, %v21915_v9  ;;  %v21913_v38 = vmax.f32 %v20265_v12, 0.0  ;;  %v11838_v9 = vld [vmem:[%s21882_s6 + $0x190] sm:$0xff] }
 0x765   : > { %17231 = vrot.lane.b32.xlu0 %v17230_v19, %s21906_s15  ;;  %v11352_v19 = vadd.f32 %v20181_v41, %v11271_v23 }
 0x766   : > { %v11228_v47 = vpop.f32.mrb[208].mxu0  ;;  %v20282_v3 = vpop.f32.mrb[216].mxu1  ;;  %17241 = vrot.lane.b32.xlu1 %v17240_v42, %s21906_s15  ;;  %v17255_v7 = vpack.i.bf16 %v21913_v38, %v21919_v52  ;;  %v17260_v42 = vpack.i.bf16 %v21917_v27, %v21911_v24  ;;  %v11790_v24 = vld [vmem:[%s21882_s6 + $0x10] sm:$0xff]  ;;  %v11836_v38 = vld [vmem:[%s21882_s6 + $0x180] sm:$0xff]  ;;  %v11797_v27 = vld [vmem:[%s21882_s6 + $0x48] sm:$0xff] }
 0x767   : > { %v11230_v60 = vpop.f32.mrb[209].mxu0  ;;  %v20294_v13 = vpop.f32.mrb[217].mxu1  ;;  %v20315_v25 = vadd.f32 %v20225_v1, %v11228_v47  ;;  %v11814_v52 = vld [vmem:[%s21882_s6 + $0xd0] sm:$0xff] }
 0x768   : > { %v11232_v17 = vpop.f32.mrb[210].mxu0  ;;  %v20302_v4 = vpop.f32.mrb[218].mxu1  ;;  %v20318_v32 = vadd.f32 %v20225_v1, %v11230_v60  ;;  %v20333_v60 = vmax.f32 %v11352_v19, 0.0 }
 0x769   : > { %v11234_v2 = vpop.f32.mrb[211].mxu0  ;;  %v20304_v5 = vpop.f32.mrb[219].mxu1  ;;  %17236 = vrot.lane.b32.xlu0 %v17235_v16, %s21906_s15  ;;  %v21912_v47 = vmax.f32 %v20315_v25, 0.0  ;;  %v20339_v23 = vadd.f32 %v20254_v59, %v11232_v17 }
 0x76a   : > { %17246 = vrot.lane.b32.xlu1 %v17245_v48, %s21906_s15  ;;  %v21905_v16 = vmax.f32 %v20318_v32, 0.0  ;;  %v20336_v48 = vadd.f32 %v20181_v41, %v11273_v35 }
 0x76b   : > { %v21910_v35 = vmax.f32 %v20339_v23, 0.0 }
 0x76c   : > { %v17265_v19 = vpack.i.bf16 %v21905_v16, %v21912_v47  ;;  %v21909_v41 = vmax.f32 %v20336_v48, 0.0  ;;  %v11806_v16 = vld [vmem:[%s21882_s6 + $0x90] sm:$0xff]  ;;  %v11809_v47 = vld [vmem:[%s21882_s6 + $0xa8] sm:$0xff] }
 0x76d   : > { %17256 = vrot.lane.b32.xlu0 %v17255_v7, %s21906_s15  ;;  %v20342_v7 = vadd.f32 %v20254_v59, %v11234_v2 }
 0x76e   : > { %17251 = vrot.lane.b32.xlu1 %v17250_v37, %s21906_s15  ;;  %v11360_v37 = vadd.f32 %v20179_v18, %v11275_v63  ;;  %v20362_v63 = vadd.f32 %v20179_v18, %v11277_v29  ;;  %v11804_v18 = vld [vmem:[%s21882_s6 + $0x80] sm:$0xff]  ;;  %v11805_v29 = vld [vmem:[%s21882_s6 + $0x88] sm:$0xff] }
 0x76f   : > { %v21904_v17 = vmax.f32 %v20342_v7, 0.0 }
 0x770   : > { %v20359_v2 = vmax.f32 %v11360_v37, 0.0  ;;  %v11788_v37 = vld [vmem:[%s21882_s6] sm:$0xff] }
 0x771   : > { %17261 = vrot.lane.b32.xlu0 %v17260_v42, %s21906_s15  ;;  %v17270_v42 = vpack.i.bf16 %v21904_v17, %v21910_v35  ;;  %v16507_v17 = vpack.c.bf16 %v11805_v29, %v11804_v18  ;;  %v11791_v18 = vld [vmem:[%s21882_s6 + $0x18] sm:$0xff]  ;;  %v11808_v29 = vld [vmem:[%s21882_s6 + $0xa0] sm:$0xff] }
 0x772   : > { %11450 = vrot.lane.b32.xlu1 %v20333_v60, %s21906_s15 }
 0x773   : > { %16508 = vmatprep.subr.bf16.mxu0 %v16507_v17  ;;  %v11810_v17 = vld [vmem:[%s21882_s6 + $0xb0] sm:$0xff] }
 0x775   : > { %17266 = vrot.lane.b32.xlu0 %v17265_v19, %s21906_s15  ;;  %v21908_v19 = vmax.f32 %v20362_v63, 0.0 }
 0x776   : > { %11579 = vrot.lane.b32.xlu1 %v21909_v41, %s21906_s15 }
 0x779   : > { %11464 = vrot.lane.b32.xlu0 %v20359_v2, %s21906_s15 }
 0x77a   : > { %17271 = vrot.lane.b32.xlu1 %v17270_v42, %s21906_s15  ;;  %v11789_v42 = vld [vmem:[%s21882_s6 + $0x8] sm:$0xff] }
 0x77b   : > { %v16509_v41 = vpack.c.bf16 %v11789_v42, %v11788_v37  ;;  %v16513_v37 = vpack.c.bf16 %v11791_v18, %v11790_v24  ;;  %v16515_v42 = vpack.c.bf16 %v11809_v47, %v11808_v29  ;;  %v11837_v24 = vld [vmem:[%s21882_s6 + $0x188] sm:$0xff]  ;;  %v11820_v47 = vld [vmem:[%s21882_s6 + $0x100] sm:$0xff] }
 0x77c   : > { %v16539_v18 = vpack.c.bf16 %v11837_v24, %v11836_v38  ;;  %v11839_v38 = vld [vmem:[%s21882_s6 + $0x198] sm:$0xff]  ;;  %v11822_v24 = vld [vmem:[%s21882_s6 + $0x110] sm:$0xff] }
 0x77d   : > { %11581 = vrot.lane.b32.xlu0 %v21908_v19, %s21906_s15  ;;  %v11807_v19 = vld [vmem:[%s21882_s6 + $0x98] sm:$0xff]  ;;  %16510 = vmatpush3.bf16.msra.mxu0 %v16509_v41  ;;  %s15713_s15 = sshll.u32 %s17698_s29, 4  ;;  %s17606_s29 = smov [#allocation3]  }
 0x77e   : > { %v16511_v35 = vpack.c.bf16 %v11807_v19, %v11806_v16  ;;  %v11792_v16 = vld [vmem:[%s21882_s6 + $0x20] sm:$0xff]  ;;  %v11793_v19 = vld [vmem:[%s21882_s6 + $0x28] sm:$0xff]  ;;  %v11811_v41 = vld [vmem:[%s21882_s6 + $0xb8] sm:$0xff]  ;;  %16540 = vmatprep.subr.bf16.mxu1 %v16539_v18  ;;  %s21834_s21 = scalar_lea.hbm %s21889_s13, %s15713_s15  ;;  %s17508_s0 = sshll.u32 %s17606_s29, 4  ;;  %s17509_s0 = int_to_ptr.vmem [resolvable:$false] %s17508_s0 }
 0x77f   : > { %v16517_v39 = vpack.c.bf16 %v11793_v19, %v11792_v16  ;;  %v16519_v26 = vpack.c.bf16 %v11811_v41, %v11810_v17  ;;  %v11795_v16 = vld [vmem:[%s21882_s6 + $0x38] sm:$0xff]  ;;  %v16543_v19 = vpack.c.bf16 %v11839_v38, %v11838_v9  ;;  %v11840_v41 = vld [vmem:[%s21882_s6 + $0x1a0] sm:$0xff]  ;;  %v11841_v9 = vld [vmem:[%s21882_s6 + $0x1a8] sm:$0xff]  ;;  %s17510_s2 = scalar_lea.vmem %s17509_s0, 32 }
 0x780   : > { %16512 = vmatprep.subr.bf16.mxu0 %v16511_v35  ;;  %v11821_v35 = vld [vmem:[%s21882_s6 + $0x108] sm:$0xff]  ;;  %v11823_v18 = vld [vmem:[%s21882_s6 + $0x118] sm:$0xff] }
 0x781   : > { %v16541_v29 = vpack.c.bf16 %v11821_v35, %v11820_v47  ;;  %16514 = vmatpush3.bf16.msra.mxu0 %v16513_v37  ;;  %v11794_v37 = vld [vmem:[%s21882_s6 + $0x30] sm:$0xff]  ;;  %v11812_v47 = vld [vmem:[%s21882_s6 + $0xc0] sm:$0xff]  ;;  %v16545_v17 = vpack.c.bf16 %v11823_v18, %v11822_v24  ;;  %v16547_v24 = vpack.c.bf16 %v11841_v9, %v11840_v41 }
 0x782   : > { %16516 = vmatprep.subr.bf16.mxu0 %v16515_v42  ;;  %v11813_v42 = vld [vmem:[%s21882_s6 + $0xc8] sm:$0xff]  ;;  %v11824_v35 = vld [vmem:[%s21882_s6 + $0x120] sm:$0xff]  ;;  %v16521_v38 = vpack.c.bf16 %v11795_v16, %v11794_v37  ;;  %v11798_v16 = vld [vmem:[%s21882_s6 + $0x50] sm:$0xff] }
 0x783   : > { %16542 = vmatpush3.bf16.msra.mxu1 %v16541_v29  ;;  %v11825_v29 = vld [vmem:[%s21882_s6 + $0x128] sm:$0xff]  ;;  %v16523_v18 = vpack.c.bf16 %v11813_v42, %v11812_v47  ;;  %v11799_v47 = vld [vmem:[%s21882_s6 + $0x58] sm:$0xff]  ;;  %v11800_v41 = vld [vmem:[%s21882_s6 + $0x60] sm:$0xff] }
 0x784   : > { %16544 = vmatprep.subr.bf16.mxu1 %v16543_v19  ;;  %v11796_v19 = vld [vmem:[%s21882_s6 + $0x40] sm:$0xff]  ;;  %v16549_v0 = vpack.c.bf16 %v11825_v29, %v11824_v35  ;;  %v16529_v42 = vpack.c.bf16 %v11799_v47, %v11798_v16  ;;  %v11842_v35 = vld [vmem:[%s21882_s6 + $0x1b0] sm:$0xff]  ;;  %v11843_v29 = vld [vmem:[%s21882_s6 + $0x1b8] sm:$0xff] }
 0x785   : > { %16518 = vmatpush3.bf16.msra.mxu0 %v16517_v39  ;;  %v11815_v39 = vld [vmem:[%s21882_s6 + $0xd8] sm:$0xff]  ;;  %v11802_v16 = vld [vmem:[%s21882_s6 + $0x70] sm:$0xff] }
 0x786   : > { %16520 = vmatprep.subr.bf16.mxu0 %v16519_v26  ;;  %v16525_v26 = vpack.c.bf16 %v11797_v27, %v11796_v19  ;;  %v16527_v37 = vpack.c.bf16 %v11815_v39, %v11814_v52  ;;  %v11817_v52 = vld [vmem:[%s21882_s6 + $0xe8] sm:$0xff]  ;;  %v11818_v39 = vld [vmem:[%s21882_s6 + $0xf0] sm:$0xff]  ;;  %v11803_v47 = vld [vmem:[%s21882_s6 + $0x78] sm:$0xff] }
 0x787   : > { %16546 = vmatpush3.bf16.msra.mxu1 %v16545_v17  ;;  %v11816_v17 = vld [vmem:[%s21882_s6 + $0xe0] sm:$0xff] }
 0x788   : > { %16548 = vmatprep.subr.bf16.mxu1 %v16547_v24  ;;  %v16531_v27 = vpack.c.bf16 %v11817_v52, %v11816_v17  ;;  %v16551_v24 = vpack.c.bf16 %v11843_v29, %v11842_v35  ;;  %v11844_v17 = vld [vmem:[%s21882_s6 + $0x1c0] sm:$0xff]  ;;  %v11845_v52 = vld [vmem:[%s21882_s6 + $0x1c8] sm:$0xff] }
 0x789   : > { %16522 = vmatpush3.bf16.msra.mxu0 %v16521_v38  ;;  %v11826_v38 = vld [vmem:[%s21882_s6 + $0x130] sm:$0xff]  ;;  %v11829_v35 = vld [vmem:[%s21882_s6 + $0x148] sm:$0xff] }
 0x78a   : > { %16524 = vmatprep.subr.bf16.mxu0 %v16523_v18  ;;  %v11827_v18 = vld [vmem:[%s21882_s6 + $0x138] sm:$0xff] }
 0x78b   : > { %16550 = vmatpush3.bf16.msra.mxu1 %v16549_v0  ;;  %v11801_v0 = vld [vmem:[%s21882_s6 + $0x68] sm:$0xff]  ;;  %v16553_v19 = vpack.c.bf16 %v11827_v18, %v11826_v38 }
 0x78c   : > { %v16533_v9 = vpack.c.bf16 %v11801_v0, %v11800_v41  ;;  %16552 = vmatprep.subr.bf16.mxu1 %v16551_v24  ;;  %v16555_v0 = vpack.c.bf16 %v11845_v52, %v11844_v17  ;;  %v11846_v17 = vld [vmem:[%s21882_s6 + $0x1d0] sm:$0xff] }
 0x78d   : > { %16526 = vmatpush3.bf16.msra.mxu0 %v16525_v26  ;;  %v11819_v26 = vld [vmem:[%s21882_s6 + $0xf8] sm:$0xff] }
 0x78e   : > { %16528 = vmatprep.subr.bf16.mxu0 %v16527_v37  ;;  %v16535_v37 = vpack.c.bf16 %v11819_v26, %v11818_v39  ;;  %v11869_v39 = vld [vmem:[%s21882_s6 + $0x288] sm:$0xff] }
 0x78f   : > { %16554 = vmatpush3.bf16.msra.mxu1 %v16553_v19  ;;  %v11868_v19 = vld [vmem:[%s21882_s6 + $0x280] sm:$0xff] }
 0x790   : > { %16556 = vmatprep.subr.bf16.mxu1 %v16555_v0 }
 0x791   : > { %16530 = vmatpush3.bf16.msra.mxu0 %v16529_v42  ;;  %v16537_v42 = vpack.c.bf16 %v11803_v47, %v11802_v16 }
 0x792   : > { %16532 = vmatprep.subr.bf16.mxu0 %v16531_v27 }
 0x795   : > { %16534 = vmatpush3.bf16.msra.mxu0 %v16533_v9  ;;  %v11828_v9 = vld [vmem:[%s21882_s6 + $0x140] sm:$0xff] }
 0x796   : > { %16536 = vmatprep.subr.bf16.mxu0 %v16535_v37  ;;  %v16557_v26 = vpack.c.bf16 %v11829_v35, %v11828_v9  ;;  %v16571_v37 = vpack.c.bf16 %v11869_v39, %v11868_v19  ;;  %v11830_v9 = vld [vmem:[%s21882_s6 + $0x150] sm:$0xff]  ;;  %v11831_v35 = vld [vmem:[%s21882_s6 + $0x158] sm:$0xff] }
 0x797   : > { %v16561_v19 = vpack.c.bf16 %v11831_v35, %v11830_v9 }
 0x798   : > { %16558 = vmatpush3.bf16.msra.mxu1 %v16557_v26 }
 0x799   : > { %16538 = vmatpush3.bf16.msra.mxu0 %v16537_v42  ;;  %v11847_v42 = vld [vmem:[%s21882_s6 + $0x1d8] sm:$0xff] }
 0x79a   : > { %16572 = vmatprep.subr.bf16.mxu0 %v16571_v37 }
 0x7c8   : > { %v17217_v27 = vpop.permute.xlu1 %17216  ;;  %v20525_v41 = vpop.permute.xlu0 %17221 }
 0x7c9   : > { %v17219_v29 = vunpack.i.h.bf16 %v17217_v27  ;;  %v17218_v38 = vunpack.i.l.bf16 %v17217_v27  ;;  %v17224_v24 = vunpack.i.h.bf16 %v20525_v41  ;;  %v17223_v18 = vunpack.i.l.bf16 %v20525_v41 }
 0x7cb   : > { %v11496_v16 = vsel %vm910_vm4, %v17218_v38, %v17219_v29  ;;  %v11497_v47 = vsel %vm910_vm4, %v17219_v29, %v17223_v18  ;;  %v11495_v27 = vsel %vm910_vm4, %v17224_v24, %v17218_v38  ;;  %v16559_v29 = vpack.c.bf16 %v11847_v42, %v11846_v17  ;;  %v11848_v38 = vld [vmem:[%s21882_s6 + $0x1e0] sm:$0xff]  ;;  %v11849_v24 = vld [vmem:[%s21882_s6 + $0x1e8] sm:$0xff]  ;;  %v11834_v42 = vld [vmem:[%s21882_s6 + $0x170] sm:$0xff] }
 0x7cc   : > { %v20551_v52 = vmax.f32 %v11379_v53, %v11496_v16  ;;  %v20556_v41 = vmax.f32 %v11380_v51, %v11497_v47  ;;  %v17227_v0 = vpop.permute.xlu1 %17226  ;;  %v20575_v39 = vmax.f32 %v11378_v43, %v11495_v27  ;;  %v16563_v37 = vpack.c.bf16 %v11849_v24, %v11848_v38  ;;  %v11832_v16 = vld [vmem:[%s21882_s6 + $0x160] sm:$0xff]  ;;  %v11833_v47 = vld [vmem:[%s21882_s6 + $0x168] sm:$0xff]  ;;  %v11850_v43 = vld [vmem:[%s21882_s6 + $0x1f0] sm:$0xff] }
 0x7cd   : > { %v17229_v15 = vunpack.i.h.bf16 %v17227_v0  ;;  %v17228_v53 = vunpack.i.l.bf16 %v17227_v0  ;;  %16560 = vmatprep.subr.bf16.mxu1 %v16559_v29  ;;  %v16565_v17 = vpack.c.bf16 %v11833_v47, %v11832_v16  ;;  %v11835_v27 = vld [vmem:[%s21882_s6 + $0x178] sm:$0xff] }
 0x7ce   : > { %v17275_v57 = vpack.i.bf16 %v20556_v41, %v20551_v52  ;;  %16562 = vmatpush3.bf16.msra.mxu1 %v16561_v19  ;;  %v16569_v0 = vpack.c.bf16 %v11835_v27, %v11834_v42  ;;  %v11885_v42 = vld [vmem:[%s21882_s6 + $0x308] sm:$0xff] }
 0x7cf   : > { %v11502_v51 = vsel %vm910_vm4, %v17228_v53, %v17229_v15  ;;  %16564 = vmatprep.subr.bf16.mxu1 %v16563_v37 }
 0x7d0   : > { %v20579_v26 = vmax.f32 %v11387_v54, %v11502_v51  ;;  %17276 = vrot.lane.b32.xlu1 %v17275_v57, %s21937_s20  ;;  %v16567_v54 = vpack.c.bf16 %v11851_v49, %v11850_v43 }
 0x7d2   : > { %v17280_v58 = vpack.i.bf16 %v20579_v26, %v20575_v39  ;;  %16566 = vmatpush3.bf16.msra.mxu1 %v16565_v17 }
 0x7d3   : > { %16568 = vmatprep.subr.bf16.mxu1 %v16567_v54 }
 0x7d4   : > { %17281 = vrot.lane.b32.xlu0 %v17280_v58, %s21937_s20 }
 0x7d6   : > { %16570 = vmatpush3.bf16.msra.mxu1 %v16569_v0 }
 0x7d7   : > { %v17232_v9 = vpop.permute.xlu0 %17231 }
 0x7d8   : > { %v17234_v35 = vunpack.i.h.bf16 %v17232_v9  ;;  %v17233_v29 = vunpack.i.l.bf16 %v17232_v9  ;;  %v17242_v19 = vpop.permute.xlu1 %17241 }
 0x7d9   : > { %v17244_v57 = vunpack.i.h.bf16 %v17242_v19  ;;  %v17243_v51 = vunpack.i.l.bf16 %v17242_v19 }
 0x7da   : > { %v11498_v38 = vsel %vm910_vm4, %v17223_v18, %v17234_v35  ;;  %v11503_v24 = vsel %vm910_vm4, %v17229_v15, %v17233_v29 }
 0x7db   : > { %v20607_v37 = vmax.f32 %v11381_v56, %v11498_v38  ;;  %v20611_v16 = vmax.f32 %v11388_v55, %v11503_v24  ;;  %v11501_v47 = vsel %vm910_vm4, %v17244_v57, %v17228_v53  ;;  %v11499_v17 = vsel %vm910_vm4, %v17234_v35, %v17243_v51  ;;  %v17237_v58 = vpop.permute.xlu0 %17236 }
 0x7dc   : > { %v20617_v43 = vmax.f32 %v11386_v44, %v11501_v47  ;;  %v20621_v18 = vmax.f32 %v11382_v36, %v11499_v17  ;;  %v17239_v46 = vunpack.i.h.bf16 %v17237_v58  ;;  %v17238_v56 = vunpack.i.l.bf16 %v17237_v58  ;;  %v17247_v15 = vpop.permute.xlu1 %17246 }
 0x7dd   : > { %v17249_v49 = vunpack.i.h.bf16 %v17247_v15  ;;  %v17248_v8 = vunpack.i.l.bf16 %v17247_v15  ;;  %v17285_v55 = vpack.i.bf16 %v20607_v37, %v20611_v16  ;;  %v20646_v57 = vpack.c.bf16 %v11885_v42, %v11884_v11 }
 0x7de   : > { %v11508_v53 = vsel %vm910_vm4, %v17238_v56, %v17239_v46  ;;  %v17290_v54 = vpack.i.bf16 %v20617_v43, %v20621_v18  ;;  %v21949_v17 = vmax.f32 %v20262_v61, 0.0 }
 0x7df   : > { %v20633_v21 = vmax.f32 %v11395_v30, %v11508_v53  ;;  %v11509_v36 = vsel %vm910_vm4, %v17239_v46, %v17248_v8  ;;  %v17257_v44 = vpop.permute.xlu0 %17256  ;;  %17286 = vrot.lane.b32.xlu1 %v17285_v55, %s21937_s20  ;;  %v11507_v27 = vsel %vm910_vm4, %v17249_v49, %v17238_v56  ;;  %16604 = vmatprep.subr.bf16.mxu1 %v20646_v57  ;;  %v21950_v56 = vmax.f32 %v20272_v62, 0.0 }
 0x7e0   : > { %v20643_v0 = vmax.f32 %v11396_v33, %v11509_v36  ;;  %v17259_v9 = vunpack.i.h.bf16 %v17257_v44  ;;  %v17258_v35 = vunpack.i.l.bf16 %v17257_v44  ;;  %v17252_v28 = vpop.permute.xlu1 %17251  ;;  %17291 = vrot.lane.b32.xlu0 %v17290_v54, %s21937_s20  ;;  %v20654_v22 = vmax.f32 %v11394_v14, %v11507_v27 }
 0x7e1   : > { %v17254_v30 = vunpack.i.h.bf16 %v17252_v28  ;;  %v17253_v19 = vunpack.i.l.bf16 %v17252_v28  ;;  %v21951_v62 = vmax.f32 %v20280_v45, 0.0  ;;  %v21952_v54 = vmax.f32 %v20269_v40, 0.0 }
 0x7e2   : > { %v11504_v38 = vsel %vm910_vm4, %v17233_v29, %v17258_v35  ;;  %v11505_v24 = vsel %vm910_vm4, %v17258_v35, %v17259_v9  ;;  %v17295_v47 = vpack.i.bf16 %v20643_v0, %v20633_v21 }
 0x7e3   : > { %v20658_v33 = vmax.f32 %v11389_v31, %v11504_v38  ;;  %v20662_v58 = vmax.f32 %v21949_v17, %v11505_v24  ;;  %v11514_v46 = vsel %vm910_vm4, %v17253_v19, %v17254_v30  ;;  %v17262_v29 = vpop.permute.xlu0 %17261 }
 0x7e4   : > { %v20668_v15 = vmax.f32 %v21950_v56, %v11514_v46  ;;  %v17264_v6 = vunpack.i.h.bf16 %v17262_v29  ;;  %v17263_v14 = vunpack.i.l.bf16 %v17262_v29  ;;  %v20670_v49 = vpop.permute.xlu1 %11450  ;;  %17296 = vrot.lane.b32.xlu1 %v17295_v47, %s21937_s20  ;;  %v21955_v46 = vmax.f32 %v20265_v12, 0.0 }
 0x7e5   : > { %v17300_v10 = vpack.i.bf16 %v20658_v33, %v20654_v22  ;;  %v11500_v44 = vsel %vm910_vm4, %v17243_v51, %v20670_v49  ;;  %v21954_v51 = vmax.f32 %v20243_v20, 0.0 }
 0x7e6   : > { %v11513_v31 = vsel %vm910_vm4, %v17264_v6, %v17253_v19  ;;  %v11515_v61 = vsel %vm910_vm4, %v17254_v30, %v17263_v14  ;;  %v17305_v55 = vpack.i.bf16 %v20668_v15, %v20662_v58  ;;  %v21953_v30 = vmax.f32 %v20246_v34, 0.0 }
 0x7e7   : > { %v20681_v53 = vmax.f32 %v21951_v62, %v11513_v31  ;;  %v20685_v11 = vmax.f32 %v21952_v54, %v11515_v61  ;;  %v20687_v36 = vpop.permute.xlu0 %17266  ;;  %17301 = vrot.lane.b32.xlu0 %v17300_v10, %s21937_s20  ;;  %v21956_v10 = vmax.f32 %v20315_v25, 0.0  ;;  %v21957_v25 = vmax.f32 %v20290_v50, 0.0 }
 0x7e8   : > { %v17269_v42 = vunpack.i.h.bf16 %v20687_v36  ;;  %v17268_v27 = vunpack.i.l.bf16 %v20687_v36  ;;  %v11580_v35 = vpop.permute.xlu1 %11579  ;;  %17306 = vrot.lane.b32.xlu1 %v17305_v55, %s21937_s20  ;;  %v20702_v19 = vmax.f32 %v21953_v30, %v11500_v44  ;;  %v20764_v30 = vadd.f32 %v20225_v1, %v20294_v13 }
 0x7e9   : > { %v11587_v45 = vsel %vm910_vm4, %v20670_v49, %v11580_v35  ;;  %v17310_v40 = vpack.i.bf16 %v20681_v53, %v20685_v11 }
 0x7ea   : > { %v11510_v28 = vsel %vm910_vm4, %v17248_v8, %v17268_v27  ;;  %v11511_v47 = vsel %vm910_vm4, %v17268_v27, %v17269_v42  ;;  %v11599_v17 = vmax.f32 %v20333_v60, %v11587_v45  ;;  %v11368_v45 = vadd.f32 %v20225_v1, %v20282_v3 }
 0x7eb   : > { %v20706_v38 = vmax.f32 %v21954_v51, %v11510_v28  ;;  %v20708_v24 = vpop.permute.xlu0 %11464  ;;  %17311 = vrot.lane.b32.xlu0 %v17310_v40, %s21937_s20  ;;  %v20729_v31 = vmax.f32 %v21956_v10, %v11511_v47  ;;  %v21959_v40 = vmax.f32 %v20336_v48, 0.0  ;;  %v11376_v51 = vadd.f32 %v20254_v59, %v20302_v4  ;;  %v11870_v10 = vld [vmem:[%s21882_s6 + $0x290] sm:$0xff] }
 0x7ec   : > { %v11506_v8 = vsel %vm910_vm4, %v17259_v9, %v20708_v24  ;;  %v20717_v34 = vpop.permute.xlu1 %17271  ;;  %v21960_v3 = vmax.f32 %v20362_v63, 0.0 }
 0x7ed   : > { %v20721_v20 = vmax.f32 %v21955_v46, %v11506_v8  ;;  %v17274_v29 = vunpack.i.h.bf16 %v20717_v34  ;;  %v17273_v56 = vunpack.i.l.bf16 %v20717_v34  ;;  %v17315_v6 = vpack.i.bf16 %v20706_v38, %v20702_v19  ;;  %v11852_v46 = vld [vmem:[%s21882_s6 + $0x200] sm:$0xff] }
 0x7ee   : > { %v11600_v28 = vmax.f32 %v21959_v40, %v11580_v35  ;;  %v11401_v35 = vmax.f32 %v20764_v30, 0.0  ;;  %v20774_v47 = vmax.f32 %v11376_v51, 0.0  ;;  %v11856_v40 = vld [vmem:[%s21882_s6 + $0x220] sm:$0xff]  ;;  %v11875_v51 = vld [vmem:[%s21882_s6 + $0x2b8] sm:$0xff] }
 0x7ef   : > { %v11516_v61 = vsel %vm910_vm4, %v17263_v14, %v17273_v56  ;;  %v11517_v9 = vsel %vm910_vm4, %v17273_v56, %v17274_v29  ;;  %v11582_v12 = vpop.permute.xlu0 %11581  ;;  %11651 = vrot.lane.b32.xlu0 %v11599_v17, %s21937_s20  ;;  %17316 = vrot.lane.b32.xlu1 %v17315_v6, %s21937_s20  ;;  %v17320_v62 = vpack.i.bf16 %v20721_v20, %v20729_v31  ;;  %v21958_v14 = vmax.f32 %v20339_v23, 0.0  ;;  %v11853_v56 = vld [vmem:[%s21882_s6 + $0x208] sm:$0xff]  ;;  %v17375_v30 = vld [vmem:[%s21883_s7 + $0x1c] sm:$0xff]  }
 0x7f0   : > { %v11588_v55 = vsel %vm910_vm4, %v20708_v24, %v11582_v12  ;;  %v20743_v54 = vmax.f32 %v21957_v25, %v11516_v61  ;;  %v20760_v23 = vmax.f32 %v11368_v45, 0.0  ;;  %v11602_v48 = vmax.f32 %v21960_v3, %v11582_v12  ;;  %v11871_v61 = vld [vmem:[%s21882_s6 + $0x298] sm:$0xff] }
 0x7f1   : > { %v20747_v44 = vmax.f32 %v21958_v14, %v11517_v9  ;;  %v11601_v27 = vmax.f32 %v20359_v2, %v11588_v55  ;;  %v20778_v17 = vadd.f32 %v20254_v59, %v20304_v5  ;;  %v16573_v9 = vpack.c.bf16 %v11853_v56, %v11852_v46  ;;  %v11855_v25 = vld [vmem:[%s21882_s6 + $0x218] sm:$0xff]  ;;  %v11872_v14 = vld [vmem:[%s21882_s6 + $0x2a0] sm:$0xff]  ;;  %v11858_v56 = vld [vmem:[%s21882_s6 + $0x230] sm:$0xff] }
 0x7f2   : > { %v16575_v55 = vpack.c.bf16 %v11871_v61, %v11870_v10  ;;  %v11876_v61 = vld [vmem:[%s21882_s6 + $0x2c0] sm:$0xff] }
 0x7f3   : > { %11667 = vrot.lane.b32.xlu0 %v11601_v27, %s21937_s20  ;;  %17321 = vrot.lane.b32.xlu1 %v17320_v62, %s21937_s20  ;;  %v17325_v50 = vpack.i.bf16 %v20747_v44, %v20743_v54  ;;  %v11409_v1 = vmax.f32 %v20778_v17, 0.0  ;;  %v11854_v62 = vld [vmem:[%s21882_s6 + $0x210] sm:$0xff]  ;;  %v11873_v27 = vld [vmem:[%s21882_s6 + $0x2a8] sm:$0xff] }
 0x7f4   : > { %v16579_v45 = vpack.c.bf16 %v11873_v27, %v11872_v14  ;;  %v17377_v17 = vld [vmem:[%s21883_s7 + $0x24] sm:$0xff]  }
 0x7f7   : > { %11653 = vrot.lane.b32.xlu0 %v11600_v28, %s21937_s20  ;;  %17326 = vrot.lane.b32.xlu1 %v17325_v50, %s21937_s20  ;;  %v11857_v28 = vld [vmem:[%s21882_s6 + $0x228] sm:$0xff]  ;;  %v11874_v50 = vld [vmem:[%s21882_s6 + $0x2b0] sm:$0xff] }
 0x7f8   : > { %v16583_v46 = vpack.c.bf16 %v11875_v51, %v11874_v50  ;;  %v11860_v50 = vld [vmem:[%s21882_s6 + $0x240] sm:$0xff] }
 0x7fb   : > { %11478 = vrot.lane.b32.xlu0 %v20760_v23, %s21961_s16  ;;  %11669 = vrot.lane.b32.xlu1 %v11602_v48, %s21937_s20  ;;  %v16581_v48 = vpack.c.bf16 %v11857_v28, %v11856_v40 }
 0x7ff   : > { %11492 = vrot.lane.b32.xlu0 %v20774_v47, %s21961_s16  ;;  %11583 = vrot.lane.b32.xlu1 %v11401_v35, %s21961_s16 }
 0x803   : > { %11585 = vrot.lane.b32.xlu1 %v11409_v1, %s21961_s16 }
 0x842   : > { %v17277_v13 = vpop.permute.xlu1 %17276 }
 0x843   : > { %v17279_v4 = vunpack.i.h.bf16 %v17277_v13  ;;  %v17278_v63 = vunpack.i.l.bf16 %v17277_v13 }
 0x845   : > { %v11705_v8 = vsel %vm2735_vm12, %v17278_v63, %v17279_v4 }
 0x846   : > { %v17282_v59 = vpop.permute.xlu0 %17281  ;;  %v11761_v5 = vmax.f32 %v20551_v52, %v11705_v8 }
 0x847   : > { %v17283_v6 = vunpack.i.l.bf16 %v17282_v59  ;;  %v17284_v13 = vunpack.i.h.bf16 %v17282_v59 }
 0x848   : > { %11974 = vmatprep.mubr.f32.mxu0 %v11761_v5 }
 0x849   : > { %v11704_v52 = vsel %vm2735_vm12, %v17283_v6, %v17278_v63  ;;  %v11859_v6 = vld [vmem:[%s21882_s6 + $0x238] sm:$0xff] }
 0x84a   : > { %v11760_v12 = vmax.f32 %v20575_v39, %v11704_v52  ;;  %v16577_v39 = vpack.c.bf16 %v11855_v25, %v11854_v62  ;;  %v11877_v52 = vld [vmem:[%s21882_s6 + $0x2c8] sm:$0xff]  ;;  %v11887_v62 = vld [vmem:[%s21882_s6 + $0x318] sm:$0xff] }
 0x84b   : > { %v16587_v28 = vpack.c.bf16 %v11877_v52, %v11876_v61 }
 0x84c   : > { %11975 = vmatmul.mubr.f32.vlgmr.msra.gmra.mrb[212].mxu0 %v11760_v12 }
 0x84d   : > { %16574 = vmatpush3.bf16.msra.mxu0 %v16573_v9 }
 0x84e   : > { %16576 = vmatprep.subr.bf16.mxu0 %v16575_v55  ;;  %v11886_v55 = vld [vmem:[%s21882_s6 + $0x310] sm:$0xff] }
 0x851   : > { %16578 = vmatpush3.bf16.msra.mxu0 %v16577_v39  ;;  %v20829_v3 = vpop.permute.xlu1 %17286 }
 0x852   : > { %v17289_v63 = vunpack.i.h.bf16 %v20829_v3  ;;  %v17288_v8 = vunpack.i.l.bf16 %v20829_v3  ;;  %v20833_v5 = vpop.permute.xlu0 %17291  ;;  %16580 = vmatprep.subr.bf16.mxu0 %v16579_v45 }
 0x853   : > { %v17294_v10 = vunpack.i.h.bf16 %v20833_v5  ;;  %v17293_v59 = vunpack.i.l.bf16 %v20833_v5 }
 0x854   : > { %v11706_v9 = vsel %vm2735_vm12, %v17279_v4, %v17289_v63  ;;  %v11712_v12 = vsel %vm2735_vm12, %v17284_v13, %v17288_v8  ;;  %v16585_v4 = vpack.c.bf16 %v11859_v6, %v11858_v56 }
 0x855   : > { %16582 = vmatpush3.bf16.msra.mxu0 %v16581_v48  ;;  %v11768_v25 = vmax.f32 %v20579_v26, %v11712_v12  ;;  %v11711_v14 = vsel %vm2735_vm12, %v17294_v10, %v17284_v13  ;;  %v11707_v27 = vsel %vm2735_vm12, %v17289_v63, %v17293_v59  ;;  %v11861_v26 = vld [vmem:[%s21882_s6 + $0x248] sm:$0xff]  ;;  %v11762_v51 = vmax.f32 %v20556_v41, %v11706_v9  ;;  %v11888_v41 = vld [vmem:[%s21882_s6 + $0x320] sm:$0xff]  ;;  %v11862_v10 = vld [vmem:[%s21882_s6 + $0x250] sm:$0xff] }
 0x856   : > { %v20862_v39 = vpop.permute.xlu1 %17296  ;;  %16584 = vmatprep.subr.bf16.mxu0 %v16583_v46  ;;  %v11767_v45 = vmax.f32 %v20617_v43, %v11711_v14  ;;  %v11763_v40 = vmax.f32 %v20607_v37, %v11707_v27  ;;  %v11878_v37 = vld [vmem:[%s21882_s6 + $0x2d0] sm:$0xff]  ;;  %v11879_v43 = vld [vmem:[%s21882_s6 + $0x2d8] sm:$0xff]  ;;  %v16607_v13 = vpack.c.bf16 %v11887_v62, %v11886_v55  ;;  %v11889_v63 = vld [vmem:[%s21882_s6 + $0x328] sm:$0xff]  ;;  %v16589_v6 = vpack.c.bf16 %v11861_v26, %v11860_v50 }
 0x857   : > { %v17299_v3 = vunpack.i.h.bf16 %v20862_v39  ;;  %v17298_v48 = vunpack.i.l.bf16 %v20862_v39  ;;  %11979 = vmatprep.mubr.f32.mxu0 %v11768_v25  ;;  %v16591_v55 = vpack.c.bf16 %v11879_v43, %v11878_v37  ;;  %v11863_v62 = vld [vmem:[%s21882_s6 + $0x258] sm:$0xff]  ;;  %v11880_v25 = vld [vmem:[%s21882_s6 + $0x2e0] sm:$0xff]  ;;  %v11881_v14 = vld [vmem:[%s21882_s6 + $0x2e8] sm:$0xff] }
 0x858   : > { %11980 = vmatmul.mubr.f32.gmra.mrb[214].mxu0 %v11767_v45  ;;  %12059 = vmatprep.mubr.f32.mxu1 %v11763_v40  ;;  %v11891_v40 = vld [vmem:[%s21882_s6 + $0x338] sm:$0xff] }
 0x859   : > { %16586 = vmatpush3.bf16.msra.mxu0 %v16585_v4  ;;  %v17302_v46 = vpop.permute.xlu0 %17301  ;;  %12060 = vmatmul.mubr.f32.vlgmr.msra.gmra.mrb[220].mxu1 %v11762_v51  ;;  %v11719_v56 = vsel %vm2735_vm12, %v17298_v48, %v17299_v3  ;;  %v16611_v4 = vpack.c.bf16 %v11889_v63, %v11888_v41  ;;  %v16593_v51 = vpack.c.bf16 %v11863_v62, %v11862_v10  ;;  %v11864_v63 = vld [vmem:[%s21882_s6 + $0x260] sm:$0xff] }
 0x85a   : > { %v17304_v61 = vunpack.i.h.bf16 %v17302_v46  ;;  %v17303_v52 = vunpack.i.l.bf16 %v17302_v46  ;;  %v20893_v9 = vpop.permute.xlu1 %17306  ;;  %16588 = vmatprep.subr.bf16.mxu0 %v16587_v28  ;;  %v11775_v12 = vmax.f32 %v20633_v21, %v11719_v56  ;;  %16606 = vmatpush3.bf16.msra.mxu1 %v20646_v57  ;;  %v11890_v57 = vld [vmem:[%s21882_s6 + $0x330] sm:$0xff] }
 0x85b   : > { %v17308_v27 = vunpack.i.l.bf16 %v20893_v9  ;;  %16608 = vmatprep.subr.bf16.mxu1 %v16607_v13  ;;  %v11882_v56 = vld [vmem:[%s21882_s6 + $0x2f0] sm:$0xff] }
 0x85c   : > { %11984 = vmatprep.mubr.f32.mxu0 %v11775_v12  ;;  %v11718_v21 = vsel %vm2735_vm12, %v17303_v52, %v17298_v48  ;;  %v11713_v45 = vsel %vm2735_vm12, %v17288_v8, %v17304_v61  ;;  %v16595_v48 = vpack.c.bf16 %v11881_v14, %v11880_v25  ;;  %v17309_v8 = vunpack.i.h.bf16 %v20893_v9 }
 0x85d   : > { %16590 = vmatpush3.bf16.msra.mxu0 %v16589_v6  ;;  %v20915_v28 = vpop.permute.xlu0 %17311  ;;  %v11774_v50 = vmax.f32 %v20654_v22, %v11718_v21  ;;  %v11714_v26 = vsel %vm2735_vm12, %v17304_v61, %v17308_v27  ;;  %v11865_v22 = vld [vmem:[%s21882_s6 + $0x268] sm:$0xff]  ;;  %v11769_v46 = vmax.f32 %v20611_v16, %v11713_v45  ;;  %v16615_v6 = vpack.c.bf16 %v11891_v40, %v11890_v57  ;;  %v11892_v16 = vld [vmem:[%s21882_s6 + $0x340] sm:$0xff]  ;;  %v11866_v45 = vld [vmem:[%s21882_s6 + $0x270] sm:$0xff] }
 0x85e   : > { %v17314_v37 = vunpack.i.h.bf16 %v20915_v28  ;;  %v17313_v43 = vunpack.i.l.bf16 %v20915_v28  ;;  %16592 = vmatprep.subr.bf16.mxu0 %v16591_v55  ;;  %v11770_v41 = vmax.f32 %v20658_v33, %v11714_v26  ;;  %16610 = vmatpush3.bf16.msra.mxu1 %v16607_v13  ;;  %v11883_v33 = vld [vmem:[%s21882_s6 + $0x2f8] sm:$0xff]  ;;  %v11893_v61 = vld [vmem:[%s21882_s6 + $0x348] sm:$0x1]  ;;  %v16597_v25 = vpack.c.bf16 %v11865_v22, %v11864_v63 }
 0x85f   : > { %11985 = vmatmul.mubr.f32.gmra.mrb[216].mxu0 %v11774_v50  ;;  %16612 = vmatprep.subr.bf16.mxu1 %v16611_v4  ;;  %v16599_v21 = vpack.c.bf16 %v11883_v33, %v11882_v56  ;;  %v11867_v57 = vld [vmem:[%s21882_s6 + $0x278] sm:$0xff]  ;;  %v16619_v50 = vpack.c.bf16 %v11893_v61, %v11892_v16 }
 0x860   : > { %12064 = vmatprep.mubr.f32.mxu1 %v11770_v41  ;;  %v11726_v10 = vsel %vm2735_vm12, %v17309_v8, %v17313_v43  ;;  %v11725_v13 = vsel %vm2735_vm12, %v17314_v37, %v17309_v8 }
 0x861   : > { %16594 = vmatpush3.bf16.msra.mxu0 %v16593_v51  ;;  %v11652_v52 = vpop.permute.xlu0 %11651  ;;  %v17317_v12 = vpop.permute.xlu1 %17316  ;;  %12065 = vmatmul.mubr.f32.gmra.mrb[222].mxu1 %v11769_v46  ;;  %v11782_v55 = vmax.f32 %v20668_v15, %v11726_v10  ;;  %v11781_v62 = vmax.f32 %v20681_v53, %v11725_v13 }
 0x862   : > { %v17318_v14 = vunpack.i.l.bf16 %v17317_v12  ;;  %16596 = vmatprep.subr.bf16.mxu0 %v16595_v48  ;;  %16614 = vmatpush3.bf16.msra.mxu1 %v16611_v4  ;;  %v17319_v40 = vunpack.i.h.bf16 %v17317_v12  ;;  %v16601_v4 = vpack.c.bf16 %v11867_v57, %v11866_v45  ;;  %v17380_v45 = vld [vmem:[%s21883_s7 + $0x18] ss:$0 sps:$4 sm:$0xff]  }
 0x863   : > { %11989 = vmatprep.mubr.f32.mxu0 %v11782_v55  ;;  %16616 = vmatprep.subr.bf16.mxu1 %v16615_v6  ;;  %v12362_v57 = vsel %vm6304_vm3, %v17380_v45, 0 }
 0x864   : > { %11990 = vmatmul.mubr.f32.gmra.mrb[218].mxu0 %v11781_v62  ;;  %v11709_v15 = vsel %vm2735_vm12, %v17318_v14, %v11652_v52  ;;  %v11708_v41 = vsel %vm2735_vm12, %v17293_v59, %v17318_v14  ;;  %v11720_v63 = vsel %vm2735_vm12, %v17299_v3, %v17319_v40  ;;  %v17603_v14 = vmov 0.0  }
 0x865   : > { %16598 = vmatpush3.bf16.msra.mxu0 %v16597_v25  ;;  %v11668_v26 = vpop.permute.xlu0 %11667  ;;  %v20962_v51 = vpop.permute.xlu1 %17321  ;;  %v11765_v48 = vmax.f32 %v20702_v19, %v11709_v15  ;;  %v11764_v39 = vmax.f32 %v20621_v18, %v11708_v41  ;;  %v17374_v25 = vld [vmem:[%s21883_s7] sm:$0xff]  }
 0x866   : > { %v17324_v8 = vunpack.i.h.bf16 %v20962_v51  ;;  %v17323_v37 = vunpack.i.l.bf16 %v20962_v51  ;;  %16600 = vmatprep.subr.bf16.mxu0 %v16599_v21  ;;  %16618 = vmatpush3.bf16.msra.mxu1 %v16615_v6  ;;  %v11776_v6 = vmax.f32 %v20643_v0, %v11720_v63  ;;  %v17379_v21 = vld [vmem:[%s21883_s7 + $0x2c] sm:$0xff]  }
 0x867   : > { %12144 = vmatprep.mubr.f32.mxu0 %v11765_v48  ;;  %16621 = vmatprep.subr.msk.bf16.mxu1 %vm20958_vm10, %v16619_v50 }
 0x868   : > { %v11721_v19 = vsel %vm2735_vm12, %v17319_v40, %v17323_v37  ;;  %v11716_v22 = vsel %vm2735_vm12, %v17324_v8, %v11668_v26  ;;  %v11715_v10 = vsel %vm2735_vm12, %v17308_v27, %v17324_v8  ;;  %v17381_v40 = vld [vmem:[%s21883_s7 + $0x34] ss:$0 sps:$4 sm:$0xff]  }
 0x869   : > { %16602 = vmatpush3.bf16.msra.mxu0 %v16601_v4  ;;  %v11654_v46 = vpop.permute.xlu0 %11653  ;;  %v20979_v56 = vpop.permute.xlu1 %17326  ;;  %v11777_v5 = vmax.f32 %v20706_v38, %v11721_v19  ;;  %v11772_v59 = vmax.f32 %v20721_v20, %v11716_v22  ;;  %v11553_v20 = vmax.f32 %v20333_v60, %v20670_v49  ;;  %v11771_v28 = vmax.f32 %v20662_v58, %v11715_v10 }
 0x86a   : > { %v17329_v3 = vunpack.i.h.bf16 %v20979_v56  ;;  %v17328_v33 = vunpack.i.l.bf16 %v20979_v56  ;;  %16624 = vmatpush3.bf16.msk.msra.mxu1 %vm20958_vm10, %v16619_v50  ;;  %v11710_v38 = vsel %vm2735_vm12, %v11652_v52, %v11654_v46  ;;  %v21965_v52 = vmax.f32 %v20318_v32, 0.0  ;;  %16087 = vmatprep.subr.bf16.mxu0 %v17603_v14 }
 0x86b   : > { %12069 = vmatprep.mubr.f32.mxu1 %v11777_v5  ;;  %16075 = vmatprep.subr.bf16.mxu1 %v17603_v14  ;;  %v12296_v50 = vsel %vm6304_vm3, %v17381_v40, 0 }
 0x86c   : > { %12145 = vmatmul.mubr.f32.vlgmr.msra.gmra.mrb[220].mxu0 %v11764_v39  ;;  %12070 = vmatmul.mubr.f32.gmra.mrb[224].mxu1 %v11776_v6  ;;  %v11728_v18 = vsel %vm2735_vm12, %v17328_v33, %v17329_v3  ;;  %v11727_v0 = vsel %vm2735_vm12, %v17313_v43, %v17328_v33  ;;  %v11766_v43 = vmax.f32 %v11553_v20, %v11710_v38 }
 0x86d   : > { %12149 = vmatprep.mubr.f32.mxu0 %v11772_v59  ;;  %v21001_v13 = vpop.permute.xlu0 %11478  ;;  %v11670_v9 = vpop.permute.xlu1 %11669  ;;  %v11784_v27 = vmax.f32 %v20743_v54, %v11728_v18  ;;  %v11783_v16 = vmax.f32 %v20685_v11, %v11727_v0  ;;  %v11560_v54 = vmax.f32 %v20359_v2, %v20708_v24  ;;  %v21966_v2 = vmax.f32 %v20342_v7, 0.0  ;;  %16088 = vmatpush3.bf16.msra.mxu0 %v17374_v25 }
 0x86e   : > { %v11512_v61 = vsel %vm910_vm4, %v17269_v42, %v21001_v13  ;;  %v11717_v49 = vsel %vm2735_vm12, %v11668_v26, %v11670_v9  ;;  %16089 = vmatprep.subr.bf16.mxu0 %v17603_v14  ;;  %v11567_v63 = vmax.f32 %v20760_v23, %v21001_v13 }
 0x86f   : > { %v21012_v60 = vmax.f32 %v21965_v52, %v11512_v61  ;;  %12074 = vmatprep.mubr.f32.mxu1 %v11784_v27  ;;  %v11773_v36 = vmax.f32 %v11560_v54, %v11717_v49 }
 0x870   : > { %12150 = vmatmul.mubr.f32.gmra.mrb[222].mxu0 %v11771_v28  ;;  %12075 = vmatmul.mubr.f32.gmra.mrb[226].mxu1 %v11783_v16 }
 0x871   : > { %11681 = vrot.lane.b32.xlu0 %v21012_v60, %s21937_s20  ;;  %v21019_v11 = vpop.permute.xlu0 %11492  ;;  %v11584_v58 = vpop.permute.xlu1 %11583  ;;  %16069 = vmatprep.mubr.msk.f32.mxu1 %vm11894_vm11, %v11766_v43 }
 0x872   : > { %v11518_v32 = vsel %vm910_vm4, %v17274_v29, %v21019_v11  ;;  %v11589_v42 = vsel %vm910_vm4, %v21001_v13, %v11584_v58  ;;  %v11604_v29 = vmax.f32 %v11401_v35, %v11584_v58  ;;  %v17376_v35 = vld [vmem:[%s21883_s7 + $0x8] sm:$0xff]  }
 0x873   : > { %v11573_v24 = vmax.f32 %v21966_v2, %v11518_v32  ;;  %v11603_v12 = vmax.f32 %v20760_v23, %v11589_v42  ;;  %16090 = vmatpush3.bf16.msra.mxu0 %v17376_v35 }
 0x874   : > { %16070 = vmatmul.mubr.msk.f32.vlgmr.msra.gmra.mrb[228].mxu1 %vm11894_vm11, %v11773_v36  ;;  %16091 = vmatprep.subr.bf16.mxu0 %v17603_v14 }
 0x875   : > { %11697 = vrot.lane.b32.xlu0 %v11573_v24, %s21937_s20  ;;  %11683 = vrot.lane.b32.xlu1 %v11603_v12, %s21937_s20  ;;  %v11586_v55 = vpop.permute.xlu1 %11585 }
 0x876   : > { %v11590_v34 = vsel %vm910_vm4, %v21019_v11, %v11586_v55  ;;  %v11606_v7 = vmax.f32 %v11409_v1, %v11586_v55  ;;  %16076 = vmatpush3.bf16.msra.mxu1 %v17375_v30  ;;  %v17378_v1 = vld [vmem:[%s21883_s7 + $0x10] sm:$0xff]   ;;  %vm17604_vm4 = vmmov 0  }
 0x877   : > { %v11605_v62 = vmax.f32 %v20774_v47, %v11590_v34  ;;  %16077 = vmatprep.subr.bf16.mxu1 %v17603_v14  ;;  %16092 = vmatpush3.bf16.msra.mxu0 %v17378_v1 }
 0x878   : > { %16093 = vmatprep.subr.bf16.mxu0 %v17603_v14 }
 0x879   : > { %11685 = vrot.lane.b32.xlu0 %v11604_v29, %s21937_s20  ;;  %11699 = vrot.lane.b32.xlu1 %v11605_v62, %s21937_s20 }
 0x87a   : > { %16078 = vmatpush3.bf16.msra.mxu1 %v17377_v17 }
 0x87b   : > { %16079 = vmatprep.subr.bf16.mxu1 %v17603_v14  ;;  %16094 = vmatpush3.bf16.msra.mxu0 %v12362_v57  ;;  %v17382_v57 = vld [vmem:[%s21883_s7 + $0x54] sm:$0xff]  }
 0x87c   : > { %16111 = vmatprep.subr.bf16.mxu0 %v17603_v14 }
 0x87d   : > { %11701 = vrot.lane.b32.xlu1 %v11606_v7, %s21937_s20  ;;  %s432_s20 = scalar_lea.vmem [#allocation3], %s431_s1 }
 0x87e   : > { %16080 = vmatpush3.bf16.msra.mxu1 %v17379_v21  ;;  %s14909_s30 = sshll.u32 %s432_s20, 4  ;;  %s21836_s30 = int_to_ptr.vmem [resolvable:$true] %s14909_s30 }
 0x87f   : > { %16081 = vmatprep.subr.bf16.mxu1 %v17603_v14  ;;  %s17504_s16 = scalar_lea.vmem %s21836_s30, 16  ;;  %p17511_p0 = scmp.lt.s32.totalorder %s21836_s30, %s17509_s0 }
 0x880   : > { %p17505_p11 = scmp.ne.s32.totalorder %s21836_s30, %s17504_s16  ;;  %p17512_p1 = scmp.lt.s32.totalorder %s17510_s2, %s17504_s16 }
 0x882   : > { %16082 = vmatpush3.bf16.msra.mxu1 %v12296_v50  ;;  %v17383_v50 = vld [vmem:[%s21883_s7 + $0x38] sm:$0xff]   ;;  %p17506_p12 = pnand %p17505_p11, %p17715_p5  ;;  %p17513_p2 = por %p17512_p1, %p17511_p0 }
 0x883   : > { %16099 = vmatprep.subr.bf16.mxu1 %v17603_v14 }
 0x884   : > { %p17507_p13 = pneg %p17506_p12 }
 0x886   : > { %p17514_p3 = pnand %p17513_p2, %p17507_p13 }
 0x8e3   : > { %v11682_v15 = vpop.permute.xlu0 %11681 }
 0x8e4   : > { %v11722_v53 = vsel %vm2735_vm12, %v17323_v37, %v11682_v15 }
 0x8e5   : > { %v11778_v41 = vmax.f32 %v20729_v31, %v11722_v53  ;;  %v11574_v31 = vmax.f32 %v20774_v47, %v21019_v11  ;;  %v17384_v53 = vld [vmem:[%s21883_s7 + $0x5c] sm:$0xff]  }
 0x8e7   : > { %v11698_v26 = vpop.permute.xlu0 %11697  ;;  %v11684_v48 = vpop.permute.xlu1 %11683 }
 0x8e8   : > { %v11723_v4 = vsel %vm2735_vm12, %v11682_v15, %v11684_v48  ;;  %v11729_v19 = vsel %vm2735_vm12, %v17329_v3, %v11698_v26 }
 0x8e9   : > { %v11779_v8 = vmax.f32 %v21012_v60, %v11723_v4  ;;  %v11785_v39 = vmax.f32 %v20747_v44, %v11729_v19  ;;  %v17388_v4 = vld [vmem:[%s21883_s7 + $0x6c] ss:$0 sps:$4 sm:$0xff]  }
 0x8eb   : > { %v11686_v22 = vpop.permute.xlu0 %11685  ;;  %v11700_v46 = vpop.permute.xlu1 %11699  ;;  %12154 = vmatprep.mubr.f32.mxu0 %v11779_v8  ;;  %v17387_v8 = vld [vmem:[%s21883_s7 + $0x48] sm:$0xff]  }
 0x8ec   : > { %v11724_v51 = vsel %vm2735_vm12, %v11684_v48, %v11686_v22  ;;  %v11730_v37 = vsel %vm2735_vm12, %v11698_v26, %v11700_v46  ;;  %12155 = vmatmul.mubr.f32.gmra.mrb[224].mxu0 %v11778_v41  ;;  %v17385_v26 = vld [vmem:[%s21883_s7 + $0x40] sm:$0xff]   ;;  %v17389_v41 = vld [vmem:[%s21883_s7 + $0x50] ss:$0 sps:$4 sm:$0xff]  }
 0x8ed   : > { %v11780_v5 = vmax.f32 %v11567_v63, %v11724_v51  ;;  %v11786_v59 = vmax.f32 %v11573_v24, %v11730_v37  ;;  %v17386_v48 = vld [vmem:[%s21883_s7 + $0x64] sm:$0xff]   ;;  %v12516_v63 = vsel %vm6304_vm3, %v17388_v4, 0  ;;  %v12439_v19 = vsel %vm6304_vm3, %v17389_v41, 0  ;;  %v17390_v22 = vld [vmem:[%s21883_s7 + $0x8c] sm:$0xff]   ;;  %v17426_v4 = vld [vmem:[%s21883_s7 + $0x17c] sm:$0xff]  }
 0x8ee   : > { %v17391_v51 = vld [vmem:[%s21883_s7 + $0x70] sm:$0xff]   ;;  %v17427_v41 = vld [vmem:[%s21883_s7 + $0x160] sm:$0xff]  }
 0x8ef   : > { %v11702_v23 = vpop.permute.xlu1 %11701  ;;  %12159 = vmatprep.mubr.f32.mxu0 %v11786_v59  ;;  %16072 = vmatprep.mubr.msk.f32.mxu1 %vm11894_vm11, %v11780_v5  ;;  %v17392_v5 = vld [vmem:[%s21883_s7 + $0x94] sm:$0xff]  }
 0x8f0   : > { %v11731_v56 = vsel %vm2735_vm12, %v11700_v46, %v11702_v23  ;;  %12160 = vmatmul.mubr.f32.gmra.mrb[226].mxu0 %v11785_v39  ;;  %v17393_v59 = vld [vmem:[%s21883_s7 + $0x78] sm:$0xff]   ;;  %v17395_v23 = vld [vmem:[%s21883_s7 + $0x80] sm:$0xff]   ;;  %vm14730_vm12 = vcmask 654336  }
 0x8f1   : > { %v11787_v3 = vmax.f32 %v11574_v31, %v11731_v56  ;;  %16095 = vmatprep.mubr.msk.bf16.mxu0 %vm17604_vm4, %v17603_v14  ;;  %v17394_v39 = vld [vmem:[%s21883_s7 + $0x9c] sm:$0xff]   ;;  %v17396_v31 = vld [vmem:[%s21883_s7 + $0xa4] ss:$0 sps:$4 sm:$0xff]   ;;  %v17397_v56 = vld [vmem:[%s21883_s7 + $0x88] ss:$0 sps:$4 sm:$0xff]  }
 0x8f3   : > { %16073 = vmatmul.mubr.msk.f32.gmra.mrb[230].mxu1 %vm11894_vm11, %v11787_v3  ;;  %v12670_v3 = vsel %vm6304_vm3, %v17396_v31, 0  ;;  %v17434_v31 = vld [vmem:[%s21883_s7 + $0x1b4] sm:$0xff]  }
 0x8f4   : > { %16083 = vmatprep.mubr.msk.bf16.mxu1 %vm17604_vm4, %v17603_v14 }
 0x91f   : > { %v15752_v44 = vpop.f32.mrb[212].mxu0 }
 0x920   : > { %v15753_v33 = vpop.f32.mrb[213].mxu0 }
 0x921   : > { %v15754_v47 = vadd.f32 %v15753_v33, %v15752_v44  ;;  %v12593_v44 = vsel %vm6304_vm3, %v17397_v56, 0  ;;  %v17398_v33 = vld [vmem:[%s21883_s7 + $0xc4] sm:$0xff]   ;;  %v17435_v56 = vld [vmem:[%s21883_s7 + $0x198] sm:$0xff]  }
 0x92b   : > { %v15755_v6 = vpop.f32.mrb[214].mxu0 }
 0x92c   : > { %v15756_v10 = vpop.f32.mrb[215].mxu0  ;;  %v15796_v38 = vpop.f32.mrb[220].mxu1 }
 0x92d   : > { %v15757_v18 = vadd.f32 %v15756_v10, %v15755_v6  ;;  %v15797_v0 = vpop.f32.mrb[221].mxu1  ;;  %v17399_v6 = vld [vmem:[%s21883_s7 + $0xa8] sm:$0xff]  }
 0x92e   : > { %v15798_v20 = vadd.f32 %v15797_v0, %v15796_v38  ;;  %v17400_v38 = vld [vmem:[%s21883_s7 + $0xcc] sm:$0xff]   ;;  %v17402_v0 = vld [vmem:[%s21883_s7 + $0xd4] sm:$0xff]  }
 0x930   : > { %v12062_v13 = vadd.f32 %v15798_v20, %v15754_v47  ;;  %v17404_v20 = vld [vmem:[%s21883_s7 + $0xdc] ss:$0 sps:$4 sm:$0xff]  }
 0x932   : > { %v15758_v9 = vpop.f32.mrb[216].mxu0 }
 0x933   : > { %v15759_v27 = vpop.f32.mrb[217].mxu0 }
 0x934   : > { %v15760_v16 = vadd.f32 %v15759_v27, %v15758_v9  ;;  %v15799_v61 = vpop.f32.mrb[222].mxu1  ;;  %v17405_v9 = vld [vmem:[%s21883_s7 + $0xc0] ss:$0 sps:$4 sm:$0xff]   ;;  %v12824_v27 = vsel %vm6304_vm3, %v17404_v20, 0 }
 0x935   : > { %v15800_v28 = vpop.f32.mrb[223].mxu1 }
 0x936   : > { %v15801_v43 = vadd.f32 %v15800_v28, %v15799_v61  ;;  %v17406_v61 = vld [vmem:[%s21883_s7 + $0xfc] sm:$0xff]  }
 0x937   : > { %v15761_v52 = vpop.f32.mrb[218].mxu0 }
 0x938   : > { %v12067_v60 = vadd.f32 %v15801_v43, %v15757_v18  ;;  %v15762_v49 = vpop.f32.mrb[219].mxu0  ;;  %v17401_v18 = vld [vmem:[%s21883_s7 + $0xb0] sm:$0xff]   ;;  %v17407_v43 = vld [vmem:[%s21883_s7 + $0xe0] sm:$0xff]  }
 0x939   : > { %v15763_v54 = vadd.f32 %v15762_v49, %v15761_v52  ;;  %v17409_v49 = vld [vmem:[%s21883_s7 + $0xe8] sm:$0xff]  }
 0x93f   : > { %v15840_v11 = vpop.f32.mrb[220].mxu0  ;;  %v15802_v58 = vpop.f32.mrb[224].mxu1 }
 0x940   : > { %v15841_v36 = vpop.f32.mrb[221].mxu0  ;;  %v15803_v32 = vpop.f32.mrb[225].mxu1 }
 0x941   : > { %v15842_v42 = vadd.f32 %v15841_v36, %v15840_v11  ;;  %v15804_v2 = vadd.f32 %v15803_v32, %v15802_v58  ;;  %v17412_v11 = vld [vmem:[%s21883_s7 + $0x114] ss:$0 sps:$4 sm:$0xff]   ;;  %v17413_v36 = vld [vmem:[%s21883_s7 + $0xf8] ss:$0 sps:$4 sm:$0xff]  }
 0x942   : > { %v17411_v58 = vld [vmem:[%s21883_s7 + $0xf0] sm:$0xff]   ;;  %v12978_v32 = vsel %vm6304_vm3, %v17412_v11, 0 }
 0x943   : > { %v21103_v24 = vadd.f32 %v15804_v2, %v15760_v16  ;;  %v15843_v12 = vpop.f32.mrb[222].mxu0  ;;  %v15805_v55 = vpop.f32.mrb[226].mxu1  ;;  %v12147_v34 = vadd.f32 %v15842_v42, %v12062_v13  ;;  %v17403_v13 = vld [vmem:[%s21883_s7 + $0xb8] sm:$0xff]   ;;  %v12747_v16 = vsel %vm6304_vm3, %v17405_v9, 0  ;;  %v12901_v42 = vsel %vm6304_vm3, %v17413_v36, 0 }
 0x944   : > { %v15844_v29 = vpop.f32.mrb[223].mxu0  ;;  %v15806_v62 = vpop.f32.mrb[227].mxu1  ;;  %v17414_v2 = vld [vmem:[%s21883_s7 + $0x134] sm:$0xff]  }
 0x945   : > { %v15845_v7 = vadd.f32 %v15844_v29, %v15843_v12  ;;  %v15807_v25 = vadd.f32 %v15806_v62, %v15805_v55  ;;  %v17415_v55 = vld [vmem:[%s21883_s7 + $0x118] sm:$0xff]   ;;  %v17417_v62 = vld [vmem:[%s21883_s7 + $0x120] sm:$0xff]  }
 0x946   : > { %v17416_v29 = vld [vmem:[%s21883_s7 + $0x13c] sm:$0xff]  }
 0x947   : > { %v21105_v30 = vadd.f32 %v15807_v25, %v15763_v54  ;;  %v12152_v35 = vadd.f32 %v15845_v7, %v12067_v60  ;;  %v16071_v17 = vpop.f32.mrb[228].mxu1  ;;  %v17408_v60 = vld [vmem:[%s21883_s7 + $0x104] sm:$0xff]   ;;  %v17410_v54 = vld [vmem:[%s21883_s7 + $0x10c] sm:$0xff]  }
 0x948   : > { %v12231_v1 = vpop.f32.mrb[229].mxu1  ;;  %v17418_v7 = vld [vmem:[%s21883_s7 + $0x144] sm:$0xff]   ;;  %v17420_v25 = vld [vmem:[%s21883_s7 + $0x14c] ss:$0 sps:$4 sm:$0xff]  }
 0x949   : > { %v12237_v21 = vadd.f32 %v16071_v17, %v12152_v35  ;;  %v12232_v45 = vadd.f32 %v12231_v1, %v12147_v34  ;;  %v17419_v35 = vld [vmem:[%s21883_s7 + $0x128] sm:$0xff]   ;;  %v17421_v17 = vld [vmem:[%s21883_s7 + $0x130] ss:$0 sps:$4 sm:$0xff]   ;;  %v13132_v1 = vsel %vm6304_vm3, %v17420_v25, 0 }
 0x94b   : > { %v21110_v40 = vpack.c.bf16 %v12237_v21, %v12232_v45  ;;  %v13055_v21 = vsel %vm6304_vm3, %v17421_v17, 0  ;;  %v17422_v45 = vld [vmem:[%s21883_s7 + $0x16c] sm:$0xff]  }
 0x94c   : > { %v17454_v17 = vld [vmem:[%s21883_s7 + $0x230] sm:$0xff]  }
 0x94d   : > { %16096 = vmatmul.mubr.msk.bf16.vlgmr.msra.gmra.mrb[228].mxu0 %vm3647_vm2, %v21110_v40  ;;  %v21118_v15 = vshrl.u32 %v21110_v40, 16  ;;  %v12413_v37 = vrot.slane %v21110_v40, 1  ;;  %v12567_v10 = vrot.slane %v21110_v40, 2  ;;  %v12721_v52 = vrot.slane %v21110_v40, 3 }
 0x94e   : > { %16112 = vmatpush3.bf16.msra.mxu0 %v17382_v57  ;;  %16119 = vmatprep.mubr.msk.bf16.mxu0 %vm17604_vm4, %v17603_v14  ;;  %v12875_v34 = vrot.slane %v21110_v40, 4 }
 0x94f   : > { %16084 = vmatmul.mubr.msk.bf16.vlgmr.msra.gmra.mrb[232].mxu1 %vm3647_vm2, %v21118_v15  ;;  %16113 = vmatprep.subr.bf16.mxu0 %v17603_v14  ;;  %v12490_v46 = vrot.slane %v21118_v15, 1  ;;  %v12644_v47 = vrot.slane %v21118_v15, 2  ;;  %v12798_v28 = vrot.slane %v21118_v15, 3  ;;  %v12952_v12 = vrot.slane %v21118_v15, 4 }
 0x950   : > { %16100 = vmatpush3.bf16.msra.mxu1 %v17383_v50  ;;  %16107 = vmatprep.mubr.msk.bf16.mxu1 %vm17604_vm4, %v17603_v14  ;;  %v13106_v57 = vrot.slane %v21118_v15, 5  ;;  %v17423_v50 = vld [vmem:[%s21883_s7 + $0x150] sm:$0xff]  }
 0x951   : > { %16101 = vmatprep.subr.bf16.mxu1 %v17603_v14 }
 0x952   : > { %16114 = vmatpush3.bf16.msra.mxu0 %v17384_v53  ;;  %v13029_v53 = vrot.slane %v21110_v40, 5 }
 0x953   : > { %16115 = vmatprep.subr.bf16.mxu0 %v17603_v14 }
 0x954   : > { %16102 = vmatpush3.bf16.msra.mxu1 %v17385_v26  ;;  %v17424_v26 = vld [vmem:[%s21883_s7 + $0x174] sm:$0xff]  }
 0x955   : > { %16103 = vmatprep.subr.bf16.mxu1 %v17603_v14 }
 0x956   : > { %16116 = vmatpush3.bf16.msra.mxu0 %v17386_v48  ;;  %v17425_v48 = vld [vmem:[%s21883_s7 + $0x158] sm:$0xff]  }
 0x957   : > { %16117 = vmatprep.subr.bf16.mxu0 %v17603_v14 }
 0x958   : > { %16104 = vmatpush3.bf16.msra.mxu1 %v17387_v8  ;;  %v17428_v8 = vld [vmem:[%s21883_s7 + $0x184] ss:$0 sps:$4 sm:$0xff]  }
 0x959   : > { %16105 = vmatprep.subr.bf16.mxu1 %v17603_v14 }
 0x95a   : > { %16118 = vmatpush3.bf16.msra.mxu0 %v12516_v63  ;;  %v17429_v63 = vld [vmem:[%s21883_s7 + $0x168] ss:$0 sps:$4 sm:$0xff]  }
 0x95b   : > { %16135 = vmatprep.subr.bf16.mxu0 %v17603_v14 }
 0x95c   : > { %16106 = vmatpush3.bf16.msra.mxu1 %v12439_v19  ;;  %v13286_v19 = vsel %vm6304_vm3, %v17428_v8, 0 }
 0x95d   : > { %16120 = vmatmul.mubr.msk.bf16.vlgmr.msra.gmra.mrb[232].mxu0 %vm3647_vm2, %v12490_v46  ;;  %16123 = vmatprep.subr.bf16.mxu1 %v17603_v14  ;;  %v17430_v46 = vld [vmem:[%s21883_s7 + $0x1a4] sm:$0xff]  }
 0x95e   : > { %16136 = vmatpush3.bf16.msra.mxu0 %v17390_v22  ;;  %16143 = vmatprep.mubr.msk.bf16.mxu0 %vm17604_vm4, %v17603_v14  ;;  %v13209_v22 = vsel %vm6304_vm3, %v17429_v63, 0  ;;  %v17462_v63 = vld [vmem:[%s21883_s7 + $0x268] sm:$0xff]  }
 0x95f   : > { %16108 = vmatmul.mubr.msk.bf16.vlgmr.msra.gmra.mrb[236].mxu1 %vm3647_vm2, %v12413_v37  ;;  %16137 = vmatprep.subr.bf16.mxu0 %v17603_v14  ;;  %v17431_v37 = vld [vmem:[%s21883_s7 + $0x188] sm:$0xff]  }
 0x960   : > { %16124 = vmatpush3.bf16.msra.mxu1 %v17391_v51  ;;  %16131 = vmatprep.mubr.msk.bf16.mxu1 %vm17604_vm4, %v17603_v14  ;;  %v13260_v51 = vrot.slane %v21118_v15, 6 }
 0x961   : > { %16125 = vmatprep.subr.bf16.mxu1 %v17603_v14 }
 0x962   : > { %16138 = vmatpush3.bf16.msra.mxu0 %v17392_v5  ;;  %v13183_v5 = vrot.slane %v21110_v40, 6 }
 0x963   : > { %16139 = vmatprep.subr.bf16.mxu0 %v17603_v14 }
 0x964   : > { %16126 = vmatpush3.bf16.msra.mxu1 %v17393_v59  ;;  %v17432_v59 = vld [vmem:[%s21883_s7 + $0x1ac] sm:$0xff]  }
 0x965   : > { %16127 = vmatprep.subr.bf16.mxu1 %v17603_v14 }
 0x966   : > { %16140 = vmatpush3.bf16.msra.mxu0 %v17394_v39  ;;  %v17433_v39 = vld [vmem:[%s21883_s7 + $0x190] sm:$0xff]  }
 0x967   : > { %16141 = vmatprep.subr.bf16.mxu0 %v17603_v14 }
 0x968   : > { %16128 = vmatpush3.bf16.msra.mxu1 %v17395_v23  ;;  %v17436_v23 = vld [vmem:[%s21883_s7 + $0x1bc] ss:$0 sps:$4 sm:$0xff]  }
 0x969   : > { %16129 = vmatprep.subr.bf16.mxu1 %v17603_v14 }
 0x96a   : > { %16142 = vmatpush3.bf16.msra.mxu0 %v12670_v3  ;;  %v17437_v3 = vld [vmem:[%s21883_s7 + $0x1a0] ss:$0 sps:$4 sm:$0xff]  }
 0x96b   : > { %16159 = vmatprep.subr.bf16.mxu0 %v17603_v14 }
 0x96c   : > { %16130 = vmatpush3.bf16.msra.mxu1 %v12593_v44  ;;  %v13440_v44 = vsel %vm6304_vm3, %v17436_v23, 0 }
 0x96d   : > { %16144 = vmatmul.mubr.msk.bf16.vlgmr.msra.gmra.mrb[236].mxu0 %vm3647_vm2, %v12644_v47  ;;  %16147 = vmatprep.subr.bf16.mxu1 %v17603_v14  ;;  %v17439_v47 = vld [vmem:[%s21883_s7 + $0x1dc] sm:$0xff]  }
 0x96e   : > { %16160 = vmatpush3.bf16.msra.mxu0 %v17398_v33  ;;  %16167 = vmatprep.mubr.msk.bf16.mxu0 %vm17604_vm4, %v17603_v14  ;;  %v13363_v33 = vsel %vm6304_vm3, %v17437_v3, 0  ;;  %v17470_v3 = vld [vmem:[%s21883_s7 + $0x2a0] sm:$0xff]  }
 0x96f   : > { %16132 = vmatmul.mubr.msk.bf16.vlgmr.msra.gmra.mrb[240].mxu1 %vm3647_vm2, %v12567_v10  ;;  %16161 = vmatprep.subr.bf16.mxu0 %v17603_v14  ;;  %v17438_v10 = vld [vmem:[%s21883_s7 + $0x1c0] sm:$0xff]  }
 0x970   : > { %16148 = vmatpush3.bf16.msra.mxu1 %v17399_v6  ;;  %16155 = vmatprep.mubr.msk.bf16.mxu1 %vm17604_vm4, %v17603_v14  ;;  %v13414_v6 = vrot.slane %v21118_v15, 7 }
 0x971   : > { %16149 = vmatprep.subr.bf16.mxu1 %v17603_v14 }
 0x972   : > { %16162 = vmatpush3.bf16.msra.mxu0 %v17400_v38  ;;  %v13337_v38 = vrot.slane %v21110_v40, 7  ;;  %v17440_v40 = vld [vmem:[%s21883_s7 + $0x1c8] sm:$0xff]  }
 0x973   : > { %16163 = vmatprep.subr.bf16.mxu0 %v17603_v14 }
 0x974   : > { %16150 = vmatpush3.bf16.msra.mxu1 %v17401_v18  ;;  %v17441_v18 = vld [vmem:[%s21883_s7 + $0x1e4] sm:$0xff]  }
 0x975   : > { %16151 = vmatprep.subr.bf16.mxu1 %v17603_v14 }
 0x976   : > { %16164 = vmatpush3.bf16.msra.mxu0 %v17402_v0 }
 0x977   : > { %16165 = vmatprep.subr.bf16.mxu0 %v17603_v14 }
 0x978   : > { %16152 = vmatpush3.bf16.msra.mxu1 %v17403_v13  ;;  %v17443_v13 = vld [vmem:[%s21883_s7 + $0x1ec] sm:$0xff]  }
 0x979   : > { %16153 = vmatprep.subr.bf16.mxu1 %v17603_v14 }
 0x97a   : > { %16166 = vmatpush3.bf16.msra.mxu0 %v12824_v27 }
 0x97b   : > { %16183 = vmatprep.subr.bf16.mxu0 %v17603_v14 }
 0x97c   : > { %16154 = vmatpush3.bf16.msra.mxu1 %v12747_v16  ;;  %v17445_v16 = vld [vmem:[%s21883_s7 + $0x1f4] ss:$0 sps:$4 sm:$0xff]  }
 0x97d   : > { %16168 = vmatmul.mubr.msk.bf16.vlgmr.msra.gmra.mrb[240].mxu0 %vm3647_vm2, %v12798_v28  ;;  %16171 = vmatprep.subr.bf16.mxu1 %v17603_v14  ;;  %v17442_v28 = vld [vmem:[%s21883_s7 + $0x1d0] sm:$0xff]  }
 0x97e   : > { %16184 = vmatpush3.bf16.msra.mxu0 %v17406_v61  ;;  %16191 = vmatprep.mubr.msk.bf16.mxu0 %vm17604_vm4, %v17603_v14 }
 0x97f   : > { %16156 = vmatmul.mubr.msk.bf16.vlgmr.msra.gmra.mrb[244].mxu1 %vm3647_vm2, %v12721_v52  ;;  %16185 = vmatprep.subr.bf16.mxu0 %v17603_v14  ;;  %v17444_v52 = vld [vmem:[%s21883_s7 + $0x1d8] ss:$0 sps:$4 sm:$0xff]  }
 0x980   : > { %16172 = vmatpush3.bf16.msra.mxu1 %v17407_v43  ;;  %16179 = vmatprep.mubr.msk.bf16.mxu1 %vm17604_vm4, %v17603_v14  ;;  %v13516_v36 = vsel %vm6304_vm3, %v17444_v52, 0  ;;  %v17483_v52 = vld [vmem:[%s21883_s7 + $0x304] sm:$0xff]  }
 0x981   : > { %16173 = vmatprep.subr.bf16.mxu1 %v17603_v14 }
 0x982   : > { %16186 = vmatpush3.bf16.msra.mxu0 %v17408_v60 }
 0x983   : > { %16187 = vmatprep.subr.bf16.mxu0 %v17603_v14 }
 0x984   : > { %16174 = vmatpush3.bf16.msra.mxu1 %v17409_v49 }
 0x985   : > { %16175 = vmatprep.subr.bf16.mxu1 %v17603_v14 }
 0x986   : > { %16188 = vmatpush3.bf16.msra.mxu0 %v17410_v54  ;;  %v13594_v54 = vsel %vm6304_vm3, %v17445_v16, 0 }
 0x987   : > { %16189 = vmatprep.subr.bf16.mxu0 %v17603_v14 }
 0x988   : > { %16176 = vmatpush3.bf16.msra.mxu1 %v17411_v58 }
 0x989   : > { %16177 = vmatprep.subr.bf16.mxu1 %v17603_v14 }
 0x98a   : > { %16190 = vmatpush3.bf16.msra.mxu0 %v12978_v32 }
 0x98b   : > { %16207 = vmatprep.subr.bf16.mxu0 %v17603_v14 }
 0x98c   : > { %16178 = vmatpush3.bf16.msra.mxu1 %v12901_v42  ;;  %v17447_v42 = vld [vmem:[%s21883_s7 + $0x214] sm:$0xff]  }
 0x98d   : > { %16192 = vmatmul.mubr.msk.bf16.vlgmr.msra.gmra.mrb[244].mxu0 %vm3647_vm2, %v12952_v12  ;;  %16195 = vmatprep.subr.bf16.mxu1 %v17603_v14  ;;  %v17448_v12 = vld [vmem:[%s21883_s7 + $0x200] sm:$0xff]  }
 0x98e   : > { %16208 = vmatpush3.bf16.msra.mxu0 %v17414_v2  ;;  %16215 = vmatprep.mubr.msk.bf16.mxu0 %vm17604_vm4, %v17603_v14 }
 0x98f   : > { %16180 = vmatmul.mubr.msk.bf16.vlgmr.msra.gmra.mrb[248].mxu1 %vm3647_vm2, %v12875_v34  ;;  %16209 = vmatprep.subr.bf16.mxu0 %v17603_v14  ;;  %v17450_v34 = vld [vmem:[%s21883_s7 + $0x208] sm:$0xff]  }
 0x990   : > { %16196 = vmatpush3.bf16.msra.mxu1 %v17415_v55  ;;  %16203 = vmatprep.mubr.msk.bf16.mxu1 %vm17604_vm4, %v17603_v14  ;;  %v17449_v55 = vld [vmem:[%s21883_s7 + $0x21c] sm:$0xff]  }
 0x991   : > { %16197 = vmatprep.subr.bf16.mxu1 %v17603_v14 }
 0x992   : > { %16210 = vmatpush3.bf16.msra.mxu0 %v17416_v29  ;;  %v17451_v29 = vld [vmem:[%s21883_s7 + $0x224] sm:$0xff]  }
 0x993   : > { %16211 = vmatprep.subr.bf16.mxu0 %v17603_v14 }
 0x994   : > { %16198 = vmatpush3.bf16.msra.mxu1 %v17417_v62  ;;  %v17452_v62 = vld [vmem:[%s21883_s7 + $0x210] ss:$0 sps:$4 sm:$0xff]  }
 0x995   : > { %16199 = vmatprep.subr.bf16.mxu1 %v17603_v14  ;;  %v13672_v25 = vsel %vm6304_vm3, %v17452_v62, 0 }
 0x996   : > { %16212 = vmatpush3.bf16.msra.mxu0 %v17418_v7  ;;  %v17453_v7 = vld [vmem:[%s21883_s7 + $0x22c] ss:$0 sps:$4 sm:$0xff]  }
 0x997   : > { %16213 = vmatprep.subr.bf16.mxu0 %v17603_v14 }
 0x998   : > { %16200 = vmatpush3.bf16.msra.mxu1 %v17419_v35  ;;  %v13749_v35 = vsel %vm6304_vm3, %v17453_v7, 0 }
 0x999   : > { %16201 = vmatprep.subr.bf16.mxu1 %v17603_v14 }
 0x99a   : > { %16214 = vmatpush3.bf16.msra.mxu0 %v13132_v1  ;;  %v17455_v1 = vld [vmem:[%s21883_s7 + $0x24c] sm:$0xff]  }
 0x99b   : > { %16231 = vmatprep.subr.bf16.mxu0 %v17603_v14 }
 0x99c   : > { %16202 = vmatpush3.bf16.msra.mxu1 %v13055_v21 }
 0x99d   : > { %16216 = vmatmul.mubr.msk.bf16.vlgmr.msra.gmra.mrb[248].mxu0 %vm3647_vm2, %v13106_v57  ;;  %16219 = vmatprep.subr.bf16.mxu1 %v17603_v14  ;;  %v17456_v57 = vld [vmem:[%s21883_s7 + $0x238] sm:$0xff]  }
 0x99e   : > { %16232 = vmatpush3.bf16.msra.mxu0 %v17422_v45  ;;  %16239 = vmatprep.mubr.msk.bf16.mxu0 %vm17604_vm4, %v17603_v14 }
 0x99f   : > { %16204 = vmatmul.mubr.msk.bf16.vlgmr.msra.gmra.mrb[252].mxu1 %vm3647_vm2, %v13029_v53  ;;  %16233 = vmatprep.subr.bf16.mxu0 %v17603_v14  ;;  %v17458_v53 = vld [vmem:[%s21883_s7 + $0x240] sm:$0xff]  }
 0x9a0   : > { %16220 = vmatpush3.bf16.msra.mxu1 %v17423_v50  ;;  %16227 = vmatprep.mubr.msk.bf16.mxu1 %vm17604_vm4, %v17603_v14  ;;  %v17457_v50 = vld [vmem:[%s21883_s7 + $0x254] sm:$0xff]  }
 0x9a1   : > { %16221 = vmatprep.subr.bf16.mxu1 %v17603_v14 }
 0x9a2   : > { %16234 = vmatpush3.bf16.msra.mxu0 %v17424_v26  ;;  %v17459_v26 = vld [vmem:[%s21883_s7 + $0x25c] sm:$0xff]  }
 0x9a3   : > { %16235 = vmatprep.subr.bf16.mxu0 %v17603_v14 }
 0x9a4   : > { %16222 = vmatpush3.bf16.msra.mxu1 %v17425_v48  ;;  %v17460_v48 = vld [vmem:[%s21883_s7 + $0x248] ss:$0 sps:$4 sm:$0xff]  }
 0x9a5   : > { %16223 = vmatprep.subr.bf16.mxu1 %v17603_v14  ;;  %v13826_v8 = vsel %vm6304_vm3, %v17460_v48, 0  ;;  %v17494_v48 = vld [vmem:[%s21883_s7 + $0x348] sm:$0xff]  }
 0x9a6   : > { %16236 = vmatpush3.bf16.msra.mxu0 %v17426_v4  ;;  %v17461_v4 = vld [vmem:[%s21883_s7 + $0x264] ss:$0 sps:$4 sm:$0xff]  }
 0x9a7   : > { %16237 = vmatprep.subr.bf16.mxu0 %v17603_v14 }
 0x9a8   : > { %16224 = vmatpush3.bf16.msra.mxu1 %v17427_v41  ;;  %v13903_v41 = vsel %vm6304_vm3, %v17461_v4, 0  ;;  %v17495_v4 = vld [vmem:[%s21883_s7 + $0x364] sm:$0xff]  }
 0x9a9   : > { %16225 = vmatprep.subr.bf16.mxu1 %v17603_v14 }
 0x9aa   : > { %16238 = vmatpush3.bf16.msra.mxu0 %v13286_v19  ;;  %v17463_v19 = vld [vmem:[%s21883_s7 + $0x284] sm:$0xff]  }
 0x9ab   : > { %16255 = vmatprep.subr.bf16.mxu0 %v17603_v14 }
 0x9ac   : > { %16226 = vmatpush3.bf16.msra.mxu1 %v13209_v22 }
 0x9ad   : > { %16240 = vmatmul.mubr.msk.bf16.vlgmr.msra.gmra.mrb[252].mxu0 %vm3647_vm2, %v13260_v51  ;;  %16243 = vmatprep.subr.bf16.mxu1 %v17603_v14  ;;  %v17464_v51 = vld [vmem:[%s21883_s7 + $0x270] sm:$0xff]  }
 0x9ae   : > { %16256 = vmatpush3.bf16.msra.mxu0 %v17430_v46  ;;  %16263 = vmatprep.mubr.msk.bf16.mxu0 %vm17604_vm4, %v17603_v14 }
 0x9af   : > { %16228 = vmatmul.mubr.msk.bf16.vlgmr.msra.gmra.mrb[0].mxu1 %vm3647_vm2, %v13183_v5  ;;  %16257 = vmatprep.subr.bf16.mxu0 %v17603_v14  ;;  %v17466_v5 = vld [vmem:[%s21883_s7 + $0x278] sm:$0xff]  }
 0x9b0   : > { %16244 = vmatpush3.bf16.msra.mxu1 %v17431_v37  ;;  %16251 = vmatprep.mubr.msk.bf16.mxu1 %vm17604_vm4, %v17603_v14  ;;  %v17465_v37 = vld [vmem:[%s21883_s7 + $0x28c] sm:$0xff]  }
 0x9b1   : > { %16245 = vmatprep.subr.bf16.mxu1 %v17603_v14 }
 0x9b2   : > { %16258 = vmatpush3.bf16.msra.mxu0 %v17432_v59  ;;  %v17467_v59 = vld [vmem:[%s21883_s7 + $0x294] sm:$0xff]  }
 0x9b3   : > { %16259 = vmatprep.subr.bf16.mxu0 %v17603_v14 }
 0x9b4   : > { %16246 = vmatpush3.bf16.msra.mxu1 %v17433_v39  ;;  %v17468_v39 = vld [vmem:[%s21883_s7 + $0x280] ss:$0 sps:$4 sm:$0xff]  }
 0x9b5   : > { %16247 = vmatprep.subr.bf16.mxu1 %v17603_v14  ;;  %v13980_v23 = vsel %vm6304_vm3, %v17468_v39, 0 }
 0x9b6   : > { %16260 = vmatpush3.bf16.msra.mxu0 %v17434_v31  ;;  %v17469_v31 = vld [vmem:[%s21883_s7 + $0x29c] ss:$0 sps:$4 sm:$0xff]  }
 0x9b7   : > { %16261 = vmatprep.subr.bf16.mxu0 %v17603_v14 }
 0x9b8   : > { %16248 = vmatpush3.bf16.msra.mxu1 %v17435_v56  ;;  %v14057_v56 = vsel %vm6304_vm3, %v17469_v31, 0 }
 0x9b9   : > { %16249 = vmatprep.subr.bf16.mxu1 %v17603_v14 }
 0x9ba   : > { %16262 = vmatpush3.bf16.msra.mxu0 %v13440_v44  ;;  %v17471_v44 = vld [vmem:[%s21883_s7 + $0x2bc] sm:$0xff]  }
 0x9bb   : > { %16279 = vmatprep.subr.bf16.mxu0 %v17603_v14 }
 0x9bc   : > { %16250 = vmatpush3.bf16.msra.mxu1 %v13363_v33 }
 0x9bd   : > { %16264 = vmatmul.mubr.msk.bf16.vlgmr.msra.gmra.mrb[0].mxu0 %vm3647_vm2, %v13414_v6  ;;  %16267 = vmatprep.subr.bf16.mxu1 %v17603_v14  ;;  %v17472_v6 = vld [vmem:[%s21883_s7 + $0x2a8] sm:$0xff]  }
 0x9be   : > { %16280 = vmatpush3.bf16.msra.mxu0 %v17439_v47  ;;  %16287 = vmatprep.mubr.msk.bf16.mxu0 %vm17604_vm4, %v17603_v14 }
 0x9bf   : > { %16252 = vmatmul.mubr.msk.bf16.vlgmr.msra.gmra.mrb[4].mxu1 %vm3647_vm2, %v13337_v38  ;;  %v15846_v15 = vpop.f32.mrb[224].mxu0  ;;  %16281 = vmatprep.subr.bf16.mxu0 %v17603_v14  ;;  %v17474_v38 = vld [vmem:[%s21883_s7 + $0x2b0] sm:$0xff]  }
 0x9c0   : > { %16268 = vmatpush3.bf16.msra.mxu1 %v17438_v10  ;;  %v15847_v0 = vpop.f32.mrb[225].mxu0  ;;  %16275 = vmatprep.mubr.msk.bf16.mxu1 %vm17604_vm4, %v17603_v14  ;;  %v17473_v10 = vld [vmem:[%s21883_s7 + $0x2c4] sm:$0xff]  }
 0x9c1   : > { %v15848_v20 = vadd.f32 %v15847_v0, %v15846_v15  ;;  %16269 = vmatprep.subr.bf16.mxu1 %v17603_v14  ;;  %v17476_v15 = vld [vmem:[%s21883_s7 + $0x2b8] ss:$0 sps:$4 sm:$0xff]   ;;  %v17477_v0 = vld [vmem:[%s21883_s7 + $0x2d4] ss:$0 sps:$4 sm:$0xff]  }
 0x9c2   : > { %16282 = vmatpush3.bf16.msra.mxu0 %v17441_v18  ;;  %v17475_v18 = vld [vmem:[%s21883_s7 + $0x2cc] sm:$0xff]  }
 0x9c3   : > { %v15849_v9 = vpop.f32.mrb[226].mxu0  ;;  %16283 = vmatprep.subr.bf16.mxu0 %v17603_v14  ;;  %v12157_v27 = vadd.f32 %v15848_v20, %v21103_v24  ;;  %v14211_v20 = vsel %vm6304_vm3, %v17477_v0, 0 }
 0x9c4   : > { %16270 = vmatpush3.bf16.msra.mxu1 %v17440_v40  ;;  %v15850_v61 = vpop.f32.mrb[227].mxu0  ;;  %v14134_v40 = vsel %vm6304_vm3, %v17476_v15, 0 }
 0x9c5   : > { %v15851_v43 = vadd.f32 %v15850_v61, %v15849_v9  ;;  %16271 = vmatprep.subr.bf16.mxu1 %v17603_v14  ;;  %v17479_v9 = vld [vmem:[%s21883_s7 + $0x2f4] sm:$0xff]   ;;  %v17480_v61 = vld [vmem:[%s21883_s7 + $0x2e0] sm:$0xff]  }
 0x9c6   : > { %v16074_v60 = vpop.f32.mrb[230].mxu1  ;;  %16284 = vmatpush3.bf16.msra.mxu0 %v17443_v13  ;;  %v17478_v13 = vld [vmem:[%s21883_s7 + $0x2d8] sm:$0xff]  }
 0x9c7   : > { %v12162_v24 = vadd.f32 %v15851_v43, %v21105_v30  ;;  %v12241_v49 = vpop.f32.mrb[231].mxu1  ;;  %16285 = vmatprep.subr.bf16.mxu0 %v17603_v14  ;;  %v17446_v30 = vld [vmem:[%s21883_s7 + $0x1f8] sm:$0xff]   ;;  %v17482_v43 = vld [vmem:[%s21883_s7 + $0x2e8] sm:$0xff]  }
 0x9c8   : > { %v12242_v11 = vadd.f32 %v12241_v49, %v12157_v27  ;;  %16272 = vmatpush3.bf16.msra.mxu1 %v17442_v28  ;;  %v17481_v28 = vld [vmem:[%s21883_s7 + $0x2fc] sm:$0xff]  }
 0x9c9   : > { %v12247_v58 = vadd.f32 %v16074_v60, %v12162_v24  ;;  %16273 = vmatprep.subr.bf16.mxu1 %v17603_v14  ;;  %v17484_v60 = vld [vmem:[%s21883_s7 + $0x2f0] ss:$0 sps:$4 sm:$0xff]   ;;  %v17485_v24 = vld [vmem:[%s21883_s7 + $0x30c] ss:$0 sps:$4 sm:$0xff]  }
 0x9ca   : > { %16286 = vmatpush3.bf16.msra.mxu0 %v13594_v54  ;;  %v14288_v49 = vsel %vm6304_vm3, %v17484_v60, 0  ;;  %v14365_v54 = vsel %vm6304_vm3, %v17485_v24, 0 }
 0x9cb   : > { %v21448_v32 = vpack.c.bf16 %v12247_v58, %v12242_v11  ;;  %16303 = vmatprep.subr.bf16.mxu0 %v17603_v14  ;;  %v17486_v11 = vld [vmem:[%s21883_s7 + $0x310] sm:$0xff]  }
 0x9cc   : > { %16274 = vmatpush3.bf16.msra.mxu1 %v13516_v36  ;;  %v17487_v58 = vld [vmem:[%s21883_s7 + $0x32c] sm:$0xff]  }
 0x9cd   : > { %16291 = vmatprep.subr.bf16.mxu1 %v17603_v14  ;;  %v21459_v2 = vshrl.u32 %v21448_v32, 16  ;;  %v13646_v21 = vrot.slane %v21448_v32, 1  ;;  %v13800_v22 = vrot.slane %v21448_v32, 2  ;;  %v13954_v33 = vrot.slane %v21448_v32, 3 }
 0x9ce   : > { %v14108_v27 = vrot.slane %v21448_v32, 4  ;;  %v14262_v36 = vrot.slane %v21448_v32, 5 }
 0x9cf   : > { %16276 = vmatmul.mubr.msk.bf16.vlgmr.msra.gmra.mrb[8].mxu1 %vm3647_vm2, %v21448_v32  ;;  %16288 = vmatmul.mubr.msk.bf16.vlgmr.msra.gmra.mrb[4].mxu0 %vm3647_vm2, %v21459_v2  ;;  %v13723_v45 = vrot.slane %v21459_v2, 1  ;;  %v13877_v46 = vrot.slane %v21459_v2, 2  ;;  %v14031_v47 = vrot.slane %v21459_v2, 3  ;;  %v14185_v16 = vrot.slane %v21459_v2, 4 }
 0x9d0   : > { %16292 = vmatpush3.bf16.msra.mxu1 %v17446_v30  ;;  %16304 = vmatpush3.bf16.msra.mxu0 %v17447_v42  ;;  %v14339_v30 = vrot.slane %v21459_v2, 5 }
 0x9d1   : > { %16293 = vmatprep.subr.bf16.mxu1 %v17603_v14  ;;  %16305 = vmatprep.subr.bf16.mxu0 %v17603_v14 }
 0x9d2   : > { %16299 = vmatprep.mubr.msk.bf16.mxu1 %vm17604_vm4, %v17603_v14  ;;  %16311 = vmatprep.mubr.msk.bf16.mxu0 %vm17604_vm4, %v17603_v14 }
 0x9d4   : > { %16294 = vmatpush3.bf16.msra.mxu1 %v17448_v12  ;;  %16306 = vmatpush3.bf16.msra.mxu0 %v17449_v55  ;;  %v17488_v12 = vld [vmem:[%s21883_s7 + $0x318] sm:$0xff]  }
 0x9d5   : > { %16295 = vmatprep.subr.bf16.mxu1 %v17603_v14  ;;  %16307 = vmatprep.subr.bf16.mxu0 %v17603_v14  ;;  %v17489_v55 = vld [vmem:[%s21883_s7 + $0x334] sm:$0xff]  }
 0x9d8   : > { %16296 = vmatpush3.bf16.msra.mxu1 %v17450_v34  ;;  %16308 = vmatpush3.bf16.msra.mxu0 %v17451_v29 }
 0x9d9   : > { %16297 = vmatprep.subr.bf16.mxu1 %v17603_v14  ;;  %16309 = vmatprep.subr.bf16.mxu0 %v17603_v14 }
 0x9dc   : > { %16298 = vmatpush3.bf16.msra.mxu1 %v13672_v25  ;;  %16310 = vmatpush3.bf16.msra.mxu0 %v13749_v35 }
 0x9dd   : > { %16315 = vmatprep.subr.bf16.mxu1 %v17603_v14  ;;  %16327 = vmatprep.subr.bf16.mxu0 %v17603_v14 }
 0x9df   : > { %16300 = vmatmul.mubr.msk.bf16.vlgmr.msra.gmra.mrb[12].mxu1 %vm3647_vm2, %v13646_v21  ;;  %16312 = vmatmul.mubr.msk.bf16.vlgmr.msra.gmra.mrb[8].mxu0 %vm3647_vm2, %v13723_v45  ;;  %v17491_v21 = vld [vmem:[%s21883_s7 + $0x33c] sm:$0xff]  }
 0x9e0   : > { %16316 = vmatpush3.bf16.msra.mxu1 %v17454_v17  ;;  %16328 = vmatpush3.bf16.msra.mxu0 %v17455_v1  ;;  %v17490_v1 = vld [vmem:[%s21883_s7 + $0x320] sm:$0xff]  }
 0x9e1   : > { %16317 = vmatprep.subr.bf16.mxu1 %v17603_v14  ;;  %16329 = vmatprep.subr.bf16.mxu0 %v17603_v14 }
 0x9e2   : > { %16323 = vmatprep.mubr.msk.bf16.mxu1 %vm17604_vm4, %v17603_v14  ;;  %16335 = vmatprep.mubr.msk.bf16.mxu0 %vm17604_vm4, %v17603_v14 }
 0x9e4   : > { %16318 = vmatpush3.bf16.msra.mxu1 %v17456_v57  ;;  %16330 = vmatpush3.bf16.msra.mxu0 %v17457_v50  ;;  %v17492_v57 = vld [vmem:[%s21883_s7 + $0x328] ss:$0 sps:$4 sm:$0xff]   ;;  %v17493_v50 = vld [vmem:[%s21883_s7 + $0x344] ss:$0 sps:$4 sm:$0xff]  }
 0x9e5   : > { %16319 = vmatprep.subr.bf16.mxu1 %v17603_v14  ;;  %16331 = vmatprep.subr.bf16.mxu0 %v17603_v14 }
 0x9e8   : > { %16320 = vmatpush3.bf16.msra.mxu1 %v17458_v53  ;;  %16332 = vmatpush3.bf16.msra.mxu0 %v17459_v26  ;;  %v14442_v53 = vsel %vm6304_vm3, %v17492_v57, 0  ;;  %v14519_v26 = vsel %vm6304_vm3, %v17493_v50, 0 }
 0x9e9   : > { %16321 = vmatprep.subr.bf16.mxu1 %v17603_v14  ;;  %16333 = vmatprep.subr.bf16.mxu0 %v17603_v14 }
 0x9ec   : > { %16322 = vmatpush3.bf16.msra.mxu1 %v13826_v8  ;;  %16334 = vmatpush3.bf16.msra.mxu0 %v13903_v41  ;;  %v14416_v8 = vrot.slane %v21448_v32, 6  ;;  %v14493_v41 = vrot.slane %v21459_v2, 6 }
 0x9ed   : > { %16339 = vmatprep.subr.bf16.mxu1 %v17603_v14  ;;  %16351 = vmatprep.subr.bf16.mxu0 %v17603_v14 }
 0x9ef   : > { %16324 = vmatmul.mubr.msk.bf16.vlgmr.msra.gmra.mrb[16].mxu1 %vm3647_vm2, %v13800_v22  ;;  %16336 = vmatmul.mubr.msk.bf16.vlgmr.msra.gmra.mrb[12].mxu0 %vm3647_vm2, %v13877_v46  ;;  %v17497_v22 = vld [vmem:[%s21883_s7 + $0x36c] sm:$0xff]  }
 0x9f0   : > { %16340 = vmatpush3.bf16.msra.mxu1 %v17462_v63  ;;  %16352 = vmatpush3.bf16.msra.mxu0 %v17463_v19  ;;  %v17496_v19 = vld [vmem:[%s21883_s7 + $0x350] sm:$0xff]  }
 0x9f1   : > { %16341 = vmatprep.subr.bf16.mxu1 %v17603_v14  ;;  %16353 = vmatprep.subr.bf16.mxu0 %v17603_v14 }
 0x9f2   : > { %16347 = vmatprep.mubr.msk.bf16.mxu1 %vm17604_vm4, %v17603_v14  ;;  %16359 = vmatprep.mubr.msk.bf16.mxu0 %vm17604_vm4, %v17603_v14 }
 0x9f4   : > { %16342 = vmatpush3.bf16.msra.mxu1 %v17464_v51  ;;  %16354 = vmatpush3.bf16.msra.mxu0 %v17465_v37 }
 0x9f5   : > { %16343 = vmatprep.subr.bf16.mxu1 %v17603_v14  ;;  %16355 = vmatprep.subr.bf16.mxu0 %v17603_v14 }
 0x9f8   : > { %16344 = vmatpush3.bf16.msra.mxu1 %v17466_v5  ;;  %16356 = vmatpush3.bf16.msra.mxu0 %v17467_v59 }
 0x9f9   : > { %16345 = vmatprep.subr.bf16.mxu1 %v17603_v14  ;;  %16357 = vmatprep.subr.bf16.mxu0 %v17603_v14 }
 0x9fc   : > { %16346 = vmatpush3.bf16.msra.mxu1 %v13980_v23  ;;  %16358 = vmatpush3.bf16.msra.mxu0 %v14057_v56  ;;  %v17498_v23 = vld [vmem:[%s21883_s7 + $0x358] sm:$0xff]  }
 0x9fd   : > { %16363 = vmatprep.subr.bf16.mxu1 %v17603_v14  ;;  %16375 = vmatprep.subr.bf16.mxu0 %v17603_v14  ;;  %v17499_v56 = vld [vmem:[%s21883_s7 + $0x374] sm:$0xff]  }
 0x9ff   : > { %16348 = vmatmul.mubr.msk.bf16.vlgmr.msra.gmra.mrb[20].mxu1 %vm3647_vm2, %v13954_v33  ;;  %16360 = vmatmul.mubr.msk.bf16.vlgmr.msra.gmra.mrb[16].mxu0 %vm3647_vm2, %v14031_v47  ;;  %v17501_v33 = vld [vmem:[%s21883_s7 + $0x37c] ss:$0 sps:$4 sm:$0xff]  }
 0xa00   : > { %16364 = vmatpush3.bf16.msra.mxu1 %v17470_v3  ;;  %16376 = vmatpush3.bf16.msra.mxu0 %v17471_v44  ;;  %v17500_v44 = vld [vmem:[%s21883_s7 + $0x360] ss:$0 sps:$4 sm:$0xff]  }
 0xa01   : > { %16365 = vmatprep.subr.bf16.mxu1 %v17603_v14  ;;  %16377 = vmatprep.subr.bf16.mxu0 %v17603_v14 }
 0xa02   : > { %16371 = vmatprep.mubr.msk.bf16.mxu1 %vm17604_vm4, %v17603_v14  ;;  %16383 = vmatprep.mubr.msk.bf16.mxu0 %vm17604_vm4, %v17603_v14 }
 0xa04   : > { %16366 = vmatpush3.bf16.msra.mxu1 %v17472_v6  ;;  %16378 = vmatpush3.bf16.msra.mxu0 %v17473_v10  ;;  %v14596_v6 = vsel %vm6304_vm3, %v17500_v44, 0  ;;  %v14673_v10 = vsel %vm6304_vm3, %v17501_v33, 0  ;;  %v14723_v33 = vld [vmem:[%s21885_s9 + $0x20] sm:$0xff] }
 0xa05   : > { %16367 = vmatprep.subr.bf16.mxu1 %v17603_v14  ;;  %16379 = vmatprep.subr.bf16.mxu0 %v17603_v14 }
 0xa08   : > { %16368 = vmatpush3.bf16.msra.mxu1 %v17474_v38  ;;  %16380 = vmatpush3.bf16.msra.mxu0 %v17475_v18  ;;  %v14570_v38 = vrot.slane %v21448_v32, 7  ;;  %v14647_v18 = vrot.slane %v21459_v2, 7 }
 0xa09   : > { %16369 = vmatprep.subr.bf16.mxu1 %v17603_v14  ;;  %16381 = vmatprep.subr.bf16.mxu0 %v17603_v14 }
 0xa0c   : > { %16370 = vmatpush3.bf16.msra.mxu1 %v14134_v40  ;;  %16382 = vmatpush3.bf16.msra.mxu0 %v14211_v20 }
 0xa0d   : > { %16387 = vmatprep.subr.bf16.mxu1 %v17603_v14  ;;  %16399 = vmatprep.subr.bf16.mxu0 %v17603_v14 }
 0xa0f   : > { %16372 = vmatmul.mubr.msk.bf16.vlgmr.msra.gmra.mrb[24].mxu1 %vm3647_vm2, %v14108_v27  ;;  %16384 = vmatmul.mubr.msk.bf16.vlgmr.msra.gmra.mrb[20].mxu0 %vm3647_vm2, %v14185_v16 }
 0xa10   : > { %16388 = vmatpush3.bf16.msra.mxu1 %v17478_v13  ;;  %16400 = vmatpush3.bf16.msra.mxu0 %v17479_v9 }
 0xa11   : > { %16389 = vmatprep.subr.bf16.mxu1 %v17603_v14  ;;  %16401 = vmatprep.subr.bf16.mxu0 %v17603_v14 }
 0xa12   : > { %16395 = vmatprep.mubr.msk.bf16.mxu1 %vm17604_vm4, %v17603_v14  ;;  %16407 = vmatprep.mubr.msk.bf16.mxu0 %vm17604_vm4, %v17603_v14 }
 0xa14   : > { %16390 = vmatpush3.bf16.msra.mxu1 %v17480_v61  ;;  %16402 = vmatpush3.bf16.msra.mxu0 %v17481_v28 }
 0xa15   : > { %16391 = vmatprep.subr.bf16.mxu1 %v17603_v14  ;;  %16403 = vmatprep.subr.bf16.mxu0 %v17603_v14 }
 0xa18   : > { %16392 = vmatpush3.bf16.msra.mxu1 %v17482_v43  ;;  %16404 = vmatpush3.bf16.msra.mxu0 %v17483_v52 }
 0xa19   : > { %16393 = vmatprep.subr.bf16.mxu1 %v17603_v14  ;;  %16405 = vmatprep.subr.bf16.mxu0 %v17603_v14 }
 0xa1c   : > { %16394 = vmatpush3.bf16.msra.mxu1 %v14288_v49  ;;  %16406 = vmatpush3.bf16.msra.mxu0 %v14365_v54 }
 0xa1d   : > { %16411 = vmatprep.subr.bf16.mxu1 %v17603_v14  ;;  %16423 = vmatprep.subr.bf16.mxu0 %v17603_v14 }
 0xa1f   : > { %16396 = vmatmul.mubr.msk.bf16.vlgmr.msra.gmra.mrb[28].mxu1 %vm3647_vm2, %v14262_v36  ;;  %16408 = vmatmul.mubr.msk.bf16.vlgmr.msra.gmra.mrb[24].mxu0 %vm3647_vm2, %v14339_v30 }
 0xa20   : > { %16412 = vmatpush3.bf16.msra.mxu1 %v17486_v11  ;;  %16424 = vmatpush3.bf16.msra.mxu0 %v17487_v58  ;;  %v12398_v42 = vpop.f32.mrb[228].mxu0 }
 0xa21   : > { %v16097_v34 = vpop.f32.mrb[229].mxu0  ;;  %16413 = vmatprep.subr.bf16.mxu1 %v17603_v14  ;;  %16425 = vmatprep.subr.bf16.mxu0 %v17603_v14 }
 0xa22   : > { %v12332_v29 = vpop.f32.mrb[232].mxu1  ;;  %v12401_v62 = vpop.f32.mrb[230].mxu0  ;;  %16419 = vmatprep.mubr.msk.bf16.mxu1 %vm17604_vm4, %v17603_v14  ;;  %16431 = vmatprep.mubr.msk.bf16.mxu0 %vm17604_vm4, %v17603_v14 }
 0xa23   : > { %v12399_v7 = vadd.f32 %v12398_v42, %v12332_v29  ;;  %v16085_v25 = vpop.f32.mrb[233].mxu1  ;;  %v16098_v35 = vpop.f32.mrb[231].mxu0 }
 0xa24   : > { %16414 = vmatpush3.bf16.msra.mxu1 %v17488_v12  ;;  %16426 = vmatpush3.bf16.msra.mxu0 %v17489_v55  ;;  %v12335_v17 = vpop.f32.mrb[234].mxu1 }
 0xa25   : > { %v16086_v45 = vpop.f32.mrb[235].mxu1  ;;  %16415 = vmatprep.subr.bf16.mxu1 %v17603_v14  ;;  %16427 = vmatprep.subr.bf16.mxu0 %v17603_v14 }
 0xa28   : > { %16416 = vmatpush3.bf16.msra.mxu1 %v17490_v1  ;;  %16428 = vmatpush3.bf16.msra.mxu0 %v17491_v21 }
 0xa29   : > { %16417 = vmatprep.subr.bf16.mxu1 %v17603_v14  ;;  %16429 = vmatprep.subr.bf16.mxu0 %v17603_v14 }
 0xa2c   : > { %16418 = vmatpush3.bf16.msra.mxu1 %v14442_v53  ;;  %16430 = vmatpush3.bf16.msra.mxu0 %v14519_v26 }
 0xa2d   : > { %16435 = vmatprep.subr.bf16.mxu1 %v17603_v14  ;;  %16447 = vmatprep.subr.bf16.mxu0 %v17603_v14 }
 0xa2f   : > { %16420 = vmatmul.mubr.msk.bf16.vlgmr.msra.gmra.mrb[32].mxu1 %vm3647_vm2, %v14416_v8  ;;  %16432 = vmatmul.mubr.msk.bf16.vlgmr.msra.gmra.mrb[28].mxu0 %vm3647_vm2, %v14493_v41 }
 0xa30   : > { %v12552_v63 = vpop.f32.mrb[232].mxu0  ;;  %16436 = vmatpush3.bf16.msra.mxu1 %v17494_v48  ;;  %16448 = vmatpush3.bf16.msra.mxu0 %v17495_v4 }
 0xa31   : > { %v16121_v46 = vpop.f32.mrb[233].mxu0  ;;  %16437 = vmatprep.subr.bf16.mxu1 %v17603_v14  ;;  %16449 = vmatprep.subr.bf16.mxu0 %v17603_v14 }
 0xa32   : > { %v12475_v51 = vpop.f32.mrb[236].mxu1  ;;  %v12555_v37 = vpop.f32.mrb[234].mxu0  ;;  %16443 = vmatprep.mubr.msk.bf16.mxu1 %vm17604_vm4, %v17603_v14  ;;  %16455 = vmatprep.mubr.msk.bf16.mxu0 %vm17604_vm4, %v17603_v14 }
 0xa33   : > { %v12481_v5 = vadd.f32 %v12475_v51, %v12399_v7  ;;  %v16109_v59 = vpop.f32.mrb[237].mxu1  ;;  %v16122_v39 = vpop.f32.mrb[235].mxu0 }
 0xa34   : > { %v12478_v31 = vpop.f32.mrb[238].mxu1  ;;  %16438 = vmatpush3.bf16.msra.mxu1 %v17496_v19  ;;  %16450 = vmatpush3.bf16.msra.mxu0 %v17497_v22  ;;  %v14719_v59 = vld [vmem:[%s21885_s9] sm:$0xff]  ;;  %v14720_v39 = vld [vmem:[%s21885_s9 + $0x8] sm:$0xff] }
 0xa35   : > { %v16110_v3 = vpop.f32.mrb[239].mxu1  ;;  %16439 = vmatprep.subr.bf16.mxu1 %v17603_v14  ;;  %16451 = vmatprep.subr.bf16.mxu0 %v17603_v14  ;;  %v12558_v47 = vadd.f32 %v12552_v63, %v12481_v5  ;;  %v14721_v31 = vld [vmem:[%s21885_s9 + $0x10] sm:$0xff] }
 0xa36   : > { %v14722_v3 = vld [vmem:[%s21885_s9 + $0x18] sm:$0xff] }
 0xa37   : > { %v16629_v44 = vpack.c.bf16 %v14722_v3, %v14721_v31 }
 0xa38   : > { %16440 = vmatpush3.bf16.msra.mxu1 %v17498_v23  ;;  %16452 = vmatpush3.bf16.msra.mxu0 %v17499_v56  ;;  %v17605_v23 = vmov 0.0|0.0   ;;  %v16626_v56 = vpack.c.bf16 %v14720_v39, %v14719_v59 }
 0xa39   : > { %16441 = vmatprep.subr.bf16.mxu1 %v17603_v14  ;;  %16453 = vmatprep.subr.bf16.mxu0 %v17603_v14 }
 0xa3c   : > { %16442 = vmatpush3.bf16.msra.mxu1 %v14596_v6  ;;  %16454 = vmatpush3.bf16.msra.mxu0 %v14673_v10 }
 0xa3d   : > { %16625 = vmatprep.subr.bf16.mxu1 %v17605_v23  ;;  %16640 = vmatprep.subr.bf16.mxu0 %v17605_v23 }
 0xa3f   : > { %16444 = vmatmul.mubr.msk.bf16.vlgmr.msra.gmra.mrb[36].mxu1 %vm3647_vm2, %v14570_v38  ;;  %16456 = vmatmul.mubr.msk.bf16.vlgmr.msra.gmra.mrb[32].mxu0 %vm3647_vm2, %v14647_v18  ;;  %v14725_v18 = vld [vmem:[%s21885_s9 + $0x30] sm:$0xff]  ;;  %vm14817_vm2 = vcmask 687104  }
 0xa40   : > { %v12706_v15 = vpop.f32.mrb[236].mxu0  ;;  %16479 = vmatprep.mubr.msk.f32.mxu1 %vm17604_vm4, %v17603_v14  ;;  %16504 = vmatprep.mubr.msk.f32.mxu0 %vm17604_vm4, %v17603_v14 }
 0xa41   : > { %v16145_v0 = vpop.f32.mrb[237].mxu0  ;;  %16627 = vmatpush3.bf16.msra.mxu1 %v16626_v56 }
 0xa42   : > { %v12629_v40 = vpop.f32.mrb[240].mxu1  ;;  %v12709_v20 = vpop.f32.mrb[238].mxu0  ;;  %16628 = vmatprep.subr.bf16.mxu1 %v17605_v23 }
 0xa43   : > { %v12635_v13 = vadd.f32 %v12629_v40, %v12558_v47  ;;  %v16133_v9 = vpop.f32.mrb[241].mxu1  ;;  %v16146_v27 = vpop.f32.mrb[239].mxu0  ;;  %v14724_v47 = vld [vmem:[%s21885_s9 + $0x28] sm:$0xff] }
 0xa44   : > { %v12632_v32 = vpop.f32.mrb[242].mxu1  ;;  %v16632_v6 = vpack.c.bf16 %v14724_v47, %v14723_v33 }
 0xa45   : > { %v16134_v16 = vpop.f32.mrb[243].mxu1  ;;  %v12712_v2 = vadd.f32 %v12706_v15, %v12635_v13  ;;  %16630 = vmatpush3.bf16.msra.mxu1 %v16629_v44  ;;  %v14726_v15 = vld [vmem:[%s21885_s9 + $0x38] sm:$0xff] }
 0xa46   : > { %16631 = vmatprep.subr.bf16.mxu1 %v17605_v23  ;;  %v16635_v20 = vpack.c.bf16 %v14726_v15, %v14725_v18 }
 0xa49   : > { %16633 = vmatpush3.bf16.msra.mxu1 %v16632_v6 }
 0xa4a   : > { %16634 = vmatprep.subr.bf16.mxu1 %v17605_v23 }
 0xa4d   : > { %16636 = vmatpush3.bf16.msra.mxu1 %v16635_v20 }
 0xa4e   : > { %16637 = vmatprep.subr.bf16.mxu1 %v17605_v23 }
 0xa50   : > { %v12860_v61 = vpop.f32.mrb[240].mxu0 }
 0xa51   : > { %v16169_v28 = vpop.f32.mrb[241].mxu0 }
 0xa52   : > { %v12783_v43 = vpop.f32.mrb[244].mxu1  ;;  %v12863_v52 = vpop.f32.mrb[242].mxu0  ;;  %v14728_v28 = vld [vmem:[%s21885_s9 + $0x48] sm:$0xff] }
 0xa53   : > { %v12789_v60 = vadd.f32 %v12783_v43, %v12712_v2  ;;  %v16157_v24 = vpop.f32.mrb[245].mxu1  ;;  %v16170_v49 = vpop.f32.mrb[243].mxu0  ;;  %v14805_v52 = vld [vmem:[%s21887_s11] sm:$0xff] }
 0xa54   : > { %v12786_v54 = vpop.f32.mrb[246].mxu1  ;;  %v14807_v24 = vld [vmem:[%s21887_s11 + $0x10] sm:$0xff] }
 0xa55   : > { %v16158_v11 = vpop.f32.mrb[247].mxu1  ;;  %v12866_v58 = vadd.f32 %v12860_v61, %v12789_v60  ;;  %v14727_v61 = vld [vmem:[%s21885_s9 + $0x40] sm:$0xff]  ;;  %v14806_v60 = vld [vmem:[%s21887_s11 + $0x8] sm:$0xff]  ;;  %v14808_v54 = vld [vmem:[%s21887_s11 + $0x18] sm:$0xff] }
 0xa56   : > { %v16638_v43 = vpack.c.bf16 %v14728_v28, %v14727_v61  ;;  %v16641_v49 = vpack.c.bf16 %v14806_v60, %v14805_v52  ;;  %v16644_v11 = vpack.c.bf16 %v14808_v54, %v14807_v24 }
 0xa58   : > { %16639 = vmatpush3.bf16.msra.mxu1 %v16638_v43  ;;  %16642 = vmatpush3.bf16.msra.mxu0 %v16641_v49 }
 0xa59   : > { %16643 = vmatprep.subr.bf16.mxu0 %v17605_v23 }
 0xa5c   : > { %16645 = vmatpush3.bf16.msra.mxu0 %v16644_v11 }
 0xa5d   : > { %16646 = vmatprep.subr.bf16.mxu0 %v17605_v23 }
 0xa60   : > { %v13014_v36 = vpop.f32.mrb[244].mxu0 }
 0xa61   : > { %v16193_v30 = vpop.f32.mrb[245].mxu0 }
 0xa62   : > { %v12937_v42 = vpop.f32.mrb[248].mxu1  ;;  %v13017_v12 = vpop.f32.mrb[246].mxu0 }
 0xa63   : > { %v12943_v55 = vadd.f32 %v12937_v42, %v12866_v58  ;;  %v16181_v34 = vpop.f32.mrb[249].mxu1  ;;  %v16194_v29 = vpop.f32.mrb[247].mxu0  ;;  %v14809_v58 = vld [vmem:[%s21887_s11 + $0x20] sm:$0xff] }
 0xa64   : > { %v12940_v62 = vpop.f32.mrb[250].mxu1 }
 0xa65   : > { %v16182_v7 = vpop.f32.mrb[251].mxu1  ;;  %v13020_v25 = vadd.f32 %v13014_v36, %v12943_v55  ;;  %v14810_v36 = vld [vmem:[%s21887_s11 + $0x28] sm:$0xff]  ;;  %v14811_v62 = vld [vmem:[%s21887_s11 + $0x30] sm:$0xff] }
 0xa66   : > { %v16647_v12 = vpack.c.bf16 %v14810_v36, %v14809_v58  ;;  %v14812_v7 = vld [vmem:[%s21887_s11 + $0x38] sm:$0xff] }
 0xa68   : > { %16648 = vmatpush3.bf16.msra.mxu0 %v16647_v12 }
 0xa69   : > { %16649 = vmatprep.subr.bf16.mxu0 %v17605_v23 }
 0xa70   : > { %v13168_v35 = vpop.f32.mrb[248].mxu0 }
 0xa71   : > { %v16217_v17 = vpop.f32.mrb[249].mxu0 }
 0xa72   : > { %v13091_v1 = vpop.f32.mrb[252].mxu1  ;;  %v13171_v21 = vpop.f32.mrb[250].mxu0 }
 0xa73   : > { %v13097_v45 = vadd.f32 %v13091_v1, %v13020_v25  ;;  %v16205_v57 = vpop.f32.mrb[253].mxu1  ;;  %v16218_v50 = vpop.f32.mrb[251].mxu0 }
 0xa74   : > { %v13094_v53 = vpop.f32.mrb[254].mxu1 }
 0xa75   : > { %v16206_v26 = vpop.f32.mrb[255].mxu1  ;;  %v13174_v48 = vadd.f32 %v13168_v35, %v13097_v45  ;;  %v16650_v45 = vpack.c.bf16 %v14812_v7, %v14811_v62 }
 0xa77   : > { %16651 = vmatpush3.bf16.msra.mxu0 %v16650_v45 }
 0xa78   : > { %16652 = vmatprep.subr.bf16.mxu0 %v17605_v23 }
 0xa80   : > { %v13322_v4 = vpop.f32.mrb[252].mxu0 }
 0xa81   : > { %v16241_v8 = vpop.f32.mrb[253].mxu0 }
 0xa82   : > { %v13245_v41 = vpop.f32.mrb[0].mxu1  ;;  %v13325_v63 = vpop.f32.mrb[254].mxu0 }
 0xa83   : > { %v13251_v19 = vadd.f32 %v13245_v41, %v13174_v48  ;;  %v16229_v22 = vpop.f32.mrb[1].mxu1  ;;  %v16242_v46 = vpop.f32.mrb[255].mxu0 }
 0xa84   : > { %v13248_v51 = vpop.f32.mrb[2].mxu1 }
 0xa85   : > { %v16230_v37 = vpop.f32.mrb[3].mxu1  ;;  %v13328_v5 = vadd.f32 %v13322_v4, %v13251_v19 }
 0xa90   : > { %v13476_v10 = vpop.f32.mrb[0].mxu0 }
 0xa91   : > { %v16265_v38 = vpop.f32.mrb[1].mxu0 }
 0xa92   : > { %v13399_v0 = vpop.f32.mrb[4].mxu1  ;;  %v13479_v40 = vpop.f32.mrb[2].mxu0 }
 0xa93   : > { %v13405_v13 = vadd.f32 %v13399_v0, %v13328_v5  ;;  %v16253_v9 = vpop.f32.mrb[5].mxu1  ;;  %v16266_v27 = vpop.f32.mrb[3].mxu0 }
 0xa94   : > { %v13402_v32 = vpop.f32.mrb[6].mxu1 }
 0xa95   : > { %v16254_v16 = vpop.f32.mrb[7].mxu1  ;;  %v13482_v2 = vadd.f32 %v13476_v10, %v13405_v13 }
 0xaa2   : > { %v13552_v30 = vpop.f32.mrb[8].mxu1  ;;  %v13630_v42 = vpop.f32.mrb[4].mxu0 }
 0xaa3   : > { %v13558_v55 = vadd.f32 %v13552_v30, %v13482_v2  ;;  %v16277_v34 = vpop.f32.mrb[9].mxu1  ;;  %v16289_v29 = vpop.f32.mrb[5].mxu0 }
 0xaa4   : > { %v13555_v25 = vpop.f32.mrb[10].mxu1  ;;  %v13633_v35 = vpop.f32.mrb[6].mxu0 }
 0xaa5   : > { %v13636_v17 = vadd.f32 %v13630_v42, %v13558_v55  ;;  %v16278_v1 = vpop.f32.mrb[11].mxu1  ;;  %v16290_v21 = vpop.f32.mrb[7].mxu0 }
 0xab2   : > { %v13708_v57 = vpop.f32.mrb[12].mxu1  ;;  %v13785_v50 = vpop.f32.mrb[8].mxu0 }
 0xab3   : > { %v13714_v53 = vadd.f32 %v13708_v57, %v13636_v17  ;;  %v16301_v26 = vpop.f32.mrb[13].mxu1  ;;  %v16313_v48 = vpop.f32.mrb[9].mxu0 }
 0xab4   : > { %v13711_v4 = vpop.f32.mrb[14].mxu1  ;;  %v13788_v8 = vpop.f32.mrb[10].mxu0 }
 0xab5   : > { %v13791_v41 = vadd.f32 %v13785_v50, %v13714_v53  ;;  %v16302_v63 = vpop.f32.mrb[15].mxu1  ;;  %v16314_v19 = vpop.f32.mrb[11].mxu0  ;;  %v14716_v53 = vld [vmem:[%s21884_s8] sm:$0x1] }
 0xac2   : > { %v13862_v22 = vpop.f32.mrb[16].mxu1  ;;  %v13939_v46 = vpop.f32.mrb[12].mxu0 }
 0xac3   : > { %v13868_v51 = vadd.f32 %v13862_v22, %v13791_v41  ;;  %v16325_v37 = vpop.f32.mrb[17].mxu1  ;;  %v16337_v5 = vpop.f32.mrb[13].mxu0  ;;  %v14813_v22 = vld [vmem:[%s21887_s11 + $0x40] sm:$0xff] }
 0xac4   : > { %v13865_v59 = vpop.f32.mrb[18].mxu1  ;;  %v13942_v39 = vpop.f32.mrb[14].mxu0  ;;  %v14815_v37 = vld [vmem:[%s21887_s11 + $0x50] sm:$0xf]  ;;  %v14729_v5 = vld [vmem:[%s21886_s10] sm:$0x1] }
 0xac5   : > { %v13945_v31 = vadd.f32 %v13939_v46, %v13868_v51  ;;  %v16326_v56 = vpop.f32.mrb[19].mxu1  ;;  %v16338_v23 = vpop.f32.mrb[15].mxu0  ;;  %v14814_v46 = vld [vmem:[%s21887_s11 + $0x48] sm:$0xff] }
 0xac6   : > { %v16653_v51 = vpack.c.bf16 %v14814_v46, %v14813_v22 }
 0xac8   : > { %16654 = vmatpush3.bf16.msra.mxu0 %v16653_v51 }
 0xac9   : > { %16502 = vmatprep.subr.mxu0 %v17603_v14  ;;  %v14816_v14 = vld [vmem:[%s21888_s12] sm:$0x1] }
 0xacc   : > { %16503 = vmatpush3.msk.msra.mxu0 %vm6304_vm3, %v14815_v37  ;;  %vm14894_vm3 = vcmask 73728  }
 0xad2   : > { %v14016_v3 = vpop.f32.mrb[20].mxu1  ;;  %v14093_v44 = vpop.f32.mrb[16].mxu0 }
 0xad3   : > { %v14022_v33 = vadd.f32 %v14016_v3, %v13945_v31  ;;  %v16349_v47 = vpop.f32.mrb[21].mxu1  ;;  %v16361_v6 = vpop.f32.mrb[17].mxu0 }
 0xad4   : > { %v14019_v10 = vpop.f32.mrb[22].mxu1  ;;  %v14096_v38 = vpop.f32.mrb[18].mxu0 }
 0xad5   : > { %v14099_v18 = vadd.f32 %v14093_v44, %v14022_v33  ;;  %v16350_v15 = vpop.f32.mrb[23].mxu1  ;;  %v16362_v0 = vpop.f32.mrb[19].mxu0 }
 0xae2   : > { %v14170_v40 = vpop.f32.mrb[24].mxu1  ;;  %v14247_v20 = vpop.f32.mrb[20].mxu0 }
 0xae3   : > { %v14176_v13 = vadd.f32 %v14170_v40, %v14099_v18  ;;  %v16373_v9 = vpop.f32.mrb[25].mxu1  ;;  %v16385_v27 = vpop.f32.mrb[21].mxu0 }
 0xae4   : > { %v14173_v32 = vpop.f32.mrb[26].mxu1  ;;  %v14250_v16 = vpop.f32.mrb[22].mxu0 }
 0xae5   : > { %v14253_v2 = vadd.f32 %v14247_v20, %v14176_v13  ;;  %v16374_v61 = vpop.f32.mrb[27].mxu1  ;;  %v16386_v28 = vpop.f32.mrb[23].mxu0 }
 0xaf2   : > { %v14324_v43 = vpop.f32.mrb[28].mxu1  ;;  %v14401_v52 = vpop.f32.mrb[24].mxu0 }
 0xaf3   : > { %v14330_v60 = vadd.f32 %v14324_v43, %v14253_v2  ;;  %v16397_v24 = vpop.f32.mrb[29].mxu1  ;;  %v16409_v49 = vpop.f32.mrb[25].mxu0 }
 0xaf4   : > { %v14327_v54 = vpop.f32.mrb[30].mxu1  ;;  %v14404_v11 = vpop.f32.mrb[26].mxu0 }
 0xaf5   : > { %v14407_v58 = vadd.f32 %v14401_v52, %v14330_v60  ;;  %v16398_v36 = vpop.f32.mrb[31].mxu1  ;;  %v16410_v30 = vpop.f32.mrb[27].mxu0 }
 0xb02   : > { %v14478_v42 = vpop.f32.mrb[32].mxu1  ;;  %v14555_v12 = vpop.f32.mrb[28].mxu0 }
 0xb03   : > { %v14484_v55 = vadd.f32 %v14478_v42, %v14407_v58  ;;  %v16421_v34 = vpop.f32.mrb[33].mxu1  ;;  %v16433_v29 = vpop.f32.mrb[29].mxu0 }
 0xb04   : > { %v14481_v62 = vpop.f32.mrb[34].mxu1  ;;  %v14558_v7 = vpop.f32.mrb[30].mxu0 }
 0xb05   : > { %v14561_v25 = vadd.f32 %v14555_v12, %v14484_v55  ;;  %v16422_v35 = vpop.f32.mrb[35].mxu1  ;;  %v16434_v17 = vpop.f32.mrb[31].mxu0 }
 0xb12   : > { %v14632_v1 = vpop.f32.mrb[36].mxu1  ;;  %v14709_v21 = vpop.f32.mrb[32].mxu0 }
 0xb13   : > { %v14638_v45 = vadd.f32 %v14632_v1, %v14561_v25  ;;  %v16445_v57 = vpop.f32.mrb[37].mxu1  ;;  %v16457_v50 = vpop.f32.mrb[33].mxu0 }
 0xb14   : > { %v14635_v26 = vpop.f32.mrb[38].mxu1  ;;  %v14712_v48 = vpop.f32.mrb[34].mxu0 }
 0xb15   : > { %v14715_v4 = vadd.f32 %v14709_v21, %v14638_v45  ;;  %v16446_v8 = vpop.f32.mrb[39].mxu1  ;;  %v16458_v41 = vpop.f32.mrb[35].mxu0 }
 0xb17   : > { %v14717_v63 = vadd.f32 %v14716_v53, %v14715_v4 }
 0xb19   : > { %v14718_v19 = vmax.f32 %v14717_v63, 0.0 }
 0xb1b   : > { %16480 = vmatmul.mubr.msk.f32.vlgmr.msra.gmra.mrb[40].mxu1 %vm14730_vm12, %v14718_v19 }
 0xbee   : > { %v14800_v59 = vpop.f32.mrb[40].mxu1 }
 0xbef   : > { %v14801_v39 = vadd.f32 %v14800_v59, %v14729_v5  ;;  %v16481_v31 = vpop.f32.mrb[41].mxu1 }
 0xbf1   : > { %v14804_v56 = vmax.f32 %v14801_v39, 0.0 }
 0xbf3   : > { %16505 = vmatmul.mubr.msk.f32.vlgmr.msra.gmra.mrb[36].mxu0 %vm14817_vm2, %v14804_v56 }
 0xcc6   : > { %v14890_v23 = vpop.f32.mrb[36].mxu0 }
 0xcc7   : > { %v14891_v3 = vadd.f32 %v14890_v23, %v14816_v14  ;;  %v16506_v44 = vpop.f32.mrb[37].mxu0 }
 0xcc9   : > { %14895 = vst.msk [vmem:[%s432_s20] sm:$0x1] %vm14894_vm3, %v14891_v3 }
 0xcca   : > { %17517 = shalt.err (!%p17514_p3)
}
 0xccb   : > { %s17518_s1 = scalar_lea.hbm %s21834_s21, 16  ;;  %s17522_s20 = scalar_lea.hbm %s21889_s13, 32 }
 0xccc   : > { %p17519_p4 = scmp.ne.s32.totalorder %s21834_s21, %s17518_s1  ;;  %p17523_p9 = scmp.lt.u32.totalorder %s21834_s21, %s21889_s13 }
 0xccd   : > { %p17524_p10 = scmp.lt.u32.totalorder %s17522_s20, %s17518_s1  ;;  %p17526_p12 = scmp.lt.u32.totalorder %s17518_s1, %s21834_s21 }
 0xcce   : > { %p17520_p7 = pnand %p17519_p4, %p17715_p5 }
 0xccf   : > { %p17525_p11 = por %p17524_p10, %p17523_p9 }
 0xcd0   : > { %p17521_p8 = pneg %p17520_p7 }
 0xcd1   : > { %p17527_p13 = por %p17526_p12, %p17525_p11 }
 0xcd3   : > { %p17528_p0 = pnand %p17527_p13, %p17521_p8 }
 0xcd5   : > { %17531 = shalt.err (!%p17528_p0)
}
 0xcd6   : > { %17136 = dma.vmem_to_hbm [thread:$0]  (%p17715_p5), %s21836_s30, 16, %s21834_s21, %s14897_s22  }
 0xcd7 PF: > { %p17142_p1 = scmp.ge.s32.totalorder %s17566_s28, 2  ;;  %s14921_s16 = sand.u32 1, %s17554_s25  }
 0xcd8   : > { %s14922_s29 = scalar_lea.sflag [#allocation4], %s14921_s16 }
 0xcd9   : > { %p17139_p2 = pnand %p17142_p1, %p17719_p6 }
 0xcdb   : > { %17549 = dma.done.wait (!%p17139_p2), %s14922_s29, 16  }
 0xcdc   : > { %17551 = vsyncadd (!%p17139_p2), %s14922_s29, 4294967280  ;;  %p23_p3 = scmp.ge.s32.totalorder %s17702_s14, 4   ;;  %s21967_s25 = smov %s17558_s26 }
 0xcdd   : > { %s21968_s26 = smov %s17562_s27  ;;  %s21969_s27 = smov %s17713_s17 }
 0xcde   : > { %s21970_s28 = smov %s17702_s14  ;;  %25 = sbr.rel (!%p23_p3) target bundleno = 8 (0x8), region = 177 }
 0xce5   :  { %14926 = vsyncpa [#allocation4], 1 }
 0xce6   :  { %14928 = vsyncpa [#allocation4 + $0x1], 1 }

</bundles_post_ra>
